<compile_context>
chip_gen: v7x
topology: tpu7x:2x2x1
jax: 0.10.0
libtpu: 0.0.40
codegen_flags: <defaults>
</compile_context>

<pallas_src>
import jax
import jax.numpy as jnp
import numpy as np
from jax.experimental import pallas as pl
from jax.experimental.pallas import tpu as pltpu


def _fill_neighbor_taps(p_ref):
    """Fill the 8 non-center taps of a 3x3 im2col scratch from its center tap.

    p_ref: (NB, Hp, Wp, 9*cin) bf16 scratch whose center-tap lane slot
    [4*cin:5*cin] already holds the source feature map.  Each neighbour tap is
    a statically-offset ref-to-ref copy; only the 1-wide halo strips the
    shifted copies never touch are zeroed (per step, multi-core safe).
    """
    NB, Hp, Wp, lanes = p_ref.shape
    cin = lanes // 9
    c0 = 4 * cin                        # center-tap lane offset (the source)
    zrow = jnp.zeros((NB, 1, Wp, cin), p_ref.dtype)   # hoisted out of loop
    zcol = jnp.zeros((NB, Hp, 1, cin), p_ref.dtype)
    for kh in range(3):
        for kw in range(3):
            dh, dw = kh - 1, kw - 1
            if dh == 0 and dw == 0:
                continue                # center tap already written
            k = kh * 3 + kw
            sl = slice(k * cin, (k + 1) * cin)
            i0, i1 = max(0, -dh), Hp - max(0, dh)   # valid output rows
            j0, j1 = max(0, -dw), Wp - max(0, dw)   # valid output cols
            # statically-offset shifted copy (no padded array, no DUS)
            p_ref[:, i0:i1, j0:j1, sl] = (
                p_ref[:, i0 + dh:i1 + dh, j0 + dw:j1 + dw, c0:c0 + cin])
            # zero ONLY the untouched 1-wide halo strips of this tap
            if dh == -1:
                p_ref[:, 0:1, :, sl] = zrow
            elif dh == 1:
                p_ref[:, Hp - 1:Hp, :, sl] = zrow
            if dw == -1:
                p_ref[:, :, 0:1, sl] = zcol
            elif dw == 1:
                p_ref[:, :, Wp - 1:Wp, sl] = zcol


def down_kernel(x_ref, w1_ref, b1_ref, w2_ref, b2_ref, o_ref, p1_ref, p2_ref):
    # x_ref : (NB, H, W, Cin)        f32   plain NHWC (no wrapper reshuffle)
    # w*_ref: (9*Cin_l, Cout_l)      bf16  BN scale folded in
    # b*_ref: (1, Cout_l)            f32   folded BN bias
    # o_ref : (NB*Hp*Wp, Cout)       f32   lane-dense output
    # p*_ref: (NB, Hp, Wp, 9*Cin_l)  bf16  im2col scratch (VMEM)
    NB, H, W, Cin = x_ref.shape
    Hp, Wp = H // 2, W // 2
    Cmid = w1_ref.shape[1]
    M = NB * Hp * Wp

    # ---- MaxPool2d(kernel=2, stride=2): four stride-2 loads straight from
    # the NHWC block + three elementwise maxes (no wrapper space-to-depth).
    x00 = x_ref[:, pl.ds(0, Hp, stride=2), pl.ds(0, Wp, stride=2), :]
    x01 = x_ref[:, pl.ds(0, Hp, stride=2), pl.ds(1, Wp, stride=2), :]
    x10 = x_ref[:, pl.ds(1, Hp, stride=2), pl.ds(0, Wp, stride=2), :]
    x11 = x_ref[:, pl.ds(1, Hp, stride=2), pl.ds(1, Wp, stride=2), :]
    pooled = jnp.maximum(jnp.maximum(x00, x01), jnp.maximum(x10, x11))

    # ---- conv1: pooled (cast to bf16 once) goes straight into the im2col
    # center-tap slot, the 8 shifted taps are ref-to-ref gathers, then ONE
    # (M, 9*Cin) x (9*Cin, Cmid) MXU matmul (bf16 operands, f32 accumulate)
    # with folded-BN bias + ReLU epilogue in f32.
    p1_ref[:, :, :, 4 * Cin:5 * Cin] = pooled.astype(jnp.bfloat16)
    _fill_neighbor_taps(p1_ref)
    h1 = jnp.dot(p1_ref[...].reshape(M, 9 * Cin), w1_ref[...],
                 preferred_element_type=jnp.float32)
    h1 = jnp.maximum(h1 + b1_ref[...], 0.0)                    # (M, Cmid) f32

    # ---- conv2: the conv1 epilogue lands directly in conv2's center-tap
    # slot, so the (M, Cmid) f32 value dies here instead of staying live
    # across the 9 tap gathers.
    p2_ref[:, :, :, 4 * Cmid:5 * Cmid] = (
        h1.astype(jnp.bfloat16).reshape(NB, Hp, Wp, Cmid))
    _fill_neighbor_taps(p2_ref)
    h2 = jnp.dot(p2_ref[...].reshape(M, 9 * Cmid), w2_ref[...],
                 preferred_element_type=jnp.float32)
    o_ref[...] = jnp.maximum(h2 + b2_ref[...], 0.0).astype(o_ref.dtype)


def down_forward(x_nhwc, w1_oihw, bn1, w2_oihw, bn2, *, eps=1e-5,
                 images_per_step=1):
    """x_nhwc: (N, H, W, Cin) f32. Conv weights in PyTorch OIHW layout."""
    N, H, W, Cin = x_nhwc.shape
    Cmid = w1_oihw.shape[0]
    Cout = w2_oihw.shape[0]
    assert H % 2 == 0 and W % 2 == 0, "MaxPool2d(2) path assumes even H, W"
    Hp, Wp = H // 2, W // 2

    NB = min(images_per_step, N)
    assert N % NB == 0
    num_blocks = N // NB          # >= 2 for N >= 2 -> megacore/pipe overlap

    def fold(w_oihw, bn):
        # Fold eval-mode BN: scale into the conv weights, bias stays separate.
        gamma, beta, mean, var = bn
        scale = gamma / jnp.sqrt(var + eps)                        # (Co,)
        bias = (beta - mean * scale)[None, :].astype(jnp.float32)  # (1, Co)
        w = w_oihw * scale[:, None, None, None]
        co, ci = w_oihw.shape[0], w_oihw.shape[1]
        # OIHW -> (kh, kw, Cin, Cout) -> (9*Cin, Cout) im2col weight layout
        w = jnp.transpose(w, (2, 3, 1, 0)).reshape(9 * ci, co)
        return w.astype(jnp.bfloat16), bias

    w1, b1 = fold(w1_oihw, bn1)
    w2, b2 = fold(w2_oihw, bn2)

    M_total = N * Hp * Wp
    flops = 2 * M_total * (9 * Cin * Cmid + 9 * Cmid * Cout)
    bytes_accessed = (N * H * W * Cin * 4            # x read
                      + 9 * Cin * Cmid * 2 + 9 * Cmid * Cout * 2   # weights
                      + (Cmid + Cout) * 4            # biases
                      + M_total * Cout * 4)          # output write

    out = pl.pallas_call(
        down_kernel,
        out_shape=jax.ShapeDtypeStruct((M_total, Cout), jnp.float32),
        grid=(num_blocks,),
        in_specs=[
            pl.BlockSpec((NB, H, W, Cin), lambda b: (b, 0, 0, 0)),
            # constant index_maps: weights / biases stay resident across steps
            pl.BlockSpec((9 * Cin, Cmid), lambda b: (0, 0)),
            pl.BlockSpec((1, Cmid), lambda b: (0, 0)),
            pl.BlockSpec((9 * Cmid, Cout), lambda b: (0, 0)),
            pl.BlockSpec((1, Cout), lambda b: (0, 0)),
        ],
        out_specs=pl.BlockSpec((NB * Hp * Wp, Cout), lambda b: (b, 0)),
        scratch_shapes=[
            pltpu.VMEM((NB, Hp, Wp, 9 * Cin), jnp.bfloat16),
            pltpu.VMEM((NB, Hp, Wp, 9 * Cmid), jnp.bfloat16),
        ],
        compiler_params=pltpu.CompilerParams(
            dimension_semantics=("parallel",),
            vmem_limit_bytes=48 * 1024 * 1024,
        ),
        cost_estimate=pl.CostEstimate(flops=flops, transcendentals=0,
                                      bytes_accessed=bytes_accessed),
    )(x_nhwc, w1, b1, w2, b2)

    return out.reshape(N, Hp, Wp, Cout)   # lane-dense (Cout=128) NHWC output


def ref_forward(x_nchw, w1, bn1, w2, bn2, eps=1e-5):
    """Plain-JAX reference of Down in NCHW (PyTorch eval-mode BN semantics)."""
    x = jax.lax.reduce_window(x_nchw, -jnp.inf, jax.lax.max,
                              (1, 1, 2, 2), (1, 1, 2, 2), 'VALID')

    def conv_bn_relu(x, w, params):
        g, b, m, v = params
        y = jax.lax.conv_general_dilated(
            x, w, window_strides=(1, 1), padding=((1, 1), (1, 1)),
            dimension_numbers=('NCHW', 'OIHW', 'NCHW'))
        scale = g / jnp.sqrt(v + eps)
        bias = b - m * scale
        y = y * scale[None, :, None, None] + bias[None, :, None, None]
        return jnp.maximum(y, 0.0)

    x = conv_bn_relu(x, w1, bn1)
    x = conv_bn_relu(x, w2, bn2)
    return x


if __name__ == "__main__":
    # UNet down1 = Down(64, 128): batch 2, 32x32 input (16x16 after pooling),
    # channels 64 -> 128, so M per grid step = 256 and Cout is lane-dense.
    N, Cin, H, W = 2, 64, 32, 32
    Cmid = Cout = 128   # DoubleConv default: mid_channels = out_channels

    key = jax.random.PRNGKey(0)
    ks = jax.random.split(key, 11)

    x_nchw = jax.random.normal(ks[0], (N, Cin, H, W), jnp.float32)

    # Conv weights (PyTorch OIHW layout), no bias; ~Kaiming scale.
    w1 = jax.random.normal(ks[1], (Cmid, Cin, 3, 3), jnp.float32) / np.sqrt(9 * Cin)
    w2 = jax.random.normal(ks[2], (Cout, Cmid, 3, 3), jnp.float32) / np.sqrt(9 * Cmid)

    # BatchNorm params (gamma, beta, running_mean, running_var) per layer.
    bn1 = (1.0 + 0.1 * jax.random.normal(ks[3], (Cmid,), jnp.float32),
           0.1 * jax.random.normal(ks[4], (Cmid,), jnp.float32),
           0.1 * jax.random.normal(ks[5], (Cmid,), jnp.float32),
           0.5 + 0.5 * jnp.abs(jax.random.normal(ks[6], (Cmid,), jnp.float32)))
    bn2 = (1.0 + 0.1 * jax.random.normal(ks[7], (Cout,), jnp.float32),
           0.1 * jax.random.normal(ks[8], (Cout,), jnp.float32),
           0.1 * jax.random.normal(ks[9], (Cout,), jnp.float32),
           0.5 + 0.5 * jnp.abs(jax.random.normal(ks[10], (Cout,), jnp.float32)))

    # Kernel (NHWC in/out; no wrapper-side space-to-depth).
    x_nhwc = jnp.transpose(x_nchw, (0, 2, 3, 1))
    out_nhwc = jax.block_until_ready(down_forward(x_nhwc, w1, bn1, w2, bn2))

    # Reference (NCHW, f32) and comparison at bf16-matmul tolerance.
    ref = ref_forward(x_nchw, w1, bn1, w2, bn2)
    out_nchw = jnp.transpose(out_nhwc, (0, 3, 1, 2))
    np.testing.assert_allclose(np.asarray(out_nchw), np.asarray(ref),
                               rtol=5e-2, atol=5e-2)

    print("KERNEL_OK")
</pallas_src>

<mosaic_0001>
module attributes {stable_mosaic.version = 11 : i64} {
  func.func @down_kernel(%arg0: i32, %arg1: memref<1x32x32x64xf32, #tpu.memory_space<vmem>>, %arg2: memref<576x128xbf16, #tpu.memory_space<vmem>>, %arg3: memref<1x128xf32, #tpu.memory_space<vmem>>, %arg4: memref<1152x128xbf16, #tpu.memory_space<vmem>>, %arg5: memref<1x128xf32, #tpu.memory_space<vmem>>, %arg6: memref<256x128xf32, #tpu.memory_space<vmem>>, %arg7: memref<1x16x16x576xbf16, #tpu.memory_space<vmem>>, %arg8: memref<1x16x16x1152xbf16, #tpu.memory_space<vmem>>) attributes {dimension_semantics = [#tpu.dimension_semantics<parallel>], iteration_bounds = array<i64: 2>, scalar_prefetch = 0 : i64, scratch_operands = 2 : i64, tpu.core_type = #tpu.core_type<tc>, window_params = [{transform_indices = @transform_0, window_bounds = array<i64: 1, 32, 32, 64>}, {pipeline_mode = #tpu.pipeline_mode<synchronous>, transform_indices = @transform_1, window_bounds = array<i64: 576, 128>}, {pipeline_mode = #tpu.pipeline_mode<synchronous>, transform_indices = @transform_2, window_bounds = array<i64: 1, 128>}, {pipeline_mode = #tpu.pipeline_mode<synchronous>, transform_indices = @transform_3, window_bounds = array<i64: 1152, 128>}, {pipeline_mode = #tpu.pipeline_mode<synchronous>, transform_indices = @transform_4, window_bounds = array<i64: 1, 128>}, {transform_indices = @transform_5, window_bounds = array<i64: 256, 128>}]} {
    %c0 = arith.constant 0 : index
    %c0_0 = arith.constant 0 : index
    %c0_1 = arith.constant 0 : index
    %c0_2 = arith.constant 0 : index
    %0 = tpu.strided_load %arg1[%c0, %c0_0, %c0_1, %c0_2] {strides = array<i32: 1, 2, 2, 1>} : memref<1x32x32x64xf32, #tpu.memory_space<vmem>>, vector<1x16x16x64xf32>
    %c0_3 = arith.constant 0 : index
    %c0_4 = arith.constant 0 : index
    %c1 = arith.constant 1 : index
    %c0_5 = arith.constant 0 : index
    %1 = tpu.strided_load %arg1[%c0_3, %c0_4, %c1, %c0_5] {strides = array<i32: 1, 2, 2, 1>} : memref<1x32x32x64xf32, #tpu.memory_space<vmem>>, vector<1x16x16x64xf32>
    %c0_6 = arith.constant 0 : index
    %c1_7 = arith.constant 1 : index
    %c0_8 = arith.constant 0 : index
    %c0_9 = arith.constant 0 : index
    %2 = tpu.strided_load %arg1[%c0_6, %c1_7, %c0_8, %c0_9] {strides = array<i32: 1, 2, 2, 1>} : memref<1x32x32x64xf32, #tpu.memory_space<vmem>>, vector<1x16x16x64xf32>
    %c0_10 = arith.constant 0 : index
    %c1_11 = arith.constant 1 : index
    %c1_12 = arith.constant 1 : index
    %c0_13 = arith.constant 0 : index
    %3 = tpu.strided_load %arg1[%c0_10, %c1_11, %c1_12, %c0_13] {strides = array<i32: 1, 2, 2, 1>} : memref<1x32x32x64xf32, #tpu.memory_space<vmem>>, vector<1x16x16x64xf32>
    %4 = arith.maximumf %0, %1 : vector<1x16x16x64xf32>
    %5 = arith.maximumf %2, %3 : vector<1x16x16x64xf32>
    %6 = arith.maximumf %4, %5 : vector<1x16x16x64xf32>
    %7 = arith.truncf %6 : vector<1x16x16x64xf32> to vector<1x16x16x64xbf16>
    %c0_14 = arith.constant 0 : index
    %c0_15 = arith.constant 0 : index
    %c0_16 = arith.constant 0 : index
    %c256 = arith.constant 256 : index
    %8 = vector.load %arg7[%c0_14, %c0_15, %c0_16, %c256] : memref<1x16x16x576xbf16, #tpu.memory_space<vmem>>, vector<1x16x16x64xbf16>
    tpu.vector_store %arg7[%c0_14, %c0_15, %c0_16, %c256], %7 {strides = array<i32>} : memref<1x16x16x576xbf16, #tpu.memory_space<vmem>>, vector<1x16x16x64xbf16>,
    %cst = arith.constant 0.000000e+00 : bf16
    %9 = vector.broadcast %cst : bf16 to vector<1x1x16x64xbf16>
    %cst_17 = arith.constant 0.000000e+00 : bf16
    %10 = vector.broadcast %cst_17 : bf16 to vector<1x16x1x64xbf16>
    %c0_18 = arith.constant 0 : index
    %c0_19 = arith.constant 0 : index
    %c0_20 = arith.constant 0 : index
    %c256_21 = arith.constant 256 : index
    %11 = vector.load %arg7[%c0_18, %c0_19, %c0_20, %c256_21] : memref<1x16x16x576xbf16, #tpu.memory_space<vmem>>, vector<1x15x15x64xbf16>
    %c0_22 = arith.constant 0 : index
    %c1_23 = arith.constant 1 : index
    %c1_24 = arith.constant 1 : index
    %c0_25 = arith.constant 0 : index
    %12 = vector.load %arg7[%c0_22, %c1_23, %c1_24, %c0_25] : memref<1x16x16x576xbf16, #tpu.memory_space<vmem>>, vector<1x15x15x64xbf16>
    tpu.vector_store %arg7[%c0_22, %c1_23, %c1_24, %c0_25], %11 {strides = array<i32>} : memref<1x16x16x576xbf16, #tpu.memory_space<vmem>>, vector<1x15x15x64xbf16>,
    %c0_26 = arith.constant 0 : index
    %c0_27 = arith.constant 0 : index
    %c0_28 = arith.constant 0 : index
    %c0_29 = arith.constant 0 : index
    %13 = vector.load %arg7[%c0_26, %c0_27, %c0_28, %c0_29] : memref<1x16x16x576xbf16, #tpu.memory_space<vmem>>, vector<1x1x16x64xbf16>
    tpu.vector_store %arg7[%c0_26, %c0_27, %c0_28, %c0_29], %9 {strides = array<i32>} : memref<1x16x16x576xbf16, #tpu.memory_space<vmem>>, vector<1x1x16x64xbf16>,
    %c0_30 = arith.constant 0 : index
    %c0_31 = arith.constant 0 : index
    %c0_32 = arith.constant 0 : index
    %c0_33 = arith.constant 0 : index
    %14 = vector.load %arg7[%c0_30, %c0_31, %c0_32, %c0_33] : memref<1x16x16x576xbf16, #tpu.memory_space<vmem>>, vector<1x16x1x64xbf16>
    tpu.vector_store %arg7[%c0_30, %c0_31, %c0_32, %c0_33], %10 {strides = array<i32>} : memref<1x16x16x576xbf16, #tpu.memory_space<vmem>>, vector<1x16x1x64xbf16>,
    %c0_34 = arith.constant 0 : index
    %c0_35 = arith.constant 0 : index
    %c0_36 = arith.constant 0 : index
    %c256_37 = arith.constant 256 : index
    %15 = vector.load %arg7[%c0_34, %c0_35, %c0_36, %c256_37] : memref<1x16x16x576xbf16, #tpu.memory_space<vmem>>, vector<1x15x16x64xbf16>
    %c0_38 = arith.constant 0 : index
    %c1_39 = arith.constant 1 : index
    %c0_40 = arith.constant 0 : index
    %c64 = arith.constant 64 : index
    %16 = vector.load %arg7[%c0_38, %c1_39, %c0_40, %c64] : memref<1x16x16x576xbf16, #tpu.memory_space<vmem>>, vector<1x15x16x64xbf16>
    tpu.vector_store %arg7[%c0_38, %c1_39, %c0_40, %c64], %15 {strides = array<i32>} : memref<1x16x16x576xbf16, #tpu.memory_space<vmem>>, vector<1x15x16x64xbf16>,
    %c0_41 = arith.constant 0 : index
    %c0_42 = arith.constant 0 : index
    %c0_43 = arith.constant 0 : index
    %c64_44 = arith.constant 64 : index
    %17 = vector.load %arg7[%c0_41, %c0_42, %c0_43, %c64_44] : memref<1x16x16x576xbf16, #tpu.memory_space<vmem>>, vector<1x1x16x64xbf16>
    tpu.vector_store %arg7[%c0_41, %c0_42, %c0_43, %c64_44], %9 {strides = array<i32>} : memref<1x16x16x576xbf16, #tpu.memory_space<vmem>>, vector<1x1x16x64xbf16>,
    %c0_45 = arith.constant 0 : index
    %c0_46 = arith.constant 0 : index
    %c1_47 = arith.constant 1 : index
    %c256_48 = arith.constant 256 : index
    %18 = vector.load %arg7[%c0_45, %c0_46, %c1_47, %c256_48] : memref<1x16x16x576xbf16, #tpu.memory_space<vmem>>, vector<1x15x15x64xbf16>
    %c0_49 = arith.constant 0 : index
    %c1_50 = arith.constant 1 : index
    %c0_51 = arith.constant 0 : index
    %c128 = arith.constant 128 : index
    %19 = vector.load %arg7[%c0_49, %c1_50, %c0_51, %c128] : memref<1x16x16x576xbf16, #tpu.memory_space<vmem>>, vector<1x15x15x64xbf16>
    tpu.vector_store %arg7[%c0_49, %c1_50, %c0_51, %c128], %18 {strides = array<i32>} : memref<1x16x16x576xbf16, #tpu.memory_space<vmem>>, vector<1x15x15x64xbf16>,
    %c0_52 = arith.constant 0 : index
    %c0_53 = arith.constant 0 : index
    %c0_54 = arith.constant 0 : index
    %c128_55 = arith.constant 128 : index
    %20 = vector.load %arg7[%c0_52, %c0_53, %c0_54, %c128_55] : memref<1x16x16x576xbf16, #tpu.memory_space<vmem>>, vector<1x1x16x64xbf16>
    tpu.vector_store %arg7[%c0_52, %c0_53, %c0_54, %c128_55], %9 {strides = array<i32>} : memref<1x16x16x576xbf16, #tpu.memory_space<vmem>>, vector<1x1x16x64xbf16>,
    %c0_56 = arith.constant 0 : index
    %c0_57 = arith.constant 0 : index
    %c15 = arith.constant 15 : index
    %c128_58 = arith.constant 128 : index
    %21 = vector.load %arg7[%c0_56, %c0_57, %c15, %c128_58] : memref<1x16x16x576xbf16, #tpu.memory_space<vmem>>, vector<1x16x1x64xbf16>
    tpu.vector_store %arg7[%c0_56, %c0_57, %c15, %c128_58], %10 {strides = array<i32>} : memref<1x16x16x576xbf16, #tpu.memory_space<vmem>>, vector<1x16x1x64xbf16>,
    %c0_59 = arith.constant 0 : index
    %c0_60 = arith.constant 0 : index
    %c0_61 = arith.constant 0 : index
    %c256_62 = arith.constant 256 : index
    %22 = vector.load %arg7[%c0_59, %c0_60, %c0_61, %c256_62] : memref<1x16x16x576xbf16, #tpu.memory_space<vmem>>, vector<1x16x15x64xbf16>
    %c0_63 = arith.constant 0 : index
    %c0_64 = arith.constant 0 : index
    %c1_65 = arith.constant 1 : index
    %c192 = arith.constant 192 : index
    %23 = vector.load %arg7[%c0_63, %c0_64, %c1_65, %c192] : memref<1x16x16x576xbf16, #tpu.memory_space<vmem>>, vector<1x16x15x64xbf16>
    tpu.vector_store %arg7[%c0_63, %c0_64, %c1_65, %c192], %22 {strides = array<i32>} : memref<1x16x16x576xbf16, #tpu.memory_space<vmem>>, vector<1x16x15x64xbf16>,
    %c0_66 = arith.constant 0 : index
    %c0_67 = arith.constant 0 : index
    %c0_68 = arith.constant 0 : index
    %c192_69 = arith.constant 192 : index
    %24 = vector.load %arg7[%c0_66, %c0_67, %c0_68, %c192_69] : memref<1x16x16x576xbf16, #tpu.memory_space<vmem>>, vector<1x16x1x64xbf16>
    tpu.vector_store %arg7[%c0_66, %c0_67, %c0_68, %c192_69], %10 {strides = array<i32>} : memref<1x16x16x576xbf16, #tpu.memory_space<vmem>>, vector<1x16x1x64xbf16>,
    %c0_70 = arith.constant 0 : index
    %c0_71 = arith.constant 0 : index
    %c1_72 = arith.constant 1 : index
    %c256_73 = arith.constant 256 : index
    %25 = vector.load %arg7[%c0_70, %c0_71, %c1_72, %c256_73] : memref<1x16x16x576xbf16, #tpu.memory_space<vmem>>, vector<1x16x15x64xbf16>
    %c0_74 = arith.constant 0 : index
    %c0_75 = arith.constant 0 : index
    %c0_76 = arith.constant 0 : index
    %c320 = arith.constant 320 : index
    %26 = vector.load %arg7[%c0_74, %c0_75, %c0_76, %c320] : memref<1x16x16x576xbf16, #tpu.memory_space<vmem>>, vector<1x16x15x64xbf16>
    tpu.vector_store %arg7[%c0_74, %c0_75, %c0_76, %c320], %25 {strides = array<i32>} : memref<1x16x16x576xbf16, #tpu.memory_space<vmem>>, vector<1x16x15x64xbf16>,
    %c0_77 = arith.constant 0 : index
    %c0_78 = arith.constant 0 : index
    %c15_79 = arith.constant 15 : index
    %c320_80 = arith.constant 320 : index
    %27 = vector.load %arg7[%c0_77, %c0_78, %c15_79, %c320_80] : memref<1x16x16x576xbf16, #tpu.memory_space<vmem>>, vector<1x16x1x64xbf16>
    tpu.vector_store %arg7[%c0_77, %c0_78, %c15_79, %c320_80], %10 {strides = array<i32>} : memref<1x16x16x576xbf16, #tpu.memory_space<vmem>>, vector<1x16x1x64xbf16>,
    %c0_81 = arith.constant 0 : index
    %c1_82 = arith.constant 1 : index
    %c0_83 = arith.constant 0 : index
    %c256_84 = arith.constant 256 : index
    %28 = vector.load %arg7[%c0_81, %c1_82, %c0_83, %c256_84] : memref<1x16x16x576xbf16, #tpu.memory_space<vmem>>, vector<1x15x15x64xbf16>
    %c0_85 = arith.constant 0 : index
    %c0_86 = arith.constant 0 : index
    %c1_87 = arith.constant 1 : index
    %c384 = arith.constant 384 : index
    %29 = vector.load %arg7[%c0_85, %c0_86, %c1_87, %c384] : memref<1x16x16x576xbf16, #tpu.memory_space<vmem>>, vector<1x15x15x64xbf16>
    tpu.vector_store %arg7[%c0_85, %c0_86, %c1_87, %c384], %28 {strides = array<i32>} : memref<1x16x16x576xbf16, #tpu.memory_space<vmem>>, vector<1x15x15x64xbf16>,
    %c0_88 = arith.constant 0 : index
    %c15_89 = arith.constant 15 : index
    %c0_90 = arith.constant 0 : index
    %c384_91 = arith.constant 384 : index
    %30 = vector.load %arg7[%c0_88, %c15_89, %c0_90, %c384_91] : memref<1x16x16x576xbf16, #tpu.memory_space<vmem>>, vector<1x1x16x64xbf16>
    tpu.vector_store %arg7[%c0_88, %c15_89, %c0_90, %c384_91], %9 {strides = array<i32>} : memref<1x16x16x576xbf16, #tpu.memory_space<vmem>>, vector<1x1x16x64xbf16>,
    %c0_92 = arith.constant 0 : index
    %c0_93 = arith.constant 0 : index
    %c0_94 = arith.constant 0 : index
    %c384_95 = arith.constant 384 : index
    %31 = vector.load %arg7[%c0_92, %c0_93, %c0_94, %c384_95] : memref<1x16x16x576xbf16, #tpu.memory_space<vmem>>, vector<1x16x1x64xbf16>
    tpu.vector_store %arg7[%c0_92, %c0_93, %c0_94, %c384_95], %10 {strides = array<i32>} : memref<1x16x16x576xbf16, #tpu.memory_space<vmem>>, vector<1x16x1x64xbf16>,
    %c0_96 = arith.constant 0 : index
    %c1_97 = arith.constant 1 : index
    %c0_98 = arith.constant 0 : index
    %c256_99 = arith.constant 256 : index
    %32 = vector.load %arg7[%c0_96, %c1_97, %c0_98, %c256_99] : memref<1x16x16x576xbf16, #tpu.memory_space<vmem>>, vector<1x15x16x64xbf16>
    %c0_100 = arith.constant 0 : index
    %c0_101 = arith.constant 0 : index
    %c0_102 = arith.constant 0 : index
    %c448 = arith.constant 448 : index
    %33 = vector.load %arg7[%c0_100, %c0_101, %c0_102, %c448] : memref<1x16x16x576xbf16, #tpu.memory_space<vmem>>, vector<1x15x16x64xbf16>
    tpu.vector_store %arg7[%c0_100, %c0_101, %c0_102, %c448], %32 {strides = array<i32>} : memref<1x16x16x576xbf16, #tpu.memory_space<vmem>>, vector<1x15x16x64xbf16>,
    %c0_103 = arith.constant 0 : index
    %c15_104 = arith.constant 15 : index
    %c0_105 = arith.constant 0 : index
    %c448_106 = arith.constant 448 : index
    %34 = vector.load %arg7[%c0_103, %c15_104, %c0_105, %c448_106] : memref<1x16x16x576xbf16, #tpu.memory_space<vmem>>, vector<1x1x16x64xbf16>
    tpu.vector_store %arg7[%c0_103, %c15_104, %c0_105, %c448_106], %9 {strides = array<i32>} : memref<1x16x16x576xbf16, #tpu.memory_space<vmem>>, vector<1x1x16x64xbf16>,
    %c0_107 = arith.constant 0 : index
    %c1_108 = arith.constant 1 : index
    %c1_109 = arith.constant 1 : index
    %c256_110 = arith.constant 256 : index
    %35 = vector.load %arg7[%c0_107, %c1_108, %c1_109, %c256_110] : memref<1x16x16x576xbf16, #tpu.memory_space<vmem>>, vector<1x15x15x64xbf16>
    %c0_111 = arith.constant 0 : index
    %c0_112 = arith.constant 0 : index
    %c0_113 = arith.constant 0 : index
    %c512 = arith.constant 512 : index
    %36 = vector.load %arg7[%c0_111, %c0_112, %c0_113, %c512] : memref<1x16x16x576xbf16, #tpu.memory_space<vmem>>, vector<1x15x15x64xbf16>
    tpu.vector_store %arg7[%c0_111, %c0_112, %c0_113, %c512], %35 {strides = array<i32>} : memref<1x16x16x576xbf16, #tpu.memory_space<vmem>>, vector<1x15x15x64xbf16>,
    %c0_114 = arith.constant 0 : index
    %c15_115 = arith.constant 15 : index
    %c0_116 = arith.constant 0 : index
    %c512_117 = arith.constant 512 : index
    %37 = vector.load %arg7[%c0_114, %c15_115, %c0_116, %c512_117] : memref<1x16x16x576xbf16, #tpu.memory_space<vmem>>, vector<1x1x16x64xbf16>
    tpu.vector_store %arg7[%c0_114, %c15_115, %c0_116, %c512_117], %9 {strides = array<i32>} : memref<1x16x16x576xbf16, #tpu.memory_space<vmem>>, vector<1x1x16x64xbf16>,
    %c0_118 = arith.constant 0 : index
    %c0_119 = arith.constant 0 : index
    %c15_120 = arith.constant 15 : index
    %c512_121 = arith.constant 512 : index
    %38 = vector.load %arg7[%c0_118, %c0_119, %c15_120, %c512_121] : memref<1x16x16x576xbf16, #tpu.memory_space<vmem>>, vector<1x16x1x64xbf16>
    tpu.vector_store %arg7[%c0_118, %c0_119, %c15_120, %c512_121], %10 {strides = array<i32>} : memref<1x16x16x576xbf16, #tpu.memory_space<vmem>>, vector<1x16x1x64xbf16>,
    %c0_122 = arith.constant 0 : index
    %c0_123 = arith.constant 0 : index
    %c0_124 = arith.constant 0 : index
    %c0_125 = arith.constant 0 : index
    %39 = vector.load %arg7[%c0_122, %c0_123, %c0_124, %c0_125] : memref<1x16x16x576xbf16, #tpu.memory_space<vmem>>, vector<1x16x16x576xbf16>
    %40 = vector.shape_cast %39 : vector<1x16x16x576xbf16> to vector<256x576xbf16>
    %c0_126 = arith.constant 0 : index
    %c0_127 = arith.constant 0 : index
    %41 = vector.load %arg2[%c0_126, %c0_127] : memref<576x128xbf16, #tpu.memory_space<vmem>>, vector<576x128xbf16>
    %cst_128 = arith.constant dense<0.000000e+00> : vector<256x128xf32>
    %42 = tpu.matmul %40, %41, %cst_128 {dimension_numbers = #tpu.dot_dimension_numbers<[1], [0], [0], [1], [0, 0, 1, 1], [], []>} : vector<256x576xbf16>, vector<576x128xbf16>, vector<256x128xf32> -> vector<256x128xf32>
    %c0_129 = arith.constant 0 : index
    %c0_130 = arith.constant 0 : index
    %43 = vector.load %arg3[%c0_129, %c0_130] : memref<1x128xf32, #tpu.memory_space<vmem>>, vector<1x128xf32>
    %44 = vector.broadcast %43 : vector<1x128xf32> to vector<256x128xf32>
    %45 = arith.addf %42, %44 : vector<256x128xf32>
    %cst_131 = arith.constant 0.000000e+00 : f32
    %46 = vector.broadcast %cst_131 : f32 to vector<256x128xf32>
    %47 = arith.maximumf %45, %46 : vector<256x128xf32>
    %48 = arith.truncf %47 : vector<256x128xf32> to vector<256x128xbf16>
    %49 = vector.shape_cast %48 : vector<256x128xbf16> to vector<1x16x16x128xbf16>
    %c0_132 = arith.constant 0 : index
    %c0_133 = arith.constant 0 : index
    %c0_134 = arith.constant 0 : index
    %c512_135 = arith.constant 512 : index
    %50 = vector.load %arg8[%c0_132, %c0_133, %c0_134, %c512_135] : memref<1x16x16x1152xbf16, #tpu.memory_space<vmem>>, vector<1x16x16x128xbf16>
    tpu.vector_store %arg8[%c0_132, %c0_133, %c0_134, %c512_135], %49 {strides = array<i32>} : memref<1x16x16x1152xbf16, #tpu.memory_space<vmem>>, vector<1x16x16x128xbf16>,
    %cst_136 = arith.constant 0.000000e+00 : bf16
    %51 = vector.broadcast %cst_136 : bf16 to vector<1x1x16x128xbf16>
    %cst_137 = arith.constant 0.000000e+00 : bf16
    %52 = vector.broadcast %cst_137 : bf16 to vector<1x16x1x128xbf16>
    %c0_138 = arith.constant 0 : index
    %c0_139 = arith.constant 0 : index
    %c0_140 = arith.constant 0 : index
    %c512_141 = arith.constant 512 : index
    %53 = vector.load %arg8[%c0_138, %c0_139, %c0_140, %c512_141] : memref<1x16x16x1152xbf16, #tpu.memory_space<vmem>>, vector<1x15x15x128xbf16>
    %c0_142 = arith.constant 0 : index
    %c1_143 = arith.constant 1 : index
    %c1_144 = arith.constant 1 : index
    %c0_145 = arith.constant 0 : index
    %54 = vector.load %arg8[%c0_142, %c1_143, %c1_144, %c0_145] : memref<1x16x16x1152xbf16, #tpu.memory_space<vmem>>, vector<1x15x15x128xbf16>
    tpu.vector_store %arg8[%c0_142, %c1_143, %c1_144, %c0_145], %53 {strides = array<i32>} : memref<1x16x16x1152xbf16, #tpu.memory_space<vmem>>, vector<1x15x15x128xbf16>,
    %c0_146 = arith.constant 0 : index
    %c0_147 = arith.constant 0 : index
    %c0_148 = arith.constant 0 : index
    %c0_149 = arith.constant 0 : index
    %55 = vector.load %arg8[%c0_146, %c0_147, %c0_148, %c0_149] : memref<1x16x16x1152xbf16, #tpu.memory_space<vmem>>, vector<1x1x16x128xbf16>
    tpu.vector_store %arg8[%c0_146, %c0_147, %c0_148, %c0_149], %51 {strides = array<i32>} : memref<1x16x16x1152xbf16, #tpu.memory_space<vmem>>, vector<1x1x16x128xbf16>,
    %c0_150 = arith.constant 0 : index
    %c0_151 = arith.constant 0 : index
    %c0_152 = arith.constant 0 : index
    %c0_153 = arith.constant 0 : index
    %56 = vector.load %arg8[%c0_150, %c0_151, %c0_152, %c0_153] : memref<1x16x16x1152xbf16, #tpu.memory_space<vmem>>, vector<1x16x1x128xbf16>
    tpu.vector_store %arg8[%c0_150, %c0_151, %c0_152, %c0_153], %52 {strides = array<i32>} : memref<1x16x16x1152xbf16, #tpu.memory_space<vmem>>, vector<1x16x1x128xbf16>,
    %c0_154 = arith.constant 0 : index
    %c0_155 = arith.constant 0 : index
    %c0_156 = arith.constant 0 : index
    %c512_157 = arith.constant 512 : index
    %57 = vector.load %arg8[%c0_154, %c0_155, %c0_156, %c512_157] : memref<1x16x16x1152xbf16, #tpu.memory_space<vmem>>, vector<1x15x16x128xbf16>
    %c0_158 = arith.constant 0 : index
    %c1_159 = arith.constant 1 : index
    %c0_160 = arith.constant 0 : index
    %c128_161 = arith.constant 128 : index
    %58 = vector.load %arg8[%c0_158, %c1_159, %c0_160, %c128_161] : memref<1x16x16x1152xbf16, #tpu.memory_space<vmem>>, vector<1x15x16x128xbf16>
    tpu.vector_store %arg8[%c0_158, %c1_159, %c0_160, %c128_161], %57 {strides = array<i32>} : memref<1x16x16x1152xbf16, #tpu.memory_space<vmem>>, vector<1x15x16x128xbf16>,
    %c0_162 = arith.constant 0 : index
    %c0_163 = arith.constant 0 : index
    %c0_164 = arith.constant 0 : index
    %c128_165 = arith.constant 128 : index
    %59 = vector.load %arg8[%c0_162, %c0_163, %c0_164, %c128_165] : memref<1x16x16x1152xbf16, #tpu.memory_space<vmem>>, vector<1x1x16x128xbf16>
    tpu.vector_store %arg8[%c0_162, %c0_163, %c0_164, %c128_165], %51 {strides = array<i32>} : memref<1x16x16x1152xbf16, #tpu.memory_space<vmem>>, vector<1x1x16x128xbf16>,
    %c0_166 = arith.constant 0 : index
    %c0_167 = arith.constant 0 : index
    %c1_168 = arith.constant 1 : index
    %c512_169 = arith.constant 512 : index
    %60 = vector.load %arg8[%c0_166, %c0_167, %c1_168, %c512_169] : memref<1x16x16x1152xbf16, #tpu.memory_space<vmem>>, vector<1x15x15x128xbf16>
    %c0_170 = arith.constant 0 : index
    %c1_171 = arith.constant 1 : index
    %c0_172 = arith.constant 0 : index
    %c256_173 = arith.constant 256 : index
    %61 = vector.load %arg8[%c0_170, %c1_171, %c0_172, %c256_173] : memref<1x16x16x1152xbf16, #tpu.memory_space<vmem>>, vector<1x15x15x128xbf16>
    tpu.vector_store %arg8[%c0_170, %c1_171, %c0_172, %c256_173], %60 {strides = array<i32>} : memref<1x16x16x1152xbf16, #tpu.memory_space<vmem>>, vector<1x15x15x128xbf16>,
    %c0_174 = arith.constant 0 : index
    %c0_175 = arith.constant 0 : index
    %c0_176 = arith.constant 0 : index
    %c256_177 = arith.constant 256 : index
    %62 = vector.load %arg8[%c0_174, %c0_175, %c0_176, %c256_177] : memref<1x16x16x1152xbf16, #tpu.memory_space<vmem>>, vector<1x1x16x128xbf16>
    tpu.vector_store %arg8[%c0_174, %c0_175, %c0_176, %c256_177], %51 {strides = array<i32>} : memref<1x16x16x1152xbf16, #tpu.memory_space<vmem>>, vector<1x1x16x128xbf16>,
    %c0_178 = arith.constant 0 : index
    %c0_179 = arith.constant 0 : index
    %c15_180 = arith.constant 15 : index
    %c256_181 = arith.constant 256 : index
    %63 = vector.load %arg8[%c0_178, %c0_179, %c15_180, %c256_181] : memref<1x16x16x1152xbf16, #tpu.memory_space<vmem>>, vector<1x16x1x128xbf16>
    tpu.vector_store %arg8[%c0_178, %c0_179, %c15_180, %c256_181], %52 {strides = array<i32>} : memref<1x16x16x1152xbf16, #tpu.memory_space<vmem>>, vector<1x16x1x128xbf16>,
    %c0_182 = arith.constant 0 : index
    %c0_183 = arith.constant 0 : index
    %c0_184 = arith.constant 0 : index
    %c512_185 = arith.constant 512 : index
    %64 = vector.load %arg8[%c0_182, %c0_183, %c0_184, %c512_185] : memref<1x16x16x1152xbf16, #tpu.memory_space<vmem>>, vector<1x16x15x128xbf16>
    %c0_186 = arith.constant 0 : index
    %c0_187 = arith.constant 0 : index
    %c1_188 = arith.constant 1 : index
    %c384_189 = arith.constant 384 : index
    %65 = vector.load %arg8[%c0_186, %c0_187, %c1_188, %c384_189] : memref<1x16x16x1152xbf16, #tpu.memory_space<vmem>>, vector<1x16x15x128xbf16>
    tpu.vector_store %arg8[%c0_186, %c0_187, %c1_188, %c384_189], %64 {strides = array<i32>} : memref<1x16x16x1152xbf16, #tpu.memory_space<vmem>>, vector<1x16x15x128xbf16>,
    %c0_190 = arith.constant 0 : index
    %c0_191 = arith.constant 0 : index
    %c0_192 = arith.constant 0 : index
    %c384_193 = arith.constant 384 : index
    %66 = vector.load %arg8[%c0_190, %c0_191, %c0_192, %c384_193] : memref<1x16x16x1152xbf16, #tpu.memory_space<vmem>>, vector<1x16x1x128xbf16>
    tpu.vector_store %arg8[%c0_190, %c0_191, %c0_192, %c384_193], %52 {strides = array<i32>} : memref<1x16x16x1152xbf16, #tpu.memory_space<vmem>>, vector<1x16x1x128xbf16>,
    %c0_194 = arith.constant 0 : index
    %c0_195 = arith.constant 0 : index
    %c1_196 = arith.constant 1 : index
    %c512_197 = arith.constant 512 : index
    %67 = vector.load %arg8[%c0_194, %c0_195, %c1_196, %c512_197] : memref<1x16x16x1152xbf16, #tpu.memory_space<vmem>>, vector<1x16x15x128xbf16>
    %c0_198 = arith.constant 0 : index
    %c0_199 = arith.constant 0 : index
    %c0_200 = arith.constant 0 : index
    %c640 = arith.constant 640 : index
    %68 = vector.load %arg8[%c0_198, %c0_199, %c0_200, %c640] : memref<1x16x16x1152xbf16, #tpu.memory_space<vmem>>, vector<1x16x15x128xbf16>
    tpu.vector_store %arg8[%c0_198, %c0_199, %c0_200, %c640], %67 {strides = array<i32>} : memref<1x16x16x1152xbf16, #tpu.memory_space<vmem>>, vector<1x16x15x128xbf16>,
    %c0_201 = arith.constant 0 : index
    %c0_202 = arith.constant 0 : index
    %c15_203 = arith.constant 15 : index
    %c640_204 = arith.constant 640 : index
    %69 = vector.load %arg8[%c0_201, %c0_202, %c15_203, %c640_204] : memref<1x16x16x1152xbf16, #tpu.memory_space<vmem>>, vector<1x16x1x128xbf16>
    tpu.vector_store %arg8[%c0_201, %c0_202, %c15_203, %c640_204], %52 {strides = array<i32>} : memref<1x16x16x1152xbf16, #tpu.memory_space<vmem>>, vector<1x16x1x128xbf16>,
    %c0_205 = arith.constant 0 : index
    %c1_206 = arith.constant 1 : index
    %c0_207 = arith.constant 0 : index
    %c512_208 = arith.constant 512 : index
    %70 = vector.load %arg8[%c0_205, %c1_206, %c0_207, %c512_208] : memref<1x16x16x1152xbf16, #tpu.memory_space<vmem>>, vector<1x15x15x128xbf16>
    %c0_209 = arith.constant 0 : index
    %c0_210 = arith.constant 0 : index
    %c1_211 = arith.constant 1 : index
    %c768 = arith.constant 768 : index
    %71 = vector.load %arg8[%c0_209, %c0_210, %c1_211, %c768] : memref<1x16x16x1152xbf16, #tpu.memory_space<vmem>>, vector<1x15x15x128xbf16>
    tpu.vector_store %arg8[%c0_209, %c0_210, %c1_211, %c768], %70 {strides = array<i32>} : memref<1x16x16x1152xbf16, #tpu.memory_space<vmem>>, vector<1x15x15x128xbf16>,
    %c0_212 = arith.constant 0 : index
    %c15_213 = arith.constant 15 : index
    %c0_214 = arith.constant 0 : index
    %c768_215 = arith.constant 768 : index
    %72 = vector.load %arg8[%c0_212, %c15_213, %c0_214, %c768_215] : memref<1x16x16x1152xbf16, #tpu.memory_space<vmem>>, vector<1x1x16x128xbf16>
    tpu.vector_store %arg8[%c0_212, %c15_213, %c0_214, %c768_215], %51 {strides = array<i32>} : memref<1x16x16x1152xbf16, #tpu.memory_space<vmem>>, vector<1x1x16x128xbf16>,
    %c0_216 = arith.constant 0 : index
    %c0_217 = arith.constant 0 : index
    %c0_218 = arith.constant 0 : index
    %c768_219 = arith.constant 768 : index
    %73 = vector.load %arg8[%c0_216, %c0_217, %c0_218, %c768_219] : memref<1x16x16x1152xbf16, #tpu.memory_space<vmem>>, vector<1x16x1x128xbf16>
    tpu.vector_store %arg8[%c0_216, %c0_217, %c0_218, %c768_219], %52 {strides = array<i32>} : memref<1x16x16x1152xbf16, #tpu.memory_space<vmem>>, vector<1x16x1x128xbf16>,
    %c0_220 = arith.constant 0 : index
    %c1_221 = arith.constant 1 : index
    %c0_222 = arith.constant 0 : index
    %c512_223 = arith.constant 512 : index
    %74 = vector.load %arg8[%c0_220, %c1_221, %c0_222, %c512_223] : memref<1x16x16x1152xbf16, #tpu.memory_space<vmem>>, vector<1x15x16x128xbf16>
    %c0_224 = arith.constant 0 : index
    %c0_225 = arith.constant 0 : index
    %c0_226 = arith.constant 0 : index
    %c896 = arith.constant 896 : index
    %75 = vector.load %arg8[%c0_224, %c0_225, %c0_226, %c896] : memref<1x16x16x1152xbf16, #tpu.memory_space<vmem>>, vector<1x15x16x128xbf16>
    tpu.vector_store %arg8[%c0_224, %c0_225, %c0_226, %c896], %74 {strides = array<i32>} : memref<1x16x16x1152xbf16, #tpu.memory_space<vmem>>, vector<1x15x16x128xbf16>,
    %c0_227 = arith.constant 0 : index
    %c15_228 = arith.constant 15 : index
    %c0_229 = arith.constant 0 : index
    %c896_230 = arith.constant 896 : index
    %76 = vector.load %arg8[%c0_227, %c15_228, %c0_229, %c896_230] : memref<1x16x16x1152xbf16, #tpu.memory_space<vmem>>, vector<1x1x16x128xbf16>
    tpu.vector_store %arg8[%c0_227, %c15_228, %c0_229, %c896_230], %51 {strides = array<i32>} : memref<1x16x16x1152xbf16, #tpu.memory_space<vmem>>, vector<1x1x16x128xbf16>,
    %c0_231 = arith.constant 0 : index
    %c1_232 = arith.constant 1 : index
    %c1_233 = arith.constant 1 : index
    %c512_234 = arith.constant 512 : index
    %77 = vector.load %arg8[%c0_231, %c1_232, %c1_233, %c512_234] : memref<1x16x16x1152xbf16, #tpu.memory_space<vmem>>, vector<1x15x15x128xbf16>
    %c0_235 = arith.constant 0 : index
    %c0_236 = arith.constant 0 : index
    %c0_237 = arith.constant 0 : index
    %c1024 = arith.constant 1024 : index
    %78 = vector.load %arg8[%c0_235, %c0_236, %c0_237, %c1024] : memref<1x16x16x1152xbf16, #tpu.memory_space<vmem>>, vector<1x15x15x128xbf16>
    tpu.vector_store %arg8[%c0_235, %c0_236, %c0_237, %c1024], %77 {strides = array<i32>} : memref<1x16x16x1152xbf16, #tpu.memory_space<vmem>>, vector<1x15x15x128xbf16>,
    %c0_238 = arith.constant 0 : index
    %c15_239 = arith.constant 15 : index
    %c0_240 = arith.constant 0 : index
    %c1024_241 = arith.constant 1024 : index
    %79 = vector.load %arg8[%c0_238, %c15_239, %c0_240, %c1024_241] : memref<1x16x16x1152xbf16, #tpu.memory_space<vmem>>, vector<1x1x16x128xbf16>
    tpu.vector_store %arg8[%c0_238, %c15_239, %c0_240, %c1024_241], %51 {strides = array<i32>} : memref<1x16x16x1152xbf16, #tpu.memory_space<vmem>>, vector<1x1x16x128xbf16>,
    %c0_242 = arith.constant 0 : index
    %c0_243 = arith.constant 0 : index
    %c15_244 = arith.constant 15 : index
    %c1024_245 = arith.constant 1024 : index
    %80 = vector.load %arg8[%c0_242, %c0_243, %c15_244, %c1024_245] : memref<1x16x16x1152xbf16, #tpu.memory_space<vmem>>, vector<1x16x1x128xbf16>
    tpu.vector_store %arg8[%c0_242, %c0_243, %c15_244, %c1024_245], %52 {strides = array<i32>} : memref<1x16x16x1152xbf16, #tpu.memory_space<vmem>>, vector<1x16x1x128xbf16>,
    %c0_246 = arith.constant 0 : index
    %c0_247 = arith.constant 0 : index
    %c0_248 = arith.constant 0 : index
    %c0_249 = arith.constant 0 : index
    %81 = vector.load %arg8[%c0_246, %c0_247, %c0_248, %c0_249] : memref<1x16x16x1152xbf16, #tpu.memory_space<vmem>>, vector<1x16x16x1152xbf16>
    %82 = vector.shape_cast %81 : vector<1x16x16x1152xbf16> to vector<256x1152xbf16>
    %c0_250 = arith.constant 0 : index
    %c0_251 = arith.constant 0 : index
    %83 = vector.load %arg4[%c0_250, %c0_251] : memref<1152x128xbf16, #tpu.memory_space<vmem>>, vector<1152x128xbf16>
    %cst_252 = arith.constant dense<0.000000e+00> : vector<256x128xf32>
    %84 = tpu.matmul %82, %83, %cst_252 {dimension_numbers = #tpu.dot_dimension_numbers<[1], [0], [0], [1], [0, 0, 1, 1], [], []>} : vector<256x1152xbf16>, vector<1152x128xbf16>, vector<256x128xf32> -> vector<256x128xf32>
    %c0_253 = arith.constant 0 : index
    %c0_254 = arith.constant 0 : index
    %85 = vector.load %arg5[%c0_253, %c0_254] : memref<1x128xf32, #tpu.memory_space<vmem>>, vector<1x128xf32>
    %86 = vector.broadcast %85 : vector<1x128xf32> to vector<256x128xf32>
    %87 = arith.addf %84, %86 : vector<256x128xf32>
    %cst_255 = arith.constant 0.000000e+00 : f32
    %88 = vector.broadcast %cst_255 : f32 to vector<256x128xf32>
    %89 = arith.maximumf %87, %88 : vector<256x128xf32>
    %c0_256 = arith.constant 0 : index
    %c0_257 = arith.constant 0 : index
    %90 = vector.load %arg6[%c0_256, %c0_257] : memref<256x128xf32, #tpu.memory_space<vmem>>, vector<256x128xf32>
    tpu.vector_store %arg6[%c0_256, %c0_257], %89 {strides = array<i32>} : memref<256x128xf32, #tpu.memory_space<vmem>>, vector<256x128xf32>,
    return
  }
  func.func @transform_0(%arg0: i32) -> (i32, i32, i32, i32) {
    %c0_i32 = arith.constant 0 : i32
    %c0_i32_0 = arith.constant 0 : i32
    %c0_i32_1 = arith.constant 0 : i32
    %c0_i32_2 = arith.constant 0 : i32
    return %arg0, %c0_i32, %c0_i32_0, %c0_i32_1 : i32, i32, i32, i32
  }
  func.func @transform_1(%arg0: i32) -> (i32, i32) {
    %c0_i32 = arith.constant 0 : i32
    %c0_i32_0 = arith.constant 0 : i32
    %c0_i32_1 = arith.constant 0 : i32
    return %c0_i32, %c0_i32_0 : i32, i32
  }
  func.func @transform_2(%arg0: i32) -> (i32, i32) {
    %c0_i32 = arith.constant 0 : i32
    %c0_i32_0 = arith.constant 0 : i32
    %c0_i32_1 = arith.constant 0 : i32
    return %c0_i32, %c0_i32_0 : i32, i32
  }
  func.func @transform_3(%arg0: i32) -> (i32, i32) {
    %c0_i32 = arith.constant 0 : i32
    %c0_i32_0 = arith.constant 0 : i32
    %c0_i32_1 = arith.constant 0 : i32
    return %c0_i32, %c0_i32_0 : i32, i32
  }
  func.func @transform_4(%arg0: i32) -> (i32, i32) {
    %c0_i32 = arith.constant 0 : i32
    %c0_i32_0 = arith.constant 0 : i32
    %c0_i32_1 = arith.constant 0 : i32
    return %c0_i32, %c0_i32_0 : i32, i32
  }
  func.func @transform_5(%arg0: i32) -> (i32, i32) {
    %c0_i32 = arith.constant 0 : i32
    %c0_i32_0 = arith.constant 0 : i32
    return %arg0, %c0_i32 : i32, i32
  }
}

</mosaic_0001>

<bundles_post_ra>
// kernel: tpu_custom_call.1
= control target key start
LH: loop header
LB: loop body
LE: loop exit
PB: predicated region body
PF: predicated region fallthrough
CT: control target
= control target key end

     0   :  { %10 = vsyncpa [#allocation5], 0  ;;  %s10374_s0 = inlined_call_operand.hbm [shape: f32[2,32,32,64], index: 0, kind: input, shape index: {}]   ;;  %s10375_s1 = inlined_call_operand.hbm [shape: bf16[576,128], index: 1, kind: input, shape index: {}]   ;;  %s10376_s2 = inlined_call_operand.vmem [shape: f32[1,128], index: 2, kind: input, shape index: {}]   ;;  %s10377_s3 = inlined_call_operand.hbm [shape: bf16[1152,128], index: 3, kind: input, shape index: {}]   ;;  %s10378_s4 = inlined_call_operand.vmem [shape: f32[1,128], index: 4, kind: input, shape index: {}]   ;;  %s10379_s5 = inlined_call_operand.hbm [shape: f32[512,128], index: 5, kind: output, shape index: {}]  }
   0x1   :  { %12 = vsyncpa [#allocation5 + $0x1], 0 }
   0x2   :  { %13 = vsyncpa [#allocation8], 0 }
   0x3   :  { %14 = vsyncpa [#allocation6], 0 }
   0x4   :  { %16 = vsyncpa [#allocation6 + $0x1], 0  ;;  %s8010_s18 = smov 0   ;;  %s8012_s19 = smov 0  }
   0x5   :  { %s8014_s20 = smov 0   ;;  %s8016_s21 = smov 0  }
   0x6 LB: > { %s8031_s22 = sadd.s32 4294967295, %s7966_s21   ;;  %s6522_s23 = sadd.s32 4294967294, %s7966_s21   ;;  %s7966_s21 = sphi %s8016_s21, %s10453_s21   ;;  %s7962_s20 = sphi %s8014_s20, %s10452_s20   ;;  %s7958_s19 = sphi %s8012_s19, %s10451_s19   ;;  %s7954_s18 = sphi %s8010_s18, %s10450_s18  }
   0x7   : > { %p42_p0 = scmp.ne.s32.totalorder %s7958_s19, %s7954_s18  ;;  %p10380_p1 = scmp.eq.s32.totalorder %s8031_s22, 0 }
   0x8   : > { %p156_p3 = scmp.eq.s32.totalorder %s6522_s23, 1  ;;  %p6523_p5 = scmp.ge.s32.totalorder %s7966_s21, 1 }
   0x9   : > { %p8040_p4 = por %p10380_p1, %p42_p0  ;;  %p163_p7 = scmp.lt.s32.totalorder %s7966_s21, 3 }
   0xa   : > { %p8045_p6 = por %p156_p3, %p42_p0  ;;  %s7968_s27 = smov [#allocation7]  }
   0xb   : > { %s10383_s24 = scalar_select %p8040_p4, 1, 0 }
   0xc   : > { %s10384_s25 = scalar_select %p8045_p6, 1, 0 }
   0xd   : > { %p8050_p8 = pnand %p6523_p5, %p163_p7  ;;  %s175_s28 = sshll.u32 %s7968_s27, 4  ;;  %s8054_s28 = int_to_ptr.vmem [resolvable:$true] %s175_s28 }
   0xe   : > { %s7969_s30 = smov [#allocation9]   ;;  %s7810_s9 = scalar_lea.hbm %s10375_s1, 4608 }
   0xf   : > { %p7611_p9 = pneg %p8050_p8  ;;  %s191_s6 = sshll.u32 %s7969_s30, 4  ;;  %s8065_s6 = int_to_ptr.vmem [resolvable:$true] %s191_s6 }
  0x10   : > { %p7811_p12 = scmp.ne.s32.totalorder %s10375_s1, %s7810_s9  ;;  %p7817_p5 = scmp.lt.u32.totalorder %s7810_s9, %s10375_s1 }
  0x11   : > { %p8061_p11 = pnand %p7611_p9, %p10380_p1 }
  0x13   : > { %p7812_p13 = pneg %p8061_p11 }
  0x15   : > { %p7813_p0 = pnand %p7812_p13, %p7811_p12 }
  0x17   : > { %p7814_p3 = pneg %p7813_p0 }
  0x19   : > { %p7819_p7 = pnand %p7817_p5, %p7814_p3 }
  0x1b   : > { %7822 = shalt.err (!%p7819_p7)
}
  0x1c   : > { %s7823_s14 = scalar_lea.vmem %s8054_s28, 4608  ;;  %p7831_p2 = scmp.lt.s32.totalorder %s8054_s28, %s8054_s28 }
  0x1d   : > { %p7824_p9 = scmp.ne.s32.totalorder %s8054_s28, %s7823_s14  ;;  %p7832_p12 = scmp.lt.s32.totalorder %s7823_s14, %s7823_s14 }
  0x1f   : > { %p7826_p10 = pnand %p7824_p9, %p7812_p13  ;;  %p7833_p0 = por %p7832_p12, %p7831_p2 }
  0x21   : > { %p7827_p1 = pneg %p7826_p10 }
  0x23   : > { %p7834_p6 = pnand %p7833_p0, %p7827_p1 }
  0x25   : > { %7837 = shalt.err (!%p7834_p6)
}
  0x26   : > { %s7970_s15 = smov 64   ;;  %s7971_s16 = smov 4  }
  0x27   : > { %7614 = dma.hbm_to_vmem [thread:$0]  (!%p8061_p11), %s10375_s1, 4608, %s8054_s28, [#allocation8], %s7970_s15, %s7970_s15, %s7971_s16  }
  0x28   : > { %s7838_s7 = scalar_lea.hbm %s10377_s3, 9216 }
  0x29   : > { %p7839_p2 = scmp.ne.s32.totalorder %s10377_s3, %s7838_s7  ;;  %p7845_p10 = scmp.lt.u32.totalorder %s7838_s7, %s10377_s3 }
  0x2b   : > { %p7841_p1 = pnand %p7839_p2, %p7812_p13 }
  0x2d   : > { %p7842_p6 = pneg %p7841_p1 }
  0x2f   : > { %p7847_p3 = pnand %p7845_p10, %p7842_p6 }
  0x31   : > { %7850 = shalt.err (!%p7847_p3)
}
  0x32   : > { %s7851_s28 = scalar_lea.vmem %s8065_s6, 9216  ;;  %p7859_p12 = scmp.lt.s32.totalorder %s8065_s6, %s8065_s6 }
  0x33   : > { %p7852_p5 = scmp.ne.s32.totalorder %s8065_s6, %s7851_s28  ;;  %p7860_p0 = scmp.lt.s32.totalorder %s7851_s28, %s7851_s28 }
  0x35   : > { %p7854_p7 = pnand %p7852_p5, %p7812_p13  ;;  %p7861_p2 = por %p7860_p0, %p7859_p12 }
  0x37   : > { %p7855_p9 = pneg %p7854_p7 }
  0x39   : > { %p7862_p1 = pnand %p7861_p2, %p7855_p9 }
  0x3b   : > { %7865 = shalt.err (!%p7862_p1)
}
  0x3c   : > { %7617 = dma.hbm_to_vmem [thread:$0]  (!%p8061_p11), %s10377_s3, 9216, %s8065_s6, [#allocation8], %s7970_s15, %s7970_s15, %s7971_s16  }
  0x3d   : > { %s8120_s14 = sadd.s32 1, %s7966_s21   ;;  %s29_s29 = sadd.s32 1, %s7962_s20 }
  0x3e   : > { %s26_s17 = ssub.s32 %s7966_s21, %s8120_s14  ;;  %p36_p13 = scmp.ne.s32.totalorder %s7962_s20, %s7958_s19 }
  0x3f   : > { %p27_p6 = scmp.eq.s32.totalorder %s26_s17, 0  ;;  %p37_p10 = scmp.eq.s32.totalorder %s7966_s21, 0 }
  0x40   : > { %p10387_p3 = scmp.eq.s32.totalorder %s8031_s22, 1  ;;  %p7628_p7 = scmp.lt.s32.totalorder %s7966_s21, 2 }
  0x41   : > { %s8136_s27 = scalar_select %p27_p6, %s7962_s20, %s29_s29  }
  0x42   : > { %p8130_p5 = por %p10387_p3, %p36_p13  ;;  %p38_p9 = por %p37_p10, %p36_p13 }
  0x43   : > { %s208_s30 = sand.u32 1, %s7962_s20   ;;  %s6793_s6 = sshll.u32 %s7966_s21, 14 }
  0x44   : > { %s10388_s23 = scalar_select %p8130_p5, 1, 0 }
  0x45   : > { %s6527_s7 = sshll.u32 %s208_s30, 10  ;;  %s8143_s8 = scalar_lea.hbm %s10374_s0, %s6793_s6 }
  0x46   : > { %s212_s9 = scalar_lea.vmem [#allocation4], %s6527_s7  ;;  %p8147_p11 = pnand %p7628_p7, %p38_p9 }
  0x47   : > { %s219_s10 = sshll.u32 %s212_s9, 4  ;;  %s8151_s28 = scalar_lea.sflag [#allocation5], %s208_s30  ;;  %s8145_s10 = int_to_ptr.vmem [resolvable:$true] %s219_s10 }
  0x48   : > { %s7866_s12 = scalar_lea.hbm %s8143_s8, 16384  ;;  %p7868_p0 = pneg %p8147_p11 }
  0x49   : > { %p7867_p12 = scmp.ne.s32.totalorder %s8143_s8, %s7866_s12  ;;  %s7871_s17 = scalar_lea.hbm %s10374_s0, 32768 }
  0x4a   : > { %p7872_p13 = scmp.lt.u32.totalorder %s8143_s8, %s10374_s0  ;;  %p7873_p6 = scmp.lt.u32.totalorder %s7871_s17, %s7866_s12 }
  0x4b   : > { %p7869_p2 = pnand %p7868_p0, %p7867_p12  ;;  %p7875_p3 = scmp.lt.u32.totalorder %s7866_s12, %s8143_s8 }
  0x4c   : > { %p7874_p10 = por %p7873_p6, %p7872_p13 }
  0x4d   : > { %p7870_p1 = pneg %p7869_p2 }
  0x4e   : > { %p7876_p7 = por %p7875_p3, %p7874_p10 }
  0x50   : > { %p7877_p9 = pnand %p7876_p7, %p7870_p1 }
  0x52   : > { %7880 = shalt.err (!%p7877_p9)
}
  0x53   : > { %s7881_s30 = scalar_lea.vmem %s8145_s10, 16384  ;;  %s7972_s15 = smov [#allocation4]  }
  0x54   : > { %p7882_p12 = scmp.ne.s32.totalorder %s8145_s10, %s7881_s30  ;;  %s7886_s16 = sshll.u32 %s7972_s15, 4  ;;  %s7887_s16 = int_to_ptr.vmem [resolvable:$false] %s7886_s16 }
  0x55   : > { %s7888_s9 = scalar_lea.vmem %s7887_s16, 32768  ;;  %p7889_p4 = scmp.lt.s32.totalorder %s8145_s10, %s7887_s16 }
  0x56   : > { %p7884_p2 = pnand %p7882_p12, %p7868_p0  ;;  %p7890_p13 = scmp.lt.s32.totalorder %s7888_s9, %s7881_s30 }
  0x58   : > { %p7885_p5 = pneg %p7884_p2  ;;  %p7891_p6 = por %p7890_p13, %p7889_p4 }
  0x5a   : > { %p7892_p10 = pnand %p7891_p6, %p7885_p5 }
  0x5c   : > { %7895 = shalt.err (!%p7892_p10)
}
  0x5d   : > { %s7973_s12 = smov 128   ;;  %s7974_s13 = smov 8  }
  0x5e   : > { %7621 = dma.hbm_to_vmem [thread:$0]  (!%p8147_p11), %s8143_s8, 16384, %s8145_s10, %s8151_s28, %s7973_s12, %s7973_s12, %s7974_s13  }
  0x5f   : > { %231 = sbr.rel (%p8050_p8) target bundleno = 1231 (0x4cf), region = 40 }
  0x66   : > { %s8182_s29 = sand.u32 1, %s7958_s19   ;;  %p10390_p4 = scmp.ne.s32.totalorder %s10383_s24, 0 }
  0x67   : > { %s6531_s17 = sshll.u32 %s8182_s29, 10  ;;  %s234_s7 = scalar_lea.sflag [#allocation5], %s8182_s29 }
  0x68   : > { %s8186_s6 = scalar_lea.vmem [#allocation4], %s6531_s17 }
  0x69   : > { %7941 = dma.done.wait (%p10390_p4), %s234_s7, 16384  }
  0x6a   : > { %7943 = vsyncadd (%p10390_p4), %s234_s7, 4294950912  ;;  %p10391_p5 = scmp.eq.s32.totalorder %s8031_s22, 0 }
  0x6c   : > { %7945 = dma.done.wait (%p10391_p5), [#allocation8], 13824   ;;  %p10392_p8 = pmov %p10391_p5 }
  0x6d   : > { %vm641_vm0 = vcmask 523264   ;;  %v7975_v0 = vmov 0   ;;  %v6538_v1 = vld [vmem:[%s8186_s6 + $0x80] ss:$2 sm:$0xff]  ;;  %v6539_v2 = vld [vmem:[%s8186_s6 + $0x90] ss:$2 sm:$0xff] }
  0x6e   : > { %7947 = vsyncadd (%p10392_p8), [#allocation8], 4294953472  ;;  %1168 = vst.msk [vmem:[#allocation2 + $0x8] sm:$0xff] %vm641_vm0, %v7975_v0  ;;  %v6570_v3 = vld [vmem:[%s8186_s6 + $0x81] ss:$2 sm:$0xff]  ;;  %s7976_s24 = smov 64  }
  0x6f   : > { %842 = vst.msk [vmem:[#allocation2] sm:$0xff] %vm641_vm0, %v7975_v0  ;;  %1951 = vst.msk [vmem:[#allocation2 + $0x270] sm:$0xff] %vm641_vm0, %v7975_v0  ;;  %v6571_v4 = vld [vmem:[%s8186_s6 + $0x91] ss:$2 sm:$0xff]  ;;  %v6602_v5 = vld [vmem:[%s8186_s6 + $0xa0] ss:$2 sm:$0xff]  ;;  %v533_v7 = vmax.f32 %v6538_v1, %v6570_v3 }
  0x70   : > { %2271 = vst.msk [vmem:[#allocation2 + $0x278] sm:$0xff] %vm641_vm0, %v7975_v0  ;;  %3473 = vst [vmem:[#allocation3] sm:$0xff] %v7975_v0  ;;  %v6603_v6 = vld [vmem:[%s8186_s6 + $0xb0] ss:$2 sm:$0xff]  ;;  %v6634_v8 = vld [vmem:[%s8186_s6 + $0xa1] ss:$2 sm:$0xff]  ;;  %v534_v10 = vmax.f32 %v6539_v2, %v6571_v4 }
  0x71   : > { %3554 = vst [vmem:[#allocation3 + $0x8] sm:$0xff] %v7975_v0  ;;  %3736 = vst [vmem:[#allocation3 + $0x10] sm:$0xff] %v7975_v0  ;;  %v6635_v9 = vld [vmem:[%s8186_s6 + $0xb1] ss:$2 sm:$0xff]  ;;  %v274_v11 = vld [vmem:[%s8186_s6] ss:$2 sm:$0xff]  ;;  %v565_v12 = vmax.f32 %v6602_v5, %v6634_v8 }
  0x72   : > { %4448 = vst [vmem:[#allocation3 + $0x468] sm:$0xff] %v7975_v0  ;;  %4708 = vst [vmem:[#allocation3 + $0x478] sm:$0xff] %v7975_v0  ;;  %v566_v13 = vmax.f32 %v6603_v6, %v6635_v9  ;;  %v6535_v14 = vld [vmem:[%s8186_s6 + $0x10] ss:$2 sm:$0xff]  ;;  %v6566_v15 = vld [vmem:[%s8186_s6 + $0x1] ss:$2 sm:$0xff] }
  0x73   : > { %v6567_v16 = vld [vmem:[%s8186_s6 + $0x11] ss:$2 sm:$0xff]  ;;  %v6598_v17 = vld [vmem:[%s8186_s6 + $0x20] ss:$2 sm:$0xff]  ;;  %v6599_v18 = vld [vmem:[%s8186_s6 + $0x30] ss:$2 sm:$0xff]  ;;  %v529_v20 = vmax.f32 %v274_v11, %v6566_v15  ;;  %v597_v22 = vmax.f32 %v533_v7, %v565_v12 }
  0x74   : > { %v6630_v19 = vld [vmem:[%s8186_s6 + $0x21] ss:$2 sm:$0xff]  ;;  %v530_v21 = vmax.f32 %v6535_v14, %v6567_v16  ;;  %v598_v23 = vmax.f32 %v534_v10, %v566_v13  ;;  %v6631_v24 = vld [vmem:[%s8186_s6 + $0x31] ss:$2 sm:$0xff]  ;;  %v6536_v26 = vld [vmem:[%s8186_s6 + $0x40] ss:$2 sm:$0xff] }
  0x75   : > { %v561_v25 = vmax.f32 %v6598_v17, %v6630_v19  ;;  %v6537_v27 = vld [vmem:[%s8186_s6 + $0x50] ss:$2 sm:$0xff]  ;;  %v562_v28 = vmax.f32 %v6599_v18, %v6631_v24  ;;  %v6568_v29 = vld [vmem:[%s8186_s6 + $0x41] ss:$2 sm:$0xff]  ;;  %v6569_v30 = vld [vmem:[%s8186_s6 + $0x51] ss:$2 sm:$0xff] }
  0x76   : > { %v6600_v31 = vld [vmem:[%s8186_s6 + $0x60] ss:$2 sm:$0xff]  ;;  %v627_v32 = vpack.c.bf16 %v598_v23, %v597_v22  ;;  %v6601_v34 = vld [vmem:[%s8186_s6 + $0x70] ss:$2 sm:$0xff]  ;;  %v6632_v35 = vld [vmem:[%s8186_s6 + $0x61] ss:$2 sm:$0xff]  ;;  %v531_v37 = vmax.f32 %v6536_v26, %v6568_v29  ;;  %v532_v38 = vmax.f32 %v6537_v27, %v6569_v30 }
  0x77   : > { %v593_v33 = vmax.f32 %v529_v20, %v561_v25  ;;  %v6633_v36 = vld [vmem:[%s8186_s6 + $0x71] ss:$2 sm:$0xff]  ;;  %v594_v39 = vmax.f32 %v530_v21, %v562_v28  ;;  %v563_v40 = vmax.f32 %v6600_v31, %v6632_v35  ;;  %v6540_v42 = vld [vmem:[%s8186_s6 + $0xc0] ss:$2 sm:$0xff]  ;;  %v6541_v43 = vld [vmem:[%s8186_s6 + $0xd0] ss:$2 sm:$0xff] }
  0x78   : > { %v564_v41 = vmax.f32 %v6601_v34, %v6633_v36  ;;  %v6572_v44 = vld [vmem:[%s8186_s6 + $0xc1] ss:$2 sm:$0xff]  ;;  %644 = vst.msk [vmem:[#allocation2 + $0x60] sm:$0xff] %vm641_vm0, %v627_v32  ;;  %v6573_v45 = vld [vmem:[%s8186_s6 + $0xd1] ss:$2 sm:$0xff]  ;;  %vm1169_vm2 = vcmask 523271  }
  0x79   : > { %v6604_v46 = vld [vmem:[%s8186_s6 + $0xe0] ss:$2 sm:$0xff]  ;;  %v6605_v47 = vld [vmem:[%s8186_s6 + $0xf0] ss:$2 sm:$0xff]  ;;  %v535_v48 = vmax.f32 %v6540_v42, %v6572_v44  ;;  %v625_v49 = vpack.c.bf16 %v594_v39, %v593_v33  ;;  %v595_v50 = vmax.f32 %v531_v37, %v563_v40  ;;  %v6636_v52 = vld [vmem:[%s8186_s6 + $0xe1] ss:$2 sm:$0xff]  ;;  %v536_v54 = vmax.f32 %v6541_v43, %v6573_v45 }
  0x7a   : > { %v596_v51 = vmax.f32 %v532_v38, %v564_v41  ;;  %v6637_v53 = vld [vmem:[%s8186_s6 + $0xf1] ss:$2 sm:$0xff]  ;;  %v6542_v55 = vld [vmem:[%s8186_s6 + $0x100] ss:$2 sm:$0xff]  ;;  %v567_v56 = vmax.f32 %v6604_v46, %v6636_v52  ;;  %v6543_v58 = vld [vmem:[%s8186_s6 + $0x110] ss:$2 sm:$0xff] }
  0x7b   : > { %v568_v57 = vmax.f32 %v6605_v47, %v6637_v53  ;;  %v6574_v59 = vld [vmem:[%s8186_s6 + $0x101] ss:$2 sm:$0xff]  ;;  %v6575_v60 = vld [vmem:[%s8186_s6 + $0x111] ss:$2 sm:$0xff]  ;;  %642 = vst.msk [vmem:[#allocation2 + $0x10] sm:$0xff] %vm641_vm0, %v625_v49  ;;  %vm843_vm7 = vcmask 516096  }
  0x7c   : > { %v626_v61 = vpack.c.bf16 %v596_v51, %v595_v50  ;;  %v6606_v62 = vld [vmem:[%s8186_s6 + $0x120] ss:$2 sm:$0xff]  ;;  %v6607_v63 = vld [vmem:[%s8186_s6 + $0x130] ss:$2 sm:$0xff]  ;;  %v6638_v0 = vld [vmem:[%s8186_s6 + $0x121] ss:$2 sm:$0xff]  ;;  %v537_v1 = vmax.f32 %v6542_v55, %v6574_v59  ;;  %v538_v2 = vmax.f32 %v6543_v58, %v6575_v60  ;;  %v599_v3 = vmax.f32 %v535_v48, %v567_v56 }
  0x7d   : > { %v600_v4 = vmax.f32 %v536_v54, %v568_v57  ;;  %v6639_v5 = vld [vmem:[%s8186_s6 + $0x131] ss:$2 sm:$0xff]  ;;  %v569_v6 = vmax.f32 %v6606_v62, %v6638_v0  ;;  %v6544_v7 = vld [vmem:[%s8186_s6 + $0x140] ss:$2 sm:$0xff]  ;;  %v6545_v8 = vld [vmem:[%s8186_s6 + $0x150] ss:$2 sm:$0xff] }
  0x7e   : > { %643 = vst.msk [vmem:[#allocation2 + $0x38] sm:$0xff] %vm641_vm0, %v626_v61  ;;  %v570_v9 = vmax.f32 %v6607_v63, %v6639_v5  ;;  %v6576_v10 = vld [vmem:[%s8186_s6 + $0x141] ss:$2 sm:$0xff]  ;;  %v6577_v11 = vld [vmem:[%s8186_s6 + $0x151] ss:$2 sm:$0xff]  ;;  %vm969_vm11 = vcmask 1048064  }
  0x7f   : > { %v6608_v12 = vld [vmem:[%s8186_s6 + $0x160] ss:$2 sm:$0xff]  ;;  %v628_v13 = vpack.c.bf16 %v600_v4, %v599_v3  ;;  %v601_v14 = vmax.f32 %v537_v1, %v569_v6  ;;  %v6609_v15 = vld [vmem:[%s8186_s6 + $0x170] ss:$2 sm:$0xff]  ;;  %v6640_v16 = vld [vmem:[%s8186_s6 + $0x161] ss:$2 sm:$0xff]  ;;  %v539_v18 = vmax.f32 %v6544_v7, %v6576_v10  ;;  %v540_v19 = vmax.f32 %v6545_v8, %v6577_v11 }
  0x80   : > { %v6641_v17 = vld [vmem:[%s8186_s6 + $0x171] ss:$2 sm:$0xff]  ;;  %v8251_v20 = vld [vmem:[#allocation2 + $0x60] sm:$0xff]  ;;  %v602_v21 = vmax.f32 %v538_v2, %v570_v9  ;;  %v571_v22 = vmax.f32 %v6608_v12, %v6640_v16  ;;  %v6547_v25 = vld [vmem:[%s8186_s6 + $0x190] ss:$2 sm:$0xff]  ;;  %vm1446_vm13 = vcmask 1040896  }
  0x81   : > { %v572_v23 = vmax.f32 %v6609_v15, %v6641_v17  ;;  %v6546_v24 = vld [vmem:[%s8186_s6 + $0x180] ss:$2 sm:$0xff]  ;;  %v1251_v26 = vshrl.u32 %v8251_v20, 16  ;;  %v1254_v27 = vshll.u32 %v8251_v20, 16  ;;  %645 = vst.msk [vmem:[#allocation2 + $0x88] sm:$0xff] %vm641_vm0, %v628_v13  ;;  %s6534_s28 = sshll.u32 %s8182_s29, 8 }
  0x82   : > { %v6578_v28 = vld [vmem:[%s8186_s6 + $0x181] ss:$2 sm:$0xff]  ;;  %v6579_v29 = vld [vmem:[%s8186_s6 + $0x191] ss:$2 sm:$0xff]  ;;  %v629_v30 = vpack.c.bf16 %v602_v21, %v601_v14  ;;  %v603_v31 = vmax.f32 %v539_v18, %v571_v22  ;;  %v6610_v33 = vld [vmem:[%s8186_s6 + $0x1a0] ss:$2 sm:$0xff] }
  0x83   : > { %v604_v32 = vmax.f32 %v540_v19, %v572_v23  ;;  %v6611_v34 = vld [vmem:[%s8186_s6 + $0x1b0] ss:$2 sm:$0xff]  ;;  %v6642_v35 = vld [vmem:[%s8186_s6 + $0x1a1] ss:$2 sm:$0xff]  ;;  %v541_v36 = vmax.f32 %v6546_v24, %v6578_v28  ;;  %v1253_v37 = vrot.slane %v1251_v26, 7  ;;  %v542_v40 = vmax.f32 %v6547_v25, %v6579_v29  ;;  %s10257_s30 = scalar_lea.vmem [#allocation10], %s6534_s28 }
  0x84   : > { %v8265_v38 = vld [vmem:[#allocation2 + $0x10] sm:$0xff]  ;;  %v573_v41 = vmax.f32 %v6610_v33, %v6642_v35  ;;  %v6548_v42 = vld [vmem:[%s8186_s6 + $0x1c0] ss:$2 sm:$0xff]  ;;  %646 = vst.msk [vmem:[#allocation2 + $0xb0] sm:$0xff] %vm641_vm0, %v629_v30  ;;  %v6580_v48 = vld [vmem:[%s8186_s6 + $0x1c1] ss:$2 sm:$0xff] }
  0x85   : > { %v6643_v39 = vld [vmem:[%s8186_s6 + $0x1b1] ss:$2 sm:$0xff]  ;;  %v1237_v43 = vshrl.u32 %v8265_v38, 16  ;;  %v1240_v44 = vshll.u32 %v8265_v38, 16  ;;  %v630_v45 = vpack.c.bf16 %v604_v32, %v603_v31  ;;  %v6549_v47 = vld [vmem:[%s8186_s6 + $0x1d0] ss:$2 sm:$0xff]  ;;  %v1256_v49 = vor.u32 %v1254_v27, %v1253_v37 }
  0x86   : > { %v574_v46 = vmax.f32 %v6611_v34, %v6643_v39  ;;  %v8276_v50 = vld [vmem:[#allocation2 + $0x38] sm:$0xff]  ;;  %v605_v51 = vmax.f32 %v541_v36, %v573_v41  ;;  %v6612_v53 = vld [vmem:[%s8186_s6 + $0x1e0] ss:$2 sm:$0xff]  ;;  %v543_v54 = vmax.f32 %v6548_v42, %v6580_v48  ;;  %v6644_v61 = vld [vmem:[%s8186_s6 + $0x1e1] ss:$2 sm:$0xff]  ;;  %s6794_s15 = sshll.u32 %s8031_s22, 12 }
  0x87   : > { %v6581_v52 = vld [vmem:[%s8186_s6 + $0x1d1] ss:$2 sm:$0xff]  ;;  %v1239_v55 = vrot.slane %v1237_v43, 7  ;;  %v1244_v56 = vshrl.u32 %v8276_v50, 16  ;;  %v1247_v57 = vshll.u32 %v8276_v50, 16  ;;  %647 = vst.msk [vmem:[#allocation2 + $0xd8] sm:$0xff] %vm641_vm0, %v630_v45  ;;  %1352 = vrot.lane.b32.xlu1 %v1256_v49, %s7976_s24  ;;  %v575_v5 = vmax.f32 %v6612_v53, %v6644_v61  ;;  %s10325_s13 = scalar_lea.hbm %s10379_s5, %s6794_s15 }
  0x88   : > { %v606_v58 = vmax.f32 %v542_v40, %v574_v46  ;;  %v6613_v59 = vld [vmem:[%s8186_s6 + $0x1f0] ss:$2 sm:$0xff]  ;;  %v7674_v60 = vld [vmem:[#allocation7 + $0x40] sm:$0xff]   ;;  %v6645_v62 = vld [vmem:[%s8186_s6 + $0x1f1] ss:$2 sm:$0xff]  ;;  %v544_v63 = vmax.f32 %v6549_v47, %v6581_v52  ;;  %s6367_s16 = sshll.u32 %s10257_s30, 4  ;;  %s10327_s16 = int_to_ptr.vmem [resolvable:$true] %s6367_s16 }
  0x89   : > { %v6550_v0 = vld [vmem:[%s8186_s6 + $0x200] ss:$2 sm:$0xff]  ;;  %v1242_v1 = vor.u32 %v1240_v44, %v1239_v55  ;;  %v1246_v2 = vrot.slane %v1244_v56, 7  ;;  %v6551_v6 = vld [vmem:[%s8186_s6 + $0x210] ss:$2 sm:$0xff]  ;;  %6795 = vmatprep.subr.bf16.mxu0 %v7674_v60  ;;  %v576_v10 = vmax.f32 %v6613_v59, %v6645_v62  ;;  %v607_v14 = vmax.f32 %v543_v54, %v575_v5  ;;  %s6354_s22 = scalar_lea.sflag [#allocation6], %s8182_s29 }
  0x8a   : > { %v8294_v3 = vld [vmem:[#allocation2 + $0x88] sm:$0xff]  ;;  %v631_v4 = vpack.c.bf16 %v606_v58, %v605_v51  ;;  %v6583_v11 = vld [vmem:[%s8186_s6 + $0x211] ss:$2 sm:$0xff]  ;;  %v7675_v12 = vld [vmem:[#allocation7] sm:$0xff]   ;;  %v8338_v53 = vrot.slane %v1247_v57, 1  ;;  %s7896_s17 = scalar_lea.vmem %s10327_s16, 4096 }
  0x8b   : > { %v6582_v7 = vld [vmem:[%s8186_s6 + $0x201] ss:$2 sm:$0xff]  ;;  %v1258_v8 = vshrl.u32 %v8294_v3, 16  ;;  %v1261_v9 = vshll.u32 %v8294_v3, 16  ;;  %1348 = vrot.lane.b32.xlu0 %v1242_v1, %s7976_s24  ;;  %v1249_v13 = vor.u32 %v1247_v57, %v1246_v2  ;;  %v6614_v15 = vld [vmem:[%s8186_s6 + $0x220] ss:$2 sm:$0xff]  ;;  %v546_v19 = vmax.f32 %v6551_v6, %v6583_v11  ;;  %924 = vrot.lane.b32.xlu1 %v8265_v38, %s7976_s24  ;;  %p7897_p11 = scmp.ne.s32.totalorder %s10327_s16, %s7896_s17 }
  0x8c   : > { %648 = vst.msk [vmem:[#allocation2 + $0x100] sm:$0xff] %vm641_vm0, %v631_v4  ;;  %v6615_v16 = vld [vmem:[%s8186_s6 + $0x230] ss:$2 sm:$0xff]  ;;  %v6646_v17 = vld [vmem:[%s8186_s6 + $0x221] ss:$2 sm:$0xff]  ;;  %v545_v18 = vmax.f32 %v6550_v0, %v6582_v7  ;;  %v608_v23 = vmax.f32 %v544_v63, %v576_v10  ;;  %6796 = vmatpush3.bf16.msra.mxu0 %v7675_v12  ;;  %p10447_p0 = scmp.ne.s32.totalorder %s10388_s23, 0 }
  0x8d   : > { %v1260_v21 = vrot.slane %v1258_v8, 7  ;;  %v8312_v22 = vld [vmem:[#allocation2 + $0xb0] sm:$0xff]  ;;  %v577_v25 = vmax.f32 %v6614_v15, %v6646_v17  ;;  %v6552_v28 = vld [vmem:[%s8186_s6 + $0x240] ss:$2 sm:$0xff]  ;;  %v6584_v32 = vld [vmem:[%s8186_s6 + $0x241] ss:$2 sm:$0xff] }
  0x8e   : > { %v6647_v24 = vld [vmem:[%s8186_s6 + $0x231] ss:$2 sm:$0xff]  ;;  %v1265_v29 = vshrl.u32 %v8312_v22, 16  ;;  %v6553_v31 = vld [vmem:[%s8186_s6 + $0x250] ss:$2 sm:$0xff]  ;;  %v1268_v34 = vshll.u32 %v8312_v22, 16  ;;  %v632_v36 = vpack.c.bf16 %v608_v23, %v607_v14  ;;  %v547_v47 = vmax.f32 %v6552_v28, %v6584_v32  ;;  %p7898_p1 = pnand %p7897_p11, %p10447_p0 }
  0x8f   : > { %v578_v30 = vmax.f32 %v6615_v16, %v6647_v24  ;;  %v1263_v33 = vor.u32 %v1261_v9, %v1260_v21  ;;  %v8322_v35 = vld [vmem:[#allocation2 + $0xd8] sm:$0xff]  ;;  %v609_v37 = vmax.f32 %v545_v18, %v577_v25  ;;  %v6616_v40 = vld [vmem:[%s8186_s6 + $0x260] ss:$2 sm:$0xff]  ;;  %1350 = vrot.lane.b32.xlu0 %v1249_v13, %s7976_s24  ;;  %926 = vrot.lane.b32.xlu1 %v8276_v50, %s7976_s24  ;;  %v6648_v49 = vld [vmem:[%s8186_s6 + $0x261] ss:$2 sm:$0xff]  ;;  %s7977_s7 = smov [#allocation10]  }
  0x90   : > { %v6585_v39 = vld [vmem:[%s8186_s6 + $0x251] ss:$2 sm:$0xff]  ;;  %v1267_v41 = vrot.slane %v1265_v29, 7  ;;  %v1272_v42 = vshrl.u32 %v8322_v35, 16  ;;  %v6617_v46 = vld [vmem:[%s8186_s6 + $0x270] ss:$2 sm:$0xff]  ;;  %v579_v55 = vmax.f32 %v6616_v40, %v6648_v49  ;;  %p7899_p3 = pneg %p7898_p1 }
  0x91   : > { %v610_v45 = vmax.f32 %v546_v19, %v578_v30  ;;  %v7676_v48 = vld [vmem:[#allocation7 + $0x48] sm:$0xff]   ;;  %649 = vst.msk [vmem:[#allocation2 + $0x128] sm:$0xff] %vm641_vm0, %v632_v36  ;;  %v6649_v51 = vld [vmem:[%s8186_s6 + $0x271] ss:$2 sm:$0xff]  ;;  %v548_v52 = vmax.f32 %v6553_v31, %v6585_v39  ;;  %v6555_v59 = vld [vmem:[%s8186_s6 + $0x290] ss:$2 sm:$0xff] }
  0x92   : > { %v6554_v58 = vld [vmem:[%s8186_s6 + $0x280] ss:$2 sm:$0xff]  ;;  %6797 = vmatprep.subr.bf16.mxu0 %v7676_v48  ;;  %v1275_v61 = vshll.u32 %v8322_v35, 16  ;;  %v580_v63 = vmax.f32 %v6617_v46, %v6649_v51  ;;  %v6586_v0 = vld [vmem:[%s8186_s6 + $0x281] ss:$2 sm:$0xff]  ;;  %v1270_v57 = vor.u32 %v1268_v34, %v1267_v41  ;;  %v1274_v2 = vrot.slane %v1272_v42, 7 }
  0x93   : > { %v633_v54 = vpack.c.bf16 %v610_v45, %v609_v37  ;;  %v7677_v60 = vld [vmem:[#allocation7 + $0x8] sm:$0xff]   ;;  %v8343_v62 = vld [vmem:[#allocation2 + $0x100] sm:$0xff]  ;;  %v6587_v1 = vld [vmem:[%s8186_s6 + $0x291] ss:$2 sm:$0xff]  ;;  %1354 = vrot.lane.b32.xlu0 %v1263_v33, %s7976_s24  ;;  %v611_v5 = vmax.f32 %v547_v47, %v579_v55  ;;  %928 = vrot.lane.b32.xlu1 %v8251_v20, %s7976_s24  ;;  %v549_v13 = vmax.f32 %v6554_v58, %v6586_v0  ;;  %vm1121_vm1 = vsmask.f32 7424 }
  0x94   : > { %v1279_v4 = vshrl.u32 %v8343_v62, 16  ;;  %v6618_v6 = vld [vmem:[%s8186_s6 + $0x2a0] ss:$2 sm:$0xff]  ;;  %v6619_v7 = vld [vmem:[%s8186_s6 + $0x2b0] ss:$2 sm:$0xff]  ;;  %6798 = vmatpush3.bf16.msra.mxu0 %v7677_v60  ;;  %v612_v10 = vmax.f32 %v548_v52, %v580_v63  ;;  %v550_v14 = vmax.f32 %v6555_v59, %v6587_v1  ;;  %v1282_v17 = vshll.u32 %v8343_v62, 16  ;;  %vm8473_vm4 = vmand %vm641_vm0, %vm1121_vm1 }
  0x95   : > { %650 = vst.msk [vmem:[#allocation2 + $0x150] sm:$0xff] %vm641_vm0, %v633_v54  ;;  %v6650_v11 = vld [vmem:[%s8186_s6 + $0x2a1] ss:$2 sm:$0xff]  ;;  %v6651_v12 = vld [vmem:[%s8186_s6 + $0x2b1] ss:$2 sm:$0xff]  ;;  %v1277_v32 = vor.u32 %v1275_v61, %v1274_v2  ;;  %vm8857_vm15 = vmand %vm969_vm11, %vm1121_vm1 }
  0x96   : > { %v6556_v15 = vld [vmem:[%s8186_s6 + $0x2c0] ss:$2 sm:$0xff]  ;;  %v1281_v16 = vrot.slane %v1279_v4, 7  ;;  %v581_v18 = vmax.f32 %v6618_v6, %v6650_v11  ;;  %v582_v19 = vmax.f32 %v6619_v7, %v6651_v12  ;;  %v6557_v21 = vld [vmem:[%s8186_s6 + $0x2d0] ss:$2 sm:$0xff]  ;;  %v634_v24 = vpack.c.bf16 %v612_v10, %v611_v5 }
  0x97   : > { %v6588_v23 = vld [vmem:[%s8186_s6 + $0x2c1] ss:$2 sm:$0xff]  ;;  %v6589_v25 = vld [vmem:[%s8186_s6 + $0x2d1] ss:$2 sm:$0xff]  ;;  %v6620_v28 = vld [vmem:[%s8186_s6 + $0x2e0] ss:$2 sm:$0xff]  ;;  %1356 = vrot.lane.b32.xlu0 %v1270_v57, %s7976_s24 }
  0x98   : > { %v6621_v30 = vld [vmem:[%s8186_s6 + $0x2f0] ss:$2 sm:$0xff]  ;;  %v551_v31 = vmax.f32 %v6556_v15, %v6588_v23  ;;  %v8372_v33 = vld [vmem:[#allocation2 + $0x128] sm:$0xff]  ;;  %v613_v36 = vmax.f32 %v549_v13, %v581_v18  ;;  %v614_v37 = vmax.f32 %v550_v14, %v582_v19  ;;  %v6653_v40 = vld [vmem:[%s8186_s6 + $0x2f1] ss:$2 sm:$0xff]  ;;  %v552_v41 = vmax.f32 %v6557_v21, %v6589_v25  ;;  %930 = vrot.lane.b32.xlu1 %v8294_v3, %s7976_s24 }
  0x99   : > { %v6652_v39 = vld [vmem:[%s8186_s6 + $0x2e1] ss:$2 sm:$0xff]  ;;  %v1286_v45 = vshrl.u32 %v8372_v33, 16  ;;  %v1289_v46 = vshll.u32 %v8372_v33, 16  ;;  %651 = vst.msk [vmem:[#allocation2 + $0x178] sm:$0xff] %vm641_vm0, %v634_v24  ;;  %v584_v48 = vmax.f32 %v6621_v30, %v6653_v40  ;;  %v1284_v52 = vor.u32 %v1282_v17, %v1281_v16 }
  0x9a   : > { %v583_v47 = vmax.f32 %v6620_v28, %v6652_v39  ;;  %v6558_v49 = vld [vmem:[%s8186_s6 + $0x300] ss:$2 sm:$0xff]  ;;  %v6559_v51 = vld [vmem:[%s8186_s6 + $0x310] ss:$2 sm:$0xff]  ;;  %v635_v54 = vpack.c.bf16 %v614_v37, %v613_v36  ;;  %v6590_v55 = vld [vmem:[%s8186_s6 + $0x301] ss:$2 sm:$0xff]  ;;  %v8405_v14 = vor.u32 %v8338_v53, %v1244_v56 }
  0x9b   : > { %v6591_v58 = vld [vmem:[%s8186_s6 + $0x311] ss:$2 sm:$0xff]  ;;  %v6622_v59 = vld [vmem:[%s8186_s6 + $0x320] ss:$2 sm:$0xff]  ;;  %v1288_v60 = vrot.slane %v1286_v45, 7  ;;  %v616_v1 = vmax.f32 %v552_v41, %v584_v48  ;;  %v553_v5 = vmax.f32 %v6558_v49, %v6590_v55  ;;  %1358 = vrot.lane.b32.xlu0 %v1277_v32, %s7976_s24  ;;  %v1531_v49 = vrot.slane %v1254_v27, 1 }
  0x9c   : > { %v8390_v63 = vld [vmem:[#allocation2 + $0x150] sm:$0xff]  ;;  %v615_v0 = vmax.f32 %v551_v31, %v583_v47  ;;  %v6654_v2 = vld [vmem:[%s8186_s6 + $0x321] ss:$2 sm:$0xff]  ;;  %652 = vst.msk [vmem:[#allocation2 + $0x1a0] sm:$0xff] %vm641_vm0, %v635_v54  ;;  %v554_v11 = vmax.f32 %v6559_v51, %v6591_v58  ;;  %v6560_v13 = vld [vmem:[%s8186_s6 + $0x340] ss:$2 sm:$0xff]  ;;  %932 = vrot.lane.b32.xlu1 %v8312_v22, %s7976_s24 }
  0x9d   : > { %v6623_v57 = vld [vmem:[%s8186_s6 + $0x330] ss:$2 sm:$0xff]  ;;  %v1293_v6 = vshrl.u32 %v8390_v63, 16  ;;  %v1296_v7 = vshll.u32 %v8390_v63, 16  ;;  %v6655_v10 = vld [vmem:[%s8186_s6 + $0x331] ss:$2 sm:$0xff]  ;;  %v585_v12 = vmax.f32 %v6622_v59, %v6654_v2  ;;  %v1291_v36 = vor.u32 %v1289_v46, %v1288_v60 }
  0x9e   : > { %v636_v15 = vpack.c.bf16 %v616_v1, %v615_v0  ;;  %v586_v16 = vmax.f32 %v6623_v57, %v6655_v10  ;;  %v6561_v18 = vld [vmem:[%s8186_s6 + $0x350] ss:$2 sm:$0xff]  ;;  %v6592_v19 = vld [vmem:[%s8186_s6 + $0x341] ss:$2 sm:$0xff]  ;;  %v6593_v21 = vld [vmem:[%s8186_s6 + $0x351] ss:$2 sm:$0xff] }
  0x9f   : > { %v1295_v23 = vrot.slane %v1293_v6, 7  ;;  %v617_v24 = vmax.f32 %v553_v5, %v585_v12  ;;  %v6624_v25 = vld [vmem:[%s8186_s6 + $0x360] ss:$2 sm:$0xff]  ;;  %v6625_v28 = vld [vmem:[%s8186_s6 + $0x370] ss:$2 sm:$0xff]  ;;  %v555_v50 = vmax.f32 %v6560_v13, %v6592_v19  ;;  %v556_v30 = vmax.f32 %v6561_v18, %v6593_v21  ;;  %1360 = vrot.lane.b32.xlu0 %v1284_v52, %s7976_s24 }
  0xa0   : > { %v7678_v56 = vld [vmem:[#allocation7 + $0x50] sm:$0xff]   ;;  %653 = vst.msk [vmem:[#allocation2 + $0x1c8] sm:$0xff] %vm641_vm0, %v636_v15  ;;  %v618_v53 = vmax.f32 %v554_v11, %v586_v16  ;;  %v6656_v31 = vld [vmem:[%s8186_s6 + $0x361] ss:$2 sm:$0xff]  ;;  %v6562_v40 = vld [vmem:[%s8186_s6 + $0x380] ss:$2 sm:$0xff]  ;;  %1626 = vrot.lane.b32.xlu1 %v8405_v14, %s7976_s24 }
  0xa1   : > { %v6657_v32 = vld [vmem:[%s8186_s6 + $0x371] ss:$2 sm:$0xff]  ;;  %v587_v37 = vmax.f32 %v6624_v25, %v6656_v31  ;;  %v6563_v41 = vld [vmem:[%s8186_s6 + $0x390] ss:$2 sm:$0xff]  ;;  %v1517_v47 = vrot.slane %v1240_v44, 1  ;;  %6799 = vmatprep.subr.bf16.mxu0 %v7678_v56  ;;  %v1298_v48 = vor.u32 %v1296_v7, %v1295_v23  ;;  %v1538_v2 = vrot.slane %v1261_v9, 1 }
  0xa2   : > { %v588_v39 = vmax.f32 %v6625_v28, %v6657_v32  ;;  %v8430_v51 = vld [vmem:[#allocation2 + $0x178] sm:$0xff]  ;;  %v637_v52 = vpack.c.bf16 %v618_v53, %v617_v24  ;;  %v6594_v54 = vld [vmem:[%s8186_s6 + $0x381] ss:$2 sm:$0xff]  ;;  %v6626_v44 = vld [vmem:[%s8186_s6 + $0x3a0] ss:$2 sm:$0xff]  ;;  %v1532_v56 = vor.u32 %v1531_v49, %v1251_v26  ;;  %v1545_v53 = vrot.slane %v1268_v34, 1 }
  0xa3   : > { %v6595_v55 = vld [vmem:[%s8186_s6 + $0x391] ss:$2 sm:$0xff]  ;;  %v619_v58 = vmax.f32 %v555_v50, %v587_v37  ;;  %v6627_v60 = vld [vmem:[%s8186_s6 + $0x3b0] ss:$2 sm:$0xff]  ;;  %v6658_v0 = vld [vmem:[%s8186_s6 + $0x3a1] ss:$2 sm:$0xff]  ;;  %v557_v1 = vmax.f32 %v6562_v40, %v6594_v54  ;;  %v8446_v12 = vor.u32 %v1517_v47, %v1237_v43  ;;  %1362 = vrot.lane.b32.xlu0 %v1291_v36, %s7976_s24 }
  0xa4   : > { %v620_v59 = vmax.f32 %v556_v30, %v588_v39  ;;  %v558_v57 = vmax.f32 %v6563_v41, %v6595_v55  ;;  %v8439_v27 = vld [vmem:[#allocation2 + $0x1a0] sm:$0xff]  ;;  %654 = vst.msk [vmem:[#allocation2 + $0x1f0] sm:$0xff] %vm641_vm0, %v637_v52  ;;  %v6659_v5 = vld [vmem:[%s8186_s6 + $0x3b1] ss:$2 sm:$0xff]  ;;  %v589_v10 = vmax.f32 %v6626_v44, %v6658_v0  ;;  %v1300_v9 = vshrl.u32 %v8430_v51, 16  ;;  %1364 = vrot.lane.b32.xlu1 %v1298_v48, %s7976_s24 }
  0xa5   : > { %v6564_v11 = vld [vmem:[%s8186_s6 + $0x3c0] ss:$2 sm:$0xff]  ;;  %v1307_v13 = vshrl.u32 %v8439_v27, 16  ;;  %v590_v16 = vmax.f32 %v6627_v60, %v6659_v5  ;;  %v6565_v18 = vld [vmem:[%s8186_s6 + $0x3d0] ss:$2 sm:$0xff]  ;;  %v1303_v37 = vshll.u32 %v8430_v51, 16  ;;  %v1539_v39 = vor.u32 %v1538_v2, %v1258_v8 }
  0xa6   : > { %v638_v15 = vpack.c.bf16 %v620_v59, %v619_v58  ;;  %v6596_v19 = vld [vmem:[%s8186_s6 + $0x3c1] ss:$2 sm:$0xff]  ;;  %v621_v21 = vmax.f32 %v557_v1, %v589_v10  ;;  %v6597_v23 = vld [vmem:[%s8186_s6 + $0x3d1] ss:$2 sm:$0xff]  ;;  %v6628_v24 = vld [vmem:[%s8186_s6 + $0x3e0] ss:$2 sm:$0xff] }
  0xa7   : > { %v6629_v38 = vld [vmem:[%s8186_s6 + $0x3f0] ss:$2 sm:$0xff]  ;;  %v559_v43 = vmax.f32 %v6564_v11, %v6596_v19  ;;  %v622_v25 = vmax.f32 %v558_v57, %v590_v16  ;;  %v6660_v28 = vld [vmem:[%s8186_s6 + $0x3e1] ss:$2 sm:$0xff]  ;;  %v6661_v50 = vld [vmem:[%s8186_s6 + $0x3f1] ss:$2 sm:$0xff]  ;;  %v560_v30 = vmax.f32 %v6565_v18, %v6597_v23  ;;  %934 = vrot.lane.b32.xlu0 %v8322_v35, %s7976_s24 }
  0xa8   : > { %655 = vst.msk [vmem:[#allocation2 + $0x218] sm:$0xff] %vm641_vm0, %v638_v15  ;;  %vm1170_vm3 = vsmask.f32 7966  ;;  %v591_v31 = vmax.f32 %v6628_v24, %v6660_v28  ;;  %v592_v32 = vmax.f32 %v6629_v38, %v6661_v50  ;;  %v1302_v36 = vrot.slane %v1300_v9, 7  ;;  %936 = vrot.lane.b32.xlu1 %v8343_v62, %s7976_s24  ;;  %v8488_v8 = vld [vmem:[#allocation2 + $0x1c8] sm:$0xff]  ;;  %v7679_v58 = vld [vmem:[#allocation7 + $0x10] sm:$0xff]  }
  0xa9   : > { %v639_v40 = vpack.c.bf16 %v622_v25, %v621_v21  ;;  %v1309_v26 = vrot.slane %v1307_v13, 7  ;;  %v1310_v34 = vshll.u32 %v8439_v27, 16  ;;  %vm8484_vm5 = vmand %vm1169_vm2, %vm1170_vm3  ;;  %vm795_vm6 = vsmask.f32 7938  ;;  %v7680_v0 = vld [vmem:[#allocation7 + $0x58] sm:$0xff]   ;;  %6800 = vmatpush3.bf16.msra.mxu0 %v7679_v58  ;;  %v7682_v15 = vld [vmem:[#allocation7 + $0x60] sm:$0xff]  }
  0xaa   : > { %v623_v41 = vmax.f32 %v559_v43, %v591_v31  ;;  %v624_v47 = vmax.f32 %v560_v30, %v592_v32  ;;  %v1552_v48 = vrot.slane %v1275_v61, 1  ;;  %v1305_v54 = vor.u32 %v1303_v37, %v1302_v36  ;;  %v1126_v57 = vld [vmem:[#allocation2 + $0x58] sm:$0xff]  ;;  %6801 = vmatprep.subr.bf16.mxu0 %v7680_v0  ;;  %v1172_v5 = vld [vmem:[#allocation2 + $0x8] sm:$0x80]  ;;  %v986_v38 = vld [vmem:[#allocation2 + $0x10] sm:$0xff]  ;;  %s7900_s6 = sshll.u32 %s7977_s7, 4  ;;  %s7901_s6 = int_to_ptr.vmem [resolvable:$false] %s7900_s6 }
  0xab   : > { %656 = vst.msk [vmem:[#allocation2 + $0x240] sm:$0xff] %vm641_vm0, %v639_v40  ;;  %v8493_v49 = vld [vmem:[#allocation2 + $0x1f0] sm:$0xff]  ;;  %1628 = vrot.lane.b32.xlu0 %v1532_v56, %s7976_s24  ;;  %v8498_v55 = vrot.slane %v1282_v17, 1  ;;  %v1312_v59 = vor.u32 %v1310_v34, %v1309_v26  ;;  %v1314_v44 = vshrl.u32 %v8488_v8, 16  ;;  %v8506_v61 = vrot.slane %v1289_v46, 1  ;;  %v7681_v2 = vld [vmem:[#allocation7 + $0x18] sm:$0xff]   ;;  %vm8558_vm9 = vmand %vm641_vm0, %vm795_vm6  ;;  %p7903_p7 = scmp.lt.s32.totalorder %s10327_s16, %s7901_s6 }
  0xac   : > { %v640_v52 = vpack.c.bf16 %v624_v47, %v623_v41  ;;  %1630 = vrot.lane.b32.xlu1 %v1539_v39, %s7976_s24  ;;  %vm844_vm8 = vsmask.f32 256  ;;  %v1317_v17 = vshll.u32 %v8488_v8, 16  ;;  %v8512_v1 = vrot.slane %v1296_v7, 1  ;;  %v7683_v50 = vld [vmem:[#allocation7 + $0x20] sm:$0xff]   ;;  %v7684_v30 = vld [vmem:[#allocation7 + $0x68] sm:$0xff]   ;;  %vm8826_vm12 = vmand %vm969_vm11, %vm795_vm6 }
  0xad   : > { %v1127_v46 = vsel %vm8473_vm4, %v8405_v14, %v1126_v57  ;;  %v1321_v10 = vshrl.u32 %v8493_v49, 16  ;;  %v8519_v11 = vrot.slane %v1303_v37, 1  ;;  %v1173_v7 = vsel %vm8484_vm5, 0, %v1172_v5  ;;  %6802 = vmatpush3.bf16.msra.mxu0 %v7681_v2  ;;  %v988_v22 = vld [vmem:[#allocation2 + $0x60] sm:$0xff]  ;;  %v1123_v40 = vld [vmem:[#allocation2 + $0x30] sm:$0xff]  ;;  %v797_v26 = vld [vmem:[#allocation2 + $0x28] sm:$0xff] }
  0xae   : > { %657 = vst.msk [vmem:[#allocation2 + $0x268] sm:$0xff] %vm641_vm0, %v640_v52  ;;  %1128 = vst [vmem:[#allocation2 + $0x58] sm:$0xff] %v1127_v46  ;;  %v1316_v16 = vrot.slane %v1314_v44, 7  ;;  %v8529_v19 = vrot.slane %v1310_v34, 1  ;;  %v1324_v21 = vshll.u32 %v8493_v49, 16  ;;  %v1546_v43 = vor.u32 %v1545_v53, %v1265_v29  ;;  %6803 = vmatprep.subr.bf16.mxu0 %v7682_v15  ;;  %v659_v47 = vld [vmem:[#allocation2 + $0x38] sm:$0xff] }
  0xaf   : > { %v8502_v60 = vld [vmem:[#allocation2 + $0x218] sm:$0xff]  ;;  %1366 = vrot.lane.b32.xlu0 %v1305_v54, %s7976_s24  ;;  %1174 = vst [vmem:[#allocation2 + $0x8] sm:$0x80] %v1173_v7  ;;  %v1002_v25 = vshrl.u32 %v986_v38, 16  ;;  %v1004_v28 = vshll.u32 %v986_v38, 16  ;;  %v1553_v56 = vor.u32 %v1552_v48, %v1272_v42  ;;  %v1323_v31 = vrot.slane %v1321_v10, 7  ;;  %vm8572_vm10 = vmand %vm843_vm7, %vm844_vm8 }
  0xb0   : > { %1368 = vrot.lane.b32.xlu1 %v1312_v59, %s7976_s24  ;;  %v1328_v18 = vshrl.u32 %v8502_v60, 16  ;;  %v1331_v23 = vshll.u32 %v8502_v60, 16  ;;  %v8542_v32 = vrot.slane %v1317_v17, 1  ;;  %v8544_v36 = vrot.slane %v1324_v21, 1  ;;  %v1129_v46 = vld [vmem:[#allocation2 + $0x80] sm:$0xff]  ;;  %v7685_v15 = vld [vmem:[#allocation7 + $0x28] sm:$0xff]   ;;  %vm8833_vm14 = vmand %vm1446_vm13, %vm844_vm8 }
  0xb1   : > { %v1006_v42 = vrot.slane %v1004_v28, 1  ;;  %v676_v37 = vrot.slane %v1002_v25, 7  ;;  %6804 = vmatpush3.bf16.msra.mxu0 %v7683_v50  ;;  %v1016_v34 = vshrl.u32 %v988_v22, 16  ;;  %v1018_v41 = vshll.u32 %v988_v22, 16  ;;  %v7686_v22 = vld [vmem:[#allocation7 + $0x70] sm:$0xff]  }
  0xb2   : > { %v8527_v14 = vld [vmem:[#allocation2 + $0x240] sm:$0xff]  ;;  %v8550_v29 = vrot.slane %v1328_v18, 7  ;;  %v8554_v53 = vrot.slane %v1331_v23, 1  ;;  %v1319_v48 = vor.u32 %v1317_v17, %v1316_v16  ;;  %6805 = vmatprep.subr.bf16.mxu0 %v7684_v30  ;;  %v681_v5 = vshrl.u32 %v659_v47, 16  ;;  %v800_v30 = vld [vmem:[#allocation2 + $0x50] sm:$0xff] }
  0xb3   : > { %v1335_v24 = vshrl.u32 %v8527_v14, 16  ;;  %938 = vrot.lane.b32.xlu0 %v8372_v33, %s7976_s24  ;;  %v1338_v39 = vshll.u32 %v8527_v14, 16  ;;  %v1007_v59 = vor.u32 %v1006_v42, %v1002_v25  ;;  %v679_v0 = vor.u32 %v1004_v28, %v676_v37  ;;  %v989_v42 = vld [vmem:[#allocation2 + $0x88] sm:$0xff] }
  0xb4   : > { %940 = vrot.lane.b32.xlu1 %v8390_v63, %s7976_s24  ;;  %v1020_v2 = vrot.slane %v1018_v41, 1  ;;  %v684_v7 = vshll.u32 %v659_v47, 16  ;;  %v1326_v16 = vor.u32 %v1324_v21, %v1323_v31  ;;  %v683_v50 = vrot.slane %v681_v5, 7  ;;  %v7687_v47 = vld [vmem:[#allocation7 + $0x30] sm:$0xff]  }
  0xb5   : > { %v8565_v52 = vrot.slane %v1335_v24, 7  ;;  %v8567_v54 = vld [vmem:[#allocation2 + $0x268] sm:$0xff]  ;;  %v1178_v58 = vld [vmem:[#allocation2 + $0x58] sm:$0x80]  ;;  %v1124_v38 = vsel %vm8473_vm4, %v1007_v59, %v1123_v40  ;;  %6806 = vmatpush3.bf16.msra.mxu0 %v7685_v15  ;;  %v8587_v21 = vor.u32 %v8498_v55, %v1279_v4  ;;  %v8592_v31 = vor.u32 %v8506_v61, %v1286_v45  ;;  %v846_v15 = vld [vmem:[#allocation2] sm:$0x1] }
  0xb6   : > { %v1179_v17 = vsel %vm8484_vm5, 0, %v1178_v58  ;;  %v1342_v25 = vshrl.u32 %v8567_v54, 16  ;;  %1125 = vst [vmem:[#allocation2 + $0x30] sm:$0xff] %v1124_v38  ;;  %v1021_v28 = vor.u32 %v1020_v2, %v1016_v34  ;;  %v1023_v37 = vshrl.u32 %v989_v42, 16  ;;  %6807 = vmatprep.subr.bf16.mxu0 %v7686_v22  ;;  %v1132_v55 = vld [vmem:[#allocation2 + $0xa8] sm:$0xff]  ;;  %v7688_v61 = vld [vmem:[#allocation7 + $0x78] sm:$0xff]  }
  0xb7   : > { %1632 = vrot.lane.b32.xlu0 %v1546_v43, %s7976_s24  ;;  %1180 = vst [vmem:[#allocation2 + $0x58] sm:$0x80] %v1179_v17  ;;  %v798_v43 = vsel %vm8558_vm9, %v679_v0, %v797_v26  ;;  %v1025_v40 = vshll.u32 %v989_v42, 16  ;;  %v803_v26 = vld [vmem:[#allocation2 + $0x78] sm:$0xff]  ;;  %v8601_v4 = vor.u32 %v8512_v1, %v1293_v6  ;;  %v1345_v33 = vshll.u32 %v8567_v54, 16  ;;  %v806_v2 = vld [vmem:[#allocation2 + $0xa0] sm:$0xff] }
  0xb8   : > { %1634 = vrot.lane.b32.xlu1 %v1553_v56, %s7976_s24  ;;  %799 = vst [vmem:[#allocation2 + $0x28] sm:$0xff] %v798_v43  ;;  %v690_v56 = vrot.slane %v1016_v34, 7  ;;  %v1130_v58 = vsel %vm8473_vm4, %v1021_v28, %v1129_v46  ;;  %v686_v34 = vor.u32 %v684_v7, %v683_v50  ;;  %v697_v59 = vrot.slane %v1023_v37, 7  ;;  %v7689_v6 = vld [vmem:[#allocation7 + $0x38] sm:$0xff]   ;;  %v1135_v42 = vld [vmem:[#allocation2 + $0xd0] sm:$0xff] }
  0xb9   : > { %1131 = vst [vmem:[#allocation2 + $0x80] sm:$0xff] %v1130_v58  ;;  %v1027_v45 = vrot.slane %v1025_v40, 1  ;;  %6808 = vmatpush3.bf16.msra.mxu0 %v7687_v47  ;;  %v8611_v1 = vor.u32 %v1331_v23, %v8550_v29  ;;  %v8615_v46 = vrot.slane %v1342_v25, 7  ;;  %v847_v43 = vsel %vm8572_vm10, 0, %v846_v15  ;;  %v7782_v47 = vld [vmem:[#allocation3] sm:$0xff] }
  0xba   : > { %v693_v62 = vor.u32 %v1018_v41, %v690_v56  ;;  %v801_v0 = vsel %vm8558_vm9, %v686_v34, %v800_v30  ;;  %6809 = vmatprep.subr.bf16.mxu0 %v7688_v61  ;;  %v700_v7 = vor.u32 %v1025_v40, %v697_v59  ;;  %v8626_v28 = vor.u32 %v1338_v39, %v8565_v52  ;;  %v809_v34 = vld [vmem:[#allocation2 + $0xc8] sm:$0xff] }
  0xbb   : > { %1370 = vrot.lane.b32.xlu0 %v1319_v48, %s7976_s24  ;;  %v990_v48 = vld [vmem:[#allocation2 + $0xb0] sm:$0xff]  ;;  %802 = vst [vmem:[#allocation2 + $0x50] sm:$0xff] %v801_v0  ;;  %v1028_v5 = vor.u32 %v1027_v45, %v1023_v37  ;;  %848 = vst [vmem:[#allocation2] sm:$0x1] %v847_v43  ;;  %v1138_v45 = vld [vmem:[#allocation2 + $0xf8] sm:$0xff]  ;;  %vm1720_vm2 = vcmask 1048071  }
  0xbc   : > { %1372 = vrot.lane.b32.xlu1 %v1326_v16, %s7976_s24  ;;  %v804_v41 = vsel %vm8558_vm9, %v693_v62, %v803_v26  ;;  %v1030_v17 = vshrl.u32 %v990_v48, 16  ;;  %v1032_v63 = vshll.u32 %v990_v48, 16  ;;  %v991_v16 = vld [vmem:[#allocation2 + $0xd8] sm:$0xff]  ;;  %v807_v56 = vsel %vm8558_vm9, %v700_v7, %v806_v2  ;;  %985 = vst.msk [vmem:[#allocation2] sm:$0xff] %vm969_vm11, %v7782_v47  ;;  %v992_v62 = vld [vmem:[#allocation2 + $0x100] sm:$0xff]  ;;  %v8637_v0 = vld [vmem:[#allocation2 + $0x128] sm:$0xff] }
  0xbd   : > { %805 = vst [vmem:[#allocation2 + $0x78] sm:$0xff] %v804_v41  ;;  %v1037_v23 = vshrl.u32 %v991_v16, 16  ;;  %v1039_v29 = vshll.u32 %v991_v16, 16  ;;  %v1175_v50 = vld [vmem:[#allocation2 + $0x30] sm:$0x80]  ;;  %v1133_v22 = vsel %vm8473_vm4, %v1028_v5, %v1132_v55  ;;  %808 = vst [vmem:[#allocation2 + $0xa0] sm:$0xff] %v807_v56  ;;  %6810 = vmatpush3.bf16.msra.mxu0 %v7689_v6 }
  0xbe   : > { %v1034_v38 = vrot.slane %v1032_v63, 1  ;;  %v704_v37 = vrot.slane %v1030_v17, 7  ;;  %v1176_v40 = vsel %vm8484_vm5, 0, %v1175_v50  ;;  %1134 = vst [vmem:[#allocation2 + $0xa8] sm:$0xff] %v1133_v22  ;;  %v1044_v61 = vshrl.u32 %v992_v62, 16  ;;  %v1141_v6 = vld [vmem:[#allocation2 + $0x120] sm:$0xff]  ;;  %vm8867_vm7 = vmand %vm1720_vm2, %vm1170_vm3 }
  0xbf   : > { %942 = vrot.lane.b32.xlu0 %v8430_v51, %s7976_s24  ;;  %v849_v30 = vld [vmem:[#allocation2 + $0x28] sm:$0x1]  ;;  %v1041_v58 = vrot.slane %v1039_v29, 1  ;;  %1177 = vst [vmem:[#allocation2 + $0x30] sm:$0x80] %v1176_v40  ;;  %v1046_v48 = vshll.u32 %v992_v62, 16  ;;  %v8684_v62 = vor.u32 %v8529_v19, %v1307_v13 }
  0xc0   : > { %944 = vrot.lane.b32.xlu1 %v8439_v27, %s7976_s24  ;;  %v850_v26 = vsel %vm8572_vm10, 0, %v849_v30  ;;  %v1035_v52 = vor.u32 %v1034_v38, %v1030_v17  ;;  %v707_v55 = vor.u32 %v1032_v63, %v704_v37  ;;  %v711_v59 = vrot.slane %v1037_v23, 7  ;;  %v1181_v41 = vld [vmem:[#allocation2 + $0x80] sm:$0x80]  ;;  %v812_v5 = vld [vmem:[#allocation2 + $0xf0] sm:$0xff]  ;;  %v1144_v43 = vld [vmem:[#allocation2 + $0x148] sm:$0xff] }
  0xc1   : > { %851 = vst [vmem:[#allocation2 + $0x28] sm:$0x1] %v850_v26  ;;  %v1042_v2 = vor.u32 %v1041_v58, %v1037_v23  ;;  %v1051_v7 = vshrl.u32 %v8637_v0, 16  ;;  %v1053_v15 = vshll.u32 %v8637_v0, 16  ;;  %v1182_v63 = vsel %vm8484_vm5, 0, %v1181_v41  ;;  %v815_v23 = vld [vmem:[#allocation2 + $0x118] sm:$0xff] }
  0xc2   : > { %v1136_v17 = vsel %vm8473_vm4, %v1035_v52, %v1135_v42  ;;  %v1048_v16 = vrot.slane %v1046_v48, 1  ;;  %v714_v38 = vor.u32 %v1039_v29, %v711_v59  ;;  %v8651_v50 = vld [vmem:[#allocation2 + $0x150] sm:$0xff]  ;;  %v8656_v30 = vor.u32 %v8519_v11, %v1300_v9  ;;  %1183 = vst [vmem:[#allocation2 + $0x80] sm:$0x80] %v1182_v63  ;;  %v8670_v58 = vld [vmem:[#allocation2 + $0x178] sm:$0xff]  ;;  %v8688_v59 = vld [vmem:[#allocation2 + $0x1a0] sm:$0xff] }
  0xc3   : > { %1636 = vrot.lane.b32.xlu0 %v8587_v21, %s7976_s24  ;;  %1137 = vst [vmem:[#allocation2 + $0xd0] sm:$0xff] %v1136_v17  ;;  %v810_v21 = vsel %vm8558_vm9, %v707_v55, %v809_v34  ;;  %v1139_v42 = vsel %vm8473_vm4, %v1042_v2, %v1138_v45  ;;  %v1055_v56 = vrot.slane %v1053_v15, 1  ;;  %v718_v37 = vrot.slane %v1044_v61, 7  ;;  %v8672_v34 = vld [vmem:[#allocation7 + $0x100] sm:$0xff]   ;;  %v1147_v41 = vld [vmem:[#allocation2 + $0x170] sm:$0xff] }
  0xc4   : > { %1638 = vrot.lane.b32.xlu1 %v8592_v31, %s7976_s24  ;;  %v852_v31 = vld [vmem:[#allocation2 + $0x50] sm:$0x1]  ;;  %v855_v22 = vld [vmem:[#allocation2 + $0x78] sm:$0x1]  ;;  %811 = vst [vmem:[#allocation2 + $0xc8] sm:$0xff] %v810_v21  ;;  %1140 = vst [vmem:[#allocation2 + $0xf8] sm:$0xff] %v1139_v42  ;;  %v1049_v51 = vor.u32 %v1048_v16, %v1044_v61  ;;  %v813_v9 = vsel %vm8558_vm9, %v714_v38, %v812_v5  ;;  %7511 = vmatprep.subr.bf16.mxu0 %v8672_v34 }
  0xc5   : > { %v853_v29 = vsel %vm8572_vm10, 0, %v852_v31  ;;  %v856_v40 = vsel %vm8572_vm10, 0, %v855_v22  ;;  %814 = vst [vmem:[#allocation2 + $0xf0] sm:$0xff] %v813_v9  ;;  %v1056_v11 = vor.u32 %v1055_v56, %v1051_v7  ;;  %v721_v26 = vor.u32 %v1046_v48, %v718_v37  ;;  %v1184_v45 = vld [vmem:[#allocation2 + $0xa8] sm:$0x80]  ;;  %v818_v19 = vld [vmem:[#allocation2 + $0x140] sm:$0xff] }
  0xc6   : > { %854 = vst [vmem:[#allocation2 + $0x50] sm:$0x1] %v853_v29  ;;  %857 = vst [vmem:[#allocation2 + $0x78] sm:$0x1] %v856_v40  ;;  %v1058_v52 = vshrl.u32 %v8651_v50, 16  ;;  %v1060_v47 = vshll.u32 %v8651_v50, 16  ;;  %v1142_v61 = vsel %vm8473_vm4, %v1049_v51, %v1141_v6 }
  0xc7   : > { %1374 = vrot.lane.b32.xlu0 %v8611_v1, %s7976_s24  ;;  %v8679_v1 = vor.u32 %v1345_v33, %v8615_v46  ;;  %v858_v55 = vld [vmem:[#allocation2 + $0xa0] sm:$0x1]  ;;  %v725_v48 = vrot.slane %v1051_v7, 7  ;;  %1143 = vst [vmem:[#allocation2 + $0x120] sm:$0xff] %v1142_v61  ;;  %v1145_v27 = vsel %vm8473_vm4, %v1056_v11, %v1144_v43  ;;  %v816_v13 = vsel %vm8558_vm9, %v721_v26, %v815_v23  ;;  %v8701_v5 = vld [vmem:[#allocation2 + $0x1c8] sm:$0xff]  ;;  %v1150_v37 = vld [vmem:[#allocation2 + $0x198] sm:$0xff] }
  0xc8   : > { %1376 = vrot.lane.b32.xlu1 %v8626_v28, %s7976_s24  ;;  %v1185_v28 = vsel %vm8484_vm5, 0, %v1184_v45  ;;  %v859_v46 = vsel %vm8572_vm10, 0, %v858_v55  ;;  %1146 = vst [vmem:[#allocation2 + $0x148] sm:$0xff] %v1145_v27  ;;  %817 = vst [vmem:[#allocation2 + $0x118] sm:$0xff] %v816_v13  ;;  %v1062_v0 = vrot.slane %v1060_v47, 1  ;;  %v1065_v2 = vshrl.u32 %v8670_v58, 16 }
  0xc9   : > { %1186 = vst [vmem:[#allocation2 + $0xa8] sm:$0x80] %v1185_v28  ;;  %860 = vst [vmem:[#allocation2 + $0xa0] sm:$0x1] %v859_v46  ;;  %v728_v17 = vor.u32 %v1053_v15, %v725_v48  ;;  %v1067_v6 = vshll.u32 %v8670_v58, 16  ;;  %v732_v63 = vrot.slane %v1058_v52, 7  ;;  %v8732_v27 = vor.u32 %v8542_v32, %v1314_v44 }
  0xca   : > { %v1187_v7 = vld [vmem:[#allocation2 + $0xd0] sm:$0x80]  ;;  %v1072_v21 = vshrl.u32 %v8688_v59, 16  ;;  %v1074_v16 = vshll.u32 %v8688_v59, 16  ;;  %v1079_v38 = vshrl.u32 %v8701_v5, 16  ;;  %v1063_v23 = vor.u32 %v1062_v0, %v1058_v52  ;;  %v821_v22 = vld [vmem:[#allocation2 + $0x168] sm:$0xff] }
  0xcb   : > { %946 = vrot.lane.b32.xlu0 %v8488_v8, %s7976_s24  ;;  %v1188_v15 = vsel %vm8484_vm5, 0, %v1187_v7  ;;  %v861_v43 = vld [vmem:[#allocation2 + $0xc8] sm:$0x1]  ;;  %v819_v50 = vsel %vm8558_vm9, %v728_v17, %v818_v19  ;;  %v1069_v31 = vrot.slane %v1067_v6, 1  ;;  %v1190_v42 = vld [vmem:[#allocation2 + $0xf8] sm:$0x80]  ;;  %v735_v29 = vor.u32 %v1060_v47, %v732_v63 }
  0xcc   : > { %948 = vrot.lane.b32.xlu1 %v8493_v49, %s7976_s24  ;;  %1189 = vst [vmem:[#allocation2 + $0xd0] sm:$0x80] %v1188_v15  ;;  %v862_v56 = vsel %vm8572_vm10, 0, %v861_v43  ;;  %820 = vst [vmem:[#allocation2 + $0x140] sm:$0xff] %v819_v50  ;;  %v1076_v40 = vrot.slane %v1074_v16, 1  ;;  %v739_v51 = vrot.slane %v1065_v2, 7  ;;  %v1148_v26 = vsel %vm8473_vm4, %v1063_v23, %v1147_v41 }
  0xcd   : > { %v1191_v9 = vsel %vm8484_vm5, 0, %v1190_v42  ;;  %863 = vst [vmem:[#allocation2 + $0xc8] sm:$0x1] %v862_v56  ;;  %v864_v11 = vld [vmem:[#allocation2 + $0xf0] sm:$0x1]  ;;  %v1070_v52 = vor.u32 %v1069_v31, %v1065_v2  ;;  %v1153_v58 = vld [vmem:[#allocation2 + $0x1c0] sm:$0xff]  ;;  %v822_v61 = vsel %vm8558_vm9, %v735_v29, %v821_v22  ;;  %v1609_v49 = vor.u32 %v8554_v53, %v1328_v18 }
  0xce   : > { %v824_v45 = vld [vmem:[#allocation2 + $0x190] sm:$0xff]  ;;  %v1081_v55 = vshll.u32 %v8701_v5, 16  ;;  %1192 = vst [vmem:[#allocation2 + $0xf8] sm:$0x80] %v1191_v9  ;;  %v865_v47 = vsel %vm8572_vm10, 0, %v864_v11  ;;  %1149 = vst [vmem:[#allocation2 + $0x170] sm:$0xff] %v1148_v26  ;;  %v1077_v48 = vor.u32 %v1076_v40, %v1072_v21  ;;  %v742_v59 = vor.u32 %v1067_v6, %v739_v51 }
  0xcf   : > { %1640 = vrot.lane.b32.xlu0 %v8601_v4, %s7976_s24  ;;  %v1156_v28 = vld [vmem:[#allocation2 + $0x1e8] sm:$0xff]  ;;  %v827_v46 = vld [vmem:[#allocation2 + $0x1b8] sm:$0xff]  ;;  %v1193_v4 = vld [vmem:[#allocation2 + $0x120] sm:$0x80]  ;;  %866 = vst [vmem:[#allocation2 + $0xf0] sm:$0x1] %v865_v47  ;;  %v1151_v13 = vsel %vm8473_vm4, %v1070_v52, %v1150_v37 }
  0xd0   : > { %1642 = vrot.lane.b32.xlu1 %v8656_v30, %s7976_s24  ;;  %823 = vst [vmem:[#allocation2 + $0x168] sm:$0xff] %v822_v61  ;;  %v1083_v19 = vrot.slane %v1081_v55, 1  ;;  %v746_v0 = vrot.slane %v1072_v21, 7  ;;  %v998_v41 = vld [vmem:[#allocation2 + $0x1f0] sm:$0xff]  ;;  %v999_v17 = vld [vmem:[#allocation2 + $0x218] sm:$0xff]  ;;  %v1194_v2 = vsel %vm8484_vm5, 0, %v1193_v4  ;;  %v1154_v8 = vsel %vm8473_vm4, %v1077_v48, %v1153_v58 }
  0xd1   : > { %v1196_v6 = vld [vmem:[#allocation2 + $0x148] sm:$0x80]  ;;  %v867_v30 = vld [vmem:[#allocation2 + $0x118] sm:$0x1]  ;;  %1152 = vst [vmem:[#allocation2 + $0x198] sm:$0xff] %v1151_v13  ;;  %v825_v44 = vsel %vm8558_vm9, %v742_v59, %v824_v45  ;;  %v1086_v32 = vshrl.u32 %v998_v41, 16 }
  0xd2   : > { %1195 = vst [vmem:[#allocation2 + $0x120] sm:$0x80] %v1194_v2  ;;  %v1197_v5 = vsel %vm8484_vm5, 0, %v1196_v6  ;;  %v868_v7 = vsel %vm8572_vm10, 0, %v867_v30  ;;  %1155 = vst [vmem:[#allocation2 + $0x1c0] sm:$0xff] %v1154_v8  ;;  %v1084_v63 = vor.u32 %v1083_v19, %v1079_v38  ;;  %v749_v21 = vor.u32 %v1074_v16, %v746_v0  ;;  %v1000_v31 = vld [vmem:[#allocation2 + $0x240] sm:$0xff] }
  0xd3   : > { %826 = vst [vmem:[#allocation2 + $0x190] sm:$0xff] %v825_v44  ;;  %1378 = vrot.lane.b32.xlu0 %v8679_v1, %s7976_s24  ;;  %1198 = vst [vmem:[#allocation2 + $0x148] sm:$0x80] %v1197_v5  ;;  %v1088_v15 = vshll.u32 %v998_v41, 16  ;;  %v753_v43 = vrot.slane %v1079_v38, 7  ;;  %v1093_v23 = vshrl.u32 %v999_v17, 16 }
  0xd4   : > { %869 = vst [vmem:[#allocation2 + $0x118] sm:$0x1] %v868_v7  ;;  %v1095_v50 = vshll.u32 %v999_v17, 16  ;;  %1624 = vrot.lane.b32.xlu1 %v8446_v12, %s7976_s24  ;;  %v870_v22 = vld [vmem:[#allocation2 + $0x140] sm:$0x1]  ;;  %v1157_v42 = vsel %vm8473_vm4, %v1084_v63, %v1156_v28  ;;  %v828_v16 = vsel %vm8558_vm9, %v749_v21, %v827_v46  ;;  %v1159_v56 = vld [vmem:[#allocation2 + $0x210] sm:$0xff] }
  0xd5   : > { %v830_v37 = vld [vmem:[#allocation2 + $0x1e0] sm:$0xff]  ;;  %v1162_v1 = vld [vmem:[#allocation2 + $0x238] sm:$0xff]  ;;  %v760_v29 = vrot.slane %v1086_v32, 7  ;;  %v1100_v40 = vshrl.u32 %v1000_v31, 16  ;;  %v871_v38 = vsel %vm8572_vm10, 0, %v870_v22  ;;  %1158 = vst [vmem:[#allocation2 + $0x1e8] sm:$0xff] %v1157_v42  ;;  %v756_v9 = vor.u32 %v1081_v55, %v753_v43 }
  0xd6   : > { %829 = vst [vmem:[#allocation2 + $0x1b8] sm:$0xff] %v828_v16  ;;  %v1090_v51 = vrot.slane %v1088_v15, 1  ;;  %v1097_v12 = vrot.slane %v1095_v50, 1  ;;  %v833_v11 = vld [vmem:[#allocation2 + $0x208] sm:$0xff]  ;;  %v1199_v26 = vld [vmem:[#allocation2 + $0x170] sm:$0x80] }
  0xd7   : > { %872 = vst [vmem:[#allocation2 + $0x140] sm:$0x1] %v871_v38  ;;  %v763_v52 = vor.u32 %v1088_v15, %v760_v29  ;;  %v1102_v58 = vshll.u32 %v1000_v31, 16  ;;  %v767_v45 = vrot.slane %v1093_v23, 7  ;;  %v836_v47 = vld [vmem:[#allocation2 + $0x230] sm:$0xff]  ;;  %v774_v61 = vrot.slane %v1100_v40, 7  ;;  %950 = vrot.lane.b32.xlu0 %v8502_v60, %s7976_s24 }
  0xd8   : > { %v1200_v48 = vsel %vm8484_vm5, 0, %v1199_v26  ;;  %v873_v59 = vld [vmem:[#allocation2 + $0x168] sm:$0x1]  ;;  %v1091_v28 = vor.u32 %v1090_v51, %v1086_v32  ;;  %v831_v55 = vsel %vm8558_vm9, %v756_v9, %v830_v37  ;;  %v1098_v46 = vor.u32 %v1097_v12, %v1093_v23  ;;  %v839_v4 = vld [vmem:[#allocation2 + $0x258] sm:$0xff]  ;;  %952 = vrot.lane.b32.xlu1 %v8527_v14, %s7976_s24  ;;  %v1165_v32 = vld [vmem:[#allocation2 + $0x260] sm:$0xff] }
  0xd9   : > { %1201 = vst [vmem:[#allocation2 + $0x170] sm:$0x80] %v1200_v48  ;;  %v1202_v13 = vld [vmem:[#allocation2 + $0x198] sm:$0x80]  ;;  %v874_v19 = vsel %vm8572_vm10, 0, %v873_v59  ;;  %832 = vst [vmem:[#allocation2 + $0x1e0] sm:$0xff] %v831_v55  ;;  %v834_v0 = vsel %vm8558_vm9, %v763_v52, %v833_v11  ;;  %v770_v17 = vor.u32 %v1095_v50, %v767_v45  ;;  %v777_v5 = vor.u32 %v1102_v58, %v774_v61 }
  0xda   : > { %v1104_v41 = vrot.slane %v1102_v58, 1  ;;  %v1203_v2 = vsel %vm8484_vm5, 0, %v1202_v13  ;;  %875 = vst [vmem:[#allocation2 + $0x168] sm:$0x1] %v874_v19  ;;  %v1205_v6 = vld [vmem:[#allocation2 + $0x1c0] sm:$0x80]  ;;  %v1160_v8 = vsel %vm8473_vm4, %v1091_v28, %v1159_v56  ;;  %v1163_v44 = vsel %vm8473_vm4, %v1098_v46, %v1162_v1 }
  0xdb   : > { %v876_v30 = vld [vmem:[#allocation2 + $0x190] sm:$0x1]  ;;  %835 = vst [vmem:[#allocation2 + $0x208] sm:$0xff] %v834_v0  ;;  %1204 = vst [vmem:[#allocation2 + $0x198] sm:$0x80] %v1203_v2  ;;  %v1206_v7 = vsel %vm8484_vm5, 0, %v1205_v6  ;;  %v837_v15 = vsel %vm8558_vm9, %v770_v17, %v836_v47  ;;  %1644 = vrot.lane.b32.xlu0 %v8684_v62, %s7976_s24  ;;  %v840_v43 = vsel %vm8558_vm9, %v777_v5, %v839_v4 }
  0xdc   : > { %v877_v63 = vsel %vm8572_vm10, 0, %v876_v30  ;;  %1161 = vst [vmem:[#allocation2 + $0x210] sm:$0xff] %v1160_v8  ;;  %1164 = vst [vmem:[#allocation2 + $0x238] sm:$0xff] %v1163_v44  ;;  %v1105_v21 = vor.u32 %v1104_v41, %v1100_v40  ;;  %1646 = vrot.lane.b32.xlu1 %v8732_v27, %s7976_s24  ;;  %v1602_v23 = vor.u32 %v8544_v36, %v1321_v10  ;;  %v1208_v50 = vld [vmem:[#allocation2 + $0x1e8] sm:$0x80]  ;;  %v1615_v10 = vrot.slane %v1338_v39, 1 }
  0xdd   : > { %1207 = vst [vmem:[#allocation2 + $0x1c0] sm:$0x80] %v1206_v7  ;;  %878 = vst [vmem:[#allocation2 + $0x190] sm:$0x1] %v877_v63  ;;  %v879_v31 = vld [vmem:[#allocation2 + $0x1b8] sm:$0x1] }
  0xde   : > { %838 = vst [vmem:[#allocation2 + $0x230] sm:$0xff] %v837_v15  ;;  %v1166_v22 = vsel %vm8473_vm4, %v1105_v21, %v1165_v32  ;;  %841 = vst [vmem:[#allocation2 + $0x258] sm:$0xff] %v840_v43  ;;  %v1209_v62 = vsel %vm8484_vm5, 0, %v1208_v50  ;;  %v880_v42 = vsel %vm8572_vm10, 0, %v879_v31  ;;  %v1616_v40 = vor.u32 %v1615_v10, %v1335_v24  ;;  %v1404_v24 = vld [vmem:[#allocation2 + $0x58] sm:$0xff]  ;;  %v1398_v52 = vld [vmem:[#allocation2 + $0x8] sm:$0xff] }
  0xdf   : > { %1167 = vst [vmem:[#allocation2 + $0x260] sm:$0xff] %v1166_v22  ;;  %1210 = vst [vmem:[#allocation2 + $0x1e8] sm:$0x80] %v1209_v62  ;;  %v1622_v38 = vrot.slane %v1345_v33, 1  ;;  %v7693_v28 = vld [vmem:[#allocation7 + $0xc0] sm:$0xff]   ;;  %v7696_v13 = vld [vmem:[#allocation7 + $0xc8] sm:$0xff]  }
  0xe0   : > { %881 = vst [vmem:[#allocation2 + $0x1b8] sm:$0x1] %v880_v42  ;;  %v882_v27 = vld [vmem:[#allocation2 + $0x1e0] sm:$0x1]  ;;  %1648 = vrot.lane.b32.xlu1 %v1602_v23, %s7976_s24  ;;  %6907 = vmatprep.subr.bf16.mxu1 %v7693_v28  ;;  %v1410_v2 = vld [vmem:[#allocation2 + $0xa8] sm:$0xff]  ;;  %v7698_v63 = vld [vmem:[#allocation7 + $0xd0] sm:$0xff]  }
  0xe1   : > { %v883_v36 = vsel %vm8572_vm10, 0, %v882_v27  ;;  %v1623_v11 = vor.u32 %v1622_v38, %v1342_v25  ;;  %v1401_v25 = vld [vmem:[#allocation2 + $0x30] sm:$0xff]  ;;  %v7694_v55 = vld [vmem:[#allocation7 + $0x80] sm:$0xff]   ;;  %v7697_v8 = vld [vmem:[#allocation7 + $0x88] sm:$0xff]  }
  0xe2   : > { %v885_v16 = vld [vmem:[#allocation2 + $0x208] sm:$0x1]  ;;  %884 = vst [vmem:[#allocation2 + $0x1e0] sm:$0x1] %v883_v36  ;;  %v1407_v4 = vld [vmem:[#allocation2 + $0x80] sm:$0xff]  ;;  %6908 = vmatpush3.bf16.msra.mxu1 %v7694_v55  ;;  %v1413_v15 = vld [vmem:[#allocation2 + $0xd0] sm:$0xff] }
  0xe3   : > { %v1211_v56 = vld [vmem:[#allocation2 + $0x210] sm:$0x80]  ;;  %v1214_v37 = vld [vmem:[#allocation2 + $0x238] sm:$0x80]  ;;  %v886_v1 = vsel %vm8572_vm10, 0, %v885_v16  ;;  %6909 = vmatprep.subr.bf16.mxu1 %v7696_v13  ;;  %v2320_v50 = vld [vmem:[#allocation2] sm:$0xff] }
  0xe4   : > { %v1212_v29 = vsel %vm8484_vm5, 0, %v1211_v56  ;;  %v1215_v60 = vsel %vm8484_vm5, 0, %v1214_v37  ;;  %887 = vst [vmem:[#allocation2 + $0x208] sm:$0x1] %v886_v1  ;;  %1650 = vrot.lane.b32.xlu1 %v1609_v49, %s7976_s24  ;;  %v7699_v43 = vld [vmem:[#allocation7 + $0x90] sm:$0xff]   ;;  %v7700_v23 = vld [vmem:[#allocation7 + $0xd8] sm:$0xff]  }
  0xe5   : > { %v888_v18 = vld [vmem:[#allocation2 + $0x230] sm:$0x1]  ;;  %1213 = vst [vmem:[#allocation2 + $0x210] sm:$0x80] %v1212_v29  ;;  %1216 = vst [vmem:[#allocation2 + $0x238] sm:$0x80] %v1215_v60 }
  0xe6   : > { %v889_v53 = vsel %vm8572_vm10, 0, %v888_v18  ;;  %v891_v39 = vld [vmem:[#allocation2 + $0x258] sm:$0x1]  ;;  %v1217_v51 = vld [vmem:[#allocation2 + $0x260] sm:$0x80]  ;;  %6910 = vmatpush3.bf16.msra.mxu1 %v7697_v8  ;;  %v7691_v42 = vld [vmem:[#allocation7 + $0x108] sm:$0xff]  }
  0xe7   : > { %890 = vst [vmem:[#allocation2 + $0x230] sm:$0x1] %v889_v53  ;;  %v892_v9 = vsel %vm8572_vm10, 0, %v891_v39  ;;  %v1218_v12 = vsel %vm8484_vm5, 0, %v1217_v51  ;;  %6911 = vmatprep.subr.bf16.mxu1 %v7698_v63  ;;  %v7701_v22 = vld [vmem:[#allocation7 + $0x98] sm:$0xff]   ;;  %v1419_v1 = vld [vmem:[#allocation2 + $0x120] sm:$0xff] }
  0xe8   : > { %893 = vst [vmem:[#allocation2 + $0x258] sm:$0x1] %v892_v9  ;;  %1219 = vst [vmem:[#allocation2 + $0x260] sm:$0x80] %v1218_v12  ;;  %1652 = vrot.lane.b32.xlu1 %v1616_v40, %s7976_s24  ;;  %v1416_v10 = vld [vmem:[#allocation2 + $0xf8] sm:$0xff]  ;;  %v7692_v39 = vld [vmem:[#allocation7 + $0x110] sm:$0xff]  }
  0xe9   : > { %v7702_v40 = vld [vmem:[#allocation7 + $0xe0] sm:$0xff]   ;;  %v7783_v9 = vld [vmem:[#allocation2 + $0x38] sm:$0xff]  ;;  %v7707_v13 = vld [vmem:[#allocation7 + $0xb0] sm:$0xff]  }
  0xea   : > { %6912 = vmatpush3.bf16.msra.mxu1 %v7699_v43  ;;  %v1428_v43 = vld [vmem:[#allocation2 + $0x198] sm:$0xff] }
  0xeb   : > { %6913 = vmatprep.subr.bf16.mxu1 %v7700_v23 }
  0xec   : > { %1654 = vrot.lane.b32.xlu1 %v1623_v11, %s7976_s24  ;;  %v7703_v11 = vld [vmem:[#allocation7 + $0xa0] sm:$0xff]  }
  0xee   : > { %6914 = vmatpush3.bf16.msra.mxu1 %v7701_v22 }
  0xef   : > { %6915 = vmatprep.subr.bf16.mxu1 %v7702_v40 }
  0xf2   : > { %6916 = vmatpush3.bf16.msra.mxu1 %v7703_v11 }
  0xf9   : > { %v1353_v33 = vpop.permute.xlu1 %1352 }
  0xfa   : > { %v1405_v26 = vsel %vm8826_vm12, %v1353_v33, %v1404_v24  ;;  %v7704_v24 = vld [vmem:[#allocation7 + $0xe8] sm:$0xff]  }
  0xfb   : > { %1406 = vst [vmem:[#allocation2 + $0x58] sm:$0xff] %v1405_v26  ;;  %v1422_v33 = vld [vmem:[#allocation2 + $0x148] sm:$0xff]  ;;  %6917 = vmatprep.subr.bf16.mxu1 %v7704_v24 }
  0xfd   : > { %v1349_v54 = vpop.permute.xlu0 %1348  ;;  %v925_v47 = vpop.permute.xlu1 %924 }
  0xfe   : > { %v1399_v45 = vsel %vm8826_vm12, %v1349_v54, %v1398_v52  ;;  %970 = vst.msk [vmem:[#allocation2 + $0x28] sm:$0xff] %vm969_vm11, %v925_v47  ;;  %v7695_v52 = vld [vmem:[#allocation7 + $0x118] sm:$0xff]  }
  0xff   : > { %1400 = vst [vmem:[#allocation2 + $0x8] sm:$0xff] %v1399_v45 }
 0x101   : > { %v1351_v61 = vpop.permute.xlu0 %1350  ;;  %v927_v59 = vpop.permute.xlu1 %926 }
 0x102   : > { %v1402_v48 = vsel %vm8826_vm12, %v1351_v61, %v1401_v25  ;;  %v1454_v46 = vld [vmem:[#allocation2 + $0x58] sm:$0x1]  ;;  %971 = vst.msk [vmem:[#allocation2 + $0x50] sm:$0xff] %vm969_vm11, %v927_v59 }
 0x103   : > { %1403 = vst [vmem:[#allocation2 + $0x30] sm:$0xff] %v1402_v48  ;;  %v1455_v19 = vsel %vm8833_vm14, 0, %v1454_v46 }
 0x104   : > { %1456 = vst [vmem:[#allocation2 + $0x58] sm:$0x1] %v1455_v19 }
 0x105   : > { %v1355_v0 = vpop.permute.xlu0 %1354  ;;  %v929_v6 = vpop.permute.xlu1 %928  ;;  %v2325_v47 = vld [vmem:[#allocation2 + $0x28] sm:$0xff] }
 0x106   : > { %v1448_v41 = vld [vmem:[#allocation2 + $0x8] sm:$0x1]  ;;  %v1408_v17 = vsel %vm8826_vm12, %v1355_v0, %v1407_v4  ;;  %972 = vst.msk [vmem:[#allocation2 + $0x78] sm:$0xff] %vm969_vm11, %v929_v6  ;;  %v7706_v4 = vld [vmem:[#allocation7 + $0xf0] sm:$0xff]  }
 0x107   : > { %v1449_v30 = vsel %vm8833_vm14, 0, %v1448_v41  ;;  %1409 = vst [vmem:[#allocation2 + $0x80] sm:$0xff] %v1408_v17  ;;  %v7708_v41 = vld [vmem:[#allocation7 + $0xf8] sm:$0xff]  }
 0x108   : > { %1450 = vst [vmem:[#allocation2 + $0x8] sm:$0x1] %v1449_v30  ;;  %v1425_v30 = vld [vmem:[#allocation2 + $0x170] sm:$0xff] }
 0x109   : > { %v1357_v44 = vpop.permute.xlu0 %1356 }
 0x10a   : > { %v1451_v32 = vld [vmem:[#allocation2 + $0x30] sm:$0x1]  ;;  %v1411_v5 = vsel %vm8826_vm12, %v1357_v44, %v1410_v2  ;;  %v931_v7 = vpop.permute.xlu1 %930  ;;  %v7709_v2 = vld [vmem:[#allocation7 + $0xb8] sm:$0xff]   ;;  %v7784_v44 = vld [vmem:[#allocation2 + $0x60] sm:$0xff] }
 0x10b   : > { %v1452_v21 = vsel %vm8833_vm14, 0, %v1451_v32  ;;  %1412 = vst [vmem:[#allocation2 + $0xa8] sm:$0xff] %v1411_v5  ;;  %973 = vst.msk [vmem:[#allocation2 + $0xa0] sm:$0xff] %vm969_vm11, %v931_v7  ;;  %v2331_v59 = vld [vmem:[#allocation2 + $0x58] sm:$0xff] }
 0x10c   : > { %1453 = vst [vmem:[#allocation2 + $0x30] sm:$0x1] %v1452_v21  ;;  %v7785_v21 = vld [vmem:[#allocation2 + $0x88] sm:$0xff] }
 0x10d   : > { %v1359_v62 = vpop.permute.xlu0 %1358  ;;  %v2335_v40 = vld [vmem:[#allocation2 + $0x78] sm:$0xff] }
 0x10e   : > { %v1457_v27 = vld [vmem:[#allocation2 + $0x80] sm:$0x1]  ;;  %v1414_v49 = vsel %vm8826_vm12, %v1359_v62, %v1413_v15  ;;  %v933_v36 = vpop.permute.xlu1 %932 }
 0x10f   : > { %v1458_v16 = vsel %vm8833_vm14, 0, %v1457_v27  ;;  %1415 = vst [vmem:[#allocation2 + $0xd0] sm:$0xff] %v1414_v49  ;;  %v2321_v56 = vld [vmem:[#allocation2 + $0x8] sm:$0xff]  ;;  %974 = vst.msk [vmem:[#allocation2 + $0xc8] sm:$0xff] %vm969_vm11, %v933_v36 }
 0x110   : > { %1459 = vst [vmem:[#allocation2 + $0x80] sm:$0x1] %v1458_v16  ;;  %2775 = vmatprep.mubr.bf16.mxu0 %v2321_v56 }
 0x111   : > { %2776 = vmatmul.mubr.bf16.vlgmr.msra.gmra.mrb[0].mxu0 %v2320_v50  ;;  %v1361_v37 = vpop.permute.xlu0 %1360  ;;  %v2330_v50 = vld [vmem:[#allocation2 + $0x50] sm:$0xff] }
 0x112   : > { %v1460_v60 = vld [vmem:[#allocation2 + $0xa8] sm:$0x1]  ;;  %v1417_v18 = vsel %vm8826_vm12, %v1361_v37, %v1416_v10  ;;  %v1627_v53 = vpop.permute.xlu1 %1626  ;;  %7512 = vmatpush3.bf16.msra.mxu0 %v8672_v34 }
 0x113   : > { %v1461_v38 = vsel %vm8833_vm14, 0, %v1460_v60  ;;  %1418 = vst [vmem:[#allocation2 + $0xf8] sm:$0xff] %v1417_v18  ;;  %v2326_v51 = vld [vmem:[#allocation2 + $0x30] sm:$0xff]  ;;  %v1676_v12 = vsel %vm8857_vm15, %v1627_v53, %v7783_v9  ;;  %7513 = vmatprep.subr.bf16.mxu0 %v7691_v42  ;;  %v7705_v34 = vld [vmem:[#allocation7 + $0xa8] sm:$0xff]   ;;  %v2226_v60 = vld [vmem:[#allocation2 + $0x20] sm:$0xff] }
 0x114   : > { %1462 = vst [vmem:[#allocation2 + $0xa8] sm:$0x1] %v1461_v38  ;;  %2783 = vmatprep.mubr.bf16.mxu0 %v2326_v51  ;;  %1677 = vst [vmem:[#allocation2 + $0x38] sm:$0xff] %v1676_v12  ;;  %6918 = vmatpush3.bf16.msra.mxu1 %v7705_v34  ;;  %v1905_v18 = vld [vmem:[#allocation2 + $0x18] sm:$0xff] }
 0x115   : > { %v1363_v26 = vpop.permute.xlu0 %1362  ;;  %6919 = vmatprep.subr.bf16.mxu1 %v7706_v4 }
 0x116   : > { %v1463_v54 = vld [vmem:[#allocation2 + $0xd0] sm:$0x1]  ;;  %v1420_v25 = vsel %vm8826_vm12, %v1363_v26, %v1419_v1  ;;  %v1365_v45 = vpop.permute.xlu1 %1364  ;;  %7514 = vmatpush3.bf16.msra.mxu0 %v7691_v42 }
 0x117   : > { %v1464_v61 = vsel %vm8833_vm14, 0, %v1463_v54  ;;  %1421 = vst [vmem:[#allocation2 + $0x120] sm:$0xff] %v1420_v25  ;;  %v1423_v48 = vsel %vm8826_vm12, %v1365_v45, %v1422_v33  ;;  %7515 = vmatprep.subr.bf16.mxu0 %v7692_v39  ;;  %v2336_v62 = vld [vmem:[#allocation2 + $0x80] sm:$0xff]  ;;  %v7786_v26 = vld [vmem:[#allocation2 + $0xb0] sm:$0xff] }
 0x118   : > { %1465 = vst [vmem:[#allocation2 + $0xd0] sm:$0x1] %v1464_v61  ;;  %1424 = vst [vmem:[#allocation2 + $0x148] sm:$0xff] %v1423_v48  ;;  %6920 = vmatpush3.bf16.msra.mxu1 %v7707_v13  ;;  %v7787_v61 = vld [vmem:[#allocation2 + $0xd8] sm:$0xff] }
 0x119   : > { %v935_v28 = vpop.permute.xlu0 %934  ;;  %2784 = vmatmul.mubr.bf16.gmra.mrb[4].mxu0 %v2325_v47  ;;  %6921 = vmatprep.subr.bf16.mxu1 %v7708_v41  ;;  %v1431_v47 = vld [vmem:[#allocation2 + $0x1c0] sm:$0xff] }
 0x11a   : > { %v1466_v55 = vld [vmem:[#allocation2 + $0xf8] sm:$0x1]  ;;  %975 = vst.msk [vmem:[#allocation2 + $0xf0] sm:$0xff] %vm969_vm11, %v935_v28  ;;  %2791 = vmatprep.mubr.bf16.mxu0 %v2331_v59  ;;  %v937_v46 = vpop.permute.xlu1 %936  ;;  %7516 = vmatpush3.bf16.msra.mxu0 %v7692_v39 }
 0x11b   : > { %v1467_v19 = vsel %vm8833_vm14, 0, %v1466_v55  ;;  %v1725_v0 = vld [vmem:[#allocation2 + $0x38] sm:$0x80]  ;;  %976 = vst.msk [vmem:[#allocation2 + $0x118] sm:$0xff] %vm969_vm11, %v937_v46  ;;  %7517 = vmatprep.subr.bf16.mxu0 %v7695_v52  ;;  %v2341_v12 = vld [vmem:[#allocation2 + $0xa8] sm:$0xff] }
 0x11c   : > { %1468 = vst [vmem:[#allocation2 + $0xf8] sm:$0x1] %v1467_v19  ;;  %v1726_v17 = vsel %vm8867_vm7, 0, %v1725_v0  ;;  %6922 = vmatpush3.bf16.msra.mxu1 %v7709_v2  ;;  %v1434_v46 = vld [vmem:[#allocation2 + $0x1e8] sm:$0xff] }
 0x11d   : > { %1727 = vst [vmem:[#allocation2 + $0x38] sm:$0x80] %v1726_v17  ;;  %v1629_v6 = vpop.permute.xlu0 %1628  ;;  %v2340_v17 = vld [vmem:[#allocation2 + $0xa0] sm:$0xff] }
 0x11e   : > { %v1469_v8 = vld [vmem:[#allocation2 + $0x120] sm:$0x1]  ;;  %v1679_v32 = vsel %vm8857_vm15, %v1629_v6, %v7784_v44  ;;  %v1631_v5 = vpop.permute.xlu1 %1630  ;;  %7518 = vmatpush3.bf16.msra.mxu0 %v7695_v52 }
 0x11f   : > { %v1470_v7 = vsel %vm8833_vm14, 0, %v1469_v8  ;;  %v1472_v63 = vld [vmem:[#allocation2 + $0x148] sm:$0x1]  ;;  %1680 = vst [vmem:[#allocation2 + $0x60] sm:$0xff] %v1679_v32  ;;  %v1682_v15 = vsel %vm8857_vm15, %v1631_v5, %v7785_v21  ;;  %v2346_v2 = vld [vmem:[#allocation2 + $0xd0] sm:$0xff] }
 0x120   : > { %1471 = vst [vmem:[#allocation2 + $0x120] sm:$0x1] %v1470_v7  ;;  %v1473_v23 = vsel %vm8833_vm14, 0, %v1472_v63  ;;  %1683 = vst [vmem:[#allocation2 + $0x88] sm:$0xff] %v1682_v15  ;;  %v2229_v32 = vld [vmem:[#allocation2 + $0x48] sm:$0xff] }
 0x121   : > { %1474 = vst [vmem:[#allocation2 + $0x148] sm:$0x1] %v1473_v23  ;;  %v1367_v22 = vpop.permute.xlu0 %1366  ;;  %2792 = vmatmul.mubr.bf16.gmra.mrb[8].mxu0 %v2330_v50 }
 0x122   : > { %v1426_v42 = vsel %vm8826_vm12, %v1367_v22, %v1425_v30  ;;  %2799 = vmatprep.mubr.bf16.mxu0 %v2336_v62  ;;  %v1369_v27 = vpop.permute.xlu1 %1368  ;;  %v2232_v62 = vld [vmem:[#allocation2 + $0x70] sm:$0xff] }
 0x123   : > { %1427 = vst [vmem:[#allocation2 + $0x170] sm:$0xff] %v1426_v42  ;;  %v1429_v49 = vsel %vm8826_vm12, %v1369_v27, %v1428_v43  ;;  %v1908_v42 = vld [vmem:[#allocation2 + $0x40] sm:$0xff] }
 0x124   : > { %1430 = vst [vmem:[#allocation2 + $0x198] sm:$0xff] %v1429_v49  ;;  %v2000_v10 = vld [vmem:[#allocation2 + $0x38] sm:$0xff] }
 0x125   : > { %v939_v36 = vpop.permute.xlu0 %938  ;;  %2030 = vrot.lane.b32.xlu0 %v2000_v10, %s7976_s24  ;;  %v2107_v16 = vshrl.u32 %v2000_v10, 16  ;;  %v2109_v56 = vshll.u32 %v2000_v10, 16 }
 0x126   : > { %v1728_v37 = vld [vmem:[#allocation2 + $0x60] sm:$0x80]  ;;  %977 = vst.msk [vmem:[#allocation2 + $0x140] sm:$0xff] %vm969_vm11, %v939_v36  ;;  %v941_v1 = vpop.permute.xlu1 %940 }
 0x127   : > { %v1729_v53 = vsel %vm8867_vm7, 0, %v1728_v37  ;;  %v1731_v39 = vld [vmem:[#allocation2 + $0x88] sm:$0x80]  ;;  %978 = vst.msk [vmem:[#allocation2 + $0x168] sm:$0xff] %vm969_vm11, %v941_v1  ;;  %v2111_v38 = vrot.slane %v2109_v56, 1  ;;  %v1788_v51 = vrot.slane %v2107_v16, 7 }
 0x128   : > { %1730 = vst [vmem:[#allocation2 + $0x60] sm:$0x80] %v1729_v53  ;;  %v1732_v9 = vsel %vm8867_vm7, 0, %v1731_v39  ;;  %v1437_v1 = vld [vmem:[#allocation2 + $0x210] sm:$0xff]  ;;  %v2361_v14 = vld [vmem:[#allocation2 + $0x148] sm:$0xff] }
 0x129   : > { %1733 = vst [vmem:[#allocation2 + $0x88] sm:$0x80] %v1732_v9  ;;  %v1633_v11 = vpop.permute.xlu0 %1632  ;;  %2800 = vmatmul.mubr.bf16.gmra.mrb[12].mxu0 %v2335_v40  ;;  %v2112_v24 = vor.u32 %v2111_v38, %v2107_v16  ;;  %v1791_v33 = vor.u32 %v2109_v56, %v1788_v51  ;;  %v1911_v56 = vld [vmem:[#allocation2 + $0x68] sm:$0xff]  ;;  %v7788_v40 = vld [vmem:[#allocation2 + $0x100] sm:$0xff] }
 0x12a   : > { %v1475_v34 = vld [vmem:[#allocation2 + $0x170] sm:$0x1]  ;;  %v1685_v52 = vsel %vm8857_vm15, %v1633_v11, %v7786_v26  ;;  %2807 = vmatprep.mubr.bf16.mxu0 %v2341_v12  ;;  %v1635_v54 = vpop.permute.xlu1 %1634  ;;  %v1440_v26 = vld [vmem:[#allocation2 + $0x238] sm:$0xff] }
 0x12b   : > { %v1476_v25 = vsel %vm8833_vm14, 0, %v1475_v34  ;;  %v1478_v45 = vld [vmem:[#allocation2 + $0x198] sm:$0x1]  ;;  %1686 = vst [vmem:[#allocation2 + $0xb0] sm:$0xff] %v1685_v52  ;;  %v1688_v48 = vsel %vm8857_vm15, %v1635_v54, %v7787_v61  ;;  %v2227_v59 = vsel %vm8473_vm4, %v2112_v24, %v2226_v60  ;;  %v1906_v28 = vsel %vm8558_vm9, %v1791_v33, %v1905_v18  ;;  %v7789_v33 = vld [vmem:[#allocation2 + $0x128] sm:$0xff] }
 0x12c   : > { %1477 = vst [vmem:[#allocation2 + $0x170] sm:$0x1] %v1476_v25  ;;  %v1479_v55 = vsel %vm8833_vm14, 0, %v1478_v45  ;;  %1689 = vst [vmem:[#allocation2 + $0xd8] sm:$0xff] %v1688_v48  ;;  %v2345_v45 = vld [vmem:[#allocation2 + $0xc8] sm:$0xff]  ;;  %v2351_v48 = vld [vmem:[#allocation2 + $0xf8] sm:$0xff] }
 0x12d   : > { %2228 = vst [vmem:[#allocation2 + $0x20] sm:$0xff] %v2227_v59  ;;  %1907 = vst [vmem:[#allocation2 + $0x18] sm:$0xff] %v1906_v28  ;;  %v1371_v4 = vpop.permute.xlu0 %1370  ;;  %v2360_v58 = vld [vmem:[#allocation2 + $0x140] sm:$0xff] }
 0x12e   : > { %1480 = vst [vmem:[#allocation2 + $0x198] sm:$0x1] %v1479_v55  ;;  %v1432_v13 = vsel %vm8826_vm12, %v1371_v4, %v1431_v47  ;;  %v1373_v19 = vpop.permute.xlu1 %1372 }
 0x12f   : > { %1433 = vst [vmem:[#allocation2 + $0x1c0] sm:$0xff] %v1432_v13  ;;  %v2001_v0 = vld [vmem:[#allocation2 + $0x60] sm:$0xff]  ;;  %v1435_v41 = vsel %vm8826_vm12, %v1373_v19, %v1434_v46 }
 0x130   : > { %2032 = vrot.lane.b32.xlu0 %v2001_v0, %s7976_s24  ;;  %1436 = vst [vmem:[#allocation2 + $0x1e8] sm:$0xff] %v1435_v41  ;;  %v2002_v6 = vld [vmem:[#allocation2 + $0x88] sm:$0xff]  ;;  %v2114_v30 = vshrl.u32 %v2001_v0, 16  ;;  %v2116_v8 = vshll.u32 %v2001_v0, 16 }
 0x131   : > { %v943_v44 = vpop.permute.xlu0 %942  ;;  %2808 = vmatmul.mubr.bf16.gmra.mrb[16].mxu0 %v2340_v17  ;;  %v2121_v5 = vshrl.u32 %v2002_v6, 16  ;;  %v2123_v7 = vshll.u32 %v2002_v6, 16  ;;  %v2235_v17 = vld [vmem:[#allocation2 + $0x98] sm:$0xff] }
 0x132   : > { %v1734_v63 = vld [vmem:[#allocation2 + $0xb0] sm:$0x80]  ;;  %979 = vst.msk [vmem:[#allocation2 + $0x190] sm:$0xff] %vm969_vm11, %v943_v44  ;;  %2815 = vmatprep.mubr.bf16.mxu0 %v2346_v2  ;;  %v945_v21 = vpop.permute.xlu1 %944  ;;  %v2118_v15 = vrot.slane %v2116_v8, 1  ;;  %v1795_v43 = vrot.slane %v2114_v30, 7 }
 0x133   : > { %v1735_v23 = vsel %vm8867_vm7, 0, %v1734_v63  ;;  %v1737_v50 = vld [vmem:[#allocation2 + $0xd8] sm:$0x80]  ;;  %980 = vst.msk [vmem:[#allocation2 + $0x1b8] sm:$0xff] %vm969_vm11, %v945_v21  ;;  %v2125_v36 = vrot.slane %v2123_v7, 1  ;;  %v1802_v53 = vrot.slane %v2121_v5, 7 }
 0x134   : > { %v2272_v22 = vld [vmem:[#allocation2 + $0x20] sm:$0x80]  ;;  %1736 = vst [vmem:[#allocation2 + $0xb0] sm:$0x80] %v1735_v23  ;;  %v1738_v27 = vsel %vm8867_vm7, 0, %v1737_v50  ;;  %2034 = vrot.lane.b32.xlu0 %v2002_v6, %s7976_s24  ;;  %v2119_v10 = vor.u32 %v2118_v15, %v2114_v30  ;;  %v1798_v18 = vor.u32 %v2116_v8, %v1795_v43  ;;  %v1914_v23 = vld [vmem:[#allocation2 + $0x90] sm:$0xff] }
 0x135   : > { %v2273_v49 = vsel %vm8484_vm5, 0, %v2272_v22  ;;  %v1952_v16 = vld [vmem:[#allocation2 + $0x18] sm:$0x1]  ;;  %1739 = vst [vmem:[#allocation2 + $0xd8] sm:$0x80] %v1738_v27  ;;  %v1637_v37 = vpop.permute.xlu0 %1636  ;;  %v2126_v12 = vor.u32 %v2125_v36, %v2121_v5  ;;  %v1805_v54 = vor.u32 %v2123_v7, %v1802_v53  ;;  %v2238_v5 = vld [vmem:[#allocation2 + $0xc0] sm:$0xff] }
 0x136   : > { %2274 = vst [vmem:[#allocation2 + $0x20] sm:$0x80] %v2273_v49  ;;  %v1953_v60 = vsel %vm8572_vm10, 0, %v1952_v16  ;;  %v1481_v39 = vld [vmem:[#allocation2 + $0x1c0] sm:$0x1]  ;;  %v1691_v38 = vsel %vm8857_vm15, %v1637_v37, %v7788_v40  ;;  %v1639_v51 = vpop.permute.xlu1 %1638  ;;  %v2230_v9 = vsel %vm8473_vm4, %v2119_v10, %v2229_v32  ;;  %v1909_v52 = vsel %vm8558_vm9, %v1798_v18, %v1908_v42  ;;  %v2350_v22 = vld [vmem:[#allocation2 + $0xf0] sm:$0xff] }
 0x137   : > { %1954 = vst [vmem:[#allocation2 + $0x18] sm:$0x1] %v1953_v60  ;;  %v1482_v11 = vsel %vm8833_vm14, 0, %v1481_v39  ;;  %v1484_v24 = vld [vmem:[#allocation2 + $0x1e8] sm:$0x1]  ;;  %1692 = vst [vmem:[#allocation2 + $0x100] sm:$0xff] %v1691_v38  ;;  %v1694_v34 = vsel %vm8857_vm15, %v1639_v51, %v7789_v33  ;;  %v2233_v47 = vsel %vm8473_vm4, %v2126_v12, %v2232_v62  ;;  %v1912_v59 = vsel %vm8558_vm9, %v1805_v54, %v1911_v56 }
 0x138   : > { %2231 = vst [vmem:[#allocation2 + $0x48] sm:$0xff] %v2230_v9  ;;  %1483 = vst [vmem:[#allocation2 + $0x1c0] sm:$0x1] %v1482_v11  ;;  %v1485_v25 = vsel %vm8833_vm14, 0, %v1484_v24  ;;  %v2356_v36 = vld [vmem:[#allocation2 + $0x120] sm:$0xff]  ;;  %v7790_v53 = vld [vmem:[#allocation2 + $0x150] sm:$0xff] }
 0x139   : > { %1695 = vst [vmem:[#allocation2 + $0x128] sm:$0xff] %v1694_v34  ;;  %1910 = vst [vmem:[#allocation2 + $0x40] sm:$0xff] %v1909_v52  ;;  %v1375_v61 = vpop.permute.xlu0 %1374  ;;  %2816 = vmatmul.mubr.bf16.gmra.mrb[20].mxu0 %v2345_v45  ;;  %v1917_v12 = vld [vmem:[#allocation2 + $0xb8] sm:$0xff]  ;;  %v1443_v33 = vld [vmem:[#allocation2 + $0x260] sm:$0xff] }
 0x13a   : > { %1486 = vst [vmem:[#allocation2 + $0x1e8] sm:$0x1] %v1485_v25  ;;  %2234 = vst [vmem:[#allocation2 + $0x70] sm:$0xff] %v2233_v47  ;;  %v1438_v28 = vsel %vm8826_vm12, %v1375_v61, %v1437_v1  ;;  %2823 = vmatprep.mubr.bf16.mxu0 %v2351_v48  ;;  %v1377_v55 = vpop.permute.xlu1 %1376  ;;  %v7791_v34 = vld [vmem:[#allocation2 + $0x178] sm:$0xff] }
 0x13b   : > { %1913 = vst [vmem:[#allocation2 + $0x68] sm:$0xff] %v1912_v59  ;;  %1439 = vst [vmem:[#allocation2 + $0x210] sm:$0xff] %v1438_v28  ;;  %v2003_v46 = vld [vmem:[#allocation2 + $0xb0] sm:$0xff]  ;;  %v1441_v4 = vsel %vm8826_vm12, %v1377_v55, %v1440_v26 }
 0x13c   : > { %2036 = vrot.lane.b32.xlu0 %v2003_v46, %s7976_s24  ;;  %1442 = vst [vmem:[#allocation2 + $0x238] sm:$0xff] %v1441_v4  ;;  %v2004_v13 = vld [vmem:[#allocation2 + $0xd8] sm:$0xff]  ;;  %v2128_v19 = vshrl.u32 %v2003_v46, 16  ;;  %v2130_v0 = vshll.u32 %v2003_v46, 16  ;;  %v7792_v28 = vld [vmem:[#allocation2 + $0x10] sm:$0xff] }
 0x13d   : > { %v947_v41 = vpop.permute.xlu0 %946  ;;  %v2135_v2 = vshrl.u32 %v2004_v13, 16  ;;  %v2137_v6 = vshll.u32 %v2004_v13, 16  ;;  %v2355_v46 = vld [vmem:[#allocation2 + $0x118] sm:$0xff] }
 0x13e   : > { %v1740_v30 = vld [vmem:[#allocation2 + $0x100] sm:$0x80]  ;;  %981 = vst.msk [vmem:[#allocation2 + $0x1e0] sm:$0xff] %vm969_vm11, %v947_v41  ;;  %v949_v8 = vpop.permute.xlu1 %948  ;;  %v2132_v32 = vrot.slane %v2130_v0, 1  ;;  %v1809_v7 = vrot.slane %v2128_v19, 7  ;;  %v2241_v41 = vld [vmem:[#allocation2 + $0xe8] sm:$0xff] }
 0x13f   : > { %v2275_v44 = vld [vmem:[#allocation2 + $0x48] sm:$0x80]  ;;  %v1741_v63 = vsel %vm8867_vm7, 0, %v1740_v30  ;;  %982 = vst.msk [vmem:[#allocation2 + $0x208] sm:$0xff] %vm969_vm11, %v949_v8  ;;  %v2139_v43 = vrot.slane %v2137_v6, 1  ;;  %v1816_v60 = vrot.slane %v2135_v2, 7 }
 0x140   : > { %v1743_v21 = vld [vmem:[#allocation2 + $0x128] sm:$0x80]  ;;  %v2276_v15 = vsel %vm8484_vm5, 0, %v2275_v44  ;;  %1742 = vst [vmem:[#allocation2 + $0x100] sm:$0x80] %v1741_v63  ;;  %2038 = vrot.lane.b32.xlu0 %v2004_v13, %s7976_s24  ;;  %v2133_v42 = vor.u32 %v2132_v32, %v2128_v19  ;;  %v1812_v49 = vor.u32 %v2130_v0, %v1809_v7 }
 0x141   : > { %v1744_v50 = vsel %vm8867_vm7, 0, %v1743_v21  ;;  %2277 = vst [vmem:[#allocation2 + $0x48] sm:$0x80] %v2276_v15  ;;  %v2278_v62 = vld [vmem:[#allocation2 + $0x70] sm:$0x80]  ;;  %v1641_v10 = vpop.permute.xlu0 %1640  ;;  %2824 = vmatmul.mubr.bf16.gmra.mrb[24].mxu0 %v2350_v22  ;;  %v2140_v56 = vor.u32 %v2139_v43, %v2135_v2  ;;  %v1819_v54 = vor.u32 %v2137_v6, %v1816_v60  ;;  %v1920_v15 = vld [vmem:[#allocation2 + $0xe0] sm:$0xff] }
 0x142   : > { %v1955_v27 = vld [vmem:[#allocation2 + $0x40] sm:$0x1]  ;;  %1745 = vst [vmem:[#allocation2 + $0x128] sm:$0x80] %v1744_v50  ;;  %v2279_v16 = vsel %vm8484_vm5, 0, %v2278_v62  ;;  %v1697_v39 = vsel %vm8857_vm15, %v1641_v10, %v7790_v53  ;;  %2831 = vmatprep.mubr.bf16.mxu0 %v2356_v36  ;;  %v1643_v40 = vpop.permute.xlu1 %1642  ;;  %v2236_v38 = vsel %vm8473_vm4, %v2133_v42, %v2235_v17  ;;  %v1915_v9 = vsel %vm8558_vm9, %v1812_v49, %v1914_v23  ;;  %v2244_v22 = vld [vmem:[#allocation2 + $0x110] sm:$0xff] }
 0x143   : > { %v1956_v37 = vsel %vm8572_vm10, 0, %v1955_v27  ;;  %v1958_v1 = vld [vmem:[#allocation2 + $0x68] sm:$0x1]  ;;  %v1487_v18 = vld [vmem:[#allocation2 + $0x210] sm:$0x1]  ;;  %1698 = vst [vmem:[#allocation2 + $0x150] sm:$0xff] %v1697_v39  ;;  %v1700_v26 = vsel %vm8857_vm15, %v1643_v40, %v7791_v34  ;;  %v2239_v52 = vsel %vm8473_vm4, %v2140_v56, %v2238_v5  ;;  %v1918_v47 = vsel %vm8558_vm9, %v1819_v54, %v1917_v12 }
 0x144   : > { %2280 = vst [vmem:[#allocation2 + $0x70] sm:$0x80] %v2279_v16  ;;  %1957 = vst [vmem:[#allocation2 + $0x40] sm:$0x1] %v1956_v37  ;;  %v1959_v51 = vsel %vm8572_vm10, 0, %v1958_v1  ;;  %v1488_v11 = vsel %vm8833_vm14, 0, %v1487_v18 }
 0x145   : > { %v1490_v24 = vld [vmem:[#allocation2 + $0x238] sm:$0x1]  ;;  %2237 = vst [vmem:[#allocation2 + $0x98] sm:$0xff] %v2236_v38  ;;  %1960 = vst [vmem:[#allocation2 + $0x68] sm:$0x1] %v1959_v51  ;;  %v1379_v45 = vpop.permute.xlu0 %1378  ;;  %v7793_v1 = vld [vmem:[#allocation2 + $0x1a0] sm:$0xff] }
 0x146   : > { %1916 = vst [vmem:[#allocation2 + $0x90] sm:$0xff] %v1915_v9  ;;  %1489 = vst [vmem:[#allocation2 + $0x210] sm:$0x1] %v1488_v11  ;;  %v1491_v25 = vsel %vm8833_vm14, 0, %v1490_v24  ;;  %v1444_v61 = vsel %vm8826_vm12, %v1379_v45, %v1443_v33  ;;  %v1625_v48 = vpop.permute.xlu1 %1624  ;;  %v1923_v38 = vld [vmem:[#allocation2 + $0x108] sm:$0xff]  ;;  %v7795_v45 = vld [vmem:[#allocation2 + $0x1f0] sm:$0xff] }
 0x147   : > { %1701 = vst [vmem:[#allocation2 + $0x178] sm:$0xff] %v1700_v26  ;;  %2240 = vst [vmem:[#allocation2 + $0xc0] sm:$0xff] %v2239_v52  ;;  %v2005_v59 = vld [vmem:[#allocation2 + $0x100] sm:$0xff]  ;;  %v1673_v55 = vsel %vm8857_vm15, %v1625_v48, %v7792_v28  ;;  %v7794_v12 = vld [vmem:[#allocation2 + $0x1c8] sm:$0xff] }
 0x148   : > { %1492 = vst [vmem:[#allocation2 + $0x238] sm:$0x1] %v1491_v25  ;;  %1919 = vst [vmem:[#allocation2 + $0xb8] sm:$0xff] %v1918_v47  ;;  %2040 = vrot.lane.b32.xlu0 %v2005_v59, %s7976_s24  ;;  %v2142_v13 = vshrl.u32 %v2005_v59, 16  ;;  %v2144_v19 = vshll.u32 %v2005_v59, 16  ;;  %v2366_v26 = vld [vmem:[#allocation2 + $0x170] sm:$0xff] }
 0x149   : > { %1445 = vst [vmem:[#allocation2 + $0x260] sm:$0xff] %v1444_v61  ;;  %1674 = vst [vmem:[#allocation2 + $0x10] sm:$0xff] %v1673_v55  ;;  %v8994_v4 = vld [vmem:[#allocation2 + $0x128] sm:$0xff]  ;;  %v951_v0 = vpop.permute.xlu0 %950  ;;  %2832 = vmatmul.mubr.bf16.gmra.mrb[28].mxu0 %v2355_v46  ;;  %v2247_v28 = vld [vmem:[#allocation2 + $0x138] sm:$0xff] }
 0x14a   : > { %2042 = vrot.lane.b32.xlu1 %v8994_v4, %s7976_s24  ;;  %v2149_v17 = vshrl.u32 %v8994_v4, 16  ;;  %v2151_v2 = vshll.u32 %v8994_v4, 16  ;;  %v1746_v6 = vld [vmem:[#allocation2 + $0x150] sm:$0x80]  ;;  %983 = vst.msk [vmem:[#allocation2 + $0x230] sm:$0xff] %vm969_vm11, %v951_v0  ;;  %2839 = vmatprep.mubr.bf16.mxu0 %v2361_v14  ;;  %v953_v30 = vpop.permute.xlu1 %952  ;;  %v2146_v44 = vrot.slane %v2144_v19, 1 }
 0x14b   : > { %v1823_v32 = vrot.slane %v2142_v13, 7  ;;  %v1747_v5 = vsel %vm8867_vm7, 0, %v1746_v6  ;;  %984 = vst.msk [vmem:[#allocation2 + $0x258] sm:$0xff] %vm969_vm11, %v953_v30  ;;  %v7796_v30 = vld [vmem:[#allocation2 + $0x218] sm:$0xff] }
 0x14c   : > { %v2281_v8 = vld [vmem:[#allocation2 + $0x98] sm:$0x80]  ;;  %v2153_v21 = vrot.slane %v2151_v2, 1  ;;  %1748 = vst [vmem:[#allocation2 + $0x150] sm:$0x80] %v1747_v5  ;;  %v2147_v50 = vor.u32 %v2146_v44, %v2142_v13  ;;  %v1830_v56 = vrot.slane %v2149_v17, 7 }
 0x14d   : > { %v2282_v63 = vsel %vm8484_vm5, 0, %v2281_v8  ;;  %v1961_v62 = vld [vmem:[#allocation2 + $0x90] sm:$0x1]  ;;  %v1826_v42 = vor.u32 %v2144_v19, %v1823_v32  ;;  %v1645_v27 = vpop.permute.xlu0 %1644 }
 0x14e   : > { %v1749_v7 = vld [vmem:[#allocation2 + $0x178] sm:$0x80]  ;;  %2283 = vst [vmem:[#allocation2 + $0x98] sm:$0x80] %v2282_v63  ;;  %v2284_v23 = vld [vmem:[#allocation2 + $0xc0] sm:$0x80]  ;;  %v2154_v10 = vor.u32 %v2153_v21, %v2149_v17  ;;  %v1703_v60 = vsel %vm8857_vm15, %v1645_v27, %v7793_v1  ;;  %v1647_v18 = vpop.permute.xlu1 %1646  ;;  %v2242_v53 = vsel %vm8473_vm4, %v2147_v50, %v2241_v41  ;;  %v1833_v33 = vor.u32 %v2151_v2, %v1830_v56 }
 0x14f   : > { %v1750_v43 = vsel %vm8867_vm7, 0, %v1749_v7  ;;  %v2285_v49 = vsel %vm8484_vm5, 0, %v2284_v23  ;;  %v1962_v36 = vsel %vm8572_vm10, 0, %v1961_v62  ;;  %v1964_v16 = vld [vmem:[#allocation2 + $0xb8] sm:$0x1]  ;;  %v1921_v40 = vsel %vm8558_vm9, %v1826_v42, %v1920_v15  ;;  %1704 = vst [vmem:[#allocation2 + $0x1a0] sm:$0xff] %v1703_v60 }
 0x150   : > { %1751 = vst [vmem:[#allocation2 + $0x178] sm:$0x80] %v1750_v43  ;;  %v1493_v37 = vld [vmem:[#allocation2 + $0x260] sm:$0x1]  ;;  %2286 = vst [vmem:[#allocation2 + $0xc0] sm:$0x80] %v2285_v49  ;;  %v1706_v11 = vsel %vm8857_vm15, %v1647_v18, %v7794_v12  ;;  %v2245_v24 = vsel %vm8473_vm4, %v2154_v10, %v2244_v22  ;;  %v1924_v52 = vsel %vm8558_vm9, %v1833_v33, %v1923_v38 }
 0x151   : > { %1963 = vst [vmem:[#allocation2 + $0x90] sm:$0x1] %v1962_v36  ;;  %v1965_v39 = vsel %vm8572_vm10, 0, %v1964_v16  ;;  %v1494_v51 = vsel %vm8833_vm14, 0, %v1493_v37  ;;  %v1722_v9 = vld [vmem:[#allocation2 + $0x10] sm:$0x80]  ;;  %2840 = vmatmul.mubr.bf16.gmra.mrb[32].mxu0 %v2360_v58 }
 0x152   : > { %2243 = vst [vmem:[#allocation2 + $0xe8] sm:$0xff] %v2242_v53  ;;  %1966 = vst [vmem:[#allocation2 + $0xb8] sm:$0x1] %v1965_v39  ;;  %v1723_v34 = vsel %vm8867_vm7, 0, %v1722_v9  ;;  %2847 = vmatprep.mubr.bf16.mxu0 %v2366_v26  ;;  %v1649_v54 = vpop.permute.xlu1 %1648  ;;  %v2250_v41 = vld [vmem:[#allocation2 + $0x160] sm:$0xff]  ;;  %v1926_v5 = vld [vmem:[#allocation2 + $0x130] sm:$0xff] }
 0x153   : > { %1922 = vst [vmem:[#allocation2 + $0xe0] sm:$0xff] %v1921_v40  ;;  %1495 = vst [vmem:[#allocation2 + $0x260] sm:$0x1] %v1494_v51  ;;  %v2007_v25 = vld [vmem:[#allocation2 + $0x150] sm:$0xff]  ;;  %v1709_v47 = vsel %vm8857_vm15, %v1649_v54, %v7795_v45  ;;  %v2365_v63 = vld [vmem:[#allocation2 + $0x168] sm:$0xff] }
 0x154   : > { %1707 = vst [vmem:[#allocation2 + $0x1c8] sm:$0xff] %v1706_v11  ;;  %2246 = vst [vmem:[#allocation2 + $0x110] sm:$0xff] %v2245_v24  ;;  %2044 = vrot.lane.b32.xlu0 %v2007_v25, %s7976_s24  ;;  %v2156_v48 = vshrl.u32 %v2007_v25, 16  ;;  %v2158_v59 = vshll.u32 %v2007_v25, 16  ;;  %v2371_v50 = vld [vmem:[#allocation2 + $0x198] sm:$0xff]  ;;  %v7797_v60 = vld [vmem:[#allocation2 + $0x240] sm:$0xff] }
 0x155   : > { %1724 = vst [vmem:[#allocation2 + $0x10] sm:$0x80] %v1723_v34  ;;  %1925 = vst [vmem:[#allocation2 + $0x108] sm:$0xff] %v1924_v52  ;;  %v1929_v37 = vld [vmem:[#allocation2 + $0x158] sm:$0xff]  ;;  %v1717_v38 = vld [vmem:[#allocation2 + $0x268] sm:$0xff] }
 0x156   : > { %1710 = vst [vmem:[#allocation2 + $0x1f0] sm:$0xff] %v1709_v47  ;;  %v1752_v13 = vld [vmem:[#allocation2 + $0x1a0] sm:$0x80]  ;;  %v1651_v19 = vpop.permute.xlu1 %1650  ;;  %v2160_v14 = vrot.slane %v2158_v59, 1  ;;  %v1837_v17 = vrot.slane %v2156_v48, 7  ;;  %v2370_v34 = vld [vmem:[#allocation2 + $0x190] sm:$0xff] }
 0x157   : > { %v2008_v61 = vld [vmem:[#allocation2 + $0x178] sm:$0xff]  ;;  %v1753_v2 = vsel %vm8867_vm7, 0, %v1752_v13  ;;  %v1712_v8 = vsel %vm8857_vm15, %v1651_v19, %v7796_v30  ;;  %v2376_v54 = vld [vmem:[#allocation2 + $0x1c0] sm:$0xff]  ;;  %v2253_v25 = vld [vmem:[#allocation2 + $0x188] sm:$0xff] }
 0x158   : > { %2046 = vrot.lane.b32.xlu1 %v2008_v61, %s7976_s24  ;;  %v2163_v55 = vshrl.u32 %v2008_v61, 16  ;;  %v2165_v46 = vshll.u32 %v2008_v61, 16  ;;  %1754 = vst [vmem:[#allocation2 + $0x1a0] sm:$0x80] %v1753_v2  ;;  %1713 = vst [vmem:[#allocation2 + $0x218] sm:$0xff] %v1712_v8  ;;  %v2161_v15 = vor.u32 %v2160_v14, %v2156_v48  ;;  %v1840_v23 = vor.u32 %v2158_v59, %v1837_v17  ;;  %v2256_v17 = vld [vmem:[#allocation2 + $0x1b0] sm:$0xff] }
 0x159   : > { %v2287_v0 = vld [vmem:[#allocation2 + $0xe8] sm:$0x80]  ;;  %2848 = vmatmul.mubr.bf16.gmra.mrb[36].mxu0 %v2365_v63  ;;  %v2339_v3 = vld [vmem:[#allocation2 + $0x98] sm:$0xff] }
 0x15a   : > { %v2288_v44 = vsel %vm8484_vm5, 0, %v2287_v0  ;;  %v2167_v32 = vrot.slane %v2165_v46, 1  ;;  %v1967_v43 = vld [vmem:[#allocation2 + $0xe0] sm:$0x1]  ;;  %v1844_v49 = vrot.slane %v2163_v55, 7  ;;  %2855 = vmatprep.mubr.bf16.mxu0 %v2371_v50  ;;  %v1653_v10 = vpop.permute.xlu1 %1652  ;;  %v2248_v36 = vsel %vm8473_vm4, %v2161_v15, %v2247_v28  ;;  %v2259_v50 = vld [vmem:[#allocation2 + $0x1d8] sm:$0xff] }
 0x15b   : > { %v1755_v6 = vld [vmem:[#allocation2 + $0x1c8] sm:$0x80]  ;;  %2289 = vst [vmem:[#allocation2 + $0xe8] sm:$0x80] %v2288_v44  ;;  %v2290_v21 = vld [vmem:[#allocation2 + $0x110] sm:$0x80]  ;;  %v1927_v56 = vsel %vm8558_vm9, %v1840_v23, %v1926_v5  ;;  %v1715_v18 = vsel %vm8857_vm15, %v1653_v10, %v7797_v60 }
 0x15c   : > { %v1756_v7 = vsel %vm8867_vm7, 0, %v1755_v6  ;;  %v2291_v22 = vsel %vm8484_vm5, 0, %v2290_v21  ;;  %v2168_v62 = vor.u32 %v2167_v32, %v2163_v55  ;;  %v1968_v42 = vsel %vm8572_vm10, 0, %v1967_v43  ;;  %v1970_v27 = vld [vmem:[#allocation2 + $0x108] sm:$0x1]  ;;  %2249 = vst [vmem:[#allocation2 + $0x138] sm:$0xff] %v2248_v36 }
 0x15d   : > { %1757 = vst [vmem:[#allocation2 + $0x1c8] sm:$0x80] %v1756_v7  ;;  %2292 = vst [vmem:[#allocation2 + $0x110] sm:$0x80] %v2291_v22  ;;  %v1971_v16 = vsel %vm8572_vm10, 0, %v1970_v27  ;;  %v1847_v39 = vor.u32 %v2165_v46, %v1844_v49  ;;  %v1932_v6 = vld [vmem:[#allocation2 + $0x180] sm:$0xff] }
 0x15e   : > { %1969 = vst [vmem:[#allocation2 + $0xe0] sm:$0x1] %v1968_v42  ;;  %v1758_v1 = vld [vmem:[#allocation2 + $0x1f0] sm:$0x80]  ;;  %v2251_v53 = vsel %vm8473_vm4, %v2168_v62, %v2250_v41  ;;  %1972 = vst [vmem:[#allocation2 + $0x108] sm:$0x1] %v1971_v16  ;;  %v1655_v9 = vpop.permute.xlu1 %1654 }
 0x15f   : > { %1928 = vst [vmem:[#allocation2 + $0x130] sm:$0xff] %v1927_v56  ;;  %v1759_v40 = vsel %vm8867_vm7, 0, %v1758_v1  ;;  %1716 = vst [vmem:[#allocation2 + $0x240] sm:$0xff] %v1715_v18  ;;  %v1930_v51 = vsel %vm8558_vm9, %v1847_v39, %v1929_v37  ;;  %v1761_v12 = vld [vmem:[#allocation2 + $0x218] sm:$0x80]  ;;  %v2009_v11 = vld [vmem:[#allocation2 + $0x1a0] sm:$0xff]  ;;  %v1718_v24 = vsel %vm8857_vm15, %v1655_v9, %v1717_v38 }
 0x160   : > { %2252 = vst [vmem:[#allocation2 + $0x160] sm:$0xff] %v2251_v53  ;;  %1760 = vst [vmem:[#allocation2 + $0x1f0] sm:$0x80] %v1759_v40  ;;  %v1762_v33 = vsel %vm8867_vm7, 0, %v1761_v12  ;;  %2048 = vrot.lane.b32.xlu0 %v2009_v11, %s7976_s24  ;;  %v2170_v26 = vshrl.u32 %v2009_v11, 16  ;;  %v2172_v52 = vshll.u32 %v2009_v11, 16 }
 0x161   : > { %1931 = vst [vmem:[#allocation2 + $0x158] sm:$0xff] %v1930_v51  ;;  %1719 = vst [vmem:[#allocation2 + $0x268] sm:$0xff] %v1718_v24  ;;  %2856 = vmatmul.mubr.bf16.gmra.mrb[40].mxu0 %v2370_v34  ;;  %v1935_v62 = vld [vmem:[#allocation2 + $0x1a8] sm:$0xff]  ;;  %v2375_v27 = vld [vmem:[#allocation2 + $0x1b8] sm:$0xff] }
 0x162   : > { %1763 = vst [vmem:[#allocation2 + $0x218] sm:$0x80] %v1762_v33  ;;  %2863 = vmatprep.mubr.bf16.mxu0 %v2376_v54  ;;  %v2174_v61 = vrot.slane %v2172_v52, 1  ;;  %v1851_v59 = vrot.slane %v2170_v26, 7  ;;  %v1938_v16 = vld [vmem:[#allocation2 + $0x1d0] sm:$0xff]  ;;  %v2381_v56 = vld [vmem:[#allocation2 + $0x1e8] sm:$0xff] }
 0x163   : > { %v2293_v31 = vld [vmem:[#allocation2 + $0x138] sm:$0x80]  ;;  %v2262_v9 = vld [vmem:[#allocation2 + $0x200] sm:$0xff]  ;;  %v2349_v57 = vld [vmem:[#allocation2 + $0xe8] sm:$0xff] }
 0x164   : > { %v2010_v58 = vld [vmem:[#allocation2 + $0x1c8] sm:$0xff]  ;;  %v2294_v55 = vsel %vm8484_vm5, 0, %v2293_v31  ;;  %v2175_v41 = vor.u32 %v2174_v61, %v2170_v26  ;;  %v1854_v5 = vor.u32 %v2172_v52, %v1851_v59  ;;  %v1941_v12 = vld [vmem:[#allocation2 + $0x1f8] sm:$0xff] }
 0x165   : > { %2050 = vrot.lane.b32.xlu1 %v2010_v58, %s7976_s24  ;;  %v2177_v45 = vshrl.u32 %v2010_v58, 16  ;;  %v2179_v47 = vshll.u32 %v2010_v58, 16  ;;  %2295 = vst [vmem:[#allocation2 + $0x138] sm:$0x80] %v2294_v55  ;;  %v2265_v26 = vld [vmem:[#allocation2 + $0x228] sm:$0xff] }
 0x166   : > { %v1973_v48 = vld [vmem:[#allocation2 + $0x130] sm:$0x1]  ;;  %v1764_v28 = vld [vmem:[#allocation2 + $0x240] sm:$0x80]  ;;  %v2254_v7 = vsel %vm8473_vm4, %v2175_v41, %v2253_v25  ;;  %v1933_v22 = vsel %vm8558_vm9, %v1854_v5, %v1932_v6 }
 0x167   : > { %v2296_v46 = vld [vmem:[#allocation2 + $0x160] sm:$0x80]  ;;  %v2181_v13 = vrot.slane %v2179_v47, 1  ;;  %v1765_v19 = vsel %vm8867_vm7, 0, %v1764_v28  ;;  %v2011_v0 = vld [vmem:[#allocation2 + $0x1f0] sm:$0xff]  ;;  %v1974_v2 = vsel %vm8572_vm10, 0, %v1973_v48 }
 0x168   : > { %v2297_v14 = vsel %vm8484_vm5, 0, %v2296_v46  ;;  %1766 = vst [vmem:[#allocation2 + $0x240] sm:$0x80] %v1765_v19  ;;  %2052 = vrot.lane.b32.xlu0 %v2011_v0, %s7976_s24  ;;  %v2184_v8 = vshrl.u32 %v2011_v0, 16  ;;  %v2186_v44 = vshll.u32 %v2011_v0, 16  ;;  %v1858_v21 = vrot.slane %v2177_v45, 7 }
 0x169   : > { %2298 = vst [vmem:[#allocation2 + $0x160] sm:$0x80] %v2297_v14  ;;  %v2182_v30 = vor.u32 %v2181_v13, %v2177_v45  ;;  %1975 = vst [vmem:[#allocation2 + $0x130] sm:$0x1] %v1974_v2  ;;  %v1976_v32 = vld [vmem:[#allocation2 + $0x158] sm:$0x1]  ;;  %2864 = vmatmul.mubr.bf16.gmra.mrb[44].mxu0 %v2375_v27 }
 0x16a   : > { %v1977_v63 = vsel %vm8572_vm10, 0, %v1976_v32  ;;  %v1767_v15 = vld [vmem:[#allocation2 + $0x268] sm:$0x80]  ;;  %2255 = vst [vmem:[#allocation2 + $0x188] sm:$0xff] %v2254_v7  ;;  %v2188_v23 = vrot.slane %v2186_v44, 1  ;;  %v1865_v42 = vrot.slane %v2184_v8, 7  ;;  %v1861_v36 = vor.u32 %v2179_v47, %v1858_v21  ;;  %2871 = vmatprep.mubr.bf16.mxu0 %v2381_v56 }
 0x16b   : > { %v2257_v43 = vsel %vm8473_vm4, %v2182_v30, %v2256_v17  ;;  %1978 = vst [vmem:[#allocation2 + $0x158] sm:$0x1] %v1977_v63  ;;  %v1768_v49 = vsel %vm8867_vm7, 0, %v1767_v15  ;;  %v2012_v10 = vld [vmem:[#allocation2 + $0x218] sm:$0xff]  ;;  %1934 = vst [vmem:[#allocation2 + $0x180] sm:$0xff] %v1933_v22  ;;  %v2380_v48 = vld [vmem:[#allocation2 + $0x1e0] sm:$0xff] }
 0x16c   : > { %2258 = vst [vmem:[#allocation2 + $0x1b0] sm:$0xff] %v2257_v43  ;;  %1769 = vst [vmem:[#allocation2 + $0x268] sm:$0x80] %v1768_v49  ;;  %2054 = vrot.lane.b32.xlu1 %v2012_v10, %s7976_s24  ;;  %v2189_v37 = vor.u32 %v2188_v23, %v2184_v8  ;;  %v2191_v1 = vshrl.u32 %v2012_v10, 16  ;;  %v2193_v60 = vshll.u32 %v2012_v10, 16  ;;  %v1868_v18 = vor.u32 %v2186_v44, %v1865_v42  ;;  %v2386_v0 = vld [vmem:[#allocation2 + $0x210] sm:$0xff] }
 0x16d   : > { %v1936_v53 = vsel %vm8558_vm9, %v1861_v36, %v1935_v62  ;;  %v1944_v41 = vld [vmem:[#allocation2 + $0x220] sm:$0xff]  ;;  %v2268_v21 = vld [vmem:[#allocation2 + $0x250] sm:$0xff]  ;;  %v1947_v22 = vld [vmem:[#allocation2 + $0x248] sm:$0xff] }
 0x16e   : > { %v2260_v29 = vsel %vm8473_vm4, %v2189_v37, %v2259_v50  ;;  %v2195_v39 = vrot.slane %v2193_v60, 1  ;;  %1937 = vst [vmem:[#allocation2 + $0x1a8] sm:$0xff] %v1936_v53  ;;  %v1939_v40 = vsel %vm8558_vm9, %v1868_v18, %v1938_v16  ;;  %v1872_v38 = vrot.slane %v2191_v1, 7  ;;  %v2385_v10 = vld [vmem:[#allocation2 + $0x208] sm:$0xff]  ;;  %v2391_v37 = vld [vmem:[#allocation2 + $0x238] sm:$0xff] }
 0x16f   : > { %v2013_v51 = vld [vmem:[#allocation2 + $0x240] sm:$0xff]  ;;  %2261 = vst [vmem:[#allocation2 + $0x1d8] sm:$0xff] %v2260_v29  ;;  %1940 = vst [vmem:[#allocation2 + $0x1d0] sm:$0xff] %v1939_v40  ;;  %v2390_v29 = vld [vmem:[#allocation2 + $0x230] sm:$0xff] }
 0x170   : > { %2056 = vrot.lane.b32.xlu0 %v2013_v51, %s7976_s24  ;;  %v2196_v11 = vor.u32 %v2195_v39, %v2191_v1  ;;  %v2198_v24 = vshrl.u32 %v2013_v51, 16  ;;  %v2200_v33 = vshll.u32 %v2013_v51, 16  ;;  %v1875_v34 = vor.u32 %v2193_v60, %v1872_v38  ;;  %v2396_v40 = vld [vmem:[#allocation2 + $0x260] sm:$0xff]  ;;  %v2395_v51 = vld [vmem:[#allocation2 + $0x258] sm:$0xff] }
 0x171   : > { %v2299_v58 = vld [vmem:[#allocation2 + $0x188] sm:$0x80]  ;;  %2872 = vmatmul.mubr.bf16.gmra.mrb[48].mxu0 %v2380_v48 }
 0x172   : > { %v2300_v52 = vsel %vm8484_vm5, 0, %v2299_v58  ;;  %v2263_v25 = vsel %vm8473_vm4, %v2196_v11, %v2262_v9  ;;  %v2202_v45 = vrot.slane %v2200_v33, 1  ;;  %v1979_v47 = vld [vmem:[#allocation2 + $0x180] sm:$0x1]  ;;  %v1942_v31 = vsel %vm8558_vm9, %v1875_v34, %v1941_v12  ;;  %2879 = vmatprep.mubr.bf16.mxu0 %v2386_v0  ;;  %v2317_v12 = vld [vmem:[#allocation2 + $0x278] sm:$0x80] }
 0x173   : > { %v2302_v54 = vld [vmem:[#allocation2 + $0x1b0] sm:$0x80]  ;;  %v2105_v61 = vld [vmem:[#allocation2 + $0x268] sm:$0xff]  ;;  %2301 = vst [vmem:[#allocation2 + $0x188] sm:$0x80] %v2300_v52  ;;  %2264 = vst [vmem:[#allocation2 + $0x200] sm:$0xff] %v2263_v25 }
 0x174   : > { %v2303_v59 = vsel %vm8484_vm5, 0, %v2302_v54  ;;  %v1980_v28 = vsel %vm8572_vm10, 0, %v1979_v47  ;;  %1943 = vst [vmem:[#allocation2 + $0x1f8] sm:$0xff] %v1942_v31  ;;  %v1879_v55 = vrot.slane %v2198_v24, 7  ;;  %v9103_v46 = vld [vmem:[#allocation2 + $0x268] sm:$0xff]  ;;  %v2205_v13 = vshrl.u32 %v2105_v61, 16  ;;  %2058 = vrot.lane.b32.xlu1 %v2105_v61, %s7976_s24 }
 0x175   : > { %v2207_v19 = vshll.u32 %v2105_v61, 16  ;;  %2304 = vst [vmem:[#allocation2 + $0x1b0] sm:$0x80] %v2303_v59  ;;  %v2203_v14 = vor.u32 %v2202_v45, %v2198_v24  ;;  %1981 = vst [vmem:[#allocation2 + $0x180] sm:$0x1] %v1980_v28  ;;  %v1884_v17 = vshrl.u32 %v9103_v46, 16 }
 0x176   : > { %v1982_v2 = vld [vmem:[#allocation2 + $0x1a8] sm:$0x1]  ;;  %v1882_v6 = vor.u32 %v2200_v33, %v1879_v55  ;;  %v1887_v30 = vshll.u32 %v9103_v46, 16  ;;  %v2305_v8 = vld [vmem:[#allocation2 + $0x1d8] sm:$0x80]  ;;  %v2324_v9 = vld [vmem:[#allocation2 + $0x20] sm:$0xff] }
 0x177   : > { %v2266_v44 = vsel %vm8473_vm4, %v2203_v14, %v2265_v26  ;;  %v2209_v32 = vrot.slane %v2207_v19, 1  ;;  %v1983_v5 = vsel %vm8572_vm10, 0, %v1982_v2  ;;  %v1985_v7 = vld [vmem:[#allocation2 + $0x1d0] sm:$0x1]  ;;  %v2306_v63 = vsel %vm8484_vm5, 0, %v2305_v8  ;;  %v2329_v24 = vld [vmem:[#allocation2 + $0x48] sm:$0xff] }
 0x178   : > { %2267 = vst [vmem:[#allocation2 + $0x228] sm:$0xff] %v2266_v44  ;;  %1984 = vst [vmem:[#allocation2 + $0x1a8] sm:$0x1] %v1983_v5  ;;  %v1986_v15 = vsel %vm8572_vm10, 0, %v1985_v7  ;;  %v1945_v43 = vsel %vm8558_vm9, %v1882_v6, %v1944_v41  ;;  %v1886_v23 = vrot.slane %v1884_v17, 7  ;;  %v2318_v11 = vsel %vm8484_vm5, 0, %v2317_v12 }
 0x179   : > { %2307 = vst [vmem:[#allocation2 + $0x1d8] sm:$0x80] %v2306_v63  ;;  %v2210_v50 = vor.u32 %v2209_v32, %v2205_v13  ;;  %1987 = vst [vmem:[#allocation2 + $0x1d0] sm:$0x1] %v1986_v15  ;;  %2880 = vmatmul.mubr.bf16.gmra.mrb[52].mxu0 %v2385_v10  ;;  %v2334_v33 = vld [vmem:[#allocation2 + $0x70] sm:$0xff]  ;;  %v9141_v26 = vld [vmem:[#allocation3] sm:$0xff] }
 0x17a   : > { %1946 = vst [vmem:[#allocation2 + $0x220] sm:$0xff] %v1945_v43  ;;  %v1889_v62 = vor.u32 %v1887_v30, %v1886_v23  ;;  %v2308_v42 = vld [vmem:[#allocation2 + $0x200] sm:$0x80]  ;;  %2887 = vmatprep.mubr.bf16.mxu0 %v2391_v37  ;;  %2319 = vst [vmem:[#allocation2 + $0x278] sm:$0x80] %v2318_v11  ;;  %v2322_v47 = vld [vmem:[#allocation2 + $0x10] sm:$0xff] }
 0x17b   : > { %v2269_v27 = vsel %vm8473_vm4, %v2210_v50, %v2268_v21  ;;  %v1988_v49 = vld [vmem:[#allocation2 + $0x1f8] sm:$0x1]  ;;  %v2309_v36 = vsel %vm8484_vm5, 0, %v2308_v42  ;;  %v1997_v34 = vld [vmem:[#allocation2 + $0x270] sm:$0x1]  ;;  %v2344_v54 = vld [vmem:[#allocation2 + $0xc0] sm:$0xff] }
 0x17c   : > { %2270 = vst [vmem:[#allocation2 + $0x250] sm:$0xff] %v2269_v27  ;;  %v1989_v16 = vsel %vm8572_vm10, 0, %v1988_v49  ;;  %v1948_v56 = vsel %vm8558_vm9, %v1889_v62, %v1947_v22  ;;  %2310 = vst [vmem:[#allocation2 + $0x200] sm:$0x80] %v2309_v36  ;;  %v1998_v58 = vsel %vm8572_vm10, 0, %v1997_v34  ;;  %v7710_v25 = vld [vmem:[#allocation9 + $0x40] sm:$0xff]  }
 0x17d   : > { %1990 = vst [vmem:[#allocation2 + $0x1f8] sm:$0x1] %v1989_v16  ;;  %1949 = vst [vmem:[#allocation2 + $0x248] sm:$0xff] %v1948_v56  ;;  %7039 = vmatprep.subr.bf16.mxu1 %v7710_v25  ;;  %v7711_v31 = vld [vmem:[#allocation9] sm:$0xff]   ;;  %v2354_v61 = vld [vmem:[#allocation2 + $0x110] sm:$0xff]  ;;  %s7902_s24 = scalar_lea.vmem %s7901_s6, 8192 }
 0x17e   : > { %1999 = vst [vmem:[#allocation2 + $0x270] sm:$0x1] %v1998_v58  ;;  %v2359_v28 = vld [vmem:[#allocation2 + $0x138] sm:$0xff]  ;;  %v2364_v55 = vld [vmem:[#allocation2 + $0x160] sm:$0xff]  ;;  %v7712_v0 = vld [vmem:[#allocation9 + $0x48] sm:$0xff]   ;;  %p7904_p9 = scmp.lt.s32.totalorder %s7902_s24, %s7896_s17 }
 0x17f   : > { %v2311_v20 = vld [vmem:[#allocation2 + $0x228] sm:$0x80]  ;;  %2090 = vst.msk [vmem:[#allocation2 + $0x270] sm:$0xff] %vm969_vm11, %v9141_v26  ;;  %v2327_v19 = vld [vmem:[#allocation2 + $0x38] sm:$0xff]  ;;  %v2374_v6 = vld [vmem:[#allocation2 + $0x1b0] sm:$0xff] }
 0x180   : > { %v2312_v1 = vsel %vm8484_vm5, 0, %v2311_v20  ;;  %v2369_v17 = vld [vmem:[#allocation2 + $0x188] sm:$0xff]  ;;  %v2332_v8 = vld [vmem:[#allocation2 + $0x60] sm:$0xff]  ;;  %v2379_v32 = vld [vmem:[#allocation2 + $0x1d8] sm:$0xff]  ;;  %p7905_p12 = por %p7904_p9, %p7903_p7 }
 0x181   : > { %v1991_v60 = vld [vmem:[#allocation2 + $0x220] sm:$0x1]  ;;  %2313 = vst [vmem:[#allocation2 + $0x228] sm:$0x80] %v2312_v1  ;;  %2888 = vmatmul.mubr.bf16.gmra.mrb[56].mxu0 %v2390_v29  ;;  %v7713_v2 = vld [vmem:[#allocation9 + $0x8] sm:$0xff]   ;;  %v7714_v43 = vld [vmem:[#allocation9 + $0x50] sm:$0xff]  }
 0x182   : > { %v1992_v18 = vsel %vm8572_vm10, 0, %v1991_v60  ;;  %2895 = vmatprep.mubr.bf16.mxu0 %v2396_v40  ;;  %v2337_v63 = vld [vmem:[#allocation2 + $0x88] sm:$0xff]  ;;  %v7715_v50 = vld [vmem:[#allocation9 + $0x10] sm:$0xff]   ;;  %v2399_v49 = vld [vmem:[#allocation2 + $0x278] sm:$0xff]  ;;  %p7906_p2 = pnand %p7905_p12, %p7899_p3 }
 0x183   : > { %1993 = vst [vmem:[#allocation2 + $0x220] sm:$0x1] %v1992_v18  ;;  %v2314_v53 = vld [vmem:[#allocation2 + $0x250] sm:$0x80]  ;;  %v2384_v5 = vld [vmem:[#allocation2 + $0x200] sm:$0xff]  ;;  %v2347_v36 = vld [vmem:[#allocation2 + $0xd8] sm:$0xff] }
 0x184   : > { %v2315_v35 = vsel %vm8484_vm5, 0, %v2314_v53  ;;  %v1994_v39 = vld [vmem:[#allocation2 + $0x248] sm:$0x1]  ;;  %v2342_v62 = vld [vmem:[#allocation2 + $0xb0] sm:$0xff]  ;;  %v7716_v56 = vld [vmem:[#allocation9 + $0x58] sm:$0xff]   ;;  %vm3737_vm5 = vcmask 1047559  }
 0x185   : > { %2316 = vst [vmem:[#allocation2 + $0x250] sm:$0x80] %v2315_v35  ;;  %v1995_v38 = vsel %vm8572_vm10, 0, %v1994_v39  ;;  %v7717_v37 = vld [vmem:[#allocation9 + $0x18] sm:$0xff]   ;;  %v2352_v1 = vld [vmem:[#allocation2 + $0x100] sm:$0xff]  ;;  %v7720_v25 = vld [vmem:[#allocation9 + $0x68] sm:$0xff]  }
 0x186   : > { %1996 = vst [vmem:[#allocation2 + $0x248] sm:$0x1] %v1995_v38  ;;  %v7718_v39 = vld [vmem:[#allocation9 + $0x60] sm:$0xff]  }
 0x187   : > { %v7719_v38 = vld [vmem:[#allocation9 + $0x20] sm:$0xff]  }
 0x188   : > { %v2389_v23 = vld [vmem:[#allocation2 + $0x228] sm:$0xff] }
 0x189   : > { %2896 = vmatmul.mubr.bf16.gmra.mrb[60].mxu0 %v2395_v51  ;;  %v2362_v51 = vld [vmem:[#allocation2 + $0x150] sm:$0xff] }
 0x18a   : > { %7519 = vmatprep.mubr.msk.bf16.mxu0 %vm641_vm0, %v2324_v9 }
 0x18c   : > { %v2394_v22 = vld [vmem:[#allocation2 + $0x250] sm:$0xff] }
 0x191   : > { %7520 = vmatmul.mubr.msk.bf16.vlgmr.msra.gmra.mrb[64].mxu0 %vm641_vm0, %v2329_v24 }
 0x192   : > { %7523 = vmatprep.mubr.msk.bf16.mxu0 %vm641_vm0, %v2334_v33 }
 0x197   : > { %v2031_v52 = vpop.permute.xlu0 %2030 }
 0x198   : > { %2075 = vst.msk [vmem:[#allocation2 + $0x18] sm:$0xff] %vm969_vm11, %v2031_v52  ;;  %v2367_v52 = vld [vmem:[#allocation2 + $0x178] sm:$0xff] }
 0x199   : > { %7524 = vmatmul.mubr.msk.bf16.gmra.mrb[68].mxu0 %vm641_vm0, %v2339_v3 }
 0x19a   : > { %7527 = vmatprep.mubr.msk.bf16.mxu0 %vm641_vm0, %v2344_v54 }
 0x19f   : > { %v2323_v45 = vld [vmem:[#allocation2 + $0x18] sm:$0xff] }
 0x1a0   : > { %2936 = vmatprep.mubr.bf16.mxu1 %v2323_v45 }
 0x1a1   : > { %7528 = vmatmul.mubr.msk.bf16.gmra.mrb[72].mxu0 %vm641_vm0, %v2349_v57  ;;  %2937 = vmatmul.mubr.bf16.vlgmr.msra.gmra.mrb[0].mxu1 %v2322_v47  ;;  %v7721_v57 = vld [vmem:[#allocation9 + $0x28] sm:$0xff]  }
 0x1a2   : > { %v2033_v48 = vpop.permute.xlu0 %2032  ;;  %7531 = vmatprep.mubr.msk.bf16.mxu0 %vm641_vm0, %v2354_v61  ;;  %7040 = vmatpush3.bf16.msra.mxu1 %v7711_v31 }
 0x1a3   : > { %2076 = vst.msk [vmem:[#allocation2 + $0x40] sm:$0xff] %vm969_vm11, %v2033_v48  ;;  %7041 = vmatprep.subr.bf16.mxu1 %v7712_v0 }
 0x1a6   : > { %v2035_v59 = vpop.permute.xlu0 %2034  ;;  %7042 = vmatpush3.bf16.msra.mxu1 %v7713_v2  ;;  %v2377_v2 = vld [vmem:[#allocation2 + $0x1c8] sm:$0xff] }
 0x1a7   : > { %2077 = vst.msk [vmem:[#allocation2 + $0x68] sm:$0xff] %vm969_vm11, %v2035_v59  ;;  %7043 = vmatprep.subr.bf16.mxu1 %v7714_v43  ;;  %v2372_v59 = vld [vmem:[#allocation2 + $0x1a0] sm:$0xff] }
 0x1a9   : > { %7532 = vmatmul.mubr.msk.bf16.gmra.mrb[76].mxu0 %vm641_vm0, %v2359_v28 }
 0x1aa   : > { %7535 = vmatprep.mubr.msk.bf16.mxu0 %vm641_vm0, %v2364_v55  ;;  %v2328_v13 = vld [vmem:[#allocation2 + $0x40] sm:$0xff]  ;;  %7044 = vmatpush3.bf16.msra.mxu1 %v7715_v50 }
 0x1ab   : > { %2944 = vmatprep.mubr.bf16.mxu1 %v2328_v13  ;;  %7045 = vmatprep.subr.bf16.mxu1 %v7716_v56 }
 0x1ac   : > { %2945 = vmatmul.mubr.bf16.gmra.mrb[4].mxu1 %v2327_v19 }
 0x1ae   : > { %v2037_v14 = vpop.permute.xlu0 %2036  ;;  %v2333_v41 = vld [vmem:[#allocation2 + $0x68] sm:$0xff]  ;;  %7046 = vmatpush3.bf16.msra.mxu1 %v7717_v37 }
 0x1af   : > { %2078 = vst.msk [vmem:[#allocation2 + $0x90] sm:$0xff] %vm969_vm11, %v2037_v14  ;;  %2952 = vmatprep.mubr.bf16.mxu1 %v2333_v41  ;;  %7047 = vmatprep.subr.bf16.mxu1 %v7718_v39 }
 0x1b1   : > { %7536 = vmatmul.mubr.msk.bf16.gmra.mrb[80].mxu0 %vm641_vm0, %v2369_v17 }
 0x1b2   : > { %v2039_v30 = vpop.permute.xlu0 %2038  ;;  %7539 = vmatprep.mubr.msk.bf16.mxu0 %vm641_vm0, %v2374_v6  ;;  %7048 = vmatpush3.bf16.msra.mxu1 %v7719_v38 }
 0x1b3   : > { %2079 = vst.msk [vmem:[#allocation2 + $0xb8] sm:$0xff] %vm969_vm11, %v2039_v30  ;;  %7049 = vmatprep.subr.bf16.mxu1 %v7720_v25 }
 0x1b4   : > { %2953 = vmatmul.mubr.bf16.gmra.mrb[8].mxu1 %v2332_v8  ;;  %v7722_v8 = vld [vmem:[#allocation9 + $0x70] sm:$0xff]  }
 0x1b6   : > { %v2338_v44 = vld [vmem:[#allocation2 + $0x90] sm:$0xff]  ;;  %7050 = vmatpush3.bf16.msra.mxu1 %v7721_v57 }
 0x1b7   : > { %2960 = vmatprep.mubr.bf16.mxu1 %v2338_v44  ;;  %v3476_v44 = vld [vmem:[#allocation3] sm:$0x1]  ;;  %7051 = vmatprep.subr.bf16.mxu1 %v7722_v8 }
 0x1b9   : > { %7540 = vmatmul.mubr.msk.bf16.gmra.mrb[84].mxu0 %vm641_vm0, %v2379_v32 }
 0x1ba   : > { %v2041_v7 = vpop.permute.xlu0 %2040  ;;  %7543 = vmatprep.mubr.msk.bf16.mxu0 %vm641_vm0, %v2384_v5  ;;  %v2343_v15 = vld [vmem:[#allocation2 + $0xb8] sm:$0xff]  ;;  %v7723_v5 = vld [vmem:[#allocation9 + $0x30] sm:$0xff]  }
 0x1bb   : > { %2080 = vst.msk [vmem:[#allocation2 + $0xe0] sm:$0xff] %vm969_vm11, %v2041_v7  ;;  %7052 = vmatpush3.bf16.msra.mxu1 %v7723_v5 }
 0x1bc   : > { %v2043_v21 = vpop.permute.xlu1 %2042  ;;  %2961 = vmatmul.mubr.bf16.gmra.mrb[12].mxu1 %v2337_v63 }
 0x1bd   : > { %2081 = vst.msk [vmem:[#allocation2 + $0x108] sm:$0xff] %vm969_vm11, %v2043_v21  ;;  %2968 = vmatprep.mubr.bf16.mxu1 %v2343_v15  ;;  %v7724_v15 = vld [vmem:[#allocation9 + $0xc0] sm:$0xff]  }
 0x1be   : > { %7151 = vmatprep.subr.bf16.mxu0 %v7724_v15 }
 0x1c1   : > { %7544 = vmatmul.mubr.msk.bf16.gmra.mrb[88].mxu0 %vm641_vm0, %v2389_v23  ;;  %v7725_v23 = vld [vmem:[#allocation9 + $0x80] sm:$0xff]  }
 0x1c2   : > { %7547 = vmatprep.mubr.msk.bf16.mxu0 %vm641_vm0, %v2394_v22  ;;  %v2348_v42 = vld [vmem:[#allocation2 + $0xe0] sm:$0xff]  ;;  %v7728_v22 = vld [vmem:[#allocation9 + $0x78] sm:$0xff]   ;;  %7152 = vmatpush3.bf16.msra.mxu0 %v7725_v23 }
 0x1c3   : > { %7053 = vmatprep.subr.bf16.mxu1 %v7728_v22  ;;  %v7738_v23 = vld [vmem:[#allocation9 + $0x140] sm:$0xff]  }
 0x1c4   : > { %2969 = vmatmul.mubr.bf16.gmra.mrb[16].mxu1 %v2342_v62  ;;  %v2353_v16 = vld [vmem:[#allocation2 + $0x108] sm:$0xff]  ;;  %v7729_v62 = vld [vmem:[#allocation9 + $0x38] sm:$0xff]   ;;  %v7739_v22 = vld [vmem:[#allocation9 + $0x100] sm:$0xff]  }
 0x1c5   : > { %2976 = vmatprep.mubr.bf16.mxu1 %v2348_v42  ;;  %v7726_v42 = vld [vmem:[#allocation9 + $0xc8] sm:$0xff]   ;;  %7054 = vmatpush3.bf16.msra.mxu1 %v7729_v62 }
 0x1c6   : > { %v2045_v27 = vpop.permute.xlu0 %2044  ;;  %7153 = vmatprep.subr.bf16.mxu0 %v7726_v42  ;;  %7263 = vmatprep.subr.bf16.mxu1 %v7738_v23 }
 0x1c7   : > { %2082 = vst.msk [vmem:[#allocation2 + $0x130] sm:$0xff] %vm969_vm11, %v2045_v27  ;;  %v2382_v27 = vld [vmem:[#allocation2 + $0x1f0] sm:$0xff] }
 0x1c9   : > { %7548 = vmatmul.mubr.msk.bf16.gmra.mrb[92].mxu0 %vm641_vm0, %v2399_v49  ;;  %vm3474_vm0 = vcmask 1040384   ;;  %v7727_v49 = vld [vmem:[#allocation9 + $0x88] sm:$0xff]  }
 0x1ca   : > { %v2047_v10 = vpop.permute.xlu1 %2046  ;;  %vm9187_vm4 = vmand %vm3474_vm0, %vm844_vm8  ;;  %7154 = vmatpush3.bf16.msra.mxu0 %v7727_v49 }
 0x1cb   : > { %2083 = vst.msk [vmem:[#allocation2 + $0x158] sm:$0xff] %vm969_vm11, %v2047_v10  ;;  %v3477_v7 = vsel %vm9187_vm4, 0, %v3476_v44  ;;  %vm9206_vm8 = vmand %vm3737_vm5, %vm1170_vm3  ;;  %vm3426_vm3 = vcmask 1047552  }
 0x1cc   : > { %2977 = vmatmul.mubr.bf16.gmra.mrb[20].mxu1 %v2347_v36  ;;  %3478 = vst [vmem:[#allocation3] sm:$0x1] %v3477_v7  ;;  %vm9299_vm9 = vmand %vm3426_vm3, %vm795_vm6 }
 0x1cd   : > { %2984 = vmatprep.mubr.bf16.mxu1 %v2353_v16  ;;  %vm9311_vm10 = vmand %vm3426_vm3, %vm1121_vm1 }
 0x1ce   : > { %v2358_v18 = vld [vmem:[#allocation2 + $0x130] sm:$0xff] }
 0x1d2   : > { %v2049_v20 = vpop.permute.xlu0 %2048  ;;  %v2363_v35 = vld [vmem:[#allocation2 + $0x158] sm:$0xff] }
 0x1d3   : > { %2084 = vst.msk [vmem:[#allocation2 + $0x180] sm:$0xff] %vm969_vm11, %v2049_v20  ;;  %v7730_v20 = vld [vmem:[#allocation9 + $0xd0] sm:$0xff]  }
 0x1d4   : > { %2985 = vmatmul.mubr.bf16.gmra.mrb[24].mxu1 %v2352_v1  ;;  %7155 = vmatprep.subr.bf16.mxu0 %v7730_v20 }
 0x1d5   : > { %2992 = vmatprep.mubr.bf16.mxu1 %v2358_v18 }
 0x1d7   : > { %v2051_v60 = vpop.permute.xlu1 %2050 }
 0x1d8   : > { %2085 = vst.msk [vmem:[#allocation2 + $0x1a8] sm:$0xff] %vm969_vm11, %v2051_v60  ;;  %v7731_v60 = vld [vmem:[#allocation9 + $0x90] sm:$0xff]  }
 0x1d9   : > { %7156 = vmatpush3.bf16.msra.mxu0 %v7731_v60  ;;  %v7744_v60 = vld [vmem:[#allocation9 + $0x148] sm:$0xff]  }
 0x1da   : > { %v2053_v53 = vpop.permute.xlu0 %2052  ;;  %v2368_v12 = vld [vmem:[#allocation2 + $0x180] sm:$0xff] }
 0x1db   : > { %2086 = vst.msk [vmem:[#allocation2 + $0x1d0] sm:$0xff] %vm969_vm11, %v2053_v53  ;;  %v7732_v53 = vld [vmem:[#allocation9 + $0xd8] sm:$0xff]  }
 0x1dc   : > { %2993 = vmatmul.mubr.bf16.gmra.mrb[28].mxu1 %v8994_v4  ;;  %7157 = vmatprep.subr.bf16.mxu0 %v7732_v53  ;;  %v7745_v53 = vld [vmem:[#allocation9 + $0x108] sm:$0xff]  }
 0x1dd   : > { %3000 = vmatprep.mubr.bf16.mxu1 %v2363_v35  ;;  %v7733_v35 = vld [vmem:[#allocation9 + $0x98] sm:$0xff]  }
 0x1de   : > { %v2055_v29 = vpop.permute.xlu1 %2054  ;;  %7158 = vmatpush3.bf16.msra.mxu0 %v7733_v35 }
 0x1df   : > { %2087 = vst.msk [vmem:[#allocation2 + $0x1f8] sm:$0xff] %vm969_vm11, %v2055_v29  ;;  %v2373_v54 = vld [vmem:[#allocation2 + $0x1a8] sm:$0xff]  ;;  %v2387_v29 = vld [vmem:[#allocation2 + $0x218] sm:$0xff] }
 0x1e2   : > { %v2057_v40 = vpop.permute.xlu0 %2056  ;;  %v2378_v55 = vld [vmem:[#allocation2 + $0x1d0] sm:$0xff] }
 0x1e3   : > { %2088 = vst.msk [vmem:[#allocation2 + $0x220] sm:$0xff] %vm969_vm11, %v2057_v40 }
 0x1e4   : > { %3001 = vmatmul.mubr.bf16.gmra.mrb[32].mxu1 %v2362_v51  ;;  %v6811_v11 = vpop.f32.mrb[0].mxu0 }
 0x1e5   : > { %3008 = vmatprep.mubr.bf16.mxu1 %v2368_v12  ;;  %v6812_v4 = vpop.f32.mrb[1].mxu0  ;;  %v7734_v12 = vld [vmem:[#allocation9 + $0xe0] sm:$0xff]  }
 0x1e6   : > { %v2059_v9 = vpop.permute.xlu1 %2058  ;;  %v9174_v24 = vadd.f32 %v6812_v4, %v6811_v11  ;;  %v6814_v33 = vpop.f32.mrb[2].mxu0  ;;  %v2383_v30 = vld [vmem:[#allocation2 + $0x1f8] sm:$0xff]  ;;  %v7735_v4 = vld [vmem:[#allocation9 + $0xa0] sm:$0xff]   ;;  %7159 = vmatprep.subr.bf16.mxu0 %v7734_v12 }
 0x1e7   : > { %2089 = vst.msk [vmem:[#allocation2 + $0x248] sm:$0xff] %vm969_vm11, %v2059_v9  ;;  %v6815_v34 = vpop.f32.mrb[3].mxu0  ;;  %7160 = vmatpush3.bf16.msra.mxu0 %v7735_v4 }
 0x1e8   : > { %v9176_v58 = vadd.f32 %v6815_v34, %v6814_v33  ;;  %v2398_v34 = vld [vmem:[#allocation2 + $0x270] sm:$0xff] }
 0x1ea   : > { %v2388_v36 = vld [vmem:[#allocation2 + $0x220] sm:$0xff] }
 0x1ec   : > { %v6817_v3 = vpop.f32.mrb[4].mxu0  ;;  %3009 = vmatmul.mubr.bf16.gmra.mrb[36].mxu1 %v2367_v52  ;;  %v7736_v52 = vld [vmem:[#allocation9 + $0xe8] sm:$0xff]  }
 0x1ed   : > { %v6818_v45 = vpop.f32.mrb[5].mxu0  ;;  %3016 = vmatprep.mubr.bf16.mxu1 %v2373_v54  ;;  %v7737_v54 = vld [vmem:[#allocation9 + $0xa8] sm:$0xff]   ;;  %7161 = vmatprep.subr.bf16.mxu0 %v7736_v52 }
 0x1ee   : > { %v9178_v47 = vadd.f32 %v6818_v45, %v6817_v3  ;;  %v6820_v31 = vpop.f32.mrb[6].mxu0  ;;  %v2393_v40 = vld [vmem:[#allocation2 + $0x248] sm:$0xff]  ;;  %v2392_v3 = vld [vmem:[#allocation2 + $0x240] sm:$0xff]  ;;  %7162 = vmatpush3.bf16.msra.mxu0 %v7737_v54  ;;  %v7746_v54 = vld [vmem:[#allocation9 + $0x150] sm:$0xff]  }
 0x1ef   : > { %v6821_v61 = vpop.f32.mrb[7].mxu0 }
 0x1f0   : > { %v9180_v48 = vadd.f32 %v6821_v61, %v6820_v31 }
 0x1f4   : > { %v6823_v28 = vpop.f32.mrb[8].mxu0  ;;  %3017 = vmatmul.mubr.bf16.gmra.mrb[40].mxu1 %v2372_v59  ;;  %v7740_v59 = vld [vmem:[#allocation9 + $0xf0] sm:$0xff]  }
 0x1f5   : > { %v6824_v13 = vpop.f32.mrb[9].mxu0  ;;  %3024 = vmatprep.mubr.bf16.mxu1 %v2378_v55  ;;  %7163 = vmatprep.subr.bf16.mxu0 %v7740_v59 }
 0x1f6   : > { %v9182_v19 = vadd.f32 %v6824_v13, %v6823_v28  ;;  %v6826_v0 = vpop.f32.mrb[10].mxu0  ;;  %v3739_v28 = vld [vmem:[#allocation3 + $0x10] sm:$0x80] }
 0x1f7   : > { %v6827_v14 = vpop.f32.mrb[11].mxu0  ;;  %v7741_v13 = vld [vmem:[#allocation9 + $0xb0] sm:$0xff]  }
 0x1f8   : > { %v9184_v41 = vadd.f32 %v6827_v14, %v6826_v0  ;;  %v3740_v0 = vsel %vm9206_vm8, 0, %v3739_v28  ;;  %7164 = vmatpush3.bf16.msra.mxu0 %v7741_v13 }
 0x1f9   : > { %3741 = vst [vmem:[#allocation3 + $0x10] sm:$0x80] %v3740_v0 }
 0x1fc   : > { %v6829_v6 = vpop.f32.mrb[12].mxu0  ;;  %3025 = vmatmul.mubr.bf16.gmra.mrb[44].mxu1 %v2377_v2  ;;  %v7742_v2 = vld [vmem:[#allocation9 + $0xf8] sm:$0xff]  }
 0x1fd   : > { %v6830_v32 = vpop.f32.mrb[13].mxu0  ;;  %3032 = vmatprep.mubr.bf16.mxu1 %v2383_v30  ;;  %7165 = vmatprep.subr.bf16.mxu0 %v7742_v2 }
 0x1fe   : > { %v9193_v63 = vadd.f32 %v6830_v32, %v6829_v6  ;;  %v6832_v21 = vpop.f32.mrb[14].mxu0  ;;  %v7743_v6 = vld [vmem:[#allocation9 + $0xb8] sm:$0xff]  }
 0x1ff   : > { %v6833_v43 = vpop.f32.mrb[15].mxu0  ;;  %7166 = vmatpush3.bf16.msra.mxu0 %v7743_v6 }
 0x200   : > { %v9195_v50 = vadd.f32 %v6833_v43, %v6832_v21  ;;  %v4757_v21 = vld [vmem:[#allocation3] sm:$0xff] }
 0x204   : > { %v6835_v10 = vpop.f32.mrb[16].mxu0  ;;  %3033 = vmatmul.mubr.bf16.gmra.mrb[48].mxu1 %v2382_v27 }
 0x205   : > { %v6836_v16 = vpop.f32.mrb[17].mxu0  ;;  %3040 = vmatprep.mubr.bf16.mxu1 %v2388_v36 }
 0x206   : > { %v9197_v56 = vadd.f32 %v6836_v16, %v6835_v10  ;;  %v6838_v37 = vpop.f32.mrb[18].mxu0 }
 0x207   : > { %v6839_v1 = vpop.f32.mrb[19].mxu0 }
 0x208   : > { %v9199_v18 = vadd.f32 %v6839_v1, %v6838_v37 }
 0x20c   : > { %v6841_v39 = vpop.f32.mrb[20].mxu0  ;;  %3041 = vmatmul.mubr.bf16.gmra.mrb[52].mxu1 %v2387_v29 }
 0x20d   : > { %v6842_v38 = vpop.f32.mrb[21].mxu0  ;;  %3048 = vmatprep.mubr.bf16.mxu1 %v2393_v40 }
 0x20e   : > { %v9201_v51 = vadd.f32 %v6842_v38, %v6841_v39  ;;  %v6844_v9 = vpop.f32.mrb[22].mxu0 }
 0x20f   : > { %v6845_v11 = vpop.f32.mrb[23].mxu0 }
 0x210   : > { %v9203_v33 = vadd.f32 %v6845_v11, %v6844_v9 }
 0x214   : > { %v6847_v45 = vpop.f32.mrb[24].mxu0  ;;  %3049 = vmatmul.mubr.bf16.gmra.mrb[56].mxu1 %v2392_v3 }
 0x215   : > { %v6848_v57 = vpop.f32.mrb[25].mxu0  ;;  %3056 = vmatprep.mubr.bf16.mxu1 %v2398_v34 }
 0x216   : > { %v9210_v31 = vadd.f32 %v6848_v57, %v6847_v45  ;;  %v6850_v61 = vpop.f32.mrb[26].mxu0  ;;  %v7747_v45 = vld [vmem:[#allocation9 + $0x110] sm:$0xff]  }
 0x217   : > { %v6851_v55 = vpop.f32.mrb[27].mxu0 }
 0x218   : > { %v9214_v14 = vadd.f32 %v6851_v55, %v6850_v61 }
 0x21c   : > { %v6853_v30 = vpop.f32.mrb[28].mxu0  ;;  %3057 = vmatmul.mubr.bf16.gmra.mrb[60].mxu1 %v9103_v46 }
 0x21d   : > { %v6854_v8 = vpop.f32.mrb[29].mxu0  ;;  %5516 = vmatprep.mubr.bf16.mxu1 %v9141_v26 }
 0x21e   : > { %v9218_v44 = vadd.f32 %v6854_v8, %v6853_v30  ;;  %v6856_v32 = vpop.f32.mrb[30].mxu0 }
 0x21f   : > { %v6857_v5 = vpop.f32.mrb[31].mxu0 }
 0x220   : > { %v9220_v7 = vadd.f32 %v6857_v5, %v6856_v32  ;;  %v7748_v5 = vld [vmem:[#allocation9 + $0x158] sm:$0xff]  }
 0x224   : > { %v6859_v15 = vpop.f32.mrb[32].mxu0  ;;  %5517 = vmatmul.mubr.bf16.vlgmr.msra.gmra.mrb[64].mxu1 %v4757_v21  ;;  %v7749_v21 = vld [vmem:[#allocation9 + $0x118] sm:$0xff]  }
 0x225   : > { %v6860_v43 = vpop.f32.mrb[33].mxu0  ;;  %7264 = vmatpush3.bf16.msra.mxu1 %v7739_v22 }
 0x226   : > { %v9222_v62 = vadd.f32 %v6860_v43, %v6859_v15  ;;  %v6862_v46 = vpop.f32.mrb[34].mxu0  ;;  %7265 = vmatprep.subr.bf16.mxu1 %v7744_v60 }
 0x227   : > { %v6863_v42 = vpop.f32.mrb[35].mxu0 }
 0x228   : > { %v9224_v27 = vadd.f32 %v6863_v42, %v6862_v46 }
 0x229   : > { %7266 = vmatpush3.bf16.msra.mxu1 %v7745_v53  ;;  %v7752_v53 = vld [vmem:[#allocation9 + $0x160] sm:$0xff]  }
 0x22a   : > { %7267 = vmatprep.subr.bf16.mxu1 %v7746_v54 }
 0x22c   : > { %v6865_v26 = vpop.f32.mrb[36].mxu0 }
 0x22d   : > { %v6866_v49 = vpop.f32.mrb[37].mxu0  ;;  %7268 = vmatpush3.bf16.msra.mxu1 %v7747_v45  ;;  %v9271_v45 = vld [vmem:[%s10376_s2] ss:$0 sm:$0xff] }
 0x22e   : > { %v9226_v10 = vadd.f32 %v6866_v49, %v6865_v26  ;;  %v6868_v36 = vpop.f32.mrb[38].mxu0  ;;  %7269 = vmatprep.subr.bf16.mxu1 %v7748_v5  ;;  %v2781_v5 = vadd.f32 %v9176_v58, %v9271_v45 }
 0x22f   : > { %v6869_v16 = vpop.f32.mrb[39].mxu0 }
 0x230   : > { %v9228_v37 = vadd.f32 %v6869_v16, %v6868_v36  ;;  %v7750_v16 = vld [vmem:[#allocation9 + $0x1c0] sm:$0xff]  }
 0x231   : > { %7270 = vmatpush3.bf16.msra.mxu1 %v7749_v21  ;;  %7375 = vmatprep.subr.bf16.mxu0 %v7750_v16 }
 0x232   : > { %7271 = vmatprep.subr.bf16.mxu1 %v7752_v53 }
 0x234   : > { %v6871_v20 = vpop.f32.mrb[40].mxu0 }
 0x235   : > { %v6872_v1 = vpop.f32.mrb[41].mxu0 }
 0x236   : > { %v9230_v29 = vadd.f32 %v6872_v1, %v6871_v20  ;;  %v6874_v35 = vpop.f32.mrb[42].mxu0 }
 0x237   : > { %v6875_v39 = vpop.f32.mrb[43].mxu0 }
 0x238   : > { %v9232_v40 = vadd.f32 %v6875_v39, %v6874_v35  ;;  %v7753_v35 = vld [vmem:[#allocation9 + $0x120] sm:$0xff]  }
 0x239   : > { %7272 = vmatpush3.bf16.msra.mxu1 %v7753_v35 }
 0x23c   : > { %v6877_v38 = vpop.f32.mrb[44].mxu0 }
 0x23d   : > { %v6878_v9 = vpop.f32.mrb[45].mxu0 }
 0x23e   : > { %v9234_v12 = vadd.f32 %v6878_v9, %v6877_v38  ;;  %v6880_v11 = vpop.f32.mrb[46].mxu0 }
 0x23f   : > { %v6881_v4 = vpop.f32.mrb[47].mxu0 }
 0x240   : > { %v9236_v34 = vadd.f32 %v6881_v4, %v6880_v11 }
 0x244   : > { %v6883_v52 = vpop.f32.mrb[48].mxu0 }
 0x245   : > { %v6884_v3 = vpop.f32.mrb[49].mxu0 }
 0x246   : > { %v9238_v57 = vadd.f32 %v6884_v3, %v6883_v52  ;;  %v6886_v61 = vpop.f32.mrb[50].mxu0 }
 0x247   : > { %v6887_v59 = vpop.f32.mrb[51].mxu0 }
 0x248   : > { %v9240_v28 = vadd.f32 %v6887_v59, %v6886_v61 }
 0x24c   : > { %v6889_v55 = vpop.f32.mrb[52].mxu0 }
 0x24d   : > { %v6890_v13 = vpop.f32.mrb[53].mxu0 }
 0x24e   : > { %v9242_v0 = vadd.f32 %v6890_v13, %v6889_v55  ;;  %v6892_v2 = vpop.f32.mrb[54].mxu0  ;;  %v2778_v55 = vadd.f32 %v9174_v24, %v9271_v45 }
 0x24f   : > { %v6893_v6 = vpop.f32.mrb[55].mxu0 }
 0x250   : > { %v9244_v30 = vadd.f32 %v6893_v6, %v6892_v2 }
 0x254   : > { %v6895_v8 = vpop.f32.mrb[56].mxu0 }
 0x255   : > { %v6896_v32 = vpop.f32.mrb[57].mxu0 }
 0x256   : > { %v9246_v15 = vadd.f32 %v6896_v32, %v6895_v8  ;;  %v6898_v43 = vpop.f32.mrb[58].mxu0 }
 0x257   : > { %v6899_v23 = vpop.f32.mrb[59].mxu0 }
 0x258   : > { %v9248_v22 = vadd.f32 %v6899_v23, %v6898_v43  ;;  %v7756_v23 = vld [vmem:[#allocation9 + $0x168] sm:$0xff]  }
 0x259   : > { %7273 = vmatprep.subr.bf16.mxu1 %v7756_v23 }
 0x25c   : > { %v6901_v46 = vpop.f32.mrb[60].mxu0 }
 0x25d   : > { %v6902_v42 = vpop.f32.mrb[61].mxu0 }
 0x25e   : > { %v9250_v26 = vadd.f32 %v6902_v42, %v6901_v46  ;;  %v6904_v49 = vpop.f32.mrb[62].mxu0  ;;  %v7757_v46 = vld [vmem:[#allocation9 + $0x128] sm:$0xff]  }
 0x25f   : > { %v6905_v36 = vpop.f32.mrb[63].mxu0  ;;  %7274 = vmatpush3.bf16.msra.mxu1 %v7757_v46 }
 0x260   : > { %v9252_v20 = vadd.f32 %v6905_v36, %v6904_v49 }
 0x264   : > { %v9254_v1 = vpop.f32.mrb[64].mxu0 }
 0x265   : > { %v3099_v60 = vpop.f32.mrb[65].mxu0 }
 0x266   : > { %v9256_v39 = vpop.f32.mrb[66].mxu0 }
 0x267   : > { %v3102_v38 = vpop.f32.mrb[67].mxu0 }
 0x26c   : > { %v9258_v9 = vpop.f32.mrb[68].mxu0 }
 0x26d   : > { %v9260_v11 = vpop.f32.mrb[69].mxu0 }
 0x26e   : > { %v9262_v4 = vpop.f32.mrb[70].mxu0 }
 0x26f   : > { %v9264_v52 = vpop.f32.mrb[71].mxu0 }
 0x274   : > { %v9266_v3 = vpop.f32.mrb[72].mxu0  ;;  %v6923_v54 = vpop.f32.mrb[0].mxu1 }
 0x275   : > { %v9273_v61 = vpop.f32.mrb[73].mxu0  ;;  %v6924_v59 = vpop.f32.mrb[1].mxu1 }
 0x276   : > { %v9277_v13 = vpop.f32.mrb[74].mxu0  ;;  %v6925_v2 = vadd.f32 %v6924_v59, %v6923_v54  ;;  %v6926_v6 = vpop.f32.mrb[2].mxu1  ;;  %v7760_v59 = vld [vmem:[#allocation9 + $0x170] sm:$0xff]  }
 0x277   : > { %10413 = vst [vmem:[#allocation14_spill] sm:$0xff] %v9277_v13  ;;  %v9279_v8 = vpop.f32.mrb[75].mxu0  ;;  %v6927_v32 = vpop.f32.mrb[3].mxu1  ;;  %7275 = vmatprep.subr.bf16.mxu1 %v7760_v59 }
 0x278   : > { %v2939_v21 = vadd.f32 %v6925_v2, %v2778_v55  ;;  %v6928_v43 = vadd.f32 %v6927_v32, %v6926_v6  ;;  %v7761_v55 = vld [vmem:[#allocation9 + $0x130] sm:$0xff]   ;;  %v7764_v6 = vld [vmem:[#allocation9 + $0x178] sm:$0xff]  }
 0x279   : > { %7276 = vmatpush3.bf16.msra.mxu1 %v7761_v55 }
 0x27a   : > { %v3100_v42 = vadd.f32 %v3099_v60, %v2939_v21  ;;  %v2942_v49 = vadd.f32 %v6928_v43, %v2781_v5  ;;  %v2789_v21 = vadd.f32 %v9180_v48, %v9271_v45  ;;  %v2794_v43 = vadd.f32 %v9182_v19, %v9271_v45  ;;  %7277 = vmatprep.subr.bf16.mxu1 %v7764_v6 }
 0x27b   : > { %v9307_v48 = vadd.f32 %v9193_v63, %v9271_v45  ;;  %v9323_v63 = vadd.f32 %v9197_v56, %v9271_v45 }
 0x27c   : > { %v3103_v36 = vadd.f32 %v3102_v38, %v2942_v49  ;;  %v9283_v16 = vpop.f32.mrb[76].mxu0  ;;  %v3226_v53 = vmax.f32 %v3100_v42, 0.0  ;;  %v2786_v38 = vadd.f32 %v9178_v47, %v9271_v45  ;;  %v2797_v47 = vadd.f32 %v9184_v41, %v9271_v45  ;;  %v3428_v41 = vld [vmem:[#allocation3 + $0x48] sm:$0xff] }
 0x27d   : > { %v9285_v24 = vpop.f32.mrb[77].mxu0 }
 0x27e   : > { %v3227_v35 = vmax.f32 %v3103_v36, 0.0  ;;  %v9287_v54 = vpop.f32.mrb[78].mxu0 }
 0x27f   : > { %10414 = vst [vmem:[#allocation15_spill] sm:$0xff] %v9287_v54  ;;  %v6929_v13 = vpop.f32.mrb[4].mxu1  ;;  %v9289_v58 = vpop.f32.mrb[79].mxu0 }
 0x280   : > { %v3258_v2 = vpack.c.bf16 %v3227_v35, %v3226_v53  ;;  %v6930_v60 = vpop.f32.mrb[5].mxu1  ;;  %v9317_v53 = vadd.f32 %v9195_v50, %v9271_v45  ;;  %v3931_v50 = vld [vmem:[#allocation3 + $0x18] sm:$0xff] }
 0x281   : > { %v6931_v32 = vadd.f32 %v6930_v60, %v6929_v13  ;;  %v6932_v5 = vpop.f32.mrb[6].mxu1 }
 0x282   : > { %3274 = vst [vmem:[#allocation3 + $0x20] sm:$0xff] %v3258_v2  ;;  %v3306_v23 = vshrl.u32 %v3258_v2, 16  ;;  %v3309_v46 = vshll.u32 %v3258_v2, 16  ;;  %v6933_v42 = vpop.f32.mrb[7].mxu1  ;;  %5524 = vmatprep.mubr.bf16.mxu1 %v3258_v2  ;;  %v9327_v2 = vadd.f32 %v9199_v18, %v9271_v45  ;;  %v9340_v18 = vadd.f32 %v9203_v33, %v9271_v45 }
 0x283   : > { %v2947_v19 = vadd.f32 %v6931_v32, %v2786_v38  ;;  %v6934_v13 = vadd.f32 %v6933_v42, %v6932_v5  ;;  %v3691_v32 = vld [vmem:[#allocation3 + $0x58] sm:$0xff]  ;;  %v4171_v5 = vld [vmem:[#allocation3 + $0x28] sm:$0xff]  ;;  %v9334_v42 = vadd.f32 %v9201_v51, %v9271_v45 }
 0x284   : > { %v9319_v35 = vpop.f32.mrb[80].mxu0  ;;  %v3308_v59 = vrot.slane %v3306_v23, 7  ;;  %v3575_v55 = vrot.slane %v3309_v46, 1 }
 0x285   : > { %10419 = vst [vmem:[#allocation16_spill] sm:$0xff] %v9319_v35  ;;  %v3108_v60 = vadd.f32 %v9254_v1, %v2947_v19  ;;  %v2950_v6 = vadd.f32 %v6934_v13, %v2789_v21  ;;  %v9330_v38 = vpop.f32.mrb[81].mxu0  ;;  %v9344_v1 = vadd.f32 %v9210_v31, %v9271_v45  ;;  %v9348_v21 = vadd.f32 %v9214_v14, %v9271_v45 }
 0x286   : > { %v9336_v35 = vpop.f32.mrb[82].mxu0  ;;  %v3311_v56 = vor.u32 %v3309_v46, %v3308_v59  ;;  %v3576_v54 = vor.u32 %v3575_v55, %v3306_v23 }
 0x287   : > { %10420 = vst [vmem:[#allocation17_spill] sm:$0xff] %v9336_v35  ;;  %v3111_v19 = vadd.f32 %v9256_v39, %v2950_v6  ;;  %v6935_v51 = vpop.f32.mrb[8].mxu1  ;;  %v9351_v13 = vpop.f32.mrb[83].mxu0  ;;  %v7765_v35 = vld [vmem:[#allocation9 + $0x138] sm:$0xff]   ;;  %v9363_v39 = vadd.f32 %v9218_v44, %v9271_v45  ;;  %v3228_v59 = vmax.f32 %v3108_v60, 0.0  ;;  %v9375_v44 = vadd.f32 %v9224_v27, %v9271_v45 }
 0x288   : > { %10421 = vst [vmem:[#allocation18_spill] sm:$0xff] %v9351_v13  ;;  %v6936_v46 = vpop.f32.mrb[9].mxu1  ;;  %v3429_v23 = vsel %vm9299_vm9, %v3311_v56, %v3428_v41  ;;  %v3932_v33 = vsel %vm9299_vm9, %v3311_v56, %v3931_v50  ;;  %v3692_v31 = vsel %vm9311_vm10, %v3576_v54, %v3691_v32  ;;  %v4172_v14 = vsel %vm9311_vm10, %v3576_v54, %v4171_v5 }
 0x289   : > { %v3229_v55 = vmax.f32 %v3111_v19, 0.0  ;;  %v6937_v6 = vadd.f32 %v6936_v46, %v6935_v51  ;;  %v6938_v13 = vpop.f32.mrb[10].mxu1  ;;  %3430 = vst [vmem:[#allocation3 + $0x48] sm:$0xff] %v3429_v23  ;;  %3933 = vst [vmem:[#allocation3 + $0x18] sm:$0xff] %v3932_v33  ;;  %7278 = vmatpush3.bf16.msra.mxu1 %v7765_v35  ;;  %v9367_v41 = vadd.f32 %v9220_v7, %v9271_v45 }
 0x28a   : > { %3693 = vst [vmem:[#allocation3 + $0x58] sm:$0xff] %v3692_v31  ;;  %4173 = vst [vmem:[#allocation3 + $0x28] sm:$0xff] %v4172_v14  ;;  %v9371_v54 = vadd.f32 %v9222_v62, %v9271_v45  ;;  %v9379_v60 = vadd.f32 %v9226_v10, %v9271_v45  ;;  %v6939_v50 = vpop.f32.mrb[11].mxu1  ;;  %v9383_v35 = vadd.f32 %v9228_v37, %v9271_v45  ;;  %v3431_v14 = vld [vmem:[#allocation3 + $0x90] sm:$0xff] }
 0x28b   : > { %v9385_v32 = vpack.c.bf16 %v3229_v55, %v3228_v59  ;;  %v2955_v7 = vadd.f32 %v6937_v6, %v2794_v43  ;;  %v6940_v5 = vadd.f32 %v6939_v50, %v6938_v13  ;;  %v9389_v62 = vadd.f32 %v9230_v29, %v9271_v45 }
 0x28c   : > { %v9393_v27 = vadd.f32 %v9232_v40, %v9271_v45  ;;  %v9397_v10 = vadd.f32 %v9234_v12, %v9271_v45  ;;  %v9401_v37 = vadd.f32 %v9236_v34, %v9271_v45  ;;  %v9403_v56 = vpop.f32.mrb[84].mxu0  ;;  %v9413_v12 = vadd.f32 %v9238_v57, %v9271_v45 }
 0x28d   : > { %3275 = vst [vmem:[#allocation3 + $0x68] sm:$0xff] %v9385_v32  ;;  %v3313_v43 = vshrl.u32 %v9385_v32, 16  ;;  %v3316_v29 = vshll.u32 %v9385_v32, 16  ;;  %v3116_v19 = vadd.f32 %v9260_v11, %v2955_v7  ;;  %v2958_v40 = vadd.f32 %v6940_v5, %v2797_v47  ;;  %v9409_v51 = vpop.f32.mrb[85].mxu0 }
 0x28e   : > { %v9417_v34 = vadd.f32 %v9240_v28, %v9271_v45  ;;  %v9421_v13 = vadd.f32 %v9242_v0, %v9271_v45  ;;  %v9425_v46 = vadd.f32 %v9244_v30, %v9271_v45  ;;  %v9427_v11 = vpop.f32.mrb[86].mxu0  ;;  %v3934_v28 = vld [vmem:[#allocation3 + $0x60] sm:$0xff]  ;;  %v9434_v59 = vadd.f32 %v9246_v15, %v9271_v45 }
 0x28f   : > { %v4285_v47 = vrot.slane %v3313_v43, 7  ;;  %v3230_v23 = vmax.f32 %v3116_v19, 0.0  ;;  %v3119_v33 = vadd.f32 %v9264_v52, %v2958_v40  ;;  %v6941_v57 = vpop.f32.mrb[12].mxu1  ;;  %v9430_v31 = vpop.f32.mrb[87].mxu0  ;;  %v9438_v0 = vadd.f32 %v9248_v22, %v9271_v45 }
 0x290   : > { %10422 = vst [vmem:[#allocation19_spill] sm:$0xff] %v9417_v34  ;;  %10423 = vst [vmem:[#allocation20_spill] sm:$0xff] %v9421_v13  ;;  %v9442_v30 = vadd.f32 %v9250_v26, %v9271_v45  ;;  %v6942_v55 = vpop.f32.mrb[13].mxu1  ;;  %v3479_v6 = vld [vmem:[#allocation3 + $0x48] sm:$0x1]  ;;  %v3582_v50 = vrot.slane %v3316_v29, 1 }
 0x291   : > { %10424 = vst [vmem:[#allocation21_spill] sm:$0xff] %v9425_v46  ;;  %10425 = vst [vmem:[#allocation22_spill] sm:$0xff] %v9434_v59  ;;  %v3979_v52 = vld [vmem:[#allocation3 + $0x18] sm:$0x1]  ;;  %v4288_v7 = vor.u32 %v4285_v47, %v3316_v29  ;;  %v3231_v5 = vmax.f32 %v3119_v33, 0.0  ;;  %v6943_v19 = vadd.f32 %v6942_v55, %v6941_v57  ;;  %v6944_v40 = vpop.f32.mrb[14].mxu1 }
 0x292   : > { %10426 = vst [vmem:[#allocation23_spill] sm:$0xff] %v9438_v0  ;;  %10427 = vst [vmem:[#allocation24_spill] sm:$0xff] %v9442_v30  ;;  %v3480_v15 = vsel %vm9187_vm4, 0, %v3479_v6  ;;  %v3742_v59 = vld [vmem:[#allocation3 + $0x58] sm:$0x80]  ;;  %v3694_v46 = vld [vmem:[#allocation3 + $0xa0] sm:$0xff]  ;;  %v9450_v30 = vor.u32 %v3582_v50, %v3313_v43 }
 0x293   : > { %v6945_v13 = vpop.f32.mrb[15].mxu1  ;;  %3481 = vst [vmem:[#allocation3 + $0x48] sm:$0x1] %v3480_v15  ;;  %v3980_v22 = vsel %vm9187_vm4, 0, %v3979_v52  ;;  %v3743_v26 = vsel %vm9206_vm8, 0, %v3742_v59  ;;  %v9452_v29 = vpack.c.bf16 %v3231_v5, %v3230_v23  ;;  %v2963_v47 = vadd.f32 %v6943_v19, %v9307_v48  ;;  %v7770_v55 = vld [vmem:[#allocation9 + $0x200] sm:$0xff]  }
 0x294   : > { %v4219_v0 = vld [vmem:[#allocation3 + $0x28] sm:$0x80]  ;;  %v6946_v33 = vadd.f32 %v6945_v13, %v6944_v40  ;;  %3981 = vst [vmem:[#allocation3 + $0x18] sm:$0x1] %v3980_v22  ;;  %3744 = vst [vmem:[#allocation3 + $0x58] sm:$0x80] %v3743_v26  ;;  %v3432_v59 = vsel %vm9299_vm9, %v4288_v7, %v3431_v14  ;;  %v3935_v43 = vsel %vm9299_vm9, %v4288_v7, %v3934_v28  ;;  %7551 = vmatprep.subr.bf16.mxu1 %v7770_v55 }
 0x295   : > { %v4220_v57 = vsel %vm9206_vm8, 0, %v4219_v0  ;;  %v4402_v6 = vld [vmem:[#allocation3 + $0x30] sm:$0xff]  ;;  %v9457_v15 = vpop.f32.mrb[88].mxu0  ;;  %v3695_v48 = vsel %vm9311_vm10, %v9450_v30, %v3694_v46  ;;  %v4497_v13 = vld [vmem:[#allocation3 + $0x68] sm:$0xff]  ;;  %3276 = vst [vmem:[#allocation3 + $0xb0] sm:$0xff] %v9452_v29  ;;  %v3320_v23 = vshrl.u32 %v9452_v29, 16  ;;  %v3124_v52 = vadd.f32 %v9258_v9, %v2963_v47 }
 0x296   : > { %10428 = vst [vmem:[#allocation25_spill] sm:$0xff] %v9457_v15  ;;  %4221 = vst [vmem:[#allocation3 + $0x28] sm:$0x80] %v4220_v57  ;;  %v3323_v0 = vshll.u32 %v9452_v29, 16  ;;  %v2966_v50 = vadd.f32 %v6946_v33, %v9317_v53  ;;  %v9471_v14 = vpop.f32.mrb[89].mxu0  ;;  %v4174_v28 = vld [vmem:[#allocation3 + $0x70] sm:$0xff]  ;;  %v9475_v46 = vadd.f32 %v9252_v20, %v9271_v45  ;;  %v4403_v19 = vsel %vm9299_vm9, %v4288_v7, %v4402_v6 }
 0x297   : > { %3433 = vst [vmem:[#allocation3 + $0x90] sm:$0xff] %v3432_v59  ;;  %3936 = vst [vmem:[#allocation3 + $0x60] sm:$0xff] %v3935_v43  ;;  %v9477_v5 = vpop.f32.mrb[90].mxu0  ;;  %v3232_v40 = vmax.f32 %v3124_v52, 0.0  ;;  %v6947_v22 = vpop.f32.mrb[16].mxu1  ;;  %v3322_v47 = vrot.slane %v3320_v23, 7  ;;  %v4175_v45 = vsel %vm9311_vm10, %v9450_v30, %v4174_v28 }
 0x298   : > { %3696 = vst [vmem:[#allocation3 + $0xa0] sm:$0xff] %v3695_v48  ;;  %4512 = vst [vmem:[#allocation3 + $0x38] sm:$0xff] %v4497_v13  ;;  %v4555_v9 = vrot.slane %v3323_v0, 1  ;;  %v3127_v53 = vadd.f32 %v9262_v4, %v2966_v50  ;;  %v9482_v26 = vpop.f32.mrb[91].mxu0  ;;  %v3434_v33 = vld [vmem:[#allocation3 + $0xd8] sm:$0xff]  ;;  %v3937_v57 = vld [vmem:[#allocation3 + $0xa8] sm:$0xff] }
 0x299   : > { %10429 = vst [vmem:[#allocation26_spill] sm:$0xff] %v9475_v46  ;;  %10430 = vst [vmem:[#allocation27_spill] sm:$0xff] %v9477_v5  ;;  %v6948_v55 = vpop.f32.mrb[17].mxu1  ;;  %v4759_v59 = vld [vmem:[#allocation3 + $0x10] sm:$0xff]  ;;  %v3697_v20 = vld [vmem:[#allocation3 + $0xe8] sm:$0xff]  ;;  %v3325_v13 = vor.u32 %v3323_v0, %v3322_v47 }
 0x29a   : > { %10431 = vst [vmem:[#allocation28_spill] sm:$0xff] %v9482_v26  ;;  %4404 = vst [vmem:[#allocation3 + $0x30] sm:$0xff] %v4403_v19  ;;  %v9487_v43 = vor.u32 %v4555_v9, %v3320_v23  ;;  %v3233_v7 = vmax.f32 %v3127_v53, 0.0  ;;  %v6949_v6 = vadd.f32 %v6948_v55, %v6947_v22  ;;  %v6950_v48 = vpop.f32.mrb[18].mxu1  ;;  %v4766_v4 = vld [vmem:[#allocation3 + $0x48] sm:$0xff]  ;;  %v7751_v52 = vld [vmem:[#allocation9 + $0x180] sm:$0xff]  }
 0x29b   : > { %4176 = vst [vmem:[#allocation3 + $0x70] sm:$0xff] %v4175_v45  ;;  %v4177_v50 = vld [vmem:[#allocation3 + $0xb8] sm:$0xff]  ;;  %v6951_v46 = vpop.f32.mrb[19].mxu1  ;;  %5525 = vmatmul.mubr.bf16.gmra.mrb[68].mxu1 %v4766_v4  ;;  %v7754_v5 = vld [vmem:[#allocation9 + $0x1c8] sm:$0xff]   ;;  %v4663_v28 = vld [vmem:[#allocation3 + $0x40] sm:$0xff]  ;;  %v3435_v22 = vsel %vm9299_vm9, %v3325_v13, %v3434_v33  ;;  %v3938_v47 = vsel %vm9299_vm9, %v3325_v13, %v3937_v57 }
 0x29c   : > { %v4760_v19 = vld [vmem:[#allocation3 + $0x18] sm:$0xff]  ;;  %v9489_v15 = vpack.c.bf16 %v3233_v7, %v3232_v40  ;;  %v2971_v26 = vadd.f32 %v6949_v6, %v9323_v63  ;;  %v6952_v34 = vadd.f32 %v6951_v46, %v6950_v48  ;;  %5532 = vmatprep.mubr.bf16.mxu1 %v9385_v32  ;;  %v4666_v9 = vld [vmem:[#allocation3 + $0x88] sm:$0xff]  ;;  %v3698_v63 = vsel %vm9311_vm10, %v9487_v43, %v3697_v20  ;;  %v9508_v57 = vpop.f32.mrb[92].mxu0  ;;  %v7758_v45 = vld [vmem:[#allocation9 + $0x1d0] sm:$0xff]  }
 0x29d   : > { %5677 = vmatprep.mubr.bf16.mxu0 %v4760_v19  ;;  %v4405_v23 = vld [vmem:[#allocation3 + $0x78] sm:$0xff]  ;;  %v4178_v32 = vsel %vm9311_vm10, %v9487_v43, %v4177_v50  ;;  %3436 = vst [vmem:[#allocation3 + $0xd8] sm:$0xff] %v3435_v22  ;;  %3939 = vst [vmem:[#allocation3 + $0xa8] sm:$0xff] %v3938_v47  ;;  %v7755_v20 = vld [vmem:[#allocation9 + $0x188] sm:$0xff]  }
 0x29e   : > { %5678 = vmatmul.mubr.bf16.vlgmr.msra.gmra.mrb[96].mxu0 %v4759_v59  ;;  %v3482_v0 = vld [vmem:[#allocation3 + $0x90] sm:$0x1]  ;;  %v3982_v53 = vld [vmem:[#allocation3 + $0x60] sm:$0x1]  ;;  %3277 = vst [vmem:[#allocation3 + $0xf8] sm:$0xff] %v9489_v15  ;;  %v3327_v46 = vshrl.u32 %v9489_v15, 16  ;;  %v3132_v33 = vadd.f32 %v9273_v61, %v2971_v26  ;;  %v2974_v59 = vadd.f32 %v6952_v34, %v9327_v2  ;;  %v4406_v4 = vsel %vm9299_vm9, %v3325_v13, %v4405_v23 }
 0x29f   : > { %v3745_v40 = vld [vmem:[#allocation3 + $0xa0] sm:$0x80]  ;;  %v3330_v55 = vshll.u32 %v9489_v15, 16  ;;  %3699 = vst [vmem:[#allocation3 + $0xe8] sm:$0xff] %v3698_v63  ;;  %7376 = vmatpush3.bf16.msra.mxu0 %v7751_v52  ;;  %4179 = vst [vmem:[#allocation3 + $0xb8] sm:$0xff] %v4178_v32  ;;  %v4498_v7 = vld [vmem:[#allocation3 + $0xb0] sm:$0xff]  ;;  %v4667_v23 = vsel %vm9311_vm10, %v9487_v43, %v4666_v9 }
 0x2a0   : > { %v3483_v6 = vsel %vm9187_vm4, 0, %v3482_v0  ;;  %v3983_v48 = vsel %vm9187_vm4, 0, %v3982_v53  ;;  %v3746_v61 = vsel %vm9206_vm8, 0, %v3745_v40  ;;  %v3437_v2 = vld [vmem:[#allocation3 + $0x120] sm:$0xff]  ;;  %7377 = vmatprep.subr.bf16.mxu0 %v7754_v5  ;;  %v9516_v34 = vpop.f32.mrb[93].mxu0  ;;  %4513 = vst [vmem:[#allocation3 + $0x80] sm:$0xff] %v4498_v7  ;;  %v3135_v50 = vadd.f32 %v9279_v8, %v2974_v59 }
 0x2a1   : > { %v4449_v26 = vld [vmem:[#allocation3 + $0x30] sm:$0x1]  ;;  %v3234_v52 = vmax.f32 %v3132_v33, 0.0  ;;  %v6953_v19 = vpop.f32.mrb[20].mxu1  ;;  %3484 = vst [vmem:[#allocation3 + $0x90] sm:$0x1] %v3483_v6  ;;  %v4664_v8 = vsel %vm9311_vm10, %v9450_v30, %v4663_v28 }
 0x2a2   : > { %3984 = vst [vmem:[#allocation3 + $0x60] sm:$0x1] %v3983_v48  ;;  %3747 = vst [vmem:[#allocation3 + $0xa0] sm:$0x80] %v3746_v61  ;;  %v3329_v0 = vrot.slane %v3327_v46, 7  ;;  %v3940_v53 = vld [vmem:[#allocation3 + $0xf0] sm:$0xff] }
 0x2a3   : > { %v3596_v22 = vrot.slane %v3330_v55, 1  ;;  %v9521_v47 = vpop.f32.mrb[94].mxu0  ;;  %4407 = vst [vmem:[#allocation3 + $0x78] sm:$0xff] %v4406_v4  ;;  %v6954_v5 = vpop.f32.mrb[21].mxu1  ;;  %v4222_v63 = vld [vmem:[#allocation3 + $0x70] sm:$0x80]  ;;  %7378 = vmatpush3.bf16.msra.mxu0 %v7755_v20 }
 0x2a4   : > { %v9523_v40 = vpop.f32.mrb[95].mxu0  ;;  %v4450_v13 = vsel %vm9187_vm4, 0, %v4449_v26  ;;  %v3235_v32 = vmax.f32 %v3135_v50, 0.0  ;;  %v6955_v33 = vadd.f32 %v6954_v5, %v6953_v19  ;;  %v6956_v59 = vpop.f32.mrb[22].mxu1  ;;  %v9533_v7 = vor.u32 %v3330_v55, %v3329_v0  ;;  %v3700_v48 = vld [vmem:[#allocation3 + $0x130] sm:$0xff]  ;;  %v4180_v26 = vld [vmem:[#allocation3 + $0x100] sm:$0xff]  ;;  %7379 = vmatprep.subr.bf16.mxu0 %v7758_v45 }
 0x2a5   : > { %v9535_v6 = vor.u32 %v3596_v22, %v3327_v46  ;;  %v7759_v61 = vld [vmem:[#allocation9 + $0x190] sm:$0xff]   ;;  %4451 = vst [vmem:[#allocation3 + $0x30] sm:$0x1] %v4450_v13  ;;  %4665 = vst [vmem:[#allocation3 + $0x40] sm:$0xff] %v4664_v8  ;;  %v6957_v4 = vpop.f32.mrb[23].mxu1  ;;  %v7762_v30 = vld [vmem:[#allocation9 + $0x1d8] sm:$0xff]  }
 0x2a6   : > { %4668 = vst [vmem:[#allocation3 + $0x88] sm:$0xff] %v4667_v23  ;;  %v4223_v43 = vsel %vm9206_vm8, 0, %v4222_v63  ;;  %v9539_v28 = vpack.c.bf16 %v3235_v32, %v3234_v52  ;;  %v2979_v9 = vadd.f32 %v6955_v33, %v9334_v42  ;;  %v6958_v55 = vadd.f32 %v6957_v4, %v6956_v59  ;;  %v7763_v20 = vld [vmem:[#allocation9 + $0x198] sm:$0xff]   ;;  %v4408_v50 = vld [vmem:[#allocation3 + $0xc0] sm:$0xff]  ;;  %v3985_v0 = vld [vmem:[#allocation3 + $0xa8] sm:$0x1] }
 0x2a7   : > { %v3438_v46 = vsel %vm9299_vm9, %v9533_v7, %v3437_v2  ;;  %4224 = vst [vmem:[#allocation3 + $0x70] sm:$0x80] %v4223_v43  ;;  %v3485_v19 = vld [vmem:[#allocation3 + $0xd8] sm:$0x1]  ;;  %v3941_v45 = vsel %vm9299_vm9, %v9533_v7, %v3940_v53  ;;  %v3748_v22 = vld [vmem:[#allocation3 + $0xe8] sm:$0x80]  ;;  %v3701_v42 = vsel %vm9311_vm10, %v9535_v6, %v3700_v48  ;;  %v4181_v52 = vsel %vm9311_vm10, %v9535_v6, %v4180_v26 }
 0x2a8   : > { %3439 = vst [vmem:[#allocation3 + $0x120] sm:$0xff] %v3438_v46  ;;  %3278 = vst [vmem:[#allocation3 + $0x140] sm:$0xff] %v9539_v28  ;;  %v3334_v2 = vshrl.u32 %v9539_v28, 16  ;;  %v3337_v5 = vshll.u32 %v9539_v28, 16  ;;  %v3140_v63 = vadd.f32 %v9266_v3, %v2979_v9  ;;  %v2982_v13 = vadd.f32 %v6958_v55, %v9340_v18  ;;  %7380 = vmatpush3.bf16.msra.mxu0 %v7759_v61  ;;  %v7766_v53 = vld [vmem:[#allocation9 + $0x1e0] sm:$0xff]   ;;  %v4499_v23 = vld [vmem:[#allocation3 + $0xf8] sm:$0xff] }
 0x2a9   : > { %3942 = vst [vmem:[#allocation3 + $0xf0] sm:$0xff] %v3941_v45  ;;  %3702 = vst [vmem:[#allocation3 + $0x130] sm:$0xff] %v3701_v42  ;;  %v4225_v8 = vld [vmem:[#allocation3 + $0xb8] sm:$0x80]  ;;  %v4775_v32 = vld [vmem:[#allocation3 + $0x90] sm:$0xff]  ;;  %v3486_v48 = vsel %vm9187_vm4, 0, %v3485_v19  ;;  %7381 = vmatprep.subr.bf16.mxu0 %v7762_v30  ;;  %v4409_v61 = vsel %vm9299_vm9, %v9533_v7, %v4408_v50 }
 0x2aa   : > { %4182 = vst [vmem:[#allocation3 + $0x100] sm:$0xff] %v4181_v52  ;;  %v4769_v33 = vld [vmem:[#allocation3 + $0x60] sm:$0xff]  ;;  %v4768_v59 = vld [vmem:[#allocation3 + $0x58] sm:$0xff]  ;;  %v3986_v26 = vsel %vm9187_vm4, 0, %v3985_v0  ;;  %v3749_v3 = vsel %vm9206_vm8, 0, %v3748_v22  ;;  %v3440_v18 = vld [vmem:[#allocation3 + $0x168] sm:$0xff]  ;;  %5533 = vmatmul.mubr.bf16.gmra.mrb[72].mxu1 %v4775_v32 }
 0x2ab   : > { %4514 = vst [vmem:[#allocation3 + $0xc8] sm:$0xff] %v4499_v23  ;;  %v3236_v4 = vmax.f32 %v3140_v63, 0.0  ;;  %v10432_v43 = vld [vmem:[#allocation14_spill] sm:$0xff]  ;;  %v6959_v55 = vpop.f32.mrb[24].mxu1  ;;  %5685 = vmatprep.mubr.bf16.mxu0 %v4769_v33  ;;  %3487 = vst [vmem:[#allocation3 + $0xd8] sm:$0x1] %v3486_v48  ;;  %5540 = vmatprep.mubr.bf16.mxu1 %v9452_v29 }
 0x2ac   : > { %v3143_v9 = vadd.f32 %v10432_v43, %v2982_v13  ;;  %3987 = vst [vmem:[#allocation3 + $0xa8] sm:$0x1] %v3986_v26  ;;  %3750 = vst [vmem:[#allocation3 + $0xe8] sm:$0x80] %v3749_v3  ;;  %v3336_v46 = vrot.slane %v3334_v2, 7  ;;  %v3943_v19 = vld [vmem:[#allocation3 + $0x138] sm:$0xff]  ;;  %5686 = vmatmul.mubr.bf16.gmra.mrb[100].mxu0 %v4768_v59 }
 0x2ad   : > { %v3603_v0 = vrot.slane %v3337_v5, 1  ;;  %v3703_v45 = vld [vmem:[#allocation3 + $0x178] sm:$0xff]  ;;  %v4183_v30 = vld [vmem:[#allocation3 + $0x148] sm:$0xff]  ;;  %4410 = vst [vmem:[#allocation3 + $0xc0] sm:$0xff] %v4409_v61  ;;  %v6960_v42 = vpop.f32.mrb[25].mxu1  ;;  %v7767_v7 = vld [vmem:[#allocation9 + $0x1a0] sm:$0xff]   ;;  %7382 = vmatpush3.bf16.msra.mxu0 %v7763_v20 }
 0x2ae   : > { %v4452_v22 = vld [vmem:[#allocation3 + $0x78] sm:$0x1]  ;;  %v4226_v50 = vsel %vm9206_vm8, 0, %v4225_v8  ;;  %v3237_v63 = vmax.f32 %v3143_v9, 0.0  ;;  %v6961_v13 = vadd.f32 %v6960_v42, %v6959_v55  ;;  %v6962_v23 = vpop.f32.mrb[26].mxu1  ;;  %v3339_v32 = vor.u32 %v3337_v5, %v3336_v46  ;;  %7383 = vmatprep.subr.bf16.mxu0 %v7766_v53  ;;  %v7768_v59 = vld [vmem:[#allocation9 + $0x1e8] sm:$0xff]  }
 0x2af   : > { %v4453_v52 = vsel %vm9187_vm4, 0, %v4452_v22  ;;  %v9574_v33 = vor.u32 %v3603_v0, %v3334_v2  ;;  %4227 = vst [vmem:[#allocation3 + $0xb8] sm:$0x80] %v4226_v50  ;;  %v4709_v48 = vld [vmem:[#allocation3 + $0x40] sm:$0x80]  ;;  %v6963_v29 = vpop.f32.mrb[27].mxu1 }
 0x2b0   : > { %4454 = vst [vmem:[#allocation3 + $0x78] sm:$0x1] %v4453_v52  ;;  %v4712_v26 = vld [vmem:[#allocation3 + $0x88] sm:$0x80]  ;;  %v4710_v8 = vsel %vm9206_vm8, 0, %v4709_v48  ;;  %v9580_v61 = vpack.c.bf16 %v3237_v63, %v3236_v4  ;;  %v2987_v5 = vadd.f32 %v6961_v13, %v9344_v1  ;;  %v6964_v2 = vadd.f32 %v6963_v29, %v6962_v23  ;;  %v4500_v0 = vld [vmem:[#allocation3 + $0x140] sm:$0xff] }
 0x2b1   : > { %v4713_v3 = vsel %vm9206_vm8, 0, %v4712_v26  ;;  %v3488_v43 = vld [vmem:[#allocation3 + $0x120] sm:$0x1]  ;;  %v3441_v20 = vsel %vm9299_vm9, %v3339_v32, %v3440_v18  ;;  %v4411_v9 = vld [vmem:[#allocation3 + $0x108] sm:$0xff]  ;;  %4711 = vst [vmem:[#allocation3 + $0x40] sm:$0x80] %v4710_v8  ;;  %v3944_v46 = vsel %vm9299_vm9, %v3339_v32, %v3943_v19  ;;  %v3704_v1 = vsel %vm9311_vm10, %v9574_v33, %v3703_v45  ;;  %7384 = vmatpush3.bf16.msra.mxu0 %v7767_v7 }
 0x2b2   : > { %4714 = vst [vmem:[#allocation3 + $0x88] sm:$0x80] %v4713_v3  ;;  %v3489_v53 = vsel %vm9187_vm4, 0, %v3488_v43  ;;  %v3988_v55 = vld [vmem:[#allocation3 + $0xf0] sm:$0x1]  ;;  %3442 = vst [vmem:[#allocation3 + $0x168] sm:$0xff] %v3441_v20  ;;  %v4184_v18 = vsel %vm9311_vm10, %v9574_v33, %v4183_v30  ;;  %v3148_v50 = vadd.f32 %v9285_v24, %v2987_v5  ;;  %v2990_v19 = vadd.f32 %v6964_v2, %v9348_v21 }
 0x2b3   : > { %v3751_v4 = vld [vmem:[#allocation3 + $0x130] sm:$0x80]  ;;  %3279 = vst [vmem:[#allocation3 + $0x188] sm:$0xff] %v9580_v61  ;;  %v3341_v22 = vshrl.u32 %v9580_v61, 16  ;;  %v3344_v42 = vshll.u32 %v9580_v61, 16  ;;  %3945 = vst [vmem:[#allocation3 + $0x138] sm:$0xff] %v3944_v46  ;;  %7385 = vmatprep.subr.bf16.mxu0 %v7768_v59  ;;  %v4412_v7 = vsel %vm9299_vm9, %v3339_v32, %v4411_v9 }
 0x2b4   : > { %3490 = vst [vmem:[#allocation3 + $0x120] sm:$0x1] %v3489_v53  ;;  %3705 = vst [vmem:[#allocation3 + $0x178] sm:$0xff] %v3704_v1  ;;  %v7769_v45 = vld [vmem:[#allocation9 + $0x1a8] sm:$0xff]   ;;  %v7771_v52 = vld [vmem:[#allocation9 + $0x1f0] sm:$0xff]   ;;  %v3989_v26 = vsel %vm9187_vm4, 0, %v3988_v55  ;;  %v3151_v8 = vadd.f32 %v9289_v58, %v2990_v19 }
 0x2b5   : > { %v4228_v63 = vld [vmem:[#allocation3 + $0x100] sm:$0x80]  ;;  %4185 = vst [vmem:[#allocation3 + $0x148] sm:$0xff] %v4184_v18  ;;  %4515 = vst [vmem:[#allocation3 + $0x110] sm:$0xff] %v4500_v0  ;;  %v4669_v30 = vld [vmem:[#allocation3 + $0xd0] sm:$0xff]  ;;  %v3752_v24 = vsel %vm9206_vm8, 0, %v3751_v4  ;;  %7386 = vmatpush3.bf16.msra.mxu0 %v7769_v45 }
 0x2b6   : > { %v4784_v13 = vld [vmem:[#allocation3 + $0xd8] sm:$0xff]  ;;  %v4778_v23 = vld [vmem:[#allocation3 + $0xa8] sm:$0xff]  ;;  %v4777_v48 = vld [vmem:[#allocation3 + $0xa0] sm:$0xff]  ;;  %v4229_v21 = vsel %vm9206_vm8, 0, %v4228_v63  ;;  %v3238_v29 = vmax.f32 %v3148_v50, 0.0  ;;  %v6965_v3 = vpop.f32.mrb[28].mxu1  ;;  %7387 = vmatprep.subr.bf16.mxu0 %v7771_v52  ;;  %v4670_v19 = vsel %vm9311_vm10, %v9535_v6, %v4669_v30 }
 0x2b7   : > { %5541 = vmatmul.mubr.bf16.gmra.mrb[76].mxu1 %v4784_v13  ;;  %5693 = vmatprep.mubr.bf16.mxu0 %v4778_v23  ;;  %3990 = vst [vmem:[#allocation3 + $0xf0] sm:$0x1] %v3989_v26  ;;  %3753 = vst [vmem:[#allocation3 + $0x130] sm:$0x80] %v3752_v24  ;;  %v3343_v5 = vrot.slane %v3341_v22, 7  ;;  %v3610_v2 = vrot.slane %v3344_v42, 1 }
 0x2b8   : > { %4230 = vst [vmem:[#allocation3 + $0x100] sm:$0x80] %v4229_v21  ;;  %v4455_v43 = vld [vmem:[#allocation3 + $0xc0] sm:$0x1]  ;;  %4413 = vst [vmem:[#allocation3 + $0x108] sm:$0xff] %v4412_v7  ;;  %v6966_v59 = vpop.f32.mrb[29].mxu1  ;;  %5548 = vmatprep.mubr.bf16.mxu1 %v9489_v15  ;;  %5694 = vmatmul.mubr.bf16.gmra.mrb[104].mxu0 %v4777_v48 }
 0x2b9   : > { %v3443_v20 = vld [vmem:[#allocation3 + $0x1b0] sm:$0xff]  ;;  %v3946_v53 = vld [vmem:[#allocation3 + $0x180] sm:$0xff]  ;;  %v4456_v32 = vsel %vm9187_vm4, 0, %v4455_v43  ;;  %v3239_v58 = vmax.f32 %v3151_v8, 0.0  ;;  %v6967_v9 = vadd.f32 %v6966_v59, %v6965_v3  ;;  %v6968_v55 = vpop.f32.mrb[30].mxu1  ;;  %v3346_v46 = vor.u32 %v3344_v42, %v3343_v5  ;;  %v7773_v15 = vld [vmem:[#allocation9 + $0x1f8] sm:$0xff]  }
 0x2ba   : > { %v9612_v4 = vor.u32 %v3610_v2, %v3341_v22  ;;  %v3706_v1 = vld [vmem:[#allocation3 + $0x1c0] sm:$0xff]  ;;  %v7772_v18 = vld [vmem:[#allocation9 + $0x1b0] sm:$0xff]   ;;  %4457 = vst [vmem:[#allocation3 + $0xc0] sm:$0x1] %v4456_v32  ;;  %v6969_v50 = vpop.f32.mrb[31].mxu1  ;;  %4671 = vst [vmem:[#allocation3 + $0xd0] sm:$0xff] %v4670_v19 }
 0x2bb   : > { %v4186_v0 = vld [vmem:[#allocation3 + $0x190] sm:$0xff]  ;;  %v9617_v63 = vpack.c.bf16 %v3239_v58, %v3238_v29  ;;  %v2995_v13 = vadd.f32 %v6967_v9, %v9363_v39  ;;  %v6970_v23 = vadd.f32 %v6969_v50, %v6968_v55  ;;  %v3491_v42 = vld [vmem:[#allocation3 + $0x168] sm:$0x1]  ;;  %v3444_v22 = vsel %vm9299_vm9, %v3346_v46, %v3443_v20  ;;  %v4793_v48 = vld [vmem:[#allocation3 + $0x120] sm:$0xff]  ;;  %7388 = vmatpush3.bf16.msra.mxu0 %v7772_v18 }
 0x2bc   : > { %v4414_v45 = vld [vmem:[#allocation3 + $0x150] sm:$0xff]  ;;  %v3492_v52 = vsel %vm9187_vm4, 0, %v3491_v42  ;;  %v3991_v26 = vld [vmem:[#allocation3 + $0x138] sm:$0x1]  ;;  %3445 = vst [vmem:[#allocation3 + $0x1b0] sm:$0xff] %v3444_v22  ;;  %v3947_v6 = vsel %vm9299_vm9, %v3346_v46, %v3946_v53  ;;  %v3707_v39 = vsel %vm9311_vm10, %v9612_v4, %v3706_v1  ;;  %v4187_v24 = vsel %vm9311_vm10, %v9612_v4, %v4186_v0  ;;  %v4501_v2 = vld [vmem:[#allocation3 + $0x188] sm:$0xff]  ;;  %7389 = vmatprep.subr.bf16.mxu0 %v7773_v15 }
 0x2bd   : > { %v3754_v30 = vld [vmem:[#allocation3 + $0x178] sm:$0x80]  ;;  %3280 = vst [vmem:[#allocation3 + $0x1d0] sm:$0xff] %v9617_v63  ;;  %v3348_v21 = vshrl.u32 %v9617_v63, 16  ;;  %v3351_v7 = vshll.u32 %v9617_v63, 16  ;;  %v3156_v29 = vadd.f32 %v9283_v16, %v2995_v13  ;;  %v2998_v8 = vadd.f32 %v6970_v23, %v9367_v41  ;;  %3948 = vst [vmem:[#allocation3 + $0x180] sm:$0xff] %v3947_v6 }
 0x2be   : > { %3493 = vst [vmem:[#allocation3 + $0x168] sm:$0x1] %v3492_v52  ;;  %3708 = vst [vmem:[#allocation3 + $0x1c0] sm:$0xff] %v3707_v39  ;;  %v7774_v3 = vld [vmem:[#allocation9 + $0x1b8] sm:$0xff]   ;;  %v4231_v5 = vld [vmem:[#allocation3 + $0x148] sm:$0x80]  ;;  %v4415_v41 = vsel %vm9299_vm9, %v3346_v46, %v4414_v45 }
 0x2bf   : > { %4188 = vst [vmem:[#allocation3 + $0x190] sm:$0xff] %v4187_v24  ;;  %v4787_v43 = vld [vmem:[#allocation3 + $0xf0] sm:$0xff]  ;;  %v4786_v59 = vld [vmem:[#allocation3 + $0xe8] sm:$0xff]  ;;  %v3992_v20 = vsel %vm9187_vm4, 0, %v3991_v26  ;;  %v3755_v53 = vsel %vm9206_vm8, 0, %v3754_v30  ;;  %v4232_v16 = vsel %vm9206_vm8, 0, %v4231_v5  ;;  %5549 = vmatmul.mubr.bf16.gmra.mrb[80].mxu1 %v4793_v48  ;;  %7390 = vmatpush3.bf16.msra.mxu0 %v7774_v3 }
 0x2c0   : > { %4516 = vst [vmem:[#allocation3 + $0x158] sm:$0xff] %v4501_v2  ;;  %v4672_v32 = vld [vmem:[#allocation3 + $0x118] sm:$0xff]  ;;  %v3240_v58 = vmax.f32 %v3156_v29, 0.0  ;;  %v10433_v9 = vld [vmem:[#allocation15_spill] sm:$0xff]  ;;  %v6971_v1 = vpop.f32.mrb[32].mxu1  ;;  %5701 = vmatprep.mubr.bf16.mxu0 %v4787_v43  ;;  %v3350_v18 = vrot.slane %v3348_v21, 7  ;;  %5556 = vmatprep.mubr.bf16.mxu1 %v9539_v28 }
 0x2c1   : > { %v3159_v55 = vadd.f32 %v10433_v9, %v2998_v8  ;;  %3993 = vst [vmem:[#allocation3 + $0x138] sm:$0x1] %v3992_v20  ;;  %3756 = vst [vmem:[#allocation3 + $0x178] sm:$0x80] %v3755_v53  ;;  %v3617_v0 = vrot.slane %v3351_v7, 1  ;;  %v6972_v15 = vpop.f32.mrb[33].mxu1  ;;  %5702 = vmatmul.mubr.bf16.gmra.mrb[108].mxu0 %v4786_v59  ;;  %v4673_v28 = vsel %vm9311_vm10, %v9574_v33, %v4672_v32 }
 0x2c2   : > { %4233 = vst [vmem:[#allocation3 + $0x148] sm:$0x80] %v4232_v16  ;;  %v4458_v50 = vld [vmem:[#allocation3 + $0x108] sm:$0x1]  ;;  %4416 = vst [vmem:[#allocation3 + $0x150] sm:$0xff] %v4415_v41  ;;  %v3446_v19 = vld [vmem:[#allocation3 + $0x1f8] sm:$0xff]  ;;  %v6973_v23 = vadd.f32 %v6972_v15, %v6971_v1  ;;  %v3353_v22 = vor.u32 %v3351_v7, %v3350_v18 }
 0x2c3   : > { %v4459_v46 = vsel %vm9187_vm4, 0, %v4458_v50  ;;  %v3241_v13 = vmax.f32 %v3159_v55, 0.0  ;;  %v6974_v42 = vpop.f32.mrb[34].mxu1  ;;  %v3949_v45 = vld [vmem:[#allocation3 + $0x1c8] sm:$0xff]  ;;  %v9649_v48 = vor.u32 %v3617_v0, %v3348_v21  ;;  %v4189_v26 = vld [vmem:[#allocation3 + $0x1d8] sm:$0xff]  ;;  %4674 = vst [vmem:[#allocation3 + $0x118] sm:$0xff] %v4673_v28 }
 0x2c4   : > { %v3709_v52 = vld [vmem:[#allocation3 + $0x208] sm:$0xff]  ;;  %4460 = vst [vmem:[#allocation3 + $0x108] sm:$0x1] %v4459_v46  ;;  %v6975_v6 = vpop.f32.mrb[35].mxu1  ;;  %v3003_v39 = vadd.f32 %v6973_v23, %v9371_v54  ;;  %v3494_v29 = vld [vmem:[#allocation3 + $0x1b0] sm:$0x1]  ;;  %v3447_v7 = vsel %vm9299_vm9, %v3353_v22, %v3446_v19  ;;  %v3950_v33 = vsel %vm9299_vm9, %v3353_v22, %v3949_v45 }
 0x2c5   : > { %v9654_v30 = vpack.c.bf16 %v3241_v13, %v3240_v58  ;;  %v6976_v24 = vadd.f32 %v6975_v6, %v6974_v42  ;;  %v4417_v21 = vld [vmem:[#allocation3 + $0x198] sm:$0xff]  ;;  %v4715_v8 = vld [vmem:[#allocation3 + $0xd0] sm:$0x80]  ;;  %v4802_v3 = vld [vmem:[#allocation3 + $0x168] sm:$0xff]  ;;  %v3495_v5 = vsel %vm9187_vm4, 0, %v3494_v29  ;;  %3448 = vst [vmem:[#allocation3 + $0x1f8] sm:$0xff] %v3447_v7  ;;  %v3710_v54 = vsel %vm9311_vm10, %v9649_v48, %v3709_v52 }
 0x2c6   : > { %v3994_v2 = vld [vmem:[#allocation3 + $0x180] sm:$0x1]  ;;  %v3757_v43 = vld [vmem:[#allocation3 + $0x1c0] sm:$0x80]  ;;  %v4190_v59 = vsel %vm9311_vm10, %v9649_v48, %v4189_v26  ;;  %v3164_v16 = vadd.f32 %v9330_v38, %v3003_v39  ;;  %3496 = vst [vmem:[#allocation3 + $0x1b0] sm:$0x1] %v3495_v5  ;;  %v4418_v38 = vsel %vm9299_vm9, %v3353_v22, %v4417_v21 }
 0x2c7   : > { %3281 = vst [vmem:[#allocation3 + $0x218] sm:$0xff] %v9654_v30  ;;  %v3355_v20 = vshrl.u32 %v9654_v30, 16  ;;  %v3358_v53 = vshll.u32 %v9654_v30, 16  ;;  %v3006_v41 = vadd.f32 %v6976_v24, %v9375_v44  ;;  %3951 = vst [vmem:[#allocation3 + $0x1c8] sm:$0xff] %v3950_v33  ;;  %v4234_v32 = vld [vmem:[#allocation3 + $0x190] sm:$0x80]  ;;  %5557 = vmatmul.mubr.bf16.gmra.mrb[84].mxu1 %v4802_v3 }
 0x2c8   : > { %3711 = vst [vmem:[#allocation3 + $0x208] sm:$0xff] %v3710_v54  ;;  %4191 = vst [vmem:[#allocation3 + $0x1d8] sm:$0xff] %v4190_v59  ;;  %v4502_v58 = vld [vmem:[#allocation3 + $0x1d0] sm:$0xff]  ;;  %v4796_v9 = vld [vmem:[#allocation3 + $0x138] sm:$0xff]  ;;  %v3995_v1 = vsel %vm9187_vm4, 0, %v3994_v2  ;;  %v3758_v18 = vsel %vm9206_vm8, 0, %v3757_v43  ;;  %5564 = vmatprep.mubr.bf16.mxu1 %v9580_v61 }
 0x2c9   : > { %v4795_v55 = vld [vmem:[#allocation3 + $0x130] sm:$0xff]  ;;  %v4235_v0 = vsel %vm9206_vm8, 0, %v4234_v32  ;;  %4517 = vst [vmem:[#allocation3 + $0x1a0] sm:$0xff] %v4502_v58  ;;  %v3242_v44 = vmax.f32 %v3164_v16, 0.0  ;;  %v10434_v50 = vld [vmem:[#allocation18_spill] sm:$0xff]  ;;  %v6977_v19 = vpop.f32.mrb[36].mxu1  ;;  %5709 = vmatprep.mubr.bf16.mxu0 %v4796_v9 }
 0x2ca   : > { %v3167_v15 = vadd.f32 %v10434_v50, %v3006_v41  ;;  %3996 = vst [vmem:[#allocation3 + $0x180] sm:$0x1] %v3995_v1  ;;  %3759 = vst [vmem:[#allocation3 + $0x1c0] sm:$0x80] %v3758_v18  ;;  %v3357_v46 = vrot.slane %v3355_v20, 7  ;;  %v3624_v13 = vrot.slane %v3358_v53, 1  ;;  %5710 = vmatmul.mubr.bf16.gmra.mrb[112].mxu0 %v4795_v55 }
 0x2cb   : > { %4236 = vst [vmem:[#allocation3 + $0x190] sm:$0x80] %v4235_v0  ;;  %v4461_v23 = vld [vmem:[#allocation3 + $0x150] sm:$0x1]  ;;  %4419 = vst [vmem:[#allocation3 + $0x198] sm:$0xff] %v4418_v38  ;;  %v6978_v42 = vpop.f32.mrb[37].mxu1 }
 0x2cc   : > { %v3449_v45 = vld [vmem:[#allocation3 + $0x240] sm:$0xff]  ;;  %v4462_v22 = vsel %vm9187_vm4, 0, %v4461_v23  ;;  %v4716_v52 = vsel %vm9206_vm8, 0, %v4715_v8  ;;  %v3243_v26 = vmax.f32 %v3167_v15, 0.0  ;;  %v6979_v6 = vadd.f32 %v6978_v42, %v6977_v19  ;;  %v6980_v28 = vpop.f32.mrb[38].mxu1  ;;  %v3952_v24 = vld [vmem:[#allocation3 + $0x210] sm:$0xff] }
 0x2cd   : > { %v3360_v39 = vor.u32 %v3358_v53, %v3357_v46  ;;  %v9688_v29 = vor.u32 %v3624_v13, %v3355_v20  ;;  %v3712_v7 = vld [vmem:[#allocation3 + $0x250] sm:$0xff]  ;;  %4463 = vst [vmem:[#allocation3 + $0x150] sm:$0x1] %v4462_v22  ;;  %v4192_v21 = vld [vmem:[#allocation3 + $0x220] sm:$0xff]  ;;  %4717 = vst [vmem:[#allocation3 + $0xd0] sm:$0x80] %v4716_v52 }
 0x2ce   : > { %v6981_v61 = vpop.f32.mrb[39].mxu1  ;;  %v9690_v3 = vpack.c.bf16 %v3243_v26, %v3242_v44  ;;  %v3011_v5 = vadd.f32 %v6979_v6, %v9379_v60  ;;  %v3497_v33 = vld [vmem:[#allocation3 + $0x1f8] sm:$0x1]  ;;  %v4420_v43 = vld [vmem:[#allocation3 + $0x1e0] sm:$0xff]  ;;  %v4811_v59 = vld [vmem:[#allocation3 + $0x1b0] sm:$0xff] }
 0x2cf   : > { %v6982_v2 = vadd.f32 %v6981_v61, %v6980_v28  ;;  %v3450_v8 = vsel %vm9299_vm9, %v3360_v39, %v3449_v45  ;;  %v4675_v54 = vld [vmem:[#allocation3 + $0x160] sm:$0xff]  ;;  %v3498_v20 = vsel %vm9187_vm4, 0, %v3497_v33  ;;  %v3997_v53 = vld [vmem:[#allocation3 + $0x1c8] sm:$0x1]  ;;  %v3953_v16 = vsel %vm9299_vm9, %v3360_v39, %v3952_v24  ;;  %v3760_v41 = vld [vmem:[#allocation3 + $0x208] sm:$0x80]  ;;  %5565 = vmatmul.mubr.bf16.gmra.mrb[88].mxu1 %v4811_v59 }
 0x2d0   : > { %3451 = vst [vmem:[#allocation3 + $0x240] sm:$0xff] %v3450_v8  ;;  %v3713_v60 = vsel %vm9311_vm10, %v9688_v29, %v3712_v7  ;;  %v4193_v32 = vsel %vm9311_vm10, %v9688_v29, %v4192_v21  ;;  %3282 = vst [vmem:[#allocation3 + $0x260] sm:$0xff] %v9690_v3  ;;  %v3362_v58 = vshrl.u32 %v9690_v3, 16  ;;  %v3365_v9 = vshll.u32 %v9690_v3, 16  ;;  %v10435_v55 = vld [vmem:[#allocation16_spill] sm:$0xff]  ;;  %v4804_v0 = vld [vmem:[#allocation3 + $0x178] sm:$0xff]  ;;  %5572 = vmatprep.mubr.bf16.mxu1 %v9617_v63 }
 0x2d1   : > { %v3172_v1 = vadd.f32 %v10435_v55, %v3011_v5  ;;  %v3014_v18 = vadd.f32 %v6982_v2, %v9383_v35  ;;  %3499 = vst [vmem:[#allocation3 + $0x1f8] sm:$0x1] %v3498_v20  ;;  %3954 = vst [vmem:[#allocation3 + $0x210] sm:$0xff] %v3953_v16  ;;  %v4237_v38 = vld [vmem:[#allocation3 + $0x1d8] sm:$0x80]  ;;  %v4805_v50 = vld [vmem:[#allocation3 + $0x180] sm:$0xff]  ;;  %v4421_v35 = vsel %vm9299_vm9, %v3360_v39, %v4420_v43 }
 0x2d2   : > { %3714 = vst [vmem:[#allocation3 + $0x250] sm:$0xff] %v3713_v60  ;;  %4194 = vst [vmem:[#allocation3 + $0x220] sm:$0xff] %v4193_v32  ;;  %v4503_v44 = vld [vmem:[#allocation3 + $0x218] sm:$0xff]  ;;  %v3998_v15 = vsel %vm9187_vm4, 0, %v3997_v53  ;;  %v3761_v19 = vsel %vm9206_vm8, 0, %v3760_v41  ;;  %v4238_v46 = vsel %vm9206_vm8, 0, %v4237_v38  ;;  %5717 = vmatprep.mubr.bf16.mxu0 %v4805_v50  ;;  %v4676_v7 = vsel %vm9311_vm10, %v9612_v4, %v4675_v54 }
 0x2d3   : > { %4518 = vst [vmem:[#allocation3 + $0x1e8] sm:$0xff] %v4503_v44  ;;  %v4718_v13 = vld [vmem:[#allocation3 + $0x118] sm:$0x80]  ;;  %v3244_v23 = vmax.f32 %v3172_v1, 0.0  ;;  %v6983_v22 = vpop.f32.mrb[40].mxu1  ;;  %v3364_v52 = vrot.slane %v3362_v58, 7  ;;  %5718 = vmatmul.mubr.bf16.gmra.mrb[116].mxu0 %v4804_v0 }
 0x2d4   : > { %v10436_v42 = vld [vmem:[#allocation17_spill] sm:$0xff]  ;;  %3999 = vst [vmem:[#allocation3 + $0x1c8] sm:$0x1] %v3998_v15  ;;  %3762 = vst [vmem:[#allocation3 + $0x208] sm:$0x80] %v3761_v19  ;;  %v3631_v26 = vrot.slane %v3365_v9, 1 }
 0x2d5   : > { %v3175_v45 = vadd.f32 %v10436_v42, %v3014_v18  ;;  %4239 = vst [vmem:[#allocation3 + $0x1d8] sm:$0x80] %v4238_v46  ;;  %v4464_v6 = vld [vmem:[#allocation3 + $0x198] sm:$0x1]  ;;  %4422 = vst [vmem:[#allocation3 + $0x1e0] sm:$0xff] %v4421_v35  ;;  %v6984_v28 = vpop.f32.mrb[41].mxu1  ;;  %v3367_v2 = vor.u32 %v3365_v9, %v3364_v52 }
 0x2d6   : > { %v3452_v24 = vld [vmem:[#allocation3 + $0x288] sm:$0xff]  ;;  %v4465_v39 = vsel %vm9187_vm4, 0, %v4464_v6  ;;  %v6985_v61 = vadd.f32 %v6984_v28, %v6983_v22  ;;  %v6986_v5 = vpop.f32.mrb[42].mxu1  ;;  %v3955_v33 = vld [vmem:[#allocation3 + $0x258] sm:$0xff]  ;;  %v9725_v8 = vor.u32 %v3631_v26, %v3362_v58  ;;  %4677 = vst [vmem:[#allocation3 + $0x160] sm:$0xff] %v4676_v7  ;;  %v4719_v20 = vsel %vm9206_vm8, 0, %v4718_v13 }
 0x2d7   : > { %v3245_v21 = vmax.f32 %v3175_v45, 0.0  ;;  %v3715_v43 = vld [vmem:[#allocation3 + $0x298] sm:$0xff]  ;;  %4466 = vst [vmem:[#allocation3 + $0x198] sm:$0x1] %v4465_v39  ;;  %v4195_v59 = vld [vmem:[#allocation3 + $0x268] sm:$0xff]  ;;  %v6987_v63 = vpop.f32.mrb[43].mxu1  ;;  %v3453_v41 = vsel %vm9299_vm9, %v3367_v2, %v3452_v24  ;;  %v3956_v55 = vsel %vm9299_vm9, %v3367_v2, %v3955_v33 }
 0x2d8   : > { %v3019_v16 = vadd.f32 %v6985_v61, %v9389_v62  ;;  %v6988_v4 = vadd.f32 %v6987_v63, %v6986_v5  ;;  %v3500_v54 = vld [vmem:[#allocation3 + $0x240] sm:$0x1]  ;;  %v4423_v60 = vld [vmem:[#allocation3 + $0x228] sm:$0xff]  ;;  %4720 = vst [vmem:[#allocation3 + $0x118] sm:$0x80] %v4719_v20  ;;  %v4820_v32 = vld [vmem:[#allocation3 + $0x1f8] sm:$0xff]  ;;  %v3716_v62 = vsel %vm9311_vm10, %v9725_v8, %v3715_v43  ;;  %v4196_v18 = vsel %vm9311_vm10, %v9725_v8, %v4195_v59 }
 0x2d9   : > { %v9729_v53 = vpack.c.bf16 %v3245_v21, %v3244_v23  ;;  %v3501_v58 = vsel %vm9187_vm4, 0, %v3500_v54  ;;  %v4000_v9 = vld [vmem:[#allocation3 + $0x210] sm:$0x1]  ;;  %3454 = vst [vmem:[#allocation3 + $0x288] sm:$0xff] %v3453_v41  ;;  %v3763_v1 = vld [vmem:[#allocation3 + $0x250] sm:$0x80]  ;;  %5573 = vmatmul.mubr.bf16.gmra.mrb[92].mxu1 %v4820_v32 }
 0x2da   : > { %v3180_v44 = vadd.f32 %v9409_v51, %v3019_v16  ;;  %v3022_v50 = vadd.f32 %v6988_v4, %v9393_v27  ;;  %3502 = vst [vmem:[#allocation3 + $0x240] sm:$0x1] %v3501_v58  ;;  %3957 = vst [vmem:[#allocation3 + $0x258] sm:$0xff] %v3956_v55  ;;  %v4240_v15 = vld [vmem:[#allocation3 + $0x220] sm:$0x80]  ;;  %v4678_v46 = vld [vmem:[#allocation3 + $0x1a8] sm:$0xff]  ;;  %v4424_v27 = vsel %vm9299_vm9, %v3367_v2, %v4423_v60  ;;  %5580 = vmatprep.mubr.bf16.mxu1 %v9654_v30 }
 0x2db   : > { %3283 = vst [vmem:[#allocation3 + $0x2a8] sm:$0xff] %v9729_v53  ;;  %v3369_v0 = vshrl.u32 %v9729_v53, 16  ;;  %v3372_v38 = vshll.u32 %v9729_v53, 16  ;;  %3717 = vst [vmem:[#allocation3 + $0x298] sm:$0xff] %v3716_v62  ;;  %v4504_v19 = vld [vmem:[#allocation3 + $0x260] sm:$0xff]  ;;  %v4814_v35 = vld [vmem:[#allocation3 + $0x1c8] sm:$0xff] }
 0x2dc   : > { %4197 = vst [vmem:[#allocation3 + $0x268] sm:$0xff] %v4196_v18  ;;  %v4813_v13 = vld [vmem:[#allocation3 + $0x1c0] sm:$0xff]  ;;  %v4001_v23 = vsel %vm9187_vm4, 0, %v4000_v9  ;;  %v3764_v42 = vsel %vm9206_vm8, 0, %v3763_v1  ;;  %v4241_v51 = vsel %vm9206_vm8, 0, %v4240_v15  ;;  %4519 = vst [vmem:[#allocation3 + $0x230] sm:$0xff] %v4504_v19  ;;  %v3183_v22 = vadd.f32 %v9430_v31, %v3022_v50  ;;  %5725 = vmatprep.mubr.bf16.mxu0 %v4814_v35 }
 0x2dd   : > { %v3246_v45 = vmax.f32 %v3180_v44, 0.0  ;;  %v6989_v52 = vpop.f32.mrb[44].mxu1  ;;  %4002 = vst [vmem:[#allocation3 + $0x210] sm:$0x1] %v4001_v23  ;;  %3765 = vst [vmem:[#allocation3 + $0x250] sm:$0x80] %v3764_v42  ;;  %5726 = vmatmul.mubr.bf16.gmra.mrb[120].mxu0 %v4813_v13  ;;  %v4679_v31 = vsel %vm9311_vm10, %v9649_v48, %v4678_v46 }
 0x2de   : > { %v3371_v26 = vrot.slane %v3369_v0, 7  ;;  %v3638_v6 = vrot.slane %v3372_v38, 1  ;;  %4242 = vst [vmem:[#allocation3 + $0x220] sm:$0x80] %v4241_v51  ;;  %v4467_v28 = vld [vmem:[#allocation3 + $0x1e0] sm:$0x1] }
 0x2df   : > { %4425 = vst [vmem:[#allocation3 + $0x228] sm:$0xff] %v4424_v27  ;;  %v6990_v24 = vpop.f32.mrb[45].mxu1  ;;  %v3455_v39 = vld [vmem:[#allocation3 + $0x2d0] sm:$0xff]  ;;  %v3958_v7 = vld [vmem:[#allocation3 + $0x2a0] sm:$0xff]  ;;  %v4468_v21 = vsel %vm9187_vm4, 0, %v4467_v28  ;;  %v3247_v61 = vmax.f32 %v3183_v22, 0.0 }
 0x2e0   : > { %v6991_v5 = vadd.f32 %v6990_v24, %v6989_v52  ;;  %v6992_v2 = vpop.f32.mrb[46].mxu1  ;;  %v3374_v33 = vor.u32 %v3372_v38, %v3371_v26  ;;  %v9764_v43 = vor.u32 %v3638_v6, %v3369_v0  ;;  %v3718_v59 = vld [vmem:[#allocation3 + $0x2e0] sm:$0xff]  ;;  %4469 = vst [vmem:[#allocation3 + $0x1e0] sm:$0x1] %v4468_v21  ;;  %v4198_v63 = vld [vmem:[#allocation3 + $0x2b0] sm:$0xff]  ;;  %4680 = vst [vmem:[#allocation3 + $0x1a8] sm:$0xff] %v4679_v31 }
 0x2e1   : > { %v4721_v30 = vld [vmem:[#allocation3 + $0x160] sm:$0x80]  ;;  %v6993_v20 = vpop.f32.mrb[47].mxu1  ;;  %v9768_v4 = vpack.c.bf16 %v3247_v61, %v3246_v45  ;;  %v3503_v41 = vld [vmem:[#allocation3 + $0x288] sm:$0x1]  ;;  %v4426_v32 = vld [vmem:[#allocation3 + $0x270] sm:$0xff] }
 0x2e2   : > { %v4722_v16 = vsel %vm9206_vm8, 0, %v4721_v30  ;;  %v3027_v54 = vadd.f32 %v6991_v5, %v9397_v10  ;;  %v6994_v48 = vadd.f32 %v6993_v20, %v6992_v2  ;;  %v3456_v60 = vsel %vm9299_vm9, %v3374_v33, %v3455_v39  ;;  %v4829_v58 = vld [vmem:[#allocation3 + $0x240] sm:$0xff]  ;;  %v4003_v55 = vld [vmem:[#allocation3 + $0x258] sm:$0x1]  ;;  %v3766_v62 = vld [vmem:[#allocation3 + $0x298] sm:$0x80] }
 0x2e3   : > { %4723 = vst [vmem:[#allocation3 + $0x160] sm:$0x80] %v4722_v16  ;;  %v3504_v9 = vsel %vm9187_vm4, 0, %v3503_v41  ;;  %3457 = vst [vmem:[#allocation3 + $0x2d0] sm:$0xff] %v3456_v60  ;;  %v3959_v1 = vsel %vm9299_vm9, %v3374_v33, %v3958_v7  ;;  %v3719_v10 = vsel %vm9311_vm10, %v9764_v43, %v3718_v59  ;;  %v4199_v18 = vsel %vm9311_vm10, %v9764_v43, %v4198_v63  ;;  %v4243_v15 = vld [vmem:[#allocation3 + $0x268] sm:$0x80] }
 0x2e4   : > { %3284 = vst [vmem:[#allocation3 + $0x2f0] sm:$0xff] %v9768_v4  ;;  %v3376_v0 = vshrl.u32 %v9768_v4, 16  ;;  %v3379_v38 = vshll.u32 %v9768_v4, 16  ;;  %v3188_v44 = vadd.f32 %v9403_v56, %v3027_v54  ;;  %v3030_v50 = vadd.f32 %v6994_v48, %v9401_v37  ;;  %3505 = vst [vmem:[#allocation3 + $0x288] sm:$0x1] %v3504_v9  ;;  %v4505_v19 = vld [vmem:[#allocation3 + $0x2a8] sm:$0xff]  ;;  %5581 = vmatmul.mubr.bf16.gmra.mrb[96].mxu1 %v4829_v58 }
 0x2e5   : > { %3960 = vst [vmem:[#allocation3 + $0x2a0] sm:$0xff] %v3959_v1  ;;  %3720 = vst [vmem:[#allocation3 + $0x2e0] sm:$0xff] %v3719_v10  ;;  %v4823_v46 = vld [vmem:[#allocation3 + $0x210] sm:$0xff]  ;;  %v4822_v35 = vld [vmem:[#allocation3 + $0x208] sm:$0xff]  ;;  %v4004_v13 = vsel %vm9187_vm4, 0, %v4003_v55  ;;  %v3767_v23 = vsel %vm9206_vm8, 0, %v3766_v62  ;;  %v4427_v37 = vsel %vm9299_vm9, %v3374_v33, %v4426_v32  ;;  %5588 = vmatprep.mubr.bf16.mxu1 %v9690_v3 }
 0x2e6   : > { %4200 = vst [vmem:[#allocation3 + $0x2b0] sm:$0xff] %v4199_v18  ;;  %v4244_v42 = vsel %vm9206_vm8, 0, %v4243_v15  ;;  %4520 = vst [vmem:[#allocation3 + $0x278] sm:$0xff] %v4505_v19  ;;  %v4681_v56 = vld [vmem:[#allocation3 + $0x1f0] sm:$0xff]  ;;  %v3248_v51 = vmax.f32 %v3188_v44, 0.0  ;;  %v3191_v27 = vadd.f32 %v9427_v11, %v3030_v50  ;;  %v6995_v45 = vpop.f32.mrb[48].mxu1  ;;  %5733 = vmatprep.mubr.bf16.mxu0 %v4823_v46 }
 0x2e7   : > { %4005 = vst [vmem:[#allocation3 + $0x258] sm:$0x1] %v4004_v13  ;;  %3768 = vst [vmem:[#allocation3 + $0x298] sm:$0x80] %v3767_v23  ;;  %v3378_v22 = vrot.slane %v3376_v0, 7  ;;  %v3645_v52 = vrot.slane %v3379_v38, 1  ;;  %5734 = vmatmul.mubr.bf16.gmra.mrb[124].mxu0 %v4822_v35  ;;  %v4682_v63 = vsel %vm9311_vm10, %v9688_v29, %v4681_v56 }
 0x2e8   : > { %4245 = vst [vmem:[#allocation3 + $0x268] sm:$0x80] %v4244_v42  ;;  %v4470_v26 = vld [vmem:[#allocation3 + $0x228] sm:$0x1]  ;;  %4428 = vst [vmem:[#allocation3 + $0x270] sm:$0xff] %v4427_v37  ;;  %v6996_v6 = vpop.f32.mrb[49].mxu1 }
 0x2e9   : > { %v3458_v28 = vld [vmem:[#allocation3 + $0x318] sm:$0xff]  ;;  %v3961_v24 = vld [vmem:[#allocation3 + $0x2e8] sm:$0xff]  ;;  %v4471_v39 = vsel %vm9187_vm4, 0, %v4470_v26  ;;  %v3249_v11 = vmax.f32 %v3191_v27, 0.0  ;;  %v6997_v7 = vadd.f32 %v6996_v6, %v6995_v45  ;;  %v6998_v21 = vpop.f32.mrb[50].mxu1  ;;  %v3381_v31 = vor.u32 %v3379_v38, %v3378_v22  ;;  %4683 = vst [vmem:[#allocation3 + $0x1f0] sm:$0xff] %v4682_v63 }
 0x2ea   : > { %v9800_v61 = vor.u32 %v3645_v52, %v3376_v0  ;;  %v3721_v5 = vld [vmem:[#allocation3 + $0x328] sm:$0xff]  ;;  %4472 = vst [vmem:[#allocation3 + $0x228] sm:$0x1] %v4471_v39  ;;  %v4201_v2 = vld [vmem:[#allocation3 + $0x2f8] sm:$0xff]  ;;  %v6999_v59 = vpop.f32.mrb[51].mxu1  ;;  %v4831_v15 = vld [vmem:[#allocation3 + $0x250] sm:$0xff] }
 0x2eb   : > { %v4724_v33 = vld [vmem:[#allocation3 + $0x1a8] sm:$0x80]  ;;  %v9807_v30 = vpack.c.bf16 %v3249_v11, %v3248_v51  ;;  %v3035_v20 = vadd.f32 %v6997_v7, %v9413_v12  ;;  %v7000_v16 = vadd.f32 %v6999_v59, %v6998_v21  ;;  %v3506_v54 = vld [vmem:[#allocation3 + $0x2d0] sm:$0x1]  ;;  %v3459_v48 = vsel %vm9299_vm9, %v3381_v31, %v3458_v28  ;;  %v4429_v41 = vld [vmem:[#allocation3 + $0x2b8] sm:$0xff]  ;;  %v7001_v37 = vpop.f32.mrb[52].mxu1 }
 0x2ec   : > { %v4725_v3 = vsel %vm9206_vm8, 0, %v4724_v33  ;;  %v4838_v60 = vld [vmem:[#allocation3 + $0x288] sm:$0xff]  ;;  %v3507_v32 = vsel %vm9187_vm4, 0, %v3506_v54  ;;  %v4006_v58 = vld [vmem:[#allocation3 + $0x2a0] sm:$0x1]  ;;  %3460 = vst [vmem:[#allocation3 + $0x318] sm:$0xff] %v3459_v48  ;;  %v3962_v29 = vsel %vm9299_vm9, %v3381_v31, %v3961_v24  ;;  %v3722_v12 = vsel %vm9311_vm10, %v9800_v61, %v3721_v5 }
 0x2ed   : > { %4726 = vst [vmem:[#allocation3 + $0x1a8] sm:$0x80] %v4725_v3  ;;  %v3769_v9 = vld [vmem:[#allocation3 + $0x2e0] sm:$0x80]  ;;  %v4202_v55 = vsel %vm9311_vm10, %v9800_v61, %v4201_v2  ;;  %3285 = vst [vmem:[#allocation3 + $0x338] sm:$0xff] %v9807_v30  ;;  %v3383_v1 = vshrl.u32 %v9807_v30, 16  ;;  %v3196_v10 = vadd.f32 %v9471_v14, %v3035_v20  ;;  %v4430_v35 = vsel %vm9299_vm9, %v3381_v31, %v4429_v41 }
 0x2ee   : > { %v3386_v62 = vshll.u32 %v9807_v30, 16  ;;  %v10437_v18 = vld [vmem:[#allocation19_spill] sm:$0xff]  ;;  %3508 = vst [vmem:[#allocation3 + $0x2d0] sm:$0x1] %v3507_v32  ;;  %3963 = vst [vmem:[#allocation3 + $0x2e8] sm:$0xff] %v3962_v29  ;;  %v9827_v44 = vld [vmem:[#allocation3 + $0x2f0] sm:$0xff]  ;;  %5589 = vmatmul.mubr.bf16.gmra.mrb[100].mxu1 %v4838_v60 }
 0x2ef   : > { %v3038_v0 = vadd.f32 %v7000_v16, %v10437_v18  ;;  %3723 = vst [vmem:[#allocation3 + $0x328] sm:$0xff] %v3722_v12  ;;  %v4246_v38 = vld [vmem:[#allocation3 + $0x2b0] sm:$0x80]  ;;  %4203 = vst [vmem:[#allocation3 + $0x2f8] sm:$0xff] %v4202_v55  ;;  %v4832_v50 = vld [vmem:[#allocation3 + $0x258] sm:$0xff]  ;;  %v4007_v19 = vsel %vm9187_vm4, 0, %v4006_v58  ;;  %5596 = vmatprep.mubr.bf16.mxu1 %v9729_v53 }
 0x2f0   : > { %v3770_v46 = vsel %vm9206_vm8, 0, %v3769_v9  ;;  %v4247_v14 = vsel %vm9206_vm8, 0, %v4246_v38  ;;  %v3250_v13 = vmax.f32 %v3196_v10, 0.0  ;;  %v10438_v23 = vld [vmem:[#allocation28_spill] sm:$0xff]  ;;  %5741 = vmatprep.mubr.bf16.mxu0 %v4832_v50  ;;  %4008 = vst [vmem:[#allocation3 + $0x2a0] sm:$0x1] %v4007_v19 }
 0x2f1   : > { %v3199_v42 = vadd.f32 %v10438_v23, %v3038_v0  ;;  %3771 = vst [vmem:[#allocation3 + $0x2e0] sm:$0x80] %v3770_v46  ;;  %v3385_v56 = vrot.slane %v3383_v1, 7  ;;  %v3652_v51 = vrot.slane %v3386_v62, 1  ;;  %4248 = vst [vmem:[#allocation3 + $0x2b0] sm:$0x80] %v4247_v14  ;;  %5742 = vmatmul.mubr.bf16.gmra.mrb[128].mxu0 %v4831_v15 }
 0x2f2   : > { %v4473_v27 = vld [vmem:[#allocation3 + $0x270] sm:$0x1]  ;;  %4431 = vst [vmem:[#allocation3 + $0x2b8] sm:$0xff] %v4430_v35  ;;  %v7002_v45 = vpop.f32.mrb[53].mxu1  ;;  %v3461_v22 = vld [vmem:[#allocation3 + $0x360] sm:$0xff]  ;;  %v10440_v9 = vld [vmem:[#allocation25_spill] sm:$0xff] }
 0x2f3   : > { %v4474_v52 = vsel %vm9187_vm4, 0, %v4473_v27  ;;  %v3251_v26 = vmax.f32 %v3199_v42, 0.0  ;;  %v7003_v6 = vadd.f32 %v7002_v45, %v7001_v37  ;;  %v7004_v28 = vpop.f32.mrb[54].mxu1  ;;  %v3388_v24 = vor.u32 %v3386_v62, %v3385_v56  ;;  %v3964_v39 = vld [vmem:[#allocation3 + $0x330] sm:$0xff]  ;;  %v4204_v21 = vld [vmem:[#allocation3 + $0x340] sm:$0xff]  ;;  %v10441_v55 = vld [vmem:[#allocation21_spill] sm:$0xff] }
 0x2f4   : > { %v9841_v11 = vor.u32 %v3652_v51, %v3383_v1  ;;  %v3724_v7 = vld [vmem:[#allocation3 + $0x370] sm:$0xff]  ;;  %4475 = vst [vmem:[#allocation3 + $0x270] sm:$0x1] %v4474_v52  ;;  %v7005_v31 = vpop.f32.mrb[55].mxu1  ;;  %v3509_v59 = vld [vmem:[#allocation3 + $0x318] sm:$0x1] }
 0x2f5   : > { %v9843_v5 = vpack.c.bf16 %v3251_v26, %v3250_v13  ;;  %v10439_v2 = vld [vmem:[#allocation20_spill] sm:$0xff]  ;;  %v7006_v33 = vadd.f32 %v7005_v31, %v7004_v28  ;;  %v3462_v3 = vsel %vm9299_vm9, %v3388_v24, %v3461_v22  ;;  %v4432_v63 = vld [vmem:[#allocation3 + $0x300] sm:$0xff]  ;;  %v3510_v16 = vsel %vm9187_vm4, 0, %v3509_v59  ;;  %v4009_v54 = vld [vmem:[#allocation3 + $0x2e8] sm:$0x1]  ;;  %v7007_v23 = vpop.f32.mrb[56].mxu1 }
 0x2f6   : > { %v3043_v53 = vadd.f32 %v7003_v6, %v10439_v2  ;;  %v4847_v20 = vld [vmem:[#allocation3 + $0x2d0] sm:$0xff]  ;;  %3463 = vst [vmem:[#allocation3 + $0x360] sm:$0xff] %v3462_v3  ;;  %v3965_v48 = vsel %vm9299_vm9, %v3388_v24, %v3964_v39  ;;  %v3772_v41 = vld [vmem:[#allocation3 + $0x328] sm:$0x80]  ;;  %v3725_v60 = vsel %vm9311_vm10, %v9841_v11, %v3724_v7  ;;  %v4205_v32 = vsel %vm9311_vm10, %v9841_v11, %v4204_v21  ;;  %v4249_v62 = vld [vmem:[#allocation3 + $0x2f8] sm:$0x80] }
 0x2f7   : > { %3286 = vst [vmem:[#allocation3 + $0x380] sm:$0xff] %v9843_v5  ;;  %v3390_v58 = vshrl.u32 %v9843_v5, 16  ;;  %v3393_v29 = vshll.u32 %v9843_v5, 16  ;;  %v3046_v1 = vadd.f32 %v7006_v33, %v10441_v55  ;;  %3511 = vst [vmem:[#allocation3 + $0x318] sm:$0x1] %v3510_v16  ;;  %v9863_v10 = vld [vmem:[#allocation3 + $0x338] sm:$0xff]  ;;  %v4433_v46 = vsel %vm9299_vm9, %v3388_v24, %v4432_v63  ;;  %5597 = vmatmul.mubr.bf16.gmra.mrb[104].mxu1 %v4847_v20 }
 0x2f8   : > { %v3204_v12 = vadd.f32 %v10440_v9, %v3043_v53  ;;  %3966 = vst [vmem:[#allocation3 + $0x330] sm:$0xff] %v3965_v48  ;;  %3726 = vst [vmem:[#allocation3 + $0x370] sm:$0xff] %v3725_v60  ;;  %v4684_v18 = vld [vmem:[#allocation3 + $0x238] sm:$0xff]  ;;  %v4841_v0 = vld [vmem:[#allocation3 + $0x2a0] sm:$0xff]  ;;  %v4010_v50 = vsel %vm9187_vm4, 0, %v4009_v54  ;;  %v3773_v15 = vsel %vm9206_vm8, 0, %v3772_v41  ;;  %5604 = vmatprep.mubr.bf16.mxu1 %v9768_v4 }
 0x2f9   : > { %4206 = vst [vmem:[#allocation3 + $0x340] sm:$0xff] %v4205_v32  ;;  %v4840_v38 = vld [vmem:[#allocation3 + $0x298] sm:$0xff]  ;;  %v4250_v19 = vsel %vm9206_vm8, 0, %v4249_v62  ;;  %v10442_v35 = vld [vmem:[#allocation27_spill] sm:$0xff]  ;;  %5749 = vmatprep.mubr.bf16.mxu0 %v4841_v0  ;;  %4011 = vst [vmem:[#allocation3 + $0x2e8] sm:$0x1] %v4010_v50  ;;  %v4685_v22 = vsel %vm9311_vm10, %v9725_v8, %v4684_v18 }
 0x2fa   : > { %v3252_v14 = vmax.f32 %v3204_v12, 0.0  ;;  %v3207_v13 = vadd.f32 %v10442_v35, %v3046_v1  ;;  %3774 = vst [vmem:[#allocation3 + $0x328] sm:$0x80] %v3773_v15  ;;  %v3392_v42 = vrot.slane %v3390_v58, 7  ;;  %v3659_v37 = vrot.slane %v3393_v29, 1  ;;  %4434 = vst [vmem:[#allocation3 + $0x300] sm:$0xff] %v4433_v46  ;;  %5750 = vmatmul.mubr.bf16.gmra.mrb[132].mxu0 %v4840_v38 }
 0x2fb   : > { %4251 = vst [vmem:[#allocation3 + $0x2f8] sm:$0x80] %v4250_v19  ;;  %v4727_v56 = vld [vmem:[#allocation3 + $0x1f0] sm:$0x80]  ;;  %v7008_v51 = vpop.f32.mrb[57].mxu1  ;;  %v3464_v27 = vld [vmem:[#allocation3 + $0x3a8] sm:$0xff] }
 0x2fc   : > { %v4476_v45 = vld [vmem:[#allocation3 + $0x2b8] sm:$0x1]  ;;  %v3253_v52 = vmax.f32 %v3207_v13, 0.0  ;;  %v7009_v26 = vadd.f32 %v7008_v51, %v7007_v23  ;;  %v7010_v6 = vpop.f32.mrb[58].mxu1  ;;  %v3395_v28 = vor.u32 %v3393_v29, %v3392_v42  ;;  %v9878_v39 = vor.u32 %v3659_v37, %v3390_v58  ;;  %v4207_v21 = vld [vmem:[#allocation3 + $0x388] sm:$0xff]  ;;  %4686 = vst [vmem:[#allocation3 + $0x238] sm:$0xff] %v4685_v22 }
 0x2fd   : > { %v3967_v24 = vld [vmem:[#allocation3 + $0x378] sm:$0xff]  ;;  %v7011_v31 = vpop.f32.mrb[59].mxu1  ;;  %v4477_v4 = vsel %vm9187_vm4, 0, %v4476_v45  ;;  %v4728_v2 = vsel %vm9206_vm8, 0, %v4727_v56  ;;  %v10443_v8 = vld [vmem:[#allocation22_spill] sm:$0xff]  ;;  %v4435_v20 = vld [vmem:[#allocation3 + $0x348] sm:$0xff] }
 0x2fe   : > { %v3727_v7 = vld [vmem:[#allocation3 + $0x3b8] sm:$0xff]  ;;  %v9884_v53 = vpack.c.bf16 %v3253_v52, %v3252_v14  ;;  %v3051_v33 = vadd.f32 %v7009_v26, %v10443_v8  ;;  %v7012_v59 = vadd.f32 %v7011_v31, %v7010_v6  ;;  %v3512_v3 = vld [vmem:[#allocation3 + $0x360] sm:$0x1]  ;;  %v3465_v63 = vsel %vm9299_vm9, %v3395_v28, %v3464_v27  ;;  %4478 = vst [vmem:[#allocation3 + $0x2b8] sm:$0x1] %v4477_v4  ;;  %v10444_v55 = vld [vmem:[#allocation23_spill] sm:$0xff] }
 0x2ff   : > { %4729 = vst [vmem:[#allocation3 + $0x1f0] sm:$0x80] %v4728_v2  ;;  %v4856_v16 = vld [vmem:[#allocation3 + $0x318] sm:$0xff]  ;;  %v3513_v54 = vsel %vm9187_vm4, 0, %v3512_v3  ;;  %v4012_v48 = vld [vmem:[#allocation3 + $0x330] sm:$0x1]  ;;  %v3968_v41 = vsel %vm9299_vm9, %v3395_v28, %v3967_v24  ;;  %v3728_v32 = vsel %vm9311_vm10, %v9878_v39, %v3727_v7  ;;  %v4208_v58 = vsel %vm9311_vm10, %v9878_v39, %v4207_v21 }
 0x300   : > { %3466 = vst [vmem:[#allocation3 + $0x3a8] sm:$0xff] %v3465_v63  ;;  %v3775_v60 = vld [vmem:[#allocation3 + $0x370] sm:$0x80]  ;;  %3287 = vst [vmem:[#allocation3 + $0x3c8] sm:$0xff] %v9884_v53  ;;  %v3397_v29 = vshrl.u32 %v9884_v53, 16  ;;  %v3400_v9 = vshll.u32 %v9884_v53, 16  ;;  %v3212_v12 = vadd.f32 %v9516_v34, %v3051_v33  ;;  %v3054_v1 = vadd.f32 %v7012_v59, %v10444_v55  ;;  %5605 = vmatmul.mubr.bf16.gmra.mrb[108].mxu1 %v4856_v16 }
 0x301   : > { %3514 = vst [vmem:[#allocation3 + $0x360] sm:$0x1] %v3513_v54  ;;  %3969 = vst [vmem:[#allocation3 + $0x378] sm:$0xff] %v3968_v41  ;;  %v4252_v62 = vld [vmem:[#allocation3 + $0x340] sm:$0x80]  ;;  %v4850_v38 = vld [vmem:[#allocation3 + $0x2e8] sm:$0xff]  ;;  %v4436_v14 = vsel %vm9299_vm9, %v3395_v28, %v4435_v20  ;;  %5612 = vmatprep.mubr.bf16.mxu1 %v9807_v30 }
 0x302   : > { %3729 = vst [vmem:[#allocation3 + $0x3b8] sm:$0xff] %v3728_v32  ;;  %4209 = vst [vmem:[#allocation3 + $0x388] sm:$0xff] %v4208_v58  ;;  %v9904_v18 = vld [vmem:[#allocation3 + $0x380] sm:$0xff]  ;;  %v4013_v15 = vsel %vm9187_vm4, 0, %v4012_v48  ;;  %v3776_v19 = vsel %vm9206_vm8, 0, %v3775_v60  ;;  %v3467_v46 = vld [vmem:[#allocation3 + $0x3f0] sm:$0xff]  ;;  %v3215_v13 = vadd.f32 %v9523_v40, %v3054_v1  ;;  %5757 = vmatprep.mubr.bf16.mxu0 %v4850_v38 }
 0x303   : > { %v4687_v0 = vld [vmem:[#allocation3 + $0x280] sm:$0xff]  ;;  %v4253_v34 = vsel %vm9206_vm8, 0, %v4252_v62  ;;  %v3254_v35 = vmax.f32 %v3212_v12, 0.0  ;;  %v7013_v23 = vpop.f32.mrb[60].mxu1  ;;  %4014 = vst [vmem:[#allocation3 + $0x330] sm:$0x1] %v4013_v15 }
 0x304   : > { %v4849_v50 = vld [vmem:[#allocation3 + $0x2e0] sm:$0xff]  ;;  %3777 = vst [vmem:[#allocation3 + $0x370] sm:$0x80] %v3776_v19  ;;  %v3399_v42 = vrot.slane %v3397_v29, 7  ;;  %v3666_v37 = vrot.slane %v3400_v9, 1  ;;  %4437 = vst [vmem:[#allocation3 + $0x348] sm:$0xff] %v4436_v14  ;;  %v4688_v40 = vsel %vm9311_vm10, %v9764_v43, %v4687_v0 }
 0x305   : > { %4254 = vst [vmem:[#allocation3 + $0x340] sm:$0x80] %v4253_v34  ;;  %v4479_v56 = vld [vmem:[#allocation3 + $0x300] sm:$0x1]  ;;  %v7014_v51 = vpop.f32.mrb[61].mxu1  ;;  %5758 = vmatmul.mubr.bf16.gmra.mrb[136].mxu0 %v4849_v50  ;;  %v3255_v22 = vmax.f32 %v3215_v13, 0.0 }
 0x306   : > { %v4480_v27 = vsel %vm9187_vm4, 0, %v4479_v56  ;;  %v4730_v45 = vld [vmem:[#allocation3 + $0x238] sm:$0x80]  ;;  %v7015_v52 = vadd.f32 %v7014_v51, %v7013_v23  ;;  %v7016_v26 = vpop.f32.mrb[62].mxu1  ;;  %v3402_v6 = vor.u32 %v3400_v9, %v3399_v42  ;;  %v3970_v28 = vld [vmem:[#allocation3 + $0x3c0] sm:$0xff]  ;;  %v9921_v24 = vor.u32 %v3666_v37, %v3397_v29  ;;  %v4210_v21 = vld [vmem:[#allocation3 + $0x3d0] sm:$0xff] }
 0x307   : > { %v3730_v7 = vld [vmem:[#allocation3 + $0x400] sm:$0xff]  ;;  %4481 = vst [vmem:[#allocation3 + $0x300] sm:$0x1] %v4480_v27  ;;  %4689 = vst [vmem:[#allocation3 + $0x280] sm:$0xff] %v4688_v40  ;;  %v7017_v30 = vpop.f32.mrb[63].mxu1  ;;  %v4731_v31 = vsel %vm9206_vm8, 0, %v4730_v45  ;;  %v9925_v4 = vpack.c.bf16 %v3255_v22, %v3254_v35 }
 0x308   : > { %v10445_v2 = vld [vmem:[#allocation24_spill] sm:$0xff]  ;;  %v7018_v43 = vadd.f32 %v7017_v30, %v7016_v26  ;;  %v3515_v33 = vld [vmem:[#allocation3 + $0x3a8] sm:$0x1]  ;;  %v3468_v59 = vsel %vm9299_vm9, %v3402_v6, %v3467_v46  ;;  %4732 = vst [vmem:[#allocation3 + $0x238] sm:$0x80] %v4731_v31  ;;  %v4865_v63 = vld [vmem:[#allocation3 + $0x360] sm:$0xff]  ;;  %v3971_v54 = vsel %vm9299_vm9, %v3402_v6, %v3970_v28  ;;  %v3731_v41 = vsel %vm9311_vm10, %v9921_v24, %v3730_v7 }
 0x309   : > { %v3059_v8 = vadd.f32 %v7015_v52, %v10445_v2  ;;  %v4438_v3 = vld [vmem:[#allocation3 + $0x390] sm:$0xff]  ;;  %v3516_v20 = vsel %vm9187_vm4, 0, %v3515_v33  ;;  %v4015_v16 = vld [vmem:[#allocation3 + $0x378] sm:$0x1]  ;;  %3469 = vst [vmem:[#allocation3 + $0x3f0] sm:$0xff] %v3468_v59  ;;  %v4211_v60 = vsel %vm9311_vm10, %v9921_v24, %v4210_v21  ;;  %3288 = vst [vmem:[#allocation3 + $0x410] sm:$0xff] %v9925_v4  ;;  %5613 = vmatmul.mubr.bf16.gmra.mrb[112].mxu1 %v4865_v63 }
 0x30a   : > { %v3778_v48 = vld [vmem:[#allocation3 + $0x3b8] sm:$0x80]  ;;  %v3404_v32 = vshrl.u32 %v9925_v4, 16  ;;  %v3407_v58 = vshll.u32 %v9925_v4, 16  ;;  %v10446_v9 = vld [vmem:[#allocation26_spill] sm:$0xff]  ;;  %3972 = vst [vmem:[#allocation3 + $0x3c0] sm:$0xff] %v3971_v54  ;;  %v4439_v19 = vsel %vm9299_vm9, %v3402_v6, %v4438_v3  ;;  %5620 = vmatprep.mubr.bf16.mxu1 %v9843_v5 }
 0x30b   : > { %v3220_v29 = vadd.f32 %v9508_v57, %v3059_v8  ;;  %v3062_v12 = vadd.f32 %v7018_v43, %v10446_v9  ;;  %3517 = vst [vmem:[#allocation3 + $0x3a8] sm:$0x1] %v3516_v20  ;;  %3732 = vst [vmem:[#allocation3 + $0x400] sm:$0xff] %v3731_v41  ;;  %v4255_v55 = vld [vmem:[#allocation3 + $0x388] sm:$0x80]  ;;  %v4859_v62 = vld [vmem:[#allocation3 + $0x330] sm:$0xff] }
 0x30c   : > { %4212 = vst [vmem:[#allocation3 + $0x3d0] sm:$0xff] %v4211_v60  ;;  %v9945_v1 = vld [vmem:[#allocation3 + $0x3c8] sm:$0xff]  ;;  %v4016_v0 = vsel %vm9187_vm4, 0, %v4015_v16  ;;  %v3779_v38 = vsel %vm9206_vm8, 0, %v3778_v48  ;;  %v3470_v50 = vld [vmem:[#allocation3 + $0x438] sm:$0xff]  ;;  %v4256_v57 = vsel %vm9206_vm8, 0, %v4255_v55  ;;  %5765 = vmatprep.mubr.bf16.mxu0 %v4859_v62 }
 0x30d   : > { %v3973_v15 = vld [vmem:[#allocation3 + $0x408] sm:$0xff]  ;;  %v3406_v46 = vrot.slane %v3404_v32, 7  ;;  %v3673_v34 = vrot.slane %v3407_v58, 1  ;;  %4017 = vst [vmem:[#allocation3 + $0x378] sm:$0x1] %v4016_v0  ;;  %v7055_v35 = vpop.f32.mrb[64].mxu1  ;;  %v3223_v23 = vadd.f32 %v9521_v47, %v3062_v12 }
 0x30e   : > { %v4858_v14 = vld [vmem:[#allocation3 + $0x328] sm:$0xff]  ;;  %3780 = vst [vmem:[#allocation3 + $0x3b8] sm:$0x80] %v3779_v38  ;;  %4257 = vst [vmem:[#allocation3 + $0x388] sm:$0x80] %v4256_v57  ;;  %v3256_v13 = vmax.f32 %v3220_v29, 0.0 }
 0x30f   : > { %4440 = vst [vmem:[#allocation3 + $0x390] sm:$0xff] %v4439_v19  ;;  %5766 = vmatmul.mubr.bf16.gmra.mrb[140].mxu0 %v4858_v14  ;;  %v3733_v42 = vld [vmem:[#allocation3 + $0x448] sm:$0xff]  ;;  %v7056_v37 = vpop.f32.mrb[65].mxu1  ;;  %v3409_v51 = vor.u32 %v3407_v58, %v3406_v46  ;;  %v3674_v27 = vor.u32 %v3673_v34, %v3404_v32  ;;  %v4213_v40 = vld [vmem:[#allocation3 + $0x418] sm:$0xff]  ;;  %v4733_v22 = vld [vmem:[#allocation3 + $0x280] sm:$0x80] }
 0x310   : > { %v4482_v56 = vld [vmem:[#allocation3 + $0x348] sm:$0x1]  ;;  %v7058_v45 = vpop.f32.mrb[66].mxu1  ;;  %v3257_v52 = vmax.f32 %v3223_v23, 0.0  ;;  %v9957_v26 = vadd.f32 %v7056_v37, %v7055_v35  ;;  %v4441_v7 = vld [vmem:[#allocation3 + $0x3d8] sm:$0xff]  ;;  %v4734_v47 = vsel %vm9206_vm8, 0, %v4733_v22 }
 0x311   : > { %v7059_v6 = vpop.f32.mrb[67].mxu1  ;;  %v4483_v28 = vsel %vm9187_vm4, 0, %v4482_v56  ;;  %v3518_v5 = vld [vmem:[#allocation3 + $0x3f0] sm:$0x1]  ;;  %v3471_v21 = vsel %vm9299_vm9, %v3409_v51, %v3470_v50  ;;  %v3974_v30 = vsel %vm9299_vm9, %v3409_v51, %v3973_v15  ;;  %v3734_v31 = vsel %vm9311_vm10, %v3674_v27, %v3733_v42  ;;  %4735 = vst [vmem:[#allocation3 + $0x280] sm:$0x80] %v4734_v47 }
 0x312   : > { %v9969_v2 = vadd.f32 %v7059_v6, %v7058_v45  ;;  %4484 = vst [vmem:[#allocation3 + $0x348] sm:$0x1] %v4483_v28  ;;  %v4690_v8 = vld [vmem:[#allocation3 + $0x2c8] sm:$0xff]  ;;  %v3273_v33 = vpack.c.bf16 %v3257_v52, %v3256_v13  ;;  %v3519_v3 = vsel %vm9187_vm4, 0, %v3518_v5  ;;  %v4018_v63 = vld [vmem:[#allocation3 + $0x3c0] sm:$0x1]  ;;  %v4214_v16 = vsel %vm9311_vm10, %v3674_v27, %v4213_v40 }
 0x313   : > { %v4702_v43 = vld [vmem:[#allocation3 + $0x3e8] sm:$0xff]  ;;  %3472 = vst [vmem:[#allocation3 + $0x438] sm:$0xff] %v3471_v21  ;;  %3975 = vst [vmem:[#allocation3 + $0x408] sm:$0xff] %v3974_v30  ;;  %v3781_v20 = vld [vmem:[#allocation3 + $0x400] sm:$0x80]  ;;  %v4019_v54 = vsel %vm9187_vm4, 0, %v4018_v63  ;;  %v4442_v32 = vsel %vm9299_vm9, %v3409_v51, %v4441_v7  ;;  %v4691_v55 = vsel %vm9311_vm10, %v9800_v61, %v4690_v8 }
 0x314   : > { %v4874_v59 = vld [vmem:[#allocation3 + $0x3a8] sm:$0xff]  ;;  %3735 = vst [vmem:[#allocation3 + $0x448] sm:$0xff] %v3734_v31  ;;  %3520 = vst [vmem:[#allocation3 + $0x3f0] sm:$0x1] %v3519_v3  ;;  %v3782_v48 = vsel %vm9206_vm8, 0, %v3781_v20  ;;  %v9979_v60 = vld [vmem:[#allocation3 + $0x410] sm:$0xff]  ;;  %v4703_v50 = vsel %vm9311_vm10, %v3674_v27, %v4702_v43 }
 0x315   : > { %v4258_v41 = vld [vmem:[#allocation3 + $0x3d0] sm:$0x80]  ;;  %4215 = vst [vmem:[#allocation3 + $0x418] sm:$0xff] %v4214_v16  ;;  %3289 = vst [vmem:[#allocation3 + $0x458] sm:$0xff] %v3273_v33  ;;  %v3909_v58 = vshrl.u32 %v3273_v33, 16  ;;  %v3912_v29 = vshll.u32 %v3273_v33, 16  ;;  %5621 = vmatmul.mubr.bf16.gmra.mrb[116].mxu1 %v4874_v59 }
 0x316   : > { %v4868_v9 = vld [vmem:[#allocation3 + $0x378] sm:$0xff]  ;;  %4020 = vst [vmem:[#allocation3 + $0x3c0] sm:$0x1] %v4019_v54  ;;  %3783 = vst [vmem:[#allocation3 + $0x400] sm:$0x80] %v3782_v48  ;;  %v4259_v12 = vsel %vm9206_vm8, 0, %v4258_v41  ;;  %5628 = vmatprep.mubr.bf16.mxu1 %v9884_v53 }
 0x317   : > { %4443 = vst [vmem:[#allocation3 + $0x3d8] sm:$0xff] %v4442_v32  ;;  %v4693_v62 = vld [vmem:[#allocation3 + $0x310] sm:$0xff]  ;;  %5773 = vmatprep.mubr.bf16.mxu0 %v4868_v9  ;;  %4260 = vst [vmem:[#allocation3 + $0x3d0] sm:$0x80] %v4259_v12  ;;  %v3911_v15 = vrot.slane %v3909_v58, 7  ;;  %v4153_v19 = vrot.slane %v3912_v29, 1 }
 0x318   : > { %v4867_v0 = vld [vmem:[#allocation3 + $0x370] sm:$0xff]  ;;  %4692 = vst [vmem:[#allocation3 + $0x2c8] sm:$0xff] %v4691_v55  ;;  %v4696_v46 = vld [vmem:[#allocation3 + $0x358] sm:$0xff]  ;;  %v4699_v61 = vld [vmem:[#allocation3 + $0x3a0] sm:$0xff]  ;;  %v4694_v14 = vsel %vm9311_vm10, %v9841_v11, %v4693_v62 }
 0x319   : > { %v4485_v38 = vld [vmem:[#allocation3 + $0x390] sm:$0x1]  ;;  %5774 = vmatmul.mubr.bf16.gmra.mrb[144].mxu0 %v4867_v0  ;;  %4704 = vst [vmem:[#allocation3 + $0x3e8] sm:$0xff] %v4703_v50  ;;  %v3914_v35 = vor.u32 %v3912_v29, %v3911_v15  ;;  %v4154_v13 = vor.u32 %v4153_v19, %v3909_v58  ;;  %v4216_v23 = vld [vmem:[#allocation3 + $0x460] sm:$0xff]  ;;  %4695 = vst [vmem:[#allocation3 + $0x310] sm:$0xff] %v4694_v14  ;;  %v4697_v27 = vsel %vm9311_vm10, %v9878_v39, %v4696_v46 }
 0x31a   : > { %v4486_v57 = vsel %vm9187_vm4, 0, %v4485_v38  ;;  %v3976_v34 = vld [vmem:[#allocation3 + $0x450] sm:$0xff]  ;;  %v4444_v42 = vld [vmem:[#allocation3 + $0x420] sm:$0xff]  ;;  %v3521_v37 = vld [vmem:[#allocation3 + $0x438] sm:$0x1]  ;;  %v4700_v45 = vsel %vm9311_vm10, %v9921_v24, %v4699_v61  ;;  %4698 = vst [vmem:[#allocation3 + $0x358] sm:$0xff] %v4697_v27 }
 0x31b   : > { %4487 = vst [vmem:[#allocation3 + $0x390] sm:$0x1] %v4486_v57  ;;  %v4705_v53 = vld [vmem:[#allocation3 + $0x430] sm:$0xff]  ;;  %v4021_v56 = vld [vmem:[#allocation3 + $0x408] sm:$0x1]  ;;  %v3522_v11 = vsel %vm9187_vm4, 0, %v3521_v37  ;;  %v3977_v52 = vsel %vm9299_vm9, %v3914_v35, %v3976_v34  ;;  %v4217_v7 = vsel %vm9311_vm10, %v4154_v13, %v4216_v23  ;;  %v4445_v5 = vsel %vm9299_vm9, %v3914_v35, %v4444_v42 }
 0x31c   : > { %v3784_v51 = vld [vmem:[#allocation3 + $0x448] sm:$0x80]  ;;  %v4883_v40 = vld [vmem:[#allocation3 + $0x3f0] sm:$0xff]  ;;  %v4022_v22 = vsel %vm9187_vm4, 0, %v4021_v56  ;;  %v4261_v28 = vld [vmem:[#allocation3 + $0x418] sm:$0x80]  ;;  %v4706_v21 = vsel %vm9311_vm10, %v4154_v13, %v4705_v53 }
 0x31d   : > { %v3785_v6 = vsel %vm9206_vm8, 0, %v3784_v51  ;;  %4701 = vst [vmem:[#allocation3 + $0x3a0] sm:$0xff] %v4700_v45  ;;  %v4877_v39 = vld [vmem:[#allocation3 + $0x3c0] sm:$0xff]  ;;  %3523 = vst [vmem:[#allocation3 + $0x438] sm:$0x1] %v3522_v11  ;;  %v4262_v24 = vsel %vm9206_vm8, 0, %v4261_v28  ;;  %5629 = vmatmul.mubr.bf16.gmra.mrb[120].mxu1 %v4883_v40 }
 0x31e   : > { %4023 = vst [vmem:[#allocation3 + $0x408] sm:$0x1] %v4022_v22  ;;  %3978 = vst [vmem:[#allocation3 + $0x450] sm:$0xff] %v3977_v52  ;;  %v4488_v47 = vld [vmem:[#allocation3 + $0x3d8] sm:$0x1]  ;;  %5781 = vmatprep.mubr.bf16.mxu0 %v4877_v39  ;;  %5636 = vmatprep.mubr.bf16.mxu1 %v9925_v4  ;;  %v4885_v55 = vld [vmem:[#allocation3 + $0x400] sm:$0xff] }
 0x31f   : > { %3786 = vst [vmem:[#allocation3 + $0x448] sm:$0x80] %v3785_v6  ;;  %4263 = vst [vmem:[#allocation3 + $0x418] sm:$0x80] %v4262_v24  ;;  %v4489_v30 = vsel %vm9187_vm4, 0, %v4488_v47  ;;  %v10020_v31 = vld [vmem:[#allocation3 + $0x458] sm:$0xff] }
 0x320   : > { %4218 = vst [vmem:[#allocation3 + $0x460] sm:$0xff] %v4217_v7  ;;  %4446 = vst [vmem:[#allocation3 + $0x420] sm:$0xff] %v4445_v5  ;;  %v4736_v8 = vld [vmem:[#allocation3 + $0x2c8] sm:$0x80]  ;;  %v4876_v43 = vld [vmem:[#allocation3 + $0x3b8] sm:$0xff] }
 0x321   : > { %4707 = vst [vmem:[#allocation3 + $0x430] sm:$0xff] %v4706_v21  ;;  %4490 = vst [vmem:[#allocation3 + $0x3d8] sm:$0x1] %v4489_v30  ;;  %v4737_v49 = vsel %vm9206_vm8, 0, %v4736_v8  ;;  %v4748_v33 = vld [vmem:[#allocation3 + $0x3e8] sm:$0x80]  ;;  %5782 = vmatmul.mubr.bf16.gmra.mrb[148].mxu0 %v4876_v43 }
 0x322   : > { %4738 = vst [vmem:[#allocation3 + $0x2c8] sm:$0x80] %v4737_v49  ;;  %v4749_v36 = vsel %vm9206_vm8, 0, %v4748_v33  ;;  %v4739_v59 = vld [vmem:[#allocation3 + $0x310] sm:$0x80]  ;;  %v4762_v62 = vld [vmem:[#allocation3 + $0x28] sm:$0xff] }
 0x323   : > { %4750 = vst [vmem:[#allocation3 + $0x3e8] sm:$0x80] %v4749_v36  ;;  %v4740_v3 = vsel %vm9206_vm8, 0, %v4739_v59  ;;  %v4742_v63 = vld [vmem:[#allocation3 + $0x358] sm:$0x80]  ;;  %v4761_v15 = vld [vmem:[#allocation3 + $0x20] sm:$0xff] }
 0x324   : > { %4741 = vst [vmem:[#allocation3 + $0x310] sm:$0x80] %v4740_v3  ;;  %v4745_v20 = vld [vmem:[#allocation3 + $0x3a0] sm:$0x80]  ;;  %v4892_v16 = vld [vmem:[#allocation3 + $0x438] sm:$0xff]  ;;  %v4743_v41 = vsel %vm9206_vm8, 0, %v4742_v63 }
 0x325   : > { %v4886_v54 = vld [vmem:[#allocation3 + $0x408] sm:$0xff]  ;;  %v4024_v48 = vld [vmem:[#allocation3 + $0x450] sm:$0x1]  ;;  %v4746_v4 = vsel %vm9206_vm8, 0, %v4745_v20  ;;  %4744 = vst [vmem:[#allocation3 + $0x358] sm:$0x80] %v4743_v41  ;;  %5637 = vmatmul.mubr.bf16.gmra.mrb[124].mxu1 %v4892_v16 }
 0x326   : > { %5789 = vmatprep.mubr.bf16.mxu0 %v4886_v54  ;;  %v4025_v32 = vsel %vm9187_vm4, 0, %v4024_v48  ;;  %4747 = vst [vmem:[#allocation3 + $0x3a0] sm:$0x80] %v4746_v4  ;;  %5838 = vmatprep.mubr.bf16.mxu1 %v4762_v62  ;;  %v7775_v57 = vld [vmem:[#allocation9 + $0x208] sm:$0xff]   ;;  %v7799_v46 = vld [vmem:[#allocation9 + $0x200] sm:$0xff]   ;;  %v4771_v61 = vld [vmem:[#allocation3 + $0x70] sm:$0xff] }
 0x327   : > { %v4264_v58 = vld [vmem:[#allocation3 + $0x460] sm:$0x80]  ;;  %4026 = vst [vmem:[#allocation3 + $0x450] sm:$0x1] %v4025_v32  ;;  %v4491_v9 = vld [vmem:[#allocation3 + $0x420] sm:$0x1] }
 0x328   : > { %v4265_v29 = vsel %vm9206_vm8, 0, %v4264_v58  ;;  %v4751_v12 = vld [vmem:[#allocation3 + $0x430] sm:$0x80]  ;;  %v4492_v0 = vsel %vm9187_vm4, 0, %v4491_v9  ;;  %v4894_v19 = vld [vmem:[#allocation3 + $0x448] sm:$0xff]  ;;  %v7800_v34 = vld [vmem:[#allocation3 + $0x38] sm:$0xff] }
 0x329   : > { %4266 = vst [vmem:[#allocation3 + $0x460] sm:$0x80] %v4265_v29  ;;  %v4752_v38 = vsel %vm9206_vm8, 0, %v4751_v12  ;;  %5790 = vmatmul.mubr.bf16.gmra.mrb[152].mxu0 %v4885_v55  ;;  %4493 = vst [vmem:[#allocation3 + $0x420] sm:$0x1] %v4492_v0  ;;  %v7776_v14 = vld [vmem:[#allocation9 + $0x210] sm:$0xff]  }
 0x32a   : > { %4753 = vst [vmem:[#allocation3 + $0x430] sm:$0x80] %v4752_v38  ;;  %v4494_v35 = vld [vmem:[#allocation3 + $0x468] sm:$0x1]  ;;  %v7777_v23 = vld [vmem:[#allocation9 + $0x218] sm:$0xff]   ;;  %v4763_v53 = vld [vmem:[#allocation3 + $0x30] sm:$0xff] }
 0x32b   : > { %v4495_v13 = vsel %vm9187_vm4, 0, %v4494_v35  ;;  %v4780_v42 = vld [vmem:[#allocation3 + $0xb8] sm:$0xff]  ;;  %v7801_v37 = vld [vmem:[#allocation3 + $0x80] sm:$0xff]  ;;  %v7779_v51 = vld [vmem:[#allocation9 + $0x228] sm:$0xff]  }
 0x32c   : > { %4496 = vst [vmem:[#allocation3 + $0x468] sm:$0x1] %v4495_v13  ;;  %v7778_v56 = vld [vmem:[#allocation9 + $0x220] sm:$0xff]   ;;  %v4772_v27 = vld [vmem:[#allocation3 + $0x78] sm:$0xff]  ;;  %v7802_v45 = vld [vmem:[#allocation3 + $0xc8] sm:$0xff] }
 0x32d   : > { %5839 = vmatmul.mubr.bf16.vlgmr.msra.gmra.mrb[128].mxu1 %v4761_v15  ;;  %v4789_v17 = vld [vmem:[#allocation3 + $0x100] sm:$0xff]  ;;  %v7780_v40 = vld [vmem:[#allocation9 + $0x230] sm:$0xff]   ;;  %v7781_v11 = vld [vmem:[#allocation9 + $0x238] sm:$0xff]  }
 0x32e   : > { %v4895_v50 = vld [vmem:[#allocation3 + $0x450] sm:$0xff]  ;;  %7552 = vmatpush3.bf16.msra.mxu1 %v7799_v46  ;;  %5846 = vmatprep.mubr.bf16.mxu1 %v4771_v61  ;;  %v4798_v22 = vld [vmem:[#allocation3 + $0x148] sm:$0xff]  ;;  %v4781_v52 = vld [vmem:[#allocation3 + $0xc0] sm:$0xff] }
 0x32f   : > { %5797 = vmatprep.mubr.bf16.mxu0 %v4895_v50  ;;  %7553 = vmatprep.subr.bf16.mxu1 %v7775_v57  ;;  %v7803_v6 = vld [vmem:[#allocation3 + $0x110] sm:$0xff]  ;;  %v4790_v39 = vld [vmem:[#allocation3 + $0x108] sm:$0xff]  ;;  %v7804_v24 = vld [vmem:[#allocation3 + $0x158] sm:$0xff] }
 0x330   : > { %v4807_v28 = vld [vmem:[#allocation3 + $0x190] sm:$0xff]  ;;  %v4816_v7 = vld [vmem:[#allocation3 + $0x1d8] sm:$0xff]  ;;  %v7805_v5 = vld [vmem:[#allocation3 + $0x1a0] sm:$0xff] }
 0x331   : > { %5798 = vmatmul.mubr.bf16.gmra.mrb[156].mxu0 %v4894_v19  ;;  %v4799_v47 = vld [vmem:[#allocation3 + $0x150] sm:$0xff]  ;;  %v4825_v21 = vld [vmem:[#allocation3 + $0x220] sm:$0xff]  ;;  %v4808_v30 = vld [vmem:[#allocation3 + $0x198] sm:$0xff] }
 0x332   : > { %5999 = vmatprep.mubr.bf16.mxu0 %v7800_v34  ;;  %7554 = vmatpush3.bf16.msra.mxu1 %v7775_v57  ;;  %v7806_v8 = vld [vmem:[#allocation3 + $0x1e8] sm:$0xff]  ;;  %v4817_v49 = vld [vmem:[#allocation3 + $0x1e0] sm:$0xff]  ;;  %v7807_v33 = vld [vmem:[#allocation3 + $0x230] sm:$0xff] }
 0x333   : > { %7555 = vmatprep.subr.bf16.mxu1 %v7776_v14  ;;  %v4834_v43 = vld [vmem:[#allocation3 + $0x268] sm:$0xff]  ;;  %v4754_v36 = vld [vmem:[#allocation3 + $0x478] sm:$0x80]  ;;  %v4843_v3 = vld [vmem:[#allocation3 + $0x2b0] sm:$0xff] }
 0x334   : > { %v4755_v59 = vsel %vm9206_vm8, 0, %v4754_v36  ;;  %v4826_v63 = vld [vmem:[#allocation3 + $0x228] sm:$0xff]  ;;  %v7808_v20 = vld [vmem:[#allocation3 + $0x278] sm:$0xff]  ;;  %v4835_v54 = vld [vmem:[#allocation3 + $0x270] sm:$0xff] }
 0x335   : > { %5847 = vmatmul.mubr.bf16.gmra.mrb[132].mxu1 %v7800_v34  ;;  %4756 = vst [vmem:[#allocation3 + $0x478] sm:$0x80] %v4755_v59  ;;  %v4852_v16 = vld [vmem:[#allocation3 + $0x2f8] sm:$0xff]  ;;  %v4861_v48 = vld [vmem:[#allocation3 + $0x340] sm:$0xff]  ;;  %v4870_v58 = vld [vmem:[#allocation3 + $0x388] sm:$0xff] }
 0x336   : > { %5854 = vmatprep.mubr.bf16.mxu1 %v4780_v42  ;;  %7556 = vmatpush3.bf16.msra.mxu1 %v7776_v14  ;;  %v4844_v25 = vld [vmem:[#allocation3 + $0x2b8] sm:$0xff]  ;;  %v10051_v4 = vld [vmem:[%s10378_s4] ss:$0 sm:$0xff]  ;;  %v4879_v34 = vld [vmem:[#allocation3 + $0x3d0] sm:$0xff] }
 0x337   : > { %7557 = vmatprep.subr.bf16.mxu1 %v7777_v23  ;;  %v4853_v29 = vld [vmem:[#allocation3 + $0x300] sm:$0xff]  ;;  %v5519_v0 = vadd.f32 %v9957_v26, %v10051_v4  ;;  %v4862_v14 = vld [vmem:[#allocation3 + $0x348] sm:$0xff] }
 0x338   : > { %v4897_v59 = vld [vmem:[#allocation3 + $0x460] sm:$0xff] }
 0x339   : > { %6000 = vmatmul.mubr.bf16.vlgmr.msra.gmra.mrb[160].mxu0 %v4763_v53 }
 0x33a   : > { %6007 = vmatprep.mubr.bf16.mxu0 %v7801_v37  ;;  %7558 = vmatpush3.bf16.msra.mxu1 %v7777_v23 }
 0x33b   : > { %7559 = vmatprep.subr.bf16.mxu1 %v7778_v56 }
 0x33d   : > { %5855 = vmatmul.mubr.bf16.gmra.mrb[136].mxu1 %v7801_v37 }
 0x33e   : > { %5862 = vmatprep.mubr.bf16.mxu1 %v4789_v17  ;;  %7560 = vmatpush3.bf16.msra.mxu1 %v7778_v56 }
 0x33f   : > { %7561 = vmatprep.subr.bf16.mxu1 %v7779_v51 }
 0x341   : > { %6008 = vmatmul.mubr.bf16.gmra.mrb[164].mxu0 %v4772_v27 }
 0x342   : > { %6015 = vmatprep.mubr.bf16.mxu0 %v7802_v45  ;;  %7562 = vmatpush3.bf16.msra.mxu1 %v7779_v51 }
 0x343   : > { %7563 = vmatprep.subr.bf16.mxu1 %v7780_v40 }
 0x345   : > { %5863 = vmatmul.mubr.bf16.gmra.mrb[140].mxu1 %v7802_v45 }
 0x346   : > { %5870 = vmatprep.mubr.bf16.mxu1 %v4798_v22  ;;  %7564 = vmatpush3.bf16.msra.mxu1 %v7780_v40  ;;  %v4871_v22 = vld [vmem:[#allocation3 + $0x390] sm:$0xff] }
 0x347   : > { %7565 = vmatprep.subr.bf16.mxu1 %v7781_v11 }
 0x349   : > { %6016 = vmatmul.mubr.bf16.gmra.mrb[168].mxu0 %v4781_v52 }
 0x34a   : > { %6023 = vmatprep.mubr.bf16.mxu0 %v7803_v6  ;;  %7566 = vmatpush3.bf16.msra.mxu1 %v7781_v11  ;;  %v4888_v11 = vld [vmem:[#allocation3 + $0x418] sm:$0xff] }
 0x34d   : > { %5871 = vmatmul.mubr.bf16.gmra.mrb[144].mxu1 %v7803_v6 }
 0x34e   : > { %5878 = vmatprep.mubr.bf16.mxu1 %v4807_v28 }
 0x351   : > { %6024 = vmatmul.mubr.bf16.gmra.mrb[172].mxu0 %v4790_v39 }
 0x352   : > { %6031 = vmatprep.mubr.bf16.mxu0 %v7804_v24 }
 0x355   : > { %5879 = vmatmul.mubr.bf16.gmra.mrb[148].mxu1 %v7804_v24 }
 0x356   : > { %5886 = vmatprep.mubr.bf16.mxu1 %v4816_v7 }
 0x359   : > { %6032 = vmatmul.mubr.bf16.gmra.mrb[176].mxu0 %v4799_v47 }
 0x35a   : > { %6039 = vmatprep.mubr.bf16.mxu0 %v7805_v5 }
 0x35d   : > { %5887 = vmatmul.mubr.bf16.gmra.mrb[152].mxu1 %v7805_v5 }
 0x35e   : > { %5894 = vmatprep.mubr.bf16.mxu1 %v4825_v21 }
 0x361   : > { %6040 = vmatmul.mubr.bf16.gmra.mrb[180].mxu0 %v4808_v30 }
 0x362   : > { %6047 = vmatprep.mubr.bf16.mxu0 %v7806_v8 }
 0x365   : > { %5895 = vmatmul.mubr.bf16.gmra.mrb[156].mxu1 %v7806_v8 }
 0x366   : > { %5902 = vmatprep.mubr.bf16.mxu1 %v4834_v43 }
 0x369   : > { %6048 = vmatmul.mubr.bf16.gmra.mrb[184].mxu0 %v4817_v49 }
 0x36a   : > { %6055 = vmatprep.mubr.bf16.mxu0 %v7807_v33 }
 0x36d   : > { %5903 = vmatmul.mubr.bf16.gmra.mrb[160].mxu1 %v7807_v33 }
 0x36e   : > { %5910 = vmatprep.mubr.bf16.mxu1 %v4843_v3  ;;  %v7061_v41 = vpop.f32.mrb[68].mxu1  ;;  %v4880_v3 = vld [vmem:[#allocation3 + $0x3d8] sm:$0xff] }
 0x36f   : > { %v7062_v32 = vpop.f32.mrb[69].mxu1 }
 0x370   : > { %v7063_v9 = vadd.f32 %v7062_v32, %v7061_v41 }
 0x371   : > { %6056 = vmatmul.mubr.bf16.gmra.mrb[188].mxu0 %v4826_v63  ;;  %v7167_v12 = vpop.f32.mrb[96].mxu0 }
 0x372   : > { %6063 = vmatprep.mubr.bf16.mxu0 %v7808_v20  ;;  %v7168_v55 = vpop.f32.mrb[97].mxu0 }
 0x373   : > { %v7169_v38 = vadd.f32 %v7168_v55, %v7167_v12  ;;  %v7170_v15 = vpop.f32.mrb[98].mxu0 }
 0x374   : > { %v7171_v57 = vpop.f32.mrb[99].mxu0 }
 0x375   : > { %5911 = vmatmul.mubr.bf16.gmra.mrb[164].mxu1 %v7808_v20  ;;  %v10059_v19 = vadd.f32 %v7169_v38, %v5519_v0  ;;  %v7172_v46 = vadd.f32 %v7171_v57, %v7170_v15  ;;  %v4889_v0 = vld [vmem:[#allocation3 + $0x420] sm:$0xff]  ;;  %v7809_v15 = vld [vmem:[#allocation3 + $0x8] sm:$0xff] }
 0x376   : > { %5918 = vmatprep.mubr.bf16.mxu1 %v4852_v16  ;;  %v4765_v38 = vld [vmem:[#allocation3 + $0x40] sm:$0xff] }
 0x379   : > { %6064 = vmatmul.mubr.bf16.gmra.mrb[192].mxu0 %v4835_v54 }
 0x37a   : > { %6071 = vmatprep.mubr.bf16.mxu0 %v9827_v44 }
 0x37d   : > { %5919 = vmatmul.mubr.bf16.gmra.mrb[168].mxu1 %v9827_v44  ;;  %v7064_v44 = vpop.f32.mrb[70].mxu1 }
 0x37e   : > { %5926 = vmatprep.mubr.bf16.mxu1 %v4861_v48  ;;  %v7065_v62 = vpop.f32.mrb[71].mxu1 }
 0x37f   : > { %v7066_v50 = vadd.f32 %v7065_v62, %v7064_v44  ;;  %v7067_v26 = vpop.f32.mrb[72].mxu1  ;;  %v7173_v13 = vpop.f32.mrb[100].mxu0 }
 0x380   : > { %v7068_v35 = vpop.f32.mrb[73].mxu1  ;;  %v7174_v53 = vpop.f32.mrb[101].mxu0 }
 0x381   : > { %6072 = vmatmul.mubr.bf16.gmra.mrb[196].mxu0 %v4844_v25  ;;  %v7069_v23 = vadd.f32 %v7068_v35, %v7067_v26  ;;  %v7070_v42 = vpop.f32.mrb[74].mxu1  ;;  %v7175_v37 = vadd.f32 %v7174_v53, %v7173_v13  ;;  %v7176_v51 = vpop.f32.mrb[102].mxu0 }
 0x382   : > { %6079 = vmatprep.mubr.bf16.mxu0 %v9863_v10  ;;  %v7071_v56 = vpop.f32.mrb[75].mxu1  ;;  %v7177_v27 = vpop.f32.mrb[103].mxu0 }
 0x383   : > { %v7072_v17 = vadd.f32 %v7071_v56, %v7070_v42  ;;  %v7178_v40 = vadd.f32 %v7177_v27, %v7176_v51  ;;  %v5535_v5 = vadd.f32 %v7069_v23, %v10051_v4  ;;  %v4783_v27 = vld [vmem:[#allocation3 + $0xd0] sm:$0xff] }
 0x385   : > { %5927 = vmatmul.mubr.bf16.gmra.mrb[172].mxu1 %v9863_v10  ;;  %v5522_v10 = vadd.f32 %v9969_v2, %v10051_v4  ;;  %v5527_v2 = vadd.f32 %v7063_v9, %v10051_v4  ;;  %v5538_v49 = vadd.f32 %v7072_v17, %v10051_v4 }
 0x386   : > { %5934 = vmatprep.mubr.bf16.mxu1 %v4870_v58 }
 0x387   : > { %v10061_v61 = vadd.f32 %v7172_v46, %v5522_v10  ;;  %v10067_v45 = vadd.f32 %v7175_v37, %v5527_v2  ;;  %v4774_v37 = vld [vmem:[#allocation3 + $0x88] sm:$0xff] }
 0x389   : > { %6080 = vmatmul.mubr.bf16.gmra.mrb[200].mxu0 %v4853_v29 }
 0x38a   : > { %6087 = vmatprep.mubr.bf16.mxu0 %v9904_v18  ;;  %v7073_v6 = vpop.f32.mrb[76].mxu1 }
 0x38b   : > { %v7074_v28 = vpop.f32.mrb[77].mxu1  ;;  %v7179_v39 = vpop.f32.mrb[104].mxu0 }
 0x38c   : > { %v7075_v24 = vadd.f32 %v7074_v28, %v7073_v6  ;;  %v7076_v7 = vpop.f32.mrb[78].mxu1  ;;  %v7180_v47 = vpop.f32.mrb[105].mxu0 }
 0x38d   : > { %5935 = vmatmul.mubr.bf16.gmra.mrb[176].mxu1 %v9904_v18  ;;  %v5530_v18 = vadd.f32 %v7066_v50, %v10051_v4  ;;  %v7181_v21 = vadd.f32 %v7180_v47, %v7179_v39  ;;  %v7077_v30 = vpop.f32.mrb[79].mxu1  ;;  %v7182_v8 = vpop.f32.mrb[106].mxu0 }
 0x38e   : > { %5942 = vmatprep.mubr.bf16.mxu1 %v4879_v34  ;;  %v7183_v43 = vpop.f32.mrb[107].mxu0  ;;  %v5543_v32 = vadd.f32 %v7075_v24, %v10051_v4 }
 0x38f   : > { %v10070_v52 = vadd.f32 %v7178_v40, %v5530_v18  ;;  %v10075_v33 = vadd.f32 %v7181_v21, %v5535_v5  ;;  %v7184_v36 = vadd.f32 %v7183_v43, %v7182_v8  ;;  %v4792_v8 = vld [vmem:[#allocation3 + $0x118] sm:$0xff] }
 0x391   : > { %6088 = vmatmul.mubr.bf16.gmra.mrb[204].mxu0 %v4862_v14  ;;  %v10078_v63 = vadd.f32 %v7184_v36, %v5538_v49  ;;  %v4801_v36 = vld [vmem:[#allocation3 + $0x160] sm:$0xff] }
 0x392   : > { %6095 = vmatprep.mubr.bf16.mxu0 %v9945_v1  ;;  %v7079_v20 = vpop.f32.mrb[80].mxu1 }
 0x393   : > { %v7080_v16 = vpop.f32.mrb[81].mxu1 }
 0x394   : > { %v7185_v54 = vpop.f32.mrb[108].mxu0  ;;  %v7081_v48 = vadd.f32 %v7080_v16, %v7079_v20  ;;  %v7082_v25 = vpop.f32.mrb[82].mxu1 }
 0x395   : > { %5943 = vmatmul.mubr.bf16.gmra.mrb[180].mxu1 %v9945_v1  ;;  %v7078_v1 = vadd.f32 %v7077_v30, %v7076_v7  ;;  %v7186_v41 = vpop.f32.mrb[109].mxu0  ;;  %v7083_v29 = vpop.f32.mrb[83].mxu1 }
 0x396   : > { %5950 = vmatprep.mubr.bf16.mxu1 %v4888_v11  ;;  %v7187_v58 = vadd.f32 %v7186_v41, %v7185_v54  ;;  %v7188_v9 = vpop.f32.mrb[110].mxu0  ;;  %v5551_v35 = vadd.f32 %v7081_v48, %v10051_v4 }
 0x397   : > { %v7189_v12 = vpop.f32.mrb[111].mxu0  ;;  %v5546_v44 = vadd.f32 %v7078_v1, %v10051_v4 }
 0x398   : > { %v10083_v55 = vadd.f32 %v7187_v58, %v5543_v32  ;;  %v7190_v62 = vadd.f32 %v7189_v12, %v7188_v9  ;;  %v4810_v12 = vld [vmem:[#allocation3 + $0x1a8] sm:$0xff] }
 0x399   : > { %6096 = vmatmul.mubr.bf16.gmra.mrb[208].mxu0 %v4871_v22 }
 0x39a   : > { %6103 = vmatprep.mubr.bf16.mxu0 %v9979_v60  ;;  %v10086_v50 = vadd.f32 %v7190_v62, %v5546_v44  ;;  %v7085_v57 = vpop.f32.mrb[84].mxu1 }
 0x39b   : > { %v7086_v10 = vpop.f32.mrb[85].mxu1 }
 0x39c   : > { %v7087_v34 = vadd.f32 %v7086_v10, %v7085_v57  ;;  %v7088_v14 = vpop.f32.mrb[86].mxu1 }
 0x39d   : > { %5951 = vmatmul.mubr.bf16.gmra.mrb[184].mxu1 %v9979_v60  ;;  %v7084_v60 = vadd.f32 %v7083_v29, %v7082_v25  ;;  %v7191_v46 = vpop.f32.mrb[112].mxu0  ;;  %v7089_v23 = vpop.f32.mrb[87].mxu1 }
 0x39e   : > { %5958 = vmatprep.mubr.bf16.mxu1 %v4897_v59  ;;  %v7192_v26 = vpop.f32.mrb[113].mxu0  ;;  %v7090_v53 = vadd.f32 %v7089_v23, %v7088_v14  ;;  %v5559_v24 = vadd.f32 %v7087_v34, %v10051_v4 }
 0x39f   : > { %v7193_v13 = vadd.f32 %v7192_v26, %v7191_v46  ;;  %v7194_v42 = vpop.f32.mrb[114].mxu0  ;;  %v5554_v56 = vadd.f32 %v7084_v60, %v10051_v4 }
 0x3a0   : > { %v7195_v2 = vpop.f32.mrb[115].mxu0  ;;  %v5562_v1 = vadd.f32 %v7090_v53, %v10051_v4 }
 0x3a1   : > { %6104 = vmatmul.mubr.bf16.gmra.mrb[212].mxu0 %v4880_v3  ;;  %v10090_v51 = vadd.f32 %v7193_v13, %v5551_v35  ;;  %v7196_v17 = vadd.f32 %v7195_v2, %v7194_v42  ;;  %v4828_v2 = vld [vmem:[#allocation3 + $0x238] sm:$0xff] }
 0x3a2   : > { %6111 = vmatprep.mubr.bf16.mxu0 %v10020_v31  ;;  %v7091_v40 = vpop.f32.mrb[88].mxu1 }
 0x3a3   : > { %v10092_v18 = vadd.f32 %v7196_v17, %v5554_v56  ;;  %v7092_v11 = vpop.f32.mrb[89].mxu1 }
 0x3a4   : > { %v7093_v6 = vadd.f32 %v7092_v11, %v7091_v40  ;;  %v7094_v28 = vpop.f32.mrb[90].mxu1 }
 0x3a5   : > { %5959 = vmatmul.mubr.bf16.gmra.mrb[188].mxu1 %v10020_v31  ;;  %v4898_v31 = vld [vmem:[#allocation3 + $0x468] sm:$0xff]  ;;  %v7095_v47 = vpop.f32.mrb[91].mxu1 }
 0x3a6   : > { %7567 = vmatprep.mubr.bf16.mxu1 %v4765_v38  ;;  %v7197_v22 = vpop.f32.mrb[116].mxu0  ;;  %v7096_v21 = vadd.f32 %v7095_v47, %v7094_v28  ;;  %v5567_v41 = vadd.f32 %v7093_v6, %v10051_v4  ;;  %v4819_v38 = vld [vmem:[#allocation3 + $0x1f0] sm:$0xff] }
 0x3a7   : > { %v7198_v39 = vpop.f32.mrb[117].mxu0 }
 0x3a8   : > { %v7199_v7 = vadd.f32 %v7198_v39, %v7197_v22  ;;  %v7200_v5 = vpop.f32.mrb[118].mxu0  ;;  %v5570_v44 = vadd.f32 %v7096_v21, %v10051_v4 }
 0x3a9   : > { %6112 = vmatmul.mubr.bf16.gmra.mrb[216].mxu0 %v4889_v0  ;;  %v7201_v30 = vpop.f32.mrb[119].mxu0 }
 0x3aa   : > { %6119 = vmatprep.mubr.bf16.mxu0 %v7809_v15  ;;  %v10096_v43 = vadd.f32 %v7199_v7, %v5559_v24  ;;  %v7202_v49 = vadd.f32 %v7201_v30, %v7200_v5 }
 0x3ac   : > { %v10098_v59 = vadd.f32 %v7202_v49, %v5562_v1  ;;  %v7097_v3 = vpop.f32.mrb[92].mxu1  ;;  %v4846_v1 = vld [vmem:[#allocation3 + $0x2c8] sm:$0xff] }
 0x3ad   : > { %7568 = vmatmul.mubr.bf16.vlgmr.msra.gmra.mrb[192].mxu1 %v4774_v37  ;;  %v7098_v20 = vpop.f32.mrb[93].mxu1 }
 0x3ae   : > { %7571 = vmatprep.mubr.bf16.mxu1 %v4783_v27  ;;  %v7099_v54 = vadd.f32 %v7098_v20, %v7097_v3  ;;  %v7100_v48 = vpop.f32.mrb[94].mxu1  ;;  %v4837_v27 = vld [vmem:[#allocation3 + $0x280] sm:$0xff]  ;;  %v4855_v20 = vld [vmem:[#allocation3 + $0x310] sm:$0xff] }
 0x3af   : > { %v7101_v58 = vpop.f32.mrb[95].mxu1 }
 0x3b0   : > { %v7203_v16 = vpop.f32.mrb[120].mxu0  ;;  %v7102_v9 = vadd.f32 %v7101_v58, %v7100_v48  ;;  %v5575_v35 = vadd.f32 %v7099_v54, %v10051_v4 }
 0x3b1   : > { %6120 = vmatmul.mubr.bf16.gmra.mrb[220].mxu0 %v4898_v31  ;;  %v7204_v25 = vpop.f32.mrb[121].mxu0 }
 0x3b2   : > { %v7205_v32 = vadd.f32 %v7204_v25, %v7203_v16  ;;  %v7206_v29 = vpop.f32.mrb[122].mxu0  ;;  %v5578_v37 = vadd.f32 %v7102_v9, %v10051_v4 }
 0x3b3   : > { %v7207_v60 = vpop.f32.mrb[123].mxu0 }
 0x3b4   : > { %v10102_v62 = vadd.f32 %v7205_v32, %v5567_v41  ;;  %v7208_v0 = vadd.f32 %v7207_v60, %v7206_v29 }
 0x3b5   : > { %7572 = vmatmul.mubr.bf16.gmra.mrb[196].mxu1 %v4792_v8 }
 0x3b6   : > { %7575 = vmatprep.mubr.bf16.mxu1 %v4801_v36  ;;  %v10104_v15 = vadd.f32 %v7208_v0, %v5570_v44 }
 0x3b7   : > { %v7103_v57 = vpop.f32.mrb[96].mxu1 }
 0x3b8   : > { %v7104_v10 = vpop.f32.mrb[97].mxu1 }
 0x3b9   : > { %v7105_v34 = vadd.f32 %v7104_v10, %v7103_v57  ;;  %v7106_v14 = vpop.f32.mrb[98].mxu1 }
 0x3ba   : > { %v7209_v46 = vpop.f32.mrb[124].mxu0  ;;  %v7107_v23 = vpop.f32.mrb[99].mxu1 }
 0x3bb   : > { %v7210_v26 = vpop.f32.mrb[125].mxu0  ;;  %v7108_v31 = vadd.f32 %v7107_v23, %v7106_v14  ;;  %v5583_v7 = vadd.f32 %v7105_v34, %v10051_v4  ;;  %v4873_v34 = vld [vmem:[#allocation3 + $0x3a0] sm:$0xff] }
 0x3bc   : > { %v7211_v13 = vadd.f32 %v7210_v26, %v7209_v46  ;;  %v7212_v42 = vpop.f32.mrb[126].mxu0 }
 0x3bd   : > { %7576 = vmatmul.mubr.bf16.gmra.mrb[200].mxu1 %v4810_v12  ;;  %v7213_v53 = vpop.f32.mrb[127].mxu0  ;;  %v5586_v49 = vadd.f32 %v7108_v31, %v10051_v4 }
 0x3be   : > { %7579 = vmatprep.mubr.bf16.mxu1 %v4819_v38  ;;  %v10108_v56 = vadd.f32 %v7211_v13, %v5575_v35  ;;  %v7214_v17 = vadd.f32 %v7213_v53, %v7212_v42  ;;  %v4864_v38 = vld [vmem:[#allocation3 + $0x358] sm:$0xff] }
 0x3c0   : > { %v10110_v40 = vadd.f32 %v7214_v17, %v5578_v37 }
 0x3c1   : > { %v7109_v11 = vpop.f32.mrb[100].mxu1 }
 0x3c2   : > { %v7110_v22 = vpop.f32.mrb[101].mxu1 }
 0x3c3   : > { %v7111_v28 = vadd.f32 %v7110_v22, %v7109_v11  ;;  %v7112_v39 = vpop.f32.mrb[102].mxu1  ;;  %v4882_v22 = vld [vmem:[#allocation3 + $0x3e8] sm:$0xff] }
 0x3c4   : > { %v7215_v6 = vpop.f32.mrb[128].mxu0  ;;  %v7113_v5 = vpop.f32.mrb[103].mxu1 }
 0x3c5   : > { %7580 = vmatmul.mubr.bf16.gmra.mrb[204].mxu1 %v4828_v2  ;;  %v7216_v24 = vpop.f32.mrb[129].mxu0  ;;  %v7114_v30 = vadd.f32 %v7113_v5, %v7112_v39  ;;  %v5591_v29 = vadd.f32 %v7111_v28, %v10051_v4 }
 0x3c6   : > { %7583 = vmatprep.mubr.bf16.mxu1 %v4837_v27  ;;  %v7217_v47 = vadd.f32 %v7216_v24, %v7215_v6  ;;  %v7218_v21 = vpop.f32.mrb[130].mxu0  ;;  %v4891_v24 = vld [vmem:[#allocation3 + $0x430] sm:$0xff] }
 0x3c7   : > { %v7219_v8 = vpop.f32.mrb[131].mxu0  ;;  %v5594_v57 = vadd.f32 %v7114_v30, %v10051_v4 }
 0x3c8   : > { %v10114_v36 = vadd.f32 %v7217_v47, %v5583_v7  ;;  %v7220_v3 = vadd.f32 %v7219_v8, %v7218_v21 }
 0x3ca   : > { %v10116_v16 = vadd.f32 %v7220_v3, %v5586_v49  ;;  %v7115_v54 = vpop.f32.mrb[104].mxu1  ;;  %v4900_v49 = vld [vmem:[#allocation3 + $0x478] sm:$0xff] }
 0x3cb   : > { %v7116_v48 = vpop.f32.mrb[105].mxu1 }
 0x3cc   : > { %v7117_v41 = vadd.f32 %v7116_v48, %v7115_v54  ;;  %v7118_v32 = vpop.f32.mrb[106].mxu1 }
 0x3cd   : > { %7584 = vmatmul.mubr.bf16.gmra.mrb[208].mxu1 %v4846_v1  ;;  %v7221_v25 = vpop.f32.mrb[132].mxu0  ;;  %v7119_v60 = vpop.f32.mrb[107].mxu1 }
 0x3ce   : > { %7587 = vmatprep.mubr.bf16.mxu1 %v4855_v20  ;;  %v7222_v58 = vpop.f32.mrb[133].mxu0  ;;  %v7120_v44 = vadd.f32 %v7119_v60, %v7118_v32  ;;  %v5599_v53 = vadd.f32 %v7117_v41, %v10051_v4 }
 0x3cf   : > { %v7223_v9 = vadd.f32 %v7222_v58, %v7221_v25  ;;  %v7224_v12 = vpop.f32.mrb[134].mxu0 }
 0x3d0   : > { %v7225_v0 = vpop.f32.mrb[135].mxu0  ;;  %v5602_v6 = vadd.f32 %v7120_v44, %v10051_v4 }
 0x3d1   : > { %v10120_v10 = vadd.f32 %v7223_v9, %v5591_v29  ;;  %v7226_v46 = vadd.f32 %v7225_v0, %v7224_v12 }
 0x3d3   : > { %v10122_v14 = vadd.f32 %v7226_v46, %v5594_v57  ;;  %v7121_v26 = vpop.f32.mrb[108].mxu1 }
 0x3d4   : > { %v7122_v35 = vpop.f32.mrb[109].mxu1 }
 0x3d5   : > { %7588 = vmatmul.mubr.bf16.gmra.mrb[212].mxu1 %v4864_v38  ;;  %v7123_v23 = vadd.f32 %v7122_v35, %v7121_v26  ;;  %v7124_v42 = vpop.f32.mrb[110].mxu1 }
 0x3d6   : > { %7591 = vmatprep.mubr.bf16.mxu1 %v4873_v34  ;;  %v7125_v37 = vpop.f32.mrb[111].mxu1 }
 0x3d7   : > { %v7126_v27 = vadd.f32 %v7125_v37, %v7124_v42  ;;  %v5607_v3 = vadd.f32 %v7123_v23, %v10051_v4 }
 0x3d8   : > { %v7227_v13 = vpop.f32.mrb[136].mxu0 }
 0x3d9   : > { %v7228_v31 = vpop.f32.mrb[137].mxu0  ;;  %v5610_v32 = vadd.f32 %v7126_v27, %v10051_v4 }
 0x3da   : > { %v7229_v2 = vadd.f32 %v7228_v31, %v7227_v13  ;;  %v7230_v17 = vpop.f32.mrb[138].mxu0 }
 0x3db   : > { %v7231_v11 = vpop.f32.mrb[139].mxu0 }
 0x3dc   : > { %v10126_v28 = vadd.f32 %v7229_v2, %v5599_v53  ;;  %v7232_v39 = vadd.f32 %v7231_v11, %v7230_v17  ;;  %v7127_v47 = vpop.f32.mrb[112].mxu1 }
 0x3dd   : > { %7592 = vmatmul.mubr.bf16.gmra.mrb[216].mxu1 %v4882_v22  ;;  %v7128_v5 = vpop.f32.mrb[113].mxu1 }
 0x3de   : > { %7595 = vmatprep.mubr.bf16.mxu1 %v4891_v24  ;;  %v10128_v7 = vadd.f32 %v7232_v39, %v5602_v6  ;;  %v7129_v30 = vadd.f32 %v7128_v5, %v7127_v47  ;;  %v7130_v8 = vpop.f32.mrb[114].mxu1 }
 0x3df   : > { %v7131_v54 = vpop.f32.mrb[115].mxu1 }
 0x3e0   : > { %v7132_v25 = vadd.f32 %v7131_v54, %v7130_v8  ;;  %v5615_v46 = vadd.f32 %v7129_v30, %v10051_v4 }
 0x3e2   : > { %v7233_v21 = vpop.f32.mrb[140].mxu0  ;;  %v5618_v42 = vadd.f32 %v7132_v25, %v10051_v4 }
 0x3e3   : > { %v7234_v1 = vpop.f32.mrb[141].mxu0 }
 0x3e4   : > { %v7235_v20 = vadd.f32 %v7234_v1, %v7233_v21  ;;  %v7236_v48 = vpop.f32.mrb[142].mxu0 }
 0x3e5   : > { %v7237_v41 = vpop.f32.mrb[143].mxu0  ;;  %7596 = vmatmul.mubr.bf16.gmra.mrb[220].mxu1 %v4900_v49 }
 0x3e6   : > { %v10132_v58 = vadd.f32 %v7235_v20, %v5607_v3  ;;  %v7238_v29 = vadd.f32 %v7237_v41, %v7236_v48 }
 0x3e8   : > { %v10134_v9 = vadd.f32 %v7238_v29, %v5610_v32  ;;  %v7133_v60 = vpop.f32.mrb[116].mxu1 }
 0x3e9   : > { %v7134_v12 = vpop.f32.mrb[117].mxu1 }
 0x3ea   : > { %v7135_v0 = vadd.f32 %v7134_v12, %v7133_v60  ;;  %v7136_v38 = vpop.f32.mrb[118].mxu1 }
 0x3eb   : > { %v7137_v26 = vpop.f32.mrb[119].mxu1 }
 0x3ec   : > { %v7239_v44 = vpop.f32.mrb[144].mxu0  ;;  %v7138_v13 = vadd.f32 %v7137_v26, %v7136_v38  ;;  %v5623_v39 = vadd.f32 %v7135_v0, %v10051_v4 }
 0x3ed   : > { %v7240_v57 = vpop.f32.mrb[145].mxu0 }
 0x3ee   : > { %v7241_v34 = vadd.f32 %v7240_v57, %v7239_v44  ;;  %v7242_v35 = vpop.f32.mrb[146].mxu0  ;;  %v5626_v8 = vadd.f32 %v7138_v13, %v10051_v4 }
 0x3ef   : > { %v7243_v23 = vpop.f32.mrb[147].mxu0 }
 0x3f0   : > { %v10138_v31 = vadd.f32 %v7241_v34, %v5615_v46  ;;  %v7244_v53 = vadd.f32 %v7243_v23, %v7242_v35  ;;  %v7139_v37 = vpop.f32.mrb[120].mxu1 }
 0x3f1   : > { %v7140_v17 = vpop.f32.mrb[121].mxu1 }
 0x3f2   : > { %v10140_v2 = vadd.f32 %v7244_v53, %v5618_v42  ;;  %v7141_v11 = vadd.f32 %v7140_v17, %v7139_v37  ;;  %v7142_v22 = vpop.f32.mrb[122].mxu1 }
 0x3f3   : > { %v7143_v47 = vpop.f32.mrb[123].mxu1 }
 0x3f4   : > { %v7245_v27 = vpop.f32.mrb[148].mxu0  ;;  %v7144_v21 = vadd.f32 %v7143_v47, %v7142_v22  ;;  %v5631_v29 = vadd.f32 %v7141_v11, %v10051_v4 }
 0x3f5   : > { %v7246_v6 = vpop.f32.mrb[149].mxu0 }
 0x3f6   : > { %v7247_v24 = vadd.f32 %v7246_v6, %v7245_v27  ;;  %v7248_v5 = vpop.f32.mrb[150].mxu0  ;;  %v5634_v57 = vadd.f32 %v7144_v21, %v10051_v4 }
 0x3f7   : > { %v7249_v30 = vpop.f32.mrb[151].mxu0 }
 0x3f8   : > { %v10144_v1 = vadd.f32 %v7247_v24, %v5623_v39  ;;  %v7250_v49 = vadd.f32 %v7249_v30, %v7248_v5  ;;  %v7145_v20 = vpop.f32.mrb[124].mxu1 }
 0x3f9   : > { %v7146_v54 = vpop.f32.mrb[125].mxu1 }
 0x3fa   : > { %v10146_v3 = vadd.f32 %v7250_v49, %v5626_v8  ;;  %v7147_v25 = vadd.f32 %v7146_v54, %v7145_v20  ;;  %v7148_v41 = vpop.f32.mrb[126].mxu1 }
 0x3fb   : > { %v7149_v12 = vpop.f32.mrb[127].mxu1 }
 0x3fc   : > { %v7251_v48 = vpop.f32.mrb[152].mxu0  ;;  %v7150_v0 = vadd.f32 %v7149_v12, %v7148_v41  ;;  %v5639_v17 = vadd.f32 %v7147_v25, %v10051_v4 }
 0x3fd   : > { %v7252_v32 = vpop.f32.mrb[153].mxu0 }
 0x3fe   : > { %v7253_v60 = vadd.f32 %v7252_v32, %v7251_v48  ;;  %v7254_v44 = vpop.f32.mrb[154].mxu0  ;;  %v5642_v47 = vadd.f32 %v7150_v0, %v10051_v4 }
 0x3ff   : > { %v7255_v38 = vpop.f32.mrb[155].mxu0 }
 0x400   : > { %v10150_v46 = vadd.f32 %v7253_v60, %v5631_v29  ;;  %v7256_v34 = vadd.f32 %v7255_v38, %v7254_v44  ;;  %v7279_v35 = vpop.f32.mrb[128].mxu1 }
 0x401   : > { %v7280_v23 = vpop.f32.mrb[129].mxu1 }
 0x402   : > { %v10152_v26 = vadd.f32 %v7256_v34, %v5634_v57  ;;  %v7281_v42 = vadd.f32 %v7280_v23, %v7279_v35  ;;  %v7282_v37 = vpop.f32.mrb[130].mxu1 }
 0x403   : > { %v7283_v22 = vpop.f32.mrb[131].mxu1 }
 0x404   : > { %v7257_v13 = vpop.f32.mrb[156].mxu0  ;;  %v5841_v6 = vadd.f32 %v7281_v42, %v10059_v19  ;;  %v7284_v39 = vadd.f32 %v7283_v22, %v7282_v37 }
 0x405   : > { %v7258_v53 = vpop.f32.mrb[157].mxu0 }
 0x406   : > { %v7259_v27 = vadd.f32 %v7258_v53, %v7257_v13  ;;  %v7260_v11 = vpop.f32.mrb[158].mxu0  ;;  %v5844_v30 = vadd.f32 %v7284_v39, %v10061_v61 }
 0x407   : > { %v7261_v24 = vpop.f32.mrb[159].mxu0 }
 0x408   : > { %v10157_v5 = vadd.f32 %v7259_v27, %v5639_v17  ;;  %v7262_v21 = vadd.f32 %v7261_v24, %v7260_v11  ;;  %v7285_v49 = vpop.f32.mrb[132].mxu1 }
 0x409   : > { %v7286_v20 = vpop.f32.mrb[133].mxu1 }
 0x40a   : > { %v10160_v8 = vadd.f32 %v7262_v21, %v5642_v47  ;;  %v7287_v48 = vadd.f32 %v7286_v20, %v7285_v49  ;;  %v7288_v25 = vpop.f32.mrb[134].mxu1 }
 0x40b   : > { %v7289_v29 = vpop.f32.mrb[135].mxu1 }
 0x40c   : > { %v7391_v54 = vpop.f32.mrb[160].mxu0  ;;  %v5849_v60 = vadd.f32 %v7287_v48, %v10067_v45  ;;  %v7290_v12 = vadd.f32 %v7289_v29, %v7288_v25 }
 0x40d   : > { %v7392_v41 = vpop.f32.mrb[161].mxu0 }
 0x40e   : > { %v7393_v32 = vadd.f32 %v7392_v41, %v7391_v54  ;;  %v7394_v19 = vpop.f32.mrb[162].mxu0  ;;  %v5852_v61 = vadd.f32 %v7290_v12, %v10070_v52 }
 0x40f   : > { %v7395_v4 = vpop.f32.mrb[163].mxu0 }
 0x410   : > { %v7396_v44 = vadd.f32 %v7395_v4, %v7394_v19  ;;  %v10163_v0 = vadd.f32 %v7393_v32, %v5841_v6  ;;  %v7291_v57 = vpop.f32.mrb[136].mxu1 }
 0x411   : > { %v7292_v34 = vpop.f32.mrb[137].mxu1 }
 0x412   : > { %v10166_v38 = vadd.f32 %v7396_v44, %v5844_v30  ;;  %v7293_v13 = vadd.f32 %v7292_v34, %v7291_v57  ;;  %v7294_v23 = vpop.f32.mrb[138].mxu1 }
 0x413   : > { %v7295_v37 = vpop.f32.mrb[139].mxu1 }
 0x414   : > { %v7397_v35 = vpop.f32.mrb[164].mxu0  ;;  %v5857_v45 = vadd.f32 %v7293_v13, %v10075_v33  ;;  %v7296_v27 = vadd.f32 %v7295_v37, %v7294_v23 }
 0x415   : > { %v7398_v42 = vpop.f32.mrb[165].mxu0 }
 0x416   : > { %v7399_v53 = vadd.f32 %v7398_v42, %v7397_v35  ;;  %v7400_v17 = vpop.f32.mrb[166].mxu0  ;;  %v5860_v52 = vadd.f32 %v7296_v27, %v10078_v63 }
 0x417   : > { %v7401_v11 = vpop.f32.mrb[167].mxu0 }
 0x418   : > { %v7402_v22 = vadd.f32 %v7401_v11, %v7400_v17  ;;  %v10169_v6 = vadd.f32 %v7399_v53, %v5849_v60  ;;  %v7297_v24 = vpop.f32.mrb[140].mxu1 }
 0x419   : > { %v7298_v47 = vpop.f32.mrb[141].mxu1 }
 0x41a   : > { %v10172_v39 = vadd.f32 %v7402_v22, %v5852_v61  ;;  %v7299_v30 = vadd.f32 %v7298_v47, %v7297_v24  ;;  %v7300_v49 = vpop.f32.mrb[142].mxu1 }
 0x41b   : > { %v7301_v48 = vpop.f32.mrb[143].mxu1 }
 0x41c   : > { %v7403_v21 = vpop.f32.mrb[168].mxu0  ;;  %v5865_v33 = vadd.f32 %v7299_v30, %v10083_v55  ;;  %v7302_v41 = vadd.f32 %v7301_v48, %v7300_v49 }
 0x41d   : > { %v7404_v20 = vpop.f32.mrb[169].mxu0 }
 0x41e   : > { %v7405_v54 = vadd.f32 %v7404_v20, %v7403_v21  ;;  %v7406_v25 = vpop.f32.mrb[170].mxu0  ;;  %v5868_v63 = vadd.f32 %v7302_v41, %v10086_v50 }
 0x41f   : > { %v7407_v32 = vpop.f32.mrb[171].mxu0 }
 0x420   : > { %v7408_v29 = vadd.f32 %v7407_v32, %v7406_v25  ;;  %v10175_v19 = vadd.f32 %v7405_v54, %v5857_v45  ;;  %v7303_v12 = vpop.f32.mrb[144].mxu1 }
 0x421   : > { %v7304_v4 = vpop.f32.mrb[145].mxu1 }
 0x422   : > { %v10178_v60 = vadd.f32 %v7408_v29, %v5860_v52  ;;  %v7305_v61 = vadd.f32 %v7304_v4, %v7303_v12  ;;  %v7306_v57 = vpop.f32.mrb[146].mxu1 }
 0x423   : > { %v7307_v13 = vpop.f32.mrb[147].mxu1 }
 0x424   : > { %v7409_v44 = vpop.f32.mrb[172].mxu0  ;;  %v5873_v55 = vadd.f32 %v7305_v61, %v10090_v51  ;;  %v7308_v42 = vadd.f32 %v7307_v13, %v7306_v57 }
 0x425   : > { %v7410_v34 = vpop.f32.mrb[173].mxu0 }
 0x426   : > { %v7411_v35 = vadd.f32 %v7410_v34, %v7409_v44  ;;  %v7412_v23 = vpop.f32.mrb[174].mxu0  ;;  %v5876_v50 = vadd.f32 %v7308_v42, %v10092_v18 }
 0x427   : > { %v7413_v53 = vpop.f32.mrb[175].mxu0 }
 0x428   : > { %v7414_v37 = vadd.f32 %v7413_v53, %v7412_v23  ;;  %v10181_v17 = vadd.f32 %v7411_v35, %v5865_v33  ;;  %v7309_v27 = vpop.f32.mrb[148].mxu1 }
 0x429   : > { %v7310_v11 = vpop.f32.mrb[149].mxu1 }
 0x42a   : > { %v10184_v45 = vadd.f32 %v7414_v37, %v5868_v63  ;;  %v7311_v52 = vadd.f32 %v7310_v11, %v7309_v27  ;;  %v7312_v24 = vpop.f32.mrb[150].mxu1 }
 0x42b   : > { %v7313_v30 = vpop.f32.mrb[151].mxu1 }
 0x42c   : > { %v7415_v22 = vpop.f32.mrb[176].mxu0  ;;  %v5881_v51 = vadd.f32 %v7311_v52, %v10096_v43  ;;  %v7314_v20 = vadd.f32 %v7313_v30, %v7312_v24 }
 0x42d   : > { %v7416_v47 = vpop.f32.mrb[177].mxu0 }
 0x42e   : > { %v7417_v21 = vadd.f32 %v7416_v47, %v7415_v22  ;;  %v7418_v49 = vpop.f32.mrb[178].mxu0  ;;  %v5884_v18 = vadd.f32 %v7314_v20, %v10098_v59 }
 0x42f   : > { %v7419_v54 = vpop.f32.mrb[179].mxu0 }
 0x430   : > { %v7420_v48 = vadd.f32 %v7419_v54, %v7418_v49  ;;  %v10187_v25 = vadd.f32 %v7417_v21, %v5873_v55  ;;  %v7315_v41 = vpop.f32.mrb[152].mxu1 }
 0x431   : > { %v7316_v32 = vpop.f32.mrb[153].mxu1 }
 0x432   : > { %v10190_v33 = vadd.f32 %v7420_v48, %v5876_v50  ;;  %v7317_v63 = vadd.f32 %v7316_v32, %v7315_v41  ;;  %v7318_v12 = vpop.f32.mrb[154].mxu1 }
 0x433   : > { %v7319_v61 = vpop.f32.mrb[155].mxu1 }
 0x434   : > { %v7421_v29 = vpop.f32.mrb[180].mxu0  ;;  %v5889_v43 = vadd.f32 %v7317_v63, %v10102_v62  ;;  %v7320_v34 = vadd.f32 %v7319_v61, %v7318_v12 }
 0x435   : > { %v7422_v4 = vpop.f32.mrb[181].mxu0 }
 0x436   : > { %v7423_v44 = vadd.f32 %v7422_v4, %v7421_v29  ;;  %v7424_v57 = vpop.f32.mrb[182].mxu0  ;;  %v5892_v59 = vadd.f32 %v7320_v34, %v10104_v15 }
 0x437   : > { %v7425_v35 = vpop.f32.mrb[183].mxu0 }
 0x438   : > { %v7426_v13 = vadd.f32 %v7425_v35, %v7424_v57  ;;  %v10193_v23 = vadd.f32 %v7423_v44, %v5881_v51  ;;  %v7321_v42 = vpop.f32.mrb[156].mxu1 }
 0x439   : > { %v7322_v53 = vpop.f32.mrb[157].mxu1 }
 0x43a   : > { %v10196_v55 = vadd.f32 %v7426_v13, %v5884_v18  ;;  %v7323_v50 = vadd.f32 %v7322_v53, %v7321_v42  ;;  %v7324_v27 = vpop.f32.mrb[158].mxu1 }
 0x43b   : > { %v7325_v52 = vpop.f32.mrb[159].mxu1 }
 0x43c   : > { %v7427_v37 = vpop.f32.mrb[184].mxu0  ;;  %v5897_v62 = vadd.f32 %v7323_v50, %v10108_v56  ;;  %v7326_v47 = vadd.f32 %v7325_v52, %v7324_v27 }
 0x43d   : > { %v7428_v11 = vpop.f32.mrb[185].mxu0 }
 0x43e   : > { %v7429_v22 = vadd.f32 %v7428_v11, %v7427_v37  ;;  %v7430_v24 = vpop.f32.mrb[186].mxu0  ;;  %v5900_v15 = vadd.f32 %v7326_v47, %v10110_v40 }
 0x43f   : > { %v7431_v21 = vpop.f32.mrb[187].mxu0 }
 0x440   : > { %v7432_v30 = vadd.f32 %v7431_v21, %v7430_v24  ;;  %v10199_v49 = vadd.f32 %v7429_v22, %v5889_v43  ;;  %v7327_v20 = vpop.f32.mrb[160].mxu1 }
 0x441   : > { %v7328_v54 = vpop.f32.mrb[161].mxu1 }
 0x442   : > { %v10202_v51 = vadd.f32 %v7432_v30, %v5892_v59  ;;  %v7329_v18 = vadd.f32 %v7328_v54, %v7327_v20  ;;  %v7330_v41 = vpop.f32.mrb[162].mxu1 }
 0x443   : > { %v7331_v63 = vpop.f32.mrb[163].mxu1 }
 0x444   : > { %v7433_v48 = vpop.f32.mrb[188].mxu0  ;;  %v5905_v56 = vadd.f32 %v7329_v18, %v10114_v36  ;;  %v7332_v4 = vadd.f32 %v7331_v63, %v7330_v41 }
 0x445   : > { %v7434_v32 = vpop.f32.mrb[189].mxu0 }
 0x446   : > { %v7435_v29 = vadd.f32 %v7434_v32, %v7433_v48  ;;  %v7436_v12 = vpop.f32.mrb[190].mxu0  ;;  %v5908_v40 = vadd.f32 %v7332_v4, %v10116_v16 }
 0x447   : > { %v7437_v44 = vpop.f32.mrb[191].mxu0 }
 0x448   : > { %v7438_v61 = vadd.f32 %v7437_v44, %v7436_v12  ;;  %v10205_v57 = vadd.f32 %v7435_v29, %v5897_v62  ;;  %v7333_v34 = vpop.f32.mrb[164].mxu1 }
 0x449   : > { %v7334_v35 = vpop.f32.mrb[165].mxu1 }
 0x44a   : > { %v10208_v43 = vadd.f32 %v7438_v61, %v5900_v15  ;;  %v7335_v59 = vadd.f32 %v7334_v35, %v7333_v34  ;;  %v7336_v42 = vpop.f32.mrb[166].mxu1 }
 0x44b   : > { %v7337_v50 = vpop.f32.mrb[167].mxu1 }
 0x44c   : > { %v7439_v13 = vpop.f32.mrb[192].mxu0  ;;  %v5913_v36 = vadd.f32 %v7335_v59, %v10120_v10  ;;  %v7338_v11 = vadd.f32 %v7337_v50, %v7336_v42 }
 0x44d   : > { %v7440_v53 = vpop.f32.mrb[193].mxu0 }
 0x44e   : > { %v7441_v37 = vadd.f32 %v7440_v53, %v7439_v13  ;;  %v7442_v27 = vpop.f32.mrb[194].mxu0  ;;  %v5916_v16 = vadd.f32 %v7338_v11, %v10122_v14 }
 0x44f   : > { %v7443_v22 = vpop.f32.mrb[195].mxu0 }
 0x450   : > { %v7444_v52 = vadd.f32 %v7443_v22, %v7442_v27  ;;  %v10211_v24 = vadd.f32 %v7441_v37, %v5905_v56  ;;  %v7339_v47 = vpop.f32.mrb[168].mxu1 }
 0x451   : > { %v7340_v21 = vpop.f32.mrb[169].mxu1 }
 0x452   : > { %v10214_v62 = vadd.f32 %v7444_v52, %v5908_v40  ;;  %v7341_v15 = vadd.f32 %v7340_v21, %v7339_v47  ;;  %v7342_v20 = vpop.f32.mrb[170].mxu1 }
 0x453   : > { %v7343_v18 = vpop.f32.mrb[171].mxu1 }
 0x454   : > { %v7445_v30 = vpop.f32.mrb[196].mxu0  ;;  %v5921_v10 = vadd.f32 %v7341_v15, %v10126_v28  ;;  %v7344_v32 = vadd.f32 %v7343_v18, %v7342_v20 }
 0x455   : > { %v7446_v54 = vpop.f32.mrb[197].mxu0 }
 0x456   : > { %v7447_v48 = vadd.f32 %v7446_v54, %v7445_v30  ;;  %v7448_v41 = vpop.f32.mrb[198].mxu0  ;;  %v5924_v14 = vadd.f32 %v7344_v32, %v10128_v7 }
 0x457   : > { %v7449_v29 = vpop.f32.mrb[199].mxu0 }
 0x458   : > { %v7450_v63 = vadd.f32 %v7449_v29, %v7448_v41  ;;  %v10217_v12 = vadd.f32 %v7447_v48, %v5913_v36  ;;  %v7345_v4 = vpop.f32.mrb[172].mxu1 }
 0x459   : > { %v7346_v44 = vpop.f32.mrb[173].mxu1 }
 0x45a   : > { %v10220_v56 = vadd.f32 %v7450_v63, %v5916_v16  ;;  %v7347_v40 = vadd.f32 %v7346_v44, %v7345_v4  ;;  %v7348_v34 = vpop.f32.mrb[174].mxu1 }
 0x45b   : > { %v7349_v59 = vpop.f32.mrb[175].mxu1 }
 0x45c   : > { %v7451_v61 = vpop.f32.mrb[200].mxu0  ;;  %v5929_v28 = vadd.f32 %v7347_v40, %v10132_v58  ;;  %v7350_v53 = vadd.f32 %v7349_v59, %v7348_v34 }
 0x45d   : > { %v7452_v35 = vpop.f32.mrb[201].mxu0 }
 0x45e   : > { %v7453_v13 = vadd.f32 %v7452_v35, %v7451_v61  ;;  %v7454_v42 = vpop.f32.mrb[202].mxu0  ;;  %v5932_v7 = vadd.f32 %v7350_v53, %v10134_v9 }
 0x45f   : > { %v7455_v37 = vpop.f32.mrb[203].mxu0 }
 0x460   : > { %v7456_v50 = vadd.f32 %v7455_v37, %v7454_v42  ;;  %v10223_v27 = vadd.f32 %v7453_v13, %v5921_v10  ;;  %v7351_v11 = vpop.f32.mrb[176].mxu1 }
 0x461   : > { %v7352_v22 = vpop.f32.mrb[177].mxu1 }
 0x462   : > { %v10226_v36 = vadd.f32 %v7456_v50, %v5924_v14  ;;  %v7353_v16 = vadd.f32 %v7352_v22, %v7351_v11  ;;  %v7354_v47 = vpop.f32.mrb[178].mxu1 }
 0x463   : > { %v7355_v15 = vpop.f32.mrb[179].mxu1 }
 0x464   : > { %v7457_v52 = vpop.f32.mrb[204].mxu0  ;;  %v5937_v58 = vadd.f32 %v7353_v16, %v10138_v31  ;;  %v7356_v54 = vadd.f32 %v7355_v15, %v7354_v47 }
 0x465   : > { %v7458_v21 = vpop.f32.mrb[205].mxu0 }
 0x466   : > { %v7459_v30 = vadd.f32 %v7458_v21, %v7457_v52  ;;  %v7460_v20 = vpop.f32.mrb[206].mxu0  ;;  %v5940_v9 = vadd.f32 %v7356_v54, %v10140_v2 }
 0x467   : > { %v7461_v48 = vpop.f32.mrb[207].mxu0 }
 0x468   : > { %v7462_v18 = vadd.f32 %v7461_v48, %v7460_v20  ;;  %v10229_v41 = vadd.f32 %v7459_v30, %v5929_v28  ;;  %v7357_v32 = vpop.f32.mrb[180].mxu1 }
 0x469   : > { %v7358_v29 = vpop.f32.mrb[181].mxu1 }
 0x46a   : > { %v10232_v10 = vadd.f32 %v7462_v18, %v5932_v7  ;;  %v7359_v14 = vadd.f32 %v7358_v29, %v7357_v32  ;;  %v7360_v4 = vpop.f32.mrb[182].mxu1 }
 0x46b   : > { %v7361_v40 = vpop.f32.mrb[183].mxu1 }
 0x46c   : > { %v7463_v63 = vpop.f32.mrb[208].mxu0  ;;  %v5945_v31 = vadd.f32 %v7359_v14, %v10144_v1  ;;  %v7362_v35 = vadd.f32 %v7361_v40, %v7360_v4 }
 0x46d   : > { %v7464_v44 = vpop.f32.mrb[209].mxu0 }
 0x46e   : > { %v7465_v61 = vadd.f32 %v7464_v44, %v7463_v63  ;;  %v7466_v34 = vpop.f32.mrb[210].mxu0  ;;  %v5948_v2 = vadd.f32 %v7362_v35, %v10146_v3 }
 0x46f   : > { %v7467_v13 = vpop.f32.mrb[211].mxu0 }
 0x470   : > { %v7468_v59 = vadd.f32 %v7467_v13, %v7466_v34  ;;  %v10235_v42 = vadd.f32 %v7465_v61, %v5937_v58  ;;  %v7363_v53 = vpop.f32.mrb[184].mxu1 }
 0x471   : > { %v7364_v37 = vpop.f32.mrb[185].mxu1 }
 0x472   : > { %v10238_v28 = vadd.f32 %v7468_v59, %v5940_v9  ;;  %v7365_v7 = vadd.f32 %v7364_v37, %v7363_v53  ;;  %v7366_v11 = vpop.f32.mrb[186].mxu1 }
 0x473   : > { %v7367_v16 = vpop.f32.mrb[187].mxu1 }
 0x474   : > { %v7469_v50 = vpop.f32.mrb[212].mxu0  ;;  %v5953_v1 = vadd.f32 %v7365_v7, %v10150_v46  ;;  %v7368_v21 = vadd.f32 %v7367_v16, %v7366_v11 }
 0x475   : > { %v7470_v22 = vpop.f32.mrb[213].mxu0 }
 0x476   : > { %v7471_v52 = vadd.f32 %v7470_v22, %v7469_v50  ;;  %v7472_v47 = vpop.f32.mrb[214].mxu0  ;;  %v5956_v3 = vadd.f32 %v7368_v21, %v10152_v26 }
 0x477   : > { %v7473_v30 = vpop.f32.mrb[215].mxu0 }
 0x478   : > { %v7474_v15 = vadd.f32 %v7473_v30, %v7472_v47  ;;  %v10241_v20 = vadd.f32 %v7471_v52, %v5945_v31  ;;  %v7369_v54 = vpop.f32.mrb[188].mxu1 }
 0x479   : > { %v7370_v48 = vpop.f32.mrb[189].mxu1 }
 0x47a   : > { %v10244_v58 = vadd.f32 %v7474_v15, %v5948_v2  ;;  %v7371_v9 = vadd.f32 %v7370_v48, %v7369_v54  ;;  %v7372_v32 = vpop.f32.mrb[190].mxu1 }
 0x47b   : > { %v7373_v14 = vpop.f32.mrb[191].mxu1 }
 0x47c   : > { %v7475_v18 = vpop.f32.mrb[216].mxu0  ;;  %v5961_v46 = vadd.f32 %v7371_v9, %v10157_v5  ;;  %v7374_v44 = vadd.f32 %v7373_v14, %v7372_v32 }
 0x47d   : > { %v7476_v29 = vpop.f32.mrb[217].mxu0 }
 0x47e   : > { %v7477_v63 = vadd.f32 %v7476_v29, %v7475_v18  ;;  %v7478_v4 = vpop.f32.mrb[218].mxu0  ;;  %v5964_v26 = vadd.f32 %v7374_v44, %v10160_v8 }
 0x47f   : > { %v7479_v61 = vpop.f32.mrb[219].mxu0 }
 0x480   : > { %v7480_v40 = vadd.f32 %v7479_v61, %v7478_v4  ;;  %v10247_v34 = vadd.f32 %v7477_v63, %v5953_v1  ;;  %v7569_v35 = vpop.f32.mrb[192].mxu1 }
 0x481   : > { %v6171_v13 = vadd.f32 %v7569_v35, %v10169_v6  ;;  %v6162_v2 = vpop.f32.mrb[193].mxu1 }
 0x482   : > { %v10251_v31 = vadd.f32 %v7480_v40, %v5956_v3  ;;  %v6163_v53 = vadd.f32 %v6162_v2, %v10163_v0  ;;  %v7570_v50 = vpop.f32.mrb[194].mxu1 }
 0x483   : > { %v6291_v5 = vmax.f32 %v6171_v13, 0.0  ;;  %v6174_v11 = vadd.f32 %v7570_v50, %v10172_v39  ;;  %v6165_v52 = vpop.f32.mrb[195].mxu1 }
 0x484   : > { %v7481_v59 = vpop.f32.mrb[220].mxu0  ;;  %v6289_v16 = vmax.f32 %v6163_v53, 0.0  ;;  %v6166_v8 = vadd.f32 %v6165_v52, %v10166_v38 }
 0x485   : > { %v7482_v37 = vpop.f32.mrb[221].mxu0  ;;  %6323 = vst [vmem:[%s10257_s30 + $0x10] sm:$0xff] %v6291_v5  ;;  %v6292_v0 = vmax.f32 %v6174_v11, 0.0 }
 0x486   : > { %v7483_v7 = vadd.f32 %v7482_v37, %v7481_v59  ;;  %v7484_v22 = vpop.f32.mrb[222].mxu0  ;;  %6321 = vst [vmem:[%s10257_s30] sm:$0xff] %v6289_v16  ;;  %v6290_v39 = vmax.f32 %v6166_v8, 0.0 }
 0x487   : > { %v7485_v47 = vpop.f32.mrb[223].mxu0  ;;  %6324 = vst [vmem:[%s10257_s30 + $0x18] sm:$0xff] %v6292_v0 }
 0x488   : > { %v7486_v6 = vadd.f32 %v7485_v47, %v7484_v22  ;;  %v10260_v1 = vadd.f32 %v7483_v7, %v5961_v46  ;;  %6322 = vst [vmem:[%s10257_s30 + $0x8] sm:$0xff] %v6290_v39  ;;  %v7573_v38 = vpop.f32.mrb[196].mxu1 }
 0x489   : > { %v6187_v30 = vadd.f32 %v7573_v38, %v10181_v17  ;;  %v6178_v15 = vpop.f32.mrb[197].mxu1 }
 0x48a   : > { %v10264_v21 = vadd.f32 %v7486_v6, %v5964_v26  ;;  %v6179_v3 = vadd.f32 %v6178_v15, %v10175_v19  ;;  %v7574_v54 = vpop.f32.mrb[198].mxu1 }
 0x48b   : > { %v6295_v48 = vmax.f32 %v6187_v30, 0.0  ;;  %v6190_v18 = vadd.f32 %v7574_v54, %v10184_v45  ;;  %v6181_v9 = vpop.f32.mrb[199].mxu1 }
 0x48c   : > { %v6293_v32 = vmax.f32 %v6179_v3, 0.0  ;;  %v6182_v29 = vadd.f32 %v6181_v9, %v10178_v60 }
 0x48d   : > { %6327 = vst [vmem:[%s10257_s30 + $0x30] sm:$0xff] %v6295_v48  ;;  %v6296_v63 = vmax.f32 %v6190_v18, 0.0 }
 0x48e   : > { %6325 = vst [vmem:[%s10257_s30 + $0x20] sm:$0xff] %v6293_v32  ;;  %v6294_v14 = vmax.f32 %v6182_v29, 0.0 }
 0x48f   : > { %6328 = vst [vmem:[%s10257_s30 + $0x38] sm:$0xff] %v6296_v63 }
 0x490   : > { %6326 = vst [vmem:[%s10257_s30 + $0x28] sm:$0xff] %v6294_v14  ;;  %v7577_v17 = vpop.f32.mrb[200].mxu1 }
 0x491   : > { %v6203_v19 = vadd.f32 %v7577_v17, %v10193_v23  ;;  %v6194_v4 = vpop.f32.mrb[201].mxu1 }
 0x492   : > { %v6195_v45 = vadd.f32 %v6194_v4, %v10187_v25  ;;  %v7578_v46 = vpop.f32.mrb[202].mxu1 }
 0x493   : > { %v6299_v44 = vmax.f32 %v6203_v19, 0.0  ;;  %v6206_v60 = vadd.f32 %v7578_v46, %v10196_v55  ;;  %v6197_v61 = vpop.f32.mrb[203].mxu1 }
 0x494   : > { %v6297_v40 = vmax.f32 %v6195_v45, 0.0  ;;  %v6198_v26 = vadd.f32 %v6197_v61, %v10190_v33 }
 0x495   : > { %6331 = vst [vmem:[%s10257_s30 + $0x50] sm:$0xff] %v6299_v44  ;;  %v6300_v35 = vmax.f32 %v6206_v60, 0.0 }
 0x496   : > { %6329 = vst [vmem:[%s10257_s30 + $0x40] sm:$0xff] %v6297_v40  ;;  %v6298_v13 = vmax.f32 %v6198_v26, 0.0 }
 0x497   : > { %6332 = vst [vmem:[%s10257_s30 + $0x58] sm:$0xff] %v6300_v35 }
 0x498   : > { %6330 = vst [vmem:[%s10257_s30 + $0x48] sm:$0xff] %v6298_v13  ;;  %v7581_v23 = vpop.f32.mrb[204].mxu1 }
 0x499   : > { %v6219_v25 = vadd.f32 %v7581_v23, %v10205_v57  ;;  %v6210_v59 = vpop.f32.mrb[205].mxu1 }
 0x49a   : > { %v6211_v55 = vadd.f32 %v6210_v59, %v10199_v49  ;;  %v7582_v2 = vpop.f32.mrb[206].mxu1 }
 0x49b   : > { %v6303_v53 = vmax.f32 %v6219_v25, 0.0  ;;  %v6222_v33 = vadd.f32 %v7582_v2, %v10208_v43  ;;  %v6213_v37 = vpop.f32.mrb[207].mxu1 }
 0x49c   : > { %v6301_v50 = vmax.f32 %v6211_v55, 0.0  ;;  %v6214_v5 = vadd.f32 %v6213_v37, %v10202_v51 }
 0x49d   : > { %6335 = vst [vmem:[%s10257_s30 + $0x70] sm:$0xff] %v6303_v53  ;;  %v6304_v7 = vmax.f32 %v6222_v33, 0.0 }
 0x49e   : > { %6333 = vst [vmem:[%s10257_s30 + $0x60] sm:$0xff] %v6301_v50  ;;  %v6302_v11 = vmax.f32 %v6214_v5, 0.0 }
 0x49f   : > { %6336 = vst [vmem:[%s10257_s30 + $0x78] sm:$0xff] %v6304_v7 }
 0x4a0   : > { %6334 = vst [vmem:[%s10257_s30 + $0x68] sm:$0xff] %v6302_v11  ;;  %v7585_v57 = vpop.f32.mrb[208].mxu1 }
 0x4a1   : > { %v6235_v49 = vadd.f32 %v7585_v57, %v10217_v12  ;;  %v6226_v22 = vpop.f32.mrb[209].mxu1 }
 0x4a2   : > { %v6227_v43 = vadd.f32 %v6226_v22, %v10211_v24  ;;  %v7586_v52 = vpop.f32.mrb[210].mxu1 }
 0x4a3   : > { %v6307_v16 = vmax.f32 %v6235_v49, 0.0  ;;  %v6238_v51 = vadd.f32 %v7586_v52, %v10220_v56  ;;  %v6229_v8 = vpop.f32.mrb[211].mxu1 }
 0x4a4   : > { %v6305_v47 = vmax.f32 %v6227_v43, 0.0  ;;  %v6230_v0 = vadd.f32 %v6229_v8, %v10214_v62 }
 0x4a5   : > { %6339 = vst [vmem:[%s10257_s30 + $0x90] sm:$0xff] %v6307_v16  ;;  %v6308_v6 = vmax.f32 %v6238_v51, 0.0 }
 0x4a6   : > { %6337 = vst [vmem:[%s10257_s30 + $0x80] sm:$0xff] %v6305_v47  ;;  %v6306_v39 = vmax.f32 %v6230_v0, 0.0 }
 0x4a7   : > { %6340 = vst [vmem:[%s10257_s30 + $0x98] sm:$0xff] %v6308_v6 }
 0x4a8   : > { %6338 = vst [vmem:[%s10257_s30 + $0x88] sm:$0xff] %v6306_v39  ;;  %v7589_v12 = vpop.f32.mrb[212].mxu1 }
 0x4a9   : > { %v6251_v24 = vadd.f32 %v7589_v12, %v10229_v41  ;;  %v6242_v38 = vpop.f32.mrb[213].mxu1 }
 0x4aa   : > { %v6243_v56 = vadd.f32 %v6242_v38, %v10223_v27  ;;  %v7590_v30 = vpop.f32.mrb[214].mxu1 }
 0x4ab   : > { %v6311_v15 = vmax.f32 %v6251_v24, 0.0  ;;  %v6254_v62 = vadd.f32 %v7590_v30, %v10232_v10  ;;  %v6245_v3 = vpop.f32.mrb[215].mxu1 }
 0x4ac   : > { %v6309_v54 = vmax.f32 %v6243_v56, 0.0  ;;  %v6246_v48 = vadd.f32 %v6245_v3, %v10226_v36 }
 0x4ad   : > { %6343 = vst [vmem:[%s10257_s30 + $0xb0] sm:$0xff] %v6311_v15  ;;  %v6312_v18 = vmax.f32 %v6254_v62, 0.0 }
 0x4ae   : > { %6341 = vst [vmem:[%s10257_s30 + $0xa0] sm:$0xff] %v6309_v54  ;;  %v6310_v9 = vmax.f32 %v6246_v48, 0.0 }
 0x4af   : > { %6344 = vst [vmem:[%s10257_s30 + $0xb8] sm:$0xff] %v6312_v18 }
 0x4b0   : > { %6342 = vst [vmem:[%s10257_s30 + $0xa8] sm:$0xff] %v6310_v9  ;;  %v7593_v41 = vpop.f32.mrb[216].mxu1 }
 0x4b1   : > { %v6267_v27 = vadd.f32 %v7593_v41, %v10241_v20  ;;  %v6258_v32 = vpop.f32.mrb[217].mxu1 }
 0x4b2   : > { %v6259_v10 = vadd.f32 %v6258_v32, %v10235_v42  ;;  %v7594_v29 = vpop.f32.mrb[218].mxu1 }
 0x4b3   : > { %v6315_v63 = vmax.f32 %v6267_v27, 0.0  ;;  %v6270_v36 = vadd.f32 %v7594_v29, %v10244_v58  ;;  %v6261_v14 = vpop.f32.mrb[219].mxu1 }
 0x4b4   : > { %v6313_v17 = vmax.f32 %v6259_v10, 0.0  ;;  %v6262_v19 = vadd.f32 %v6261_v14, %v10238_v28 }
 0x4b5   : > { %6347 = vst [vmem:[%s10257_s30 + $0xd0] sm:$0xff] %v6315_v63  ;;  %v6316_v4 = vmax.f32 %v6270_v36, 0.0 }
 0x4b6   : > { %6345 = vst [vmem:[%s10257_s30 + $0xc0] sm:$0xff] %v6313_v17  ;;  %v6314_v45 = vmax.f32 %v6262_v19, 0.0 }
 0x4b7   : > { %6348 = vst [vmem:[%s10257_s30 + $0xd8] sm:$0xff] %v6316_v4 }
 0x4b8   : > { %6346 = vst [vmem:[%s10257_s30 + $0xc8] sm:$0xff] %v6314_v45  ;;  %v7597_v20 = vpop.f32.mrb[220].mxu1 }
 0x4b9   : > { %v6283_v42 = vadd.f32 %v7597_v20, %v10260_v1  ;;  %v6274_v46 = vpop.f32.mrb[221].mxu1 }
 0x4ba   : > { %v6275_v58 = vadd.f32 %v6274_v46, %v10247_v34  ;;  %v7598_v44 = vpop.f32.mrb[222].mxu1 }
 0x4bb   : > { %v6319_v28 = vmax.f32 %v6283_v42, 0.0  ;;  %v6286_v60 = vadd.f32 %v7598_v44, %v10264_v21  ;;  %v6277_v61 = vpop.f32.mrb[223].mxu1 }
 0x4bc   : > { %v6317_v40 = vmax.f32 %v6275_v58, 0.0  ;;  %v6278_v26 = vadd.f32 %v6277_v61, %v10251_v31 }
 0x4bd   : > { %6351 = vst [vmem:[%s10257_s30 + $0xf0] sm:$0xff] %v6319_v28  ;;  %v6320_v35 = vmax.f32 %v6286_v60, 0.0 }
 0x4be   : > { %6349 = vst [vmem:[%s10257_s30 + $0xe0] sm:$0xff] %v6317_v40  ;;  %v6318_v34 = vmax.f32 %v6278_v26, 0.0 }
 0x4bf   : > { %6352 = vst [vmem:[%s10257_s30 + $0xf8] sm:$0xff] %v6320_v35 }
 0x4c0   : > { %6350 = vst [vmem:[%s10257_s30 + $0xe8] sm:$0xff] %v6318_v34 }
 0x4c1   : > { %7909 = shalt.err (!%p7906_p2)
}
 0x4c2   : > { %s7910_s26 = scalar_lea.hbm %s10325_s13, 4096  ;;  %s7914_s11 = scalar_lea.hbm %s10379_s5, 8192 }
 0x4c3   : > { %p7911_p13 = scmp.ne.s32.totalorder %s10325_s13, %s7910_s26  ;;  %p7915_p4 = scmp.lt.u32.totalorder %s10325_s13, %s10379_s5 }
 0x4c4   : > { %p7916_p5 = scmp.lt.u32.totalorder %s7914_s11, %s7910_s26  ;;  %p7918_p11 = scmp.lt.u32.totalorder %s7910_s26, %s10325_s13 }
 0x4c5   : > { %p7912_p6 = pnand %p7911_p13, %p10447_p0 }
 0x4c6   : > { %p7917_p8 = por %p7916_p5, %p7915_p4 }
 0x4c7   : > { %p7913_p10 = pneg %p7912_p6 }
 0x4c8   : > { %p7919_p1 = por %p7918_p11, %p7917_p8 }
 0x4ca   : > { %p7920_p3 = pnand %p7919_p1, %p7913_p10 }
 0x4cc   : > { %7923 = shalt.err (!%p7920_p3)
}
 0x4cd   : > { %s7978_s15 = smov 128   ;;  %s7979_s9 = smov 8  }
 0x4ce   : > { %7609 = dma.vmem_to_hbm [thread:$0]  (%p10447_p0), %s10327_s16, 4096, %s10325_s13, %s6354_s22, %s7978_s15, %s7978_s15, %s7979_s9  }
 0x4cf PF: > { %s6382_s12 = sand.u32 1, %s7954_s18   ;;  %p10448_p7 = scmp.ne.s32.totalorder %s10384_s25, 0 }
 0x4d0   : > { %p10449_p9 = scmp.ge.s32.totalorder %s7966_s21, 2  ;;  %s6383_s17 = scalar_lea.sflag [#allocation6], %s6382_s12 }
 0x4d2   : > { %p7623_p12 = pnand %p10449_p9, %p10448_p7 }
 0x4d4   : > { %7949 = dma.done.wait (!%p7623_p12), %s6383_s17, 4096  }
 0x4d5   : > { %7951 = vsyncadd (!%p7623_p12), %s6383_s17, 4294963200  ;;  %p19_p2 = scmp.ge.s32.totalorder %s8120_s14, 4   ;;  %s10450_s18 = smov %s7958_s19 }
 0x4d6   : > { %s10451_s19 = smov %s7962_s20  ;;  %s10452_s20 = smov %s8136_s27 }
 0x4d7   : > { %s10453_s21 = smov %s8120_s14  ;;  %21 = sbr.rel (!%p19_p2) target bundleno = 6 (0x6), region = 224 }
 0x4de   :  { %6388 = vsyncpa [#allocation5], 1 }
 0x4df   :  { %6390 = vsyncpa [#allocation5 + $0x1], 1 }
 0x4e0   :  { %6391 = vsyncpa [#allocation8], 1 }
 0x4e1   :  { %6392 = vsyncpa [#allocation6], 1 }
 0x4e2   :  { %6394 = vsyncpa [#allocation6 + $0x1], 1 }

</bundles_post_ra>
